<compile_context>
chip_gen: v7x
topology: tpu7x:2x2x1
jax: 0.10.0
libtpu: 0.0.40
codegen_flags: <defaults>
</compile_context>

<pallas_src>
import functools

import jax
import jax.numpy as jnp
from jax.experimental import pallas as pl
from jax.experimental.pallas import tpu as pltpu

EPS = 1e-5
_LC = 128  # lane-chunk width (one vreg of channels)


def dwconv_bn_kernel(x_ref, w_ref, gamma_ref, beta_ref, o_ref, xp_scr):
    """One grid step = one block_c-wide channel block over all of (N, H, W).

    x_ref     : (N, H, W, BC)        unpadded NHWC input block
    w_ref     : (3, 3, BC)           per-channel depthwise taps
    gamma_ref : (1, 1, 1, BC)        BN scale
    beta_ref  : (1, 1, 1, BC)        BN shift
    o_ref     : (N, H, W, BC)        output block
    xp_scr    : (N, H+2, W+2, _LC)   zero-halo staging buffer for ONE chunk
    """
    N, H, W, BC = o_ref.shape
    n_chunks = BC // _LC
    cnt = jnp.float32(N * H * W)

    # Zero the (small, single-chunk) staging scratch once per grid step.
    # Only the halo (row 0, row H+1, col 0, col W+1) actually needs to be
    # zero -- the interior is fully overwritten by every chunk's copy-in
    # below -- but a single 32-vreg contiguous fill per step is cheaper than
    # strided per-sublane halo stores at this geometry, and doing it every
    # step keeps it correct when the parallel axis is sharded across cores.
    xp_scr[...] = jnp.zeros_like(xp_scr)

    # Unrolled static chunk loop: all ref slices below are static and
    # 128-aligned, every vreg load/store is lane-dense.
    for ci in range(n_chunks):
        c0 = ci * _LC

        # ---- fused zero padding: copy this chunk's interior into scratch ---
        # Interior at (row 1..H, col 1..W); kj=0 tap reads stay at sublane
        # offset 0 (aligned).
        xp_scr[:, 1:H + 1, 1:W + 1, :] = (
            x_ref[:, :, :, c0:c0 + _LC].astype(jnp.float32))

        # ---- depthwise 3x3 conv: 9 shifted multiply-accumulates (VPU) ------
        w_c = w_ref[:, :, c0:c0 + _LC].astype(jnp.float32)     # (3, 3, _LC)
        acc = jnp.zeros((N, H, W, _LC), jnp.float32)
        for ki in range(3):
            for kj in range(3):
                tap = xp_scr[:, ki:ki + H, kj:kj + W, :]
                acc = acc + tap * w_c[ki, kj]

        # ---- BatchNorm2d (training mode): single-pass sum / sum-of-squares -
        # NOTE: E[x^2] - mean^2 in f32 can lose precision when |mean| >> std;
        # validated here at 5e-4 tolerance for conv activations.
        mean = jnp.sum(acc, axis=(0, 1, 2), keepdims=True) / cnt
        ex2 = jnp.sum(acc * acc, axis=(0, 1, 2), keepdims=True) / cnt
        var = ex2 - mean * mean                  # biased variance (PyTorch fwd)
        inv = jax.lax.rsqrt(var + EPS)

        scale = gamma_ref[:, :, :, c0:c0 + _LC].astype(jnp.float32) * inv
        shift = beta_ref[:, :, :, c0:c0 + _LC].astype(jnp.float32) - mean * scale
        o_ref[:, :, :, c0:c0 + _LC] = (acc * scale + shift).astype(o_ref.dtype)


@functools.partial(jax.jit, static_argnames=("block_c",))
def dwconv_bn(x_nchw, w_c33, gamma, beta, *, block_c=384):
    """x_nchw: (N,C,H,W); w_c33: (C,3,3); gamma/beta: (C,). Returns NCHW."""
    assert block_c % _LC == 0
    N, C, H, W = x_nchw.shape
    n_blk = pl.cdiv(C, block_c)
    Cp = n_blk * block_c

    # NCHW -> NHWC (channel on the lane axis); pad channels to a block_c
    # multiple so every block / chunk is lane-dense.  Padded channels are
    # zeros (weights/gamma/beta zero too -> finite, sliced off at the end).
    x = jnp.transpose(x_nchw, (0, 2, 3, 1))
    w_hwc = jnp.transpose(w_c33, (1, 2, 0))
    if Cp != C:
        pc = Cp - C
        x = jnp.pad(x, ((0, 0), (0, 0), (0, 0), (0, pc)))
        w_hwc = jnp.pad(w_hwc, ((0, 0), (0, 0), (0, pc)))
        gamma = jnp.pad(gamma, (0, pc))
        beta = jnp.pad(beta, (0, pc))
    g = gamma.reshape(1, 1, 1, Cp)
    b = beta.reshape(1, 1, 1, Cp)

    out_nhwc = pl.pallas_call(
        dwconv_bn_kernel,
        out_shape=jax.ShapeDtypeStruct((N, H, W, Cp), x.dtype),
        grid=(n_blk,),
        in_specs=[
            pl.BlockSpec((N, H, W, block_c), lambda c: (0, 0, 0, c)),
            pl.BlockSpec((3, 3, block_c), lambda c: (0, 0, c)),
            pl.BlockSpec((1, 1, 1, block_c), lambda c: (0, 0, 0, c)),
            pl.BlockSpec((1, 1, 1, block_c), lambda c: (0, 0, 0, c)),
        ],
        out_specs=pl.BlockSpec((N, H, W, block_c), lambda c: (0, 0, 0, c)),
        scratch_shapes=[
            pltpu.VMEM((N, H + 2, W + 2, _LC), jnp.float32),
        ],
        compiler_params=pltpu.CompilerParams(
            dimension_semantics=("parallel",)),
    )(x, w_hwc, g, b)

    if Cp != C:
        out_nhwc = out_nhwc[..., :C]
    return jnp.transpose(out_nhwc, (0, 3, 1, 2))        # back to NCHW


def reference(x_nchw, w_c33, gamma, beta):
    """Pure-JAX reference of the PyTorch forward (training-mode BN)."""
    N, C, H, W = x_nchw.shape
    conv = jax.lax.conv_general_dilated(
        x_nchw, w_c33.reshape(C, 1, 3, 3),
        window_strides=(1, 1), padding=((1, 1), (1, 1)),
        dimension_numbers=("NCHW", "OIHW", "NCHW"),
        feature_group_count=C,
        precision=jax.lax.Precision.HIGHEST)
    mean = conv.mean(axis=(0, 2, 3), keepdims=True)
    var = conv.var(axis=(0, 2, 3), keepdims=True)   # biased, like PyTorch BN
    return ((conv - mean) / jnp.sqrt(var + EPS)
            * gamma.reshape(1, C, 1, 1) + beta.reshape(1, C, 1, 1))


if __name__ == "__main__":
    # Real module shape [1, 528, 14, 14] -- small, and it exercises the
    # 528 -> 768 channel-padding / 2 x (3 x 128-lane chunk) path.
    N, C, H, W = 1, 528, 14, 14

    key = jax.random.PRNGKey(0)
    kx, kw, kg, kb = jax.random.split(key, 4)
    x = jax.random.normal(kx, (N, C, H, W), dtype=jnp.float32)
    w = jax.random.normal(kw, (C, 3, 3), dtype=jnp.float32) * 0.1  # depthwise
    gamma = 1.0 + 0.1 * jax.random.normal(kg, (C,), dtype=jnp.float32)
    beta = 0.1 * jax.random.normal(kb, (C,), dtype=jnp.float32)

    out = dwconv_bn(x, w, gamma, beta)
    jax.block_until_ready(out)

    ref = reference(x, w, gamma, beta)
    assert out.shape == (N, C, H, W)
    err = float(jnp.max(jnp.abs(out - ref)))
    assert jnp.allclose(out, ref, atol=5e-4, rtol=5e-4), err

    print("KERNEL_OK")
</pallas_src>

<mosaic_0001>
module attributes {stable_mosaic.version = 11 : i64} {
  func.func @dwconv_bn_kernel(%arg0: i32, %arg1: memref<1x14x14x384xf32, #tpu.memory_space<vmem>>, %arg2: memref<3x3x384xf32, #tpu.memory_space<vmem>>, %arg3: memref<1x1x1x384xf32, #tpu.memory_space<vmem>>, %arg4: memref<1x1x1x384xf32, #tpu.memory_space<vmem>>, %arg5: memref<1x14x14x384xf32, #tpu.memory_space<vmem>>, %arg6: memref<1x16x16x128xf32, #tpu.memory_space<vmem>>) attributes {dimension_semantics = [#tpu.dimension_semantics<parallel>], iteration_bounds = array<i64: 2>, scalar_prefetch = 0 : i64, scratch_operands = 1 : i64, tpu.core_type = #tpu.core_type<tc>, window_params = [{transform_indices = @transform_0, window_bounds = array<i64: 1, 14, 14, 384>}, {transform_indices = @transform_1, window_bounds = array<i64: 3, 3, 384>}, {transform_indices = @transform_2, window_bounds = array<i64: 1, 1, 1, 384>}, {transform_indices = @transform_3, window_bounds = array<i64: 1, 1, 1, 384>}, {transform_indices = @transform_4, window_bounds = array<i64: 1, 14, 14, 384>}]} {
    %cst = arith.constant 0.000000e+00 : f32
    %0 = vector.broadcast %cst : f32 to vector<1x16x16x128xf32>
    %c0 = arith.constant 0 : index
    %c0_0 = arith.constant 0 : index
    %c0_1 = arith.constant 0 : index
    %c0_2 = arith.constant 0 : index
    %1 = vector.load %arg6[%c0, %c0_0, %c0_1, %c0_2] : memref<1x16x16x128xf32, #tpu.memory_space<vmem>>, vector<1x16x16x128xf32>
    tpu.vector_store %arg6[%c0, %c0_0, %c0_1, %c0_2], %0 {strides = array<i32>} : memref<1x16x16x128xf32, #tpu.memory_space<vmem>>, vector<1x16x16x128xf32>,
    %c0_3 = arith.constant 0 : index
    %c0_4 = arith.constant 0 : index
    %c0_5 = arith.constant 0 : index
    %c0_6 = arith.constant 0 : index
    %2 = vector.load %arg1[%c0_3, %c0_4, %c0_5, %c0_6] : memref<1x14x14x384xf32, #tpu.memory_space<vmem>>, vector<1x14x14x128xf32>
    %c0_7 = arith.constant 0 : index
    %c1 = arith.constant 1 : index
    %c1_8 = arith.constant 1 : index
    %c0_9 = arith.constant 0 : index
    %3 = vector.load %arg6[%c0_7, %c1, %c1_8, %c0_9] : memref<1x16x16x128xf32, #tpu.memory_space<vmem>>, vector<1x14x14x128xf32>
    tpu.vector_store %arg6[%c0_7, %c1, %c1_8, %c0_9], %2 {strides = array<i32>} : memref<1x16x16x128xf32, #tpu.memory_space<vmem>>, vector<1x14x14x128xf32>,
    %c0_10 = arith.constant 0 : index
    %c0_11 = arith.constant 0 : index
    %c0_12 = arith.constant 0 : index
    %4 = vector.load %arg2[%c0_10, %c0_11, %c0_12] : memref<3x3x384xf32, #tpu.memory_space<vmem>>, vector<3x3x128xf32>
    %cst_13 = arith.constant 0.000000e+00 : f32
    %5 = vector.broadcast %cst_13 : f32 to vector<1x14x14x128xf32>
    %c0_14 = arith.constant 0 : index
    %c0_15 = arith.constant 0 : index
    %c0_16 = arith.constant 0 : index
    %c0_17 = arith.constant 0 : index
    %6 = vector.load %arg6[%c0_14, %c0_15, %c0_16, %c0_17] : memref<1x16x16x128xf32, #tpu.memory_space<vmem>>, vector<1x14x14x128xf32>
    %7 = vector.extract_strided_slice %4 {offsets = [0, 0, 0], sizes = [1, 1, 128], strides = [1, 1, 1]} : vector<3x3x128xf32> to vector<1x1x128xf32>
    %8 = vector.shape_cast %7 : vector<1x1x128xf32> to vector<128xf32>
    %9 = vector.shape_cast %8 : vector<128xf32> to vector<1x1x1x128xf32>
    %10 = vector.broadcast %9 : vector<1x1x1x128xf32> to vector<1x14x14x128xf32>
    %11 = arith.mulf %6, %10 : vector<1x14x14x128xf32>
    %12 = arith.addf %5, %11 : vector<1x14x14x128xf32>
    %c0_18 = arith.constant 0 : index
    %c0_19 = arith.constant 0 : index
    %c1_20 = arith.constant 1 : index
    %c0_21 = arith.constant 0 : index
    %13 = vector.load %arg6[%c0_18, %c0_19, %c1_20, %c0_21] : memref<1x16x16x128xf32, #tpu.memory_space<vmem>>, vector<1x14x14x128xf32>
    %14 = vector.extract_strided_slice %4 {offsets = [0, 1, 0], sizes = [1, 1, 128], strides = [1, 1, 1]} : vector<3x3x128xf32> to vector<1x1x128xf32>
    %15 = vector.shape_cast %14 : vector<1x1x128xf32> to vector<128xf32>
    %16 = vector.shape_cast %15 : vector<128xf32> to vector<1x1x1x128xf32>
    %17 = vector.broadcast %16 : vector<1x1x1x128xf32> to vector<1x14x14x128xf32>
    %18 = arith.mulf %13, %17 : vector<1x14x14x128xf32>
    %19 = arith.addf %12, %18 : vector<1x14x14x128xf32>
    %c0_22 = arith.constant 0 : index
    %c0_23 = arith.constant 0 : index
    %c2 = arith.constant 2 : index
    %c0_24 = arith.constant 0 : index
    %20 = vector.load %arg6[%c0_22, %c0_23, %c2, %c0_24] : memref<1x16x16x128xf32, #tpu.memory_space<vmem>>, vector<1x14x14x128xf32>
    %21 = vector.extract_strided_slice %4 {offsets = [0, 2, 0], sizes = [1, 1, 128], strides = [1, 1, 1]} : vector<3x3x128xf32> to vector<1x1x128xf32>
    %22 = vector.shape_cast %21 : vector<1x1x128xf32> to vector<128xf32>
    %23 = vector.shape_cast %22 : vector<128xf32> to vector<1x1x1x128xf32>
    %24 = vector.broadcast %23 : vector<1x1x1x128xf32> to vector<1x14x14x128xf32>
    %25 = arith.mulf %20, %24 : vector<1x14x14x128xf32>
    %26 = arith.addf %19, %25 : vector<1x14x14x128xf32>
    %c0_25 = arith.constant 0 : index
    %c1_26 = arith.constant 1 : index
    %c0_27 = arith.constant 0 : index
    %c0_28 = arith.constant 0 : index
    %27 = vector.load %arg6[%c0_25, %c1_26, %c0_27, %c0_28] : memref<1x16x16x128xf32, #tpu.memory_space<vmem>>, vector<1x14x14x128xf32>
    %28 = vector.extract_strided_slice %4 {offsets = [1, 0, 0], sizes = [1, 1, 128], strides = [1, 1, 1]} : vector<3x3x128xf32> to vector<1x1x128xf32>
    %29 = vector.shape_cast %28 : vector<1x1x128xf32> to vector<128xf32>
    %30 = vector.shape_cast %29 : vector<128xf32> to vector<1x1x1x128xf32>
    %31 = vector.broadcast %30 : vector<1x1x1x128xf32> to vector<1x14x14x128xf32>
    %32 = arith.mulf %27, %31 : vector<1x14x14x128xf32>
    %33 = arith.addf %26, %32 : vector<1x14x14x128xf32>
    %c0_29 = arith.constant 0 : index
    %c1_30 = arith.constant 1 : index
    %c1_31 = arith.constant 1 : index
    %c0_32 = arith.constant 0 : index
    %34 = vector.load %arg6[%c0_29, %c1_30, %c1_31, %c0_32] : memref<1x16x16x128xf32, #tpu.memory_space<vmem>>, vector<1x14x14x128xf32>
    %35 = vector.extract_strided_slice %4 {offsets = [1, 1, 0], sizes = [1, 1, 128], strides = [1, 1, 1]} : vector<3x3x128xf32> to vector<1x1x128xf32>
    %36 = vector.shape_cast %35 : vector<1x1x128xf32> to vector<128xf32>
    %37 = vector.shape_cast %36 : vector<128xf32> to vector<1x1x1x128xf32>
    %38 = vector.broadcast %37 : vector<1x1x1x128xf32> to vector<1x14x14x128xf32>
    %39 = arith.mulf %34, %38 : vector<1x14x14x128xf32>
    %40 = arith.addf %33, %39 : vector<1x14x14x128xf32>
    %c0_33 = arith.constant 0 : index
    %c1_34 = arith.constant 1 : index
    %c2_35 = arith.constant 2 : index
    %c0_36 = arith.constant 0 : index
    %41 = vector.load %arg6[%c0_33, %c1_34, %c2_35, %c0_36] : memref<1x16x16x128xf32, #tpu.memory_space<vmem>>, vector<1x14x14x128xf32>
    %42 = vector.extract_strided_slice %4 {offsets = [1, 2, 0], sizes = [1, 1, 128], strides = [1, 1, 1]} : vector<3x3x128xf32> to vector<1x1x128xf32>
    %43 = vector.shape_cast %42 : vector<1x1x128xf32> to vector<128xf32>
    %44 = vector.shape_cast %43 : vector<128xf32> to vector<1x1x1x128xf32>
    %45 = vector.broadcast %44 : vector<1x1x1x128xf32> to vector<1x14x14x128xf32>
    %46 = arith.mulf %41, %45 : vector<1x14x14x128xf32>
    %47 = arith.addf %40, %46 : vector<1x14x14x128xf32>
    %c0_37 = arith.constant 0 : index
    %c2_38 = arith.constant 2 : index
    %c0_39 = arith.constant 0 : index
    %c0_40 = arith.constant 0 : index
    %48 = vector.load %arg6[%c0_37, %c2_38, %c0_39, %c0_40] : memref<1x16x16x128xf32, #tpu.memory_space<vmem>>, vector<1x14x14x128xf32>
    %49 = vector.extract_strided_slice %4 {offsets = [2, 0, 0], sizes = [1, 1, 128], strides = [1, 1, 1]} : vector<3x3x128xf32> to vector<1x1x128xf32>
    %50 = vector.shape_cast %49 : vector<1x1x128xf32> to vector<128xf32>
    %51 = vector.shape_cast %50 : vector<128xf32> to vector<1x1x1x128xf32>
    %52 = vector.broadcast %51 : vector<1x1x1x128xf32> to vector<1x14x14x128xf32>
    %53 = arith.mulf %48, %52 : vector<1x14x14x128xf32>
    %54 = arith.addf %47, %53 : vector<1x14x14x128xf32>
    %c0_41 = arith.constant 0 : index
    %c2_42 = arith.constant 2 : index
    %c1_43 = arith.constant 1 : index
    %c0_44 = arith.constant 0 : index
    %55 = vector.load %arg6[%c0_41, %c2_42, %c1_43, %c0_44] : memref<1x16x16x128xf32, #tpu.memory_space<vmem>>, vector<1x14x14x128xf32>
    %56 = vector.extract_strided_slice %4 {offsets = [2, 1, 0], sizes = [1, 1, 128], strides = [1, 1, 1]} : vector<3x3x128xf32> to vector<1x1x128xf32>
    %57 = vector.shape_cast %56 : vector<1x1x128xf32> to vector<128xf32>
    %58 = vector.shape_cast %57 : vector<128xf32> to vector<1x1x1x128xf32>
    %59 = vector.broadcast %58 : vector<1x1x1x128xf32> to vector<1x14x14x128xf32>
    %60 = arith.mulf %55, %59 : vector<1x14x14x128xf32>
    %61 = arith.addf %54, %60 : vector<1x14x14x128xf32>
    %c0_45 = arith.constant 0 : index
    %c2_46 = arith.constant 2 : index
    %c2_47 = arith.constant 2 : index
    %c0_48 = arith.constant 0 : index
    %62 = vector.load %arg6[%c0_45, %c2_46, %c2_47, %c0_48] : memref<1x16x16x128xf32, #tpu.memory_space<vmem>>, vector<1x14x14x128xf32>
    %63 = vector.extract_strided_slice %4 {offsets = [2, 2, 0], sizes = [1, 1, 128], strides = [1, 1, 1]} : vector<3x3x128xf32> to vector<1x1x128xf32>
    %64 = vector.shape_cast %63 : vector<1x1x128xf32> to vector<128xf32>
    %65 = vector.shape_cast %64 : vector<128xf32> to vector<1x1x1x128xf32>
    %66 = vector.broadcast %65 : vector<1x1x1x128xf32> to vector<1x14x14x128xf32>
    %67 = arith.mulf %62, %66 : vector<1x14x14x128xf32>
    %68 = arith.addf %61, %67 : vector<1x14x14x128xf32>
    %cst_49 = arith.constant dense<0.000000e+00> : vector<128xf32>
    %69 = vector.multi_reduction <add>, %68, %cst_49 [0, 1, 2] : vector<1x14x14x128xf32> to vector<128xf32>
    %70 = vector.shape_cast %69 : vector<128xf32> to vector<1x1x1x128xf32>
    %cst_50 = arith.constant 1.960000e+02 : f32
    %71 = vector.broadcast %cst_50 : f32 to vector<1x1x1x128xf32>
    %72 = arith.divf %70, %71 : vector<1x1x1x128xf32>
    %73 = arith.mulf %68, %68 : vector<1x14x14x128xf32>
    %cst_51 = arith.constant dense<0.000000e+00> : vector<128xf32>
    %74 = vector.multi_reduction <add>, %73, %cst_51 [0, 1, 2] : vector<1x14x14x128xf32> to vector<128xf32>
    %75 = vector.shape_cast %74 : vector<128xf32> to vector<1x1x1x128xf32>
    %cst_52 = arith.constant 1.960000e+02 : f32
    %76 = vector.broadcast %cst_52 : f32 to vector<1x1x1x128xf32>
    %77 = arith.divf %75, %76 : vector<1x1x1x128xf32>
    %78 = arith.mulf %72, %72 : vector<1x1x1x128xf32>
    %79 = arith.subf %77, %78 : vector<1x1x1x128xf32>
    %cst_53 = arith.constant 9.99999974E-6 : f32
    %80 = vector.broadcast %cst_53 : f32 to vector<1x1x1x128xf32>
    %81 = arith.addf %79, %80 : vector<1x1x1x128xf32>
    %82 = math.rsqrt %81 : vector<1x1x1x128xf32>
    %c0_54 = arith.constant 0 : index
    %c0_55 = arith.constant 0 : index
    %c0_56 = arith.constant 0 : index
    %c0_57 = arith.constant 0 : index
    %83 = vector.load %arg3[%c0_54, %c0_55, %c0_56, %c0_57] : memref<1x1x1x384xf32, #tpu.memory_space<vmem>>, vector<1x1x1x128xf32>
    %84 = arith.mulf %83, %82 : vector<1x1x1x128xf32>
    %c0_58 = arith.constant 0 : index
    %c0_59 = arith.constant 0 : index
    %c0_60 = arith.constant 0 : index
    %c0_61 = arith.constant 0 : index
    %85 = vector.load %arg4[%c0_58, %c0_59, %c0_60, %c0_61] : memref<1x1x1x384xf32, #tpu.memory_space<vmem>>, vector<1x1x1x128xf32>
    %86 = arith.mulf %72, %84 : vector<1x1x1x128xf32>
    %87 = arith.subf %85, %86 : vector<1x1x1x128xf32>
    %88 = vector.broadcast %84 : vector<1x1x1x128xf32> to vector<1x14x14x128xf32>
    %89 = arith.mulf %68, %88 : vector<1x14x14x128xf32>
    %90 = vector.broadcast %87 : vector<1x1x1x128xf32> to vector<1x14x14x128xf32>
    %91 = arith.addf %89, %90 : vector<1x14x14x128xf32>
    %c0_62 = arith.constant 0 : index
    %c0_63 = arith.constant 0 : index
    %c0_64 = arith.constant 0 : index
    %c0_65 = arith.constant 0 : index
    %92 = vector.load %arg5[%c0_62, %c0_63, %c0_64, %c0_65] : memref<1x14x14x384xf32, #tpu.memory_space<vmem>>, vector<1x14x14x128xf32>
    tpu.vector_store %arg5[%c0_62, %c0_63, %c0_64, %c0_65], %91 {strides = array<i32>} : memref<1x14x14x384xf32, #tpu.memory_space<vmem>>, vector<1x14x14x128xf32>,
    %c0_66 = arith.constant 0 : index
    %c0_67 = arith.constant 0 : index
    %c0_68 = arith.constant 0 : index
    %c128 = arith.constant 128 : index
    %93 = vector.load %arg1[%c0_66, %c0_67, %c0_68, %c128] : memref<1x14x14x384xf32, #tpu.memory_space<vmem>>, vector<1x14x14x128xf32>
    %c0_69 = arith.constant 0 : index
    %c1_70 = arith.constant 1 : index
    %c1_71 = arith.constant 1 : index
    %c0_72 = arith.constant 0 : index
    %94 = vector.load %arg6[%c0_69, %c1_70, %c1_71, %c0_72] : memref<1x16x16x128xf32, #tpu.memory_space<vmem>>, vector<1x14x14x128xf32>
    tpu.vector_store %arg6[%c0_69, %c1_70, %c1_71, %c0_72], %93 {strides = array<i32>} : memref<1x16x16x128xf32, #tpu.memory_space<vmem>>, vector<1x14x14x128xf32>,
    %c0_73 = arith.constant 0 : index
    %c0_74 = arith.constant 0 : index
    %c128_75 = arith.constant 128 : index
    %95 = vector.load %arg2[%c0_73, %c0_74, %c128_75] : memref<3x3x384xf32, #tpu.memory_space<vmem>>, vector<3x3x128xf32>
    %cst_76 = arith.constant 0.000000e+00 : f32
    %96 = vector.broadcast %cst_76 : f32 to vector<1x14x14x128xf32>
    %c0_77 = arith.constant 0 : index
    %c0_78 = arith.constant 0 : index
    %c0_79 = arith.constant 0 : index
    %c0_80 = arith.constant 0 : index
    %97 = vector.load %arg6[%c0_77, %c0_78, %c0_79, %c0_80] : memref<1x16x16x128xf32, #tpu.memory_space<vmem>>, vector<1x14x14x128xf32>
    %98 = vector.extract_strided_slice %95 {offsets = [0, 0, 0], sizes = [1, 1, 128], strides = [1, 1, 1]} : vector<3x3x128xf32> to vector<1x1x128xf32>
    %99 = vector.shape_cast %98 : vector<1x1x128xf32> to vector<128xf32>
    %100 = vector.shape_cast %99 : vector<128xf32> to vector<1x1x1x128xf32>
    %101 = vector.broadcast %100 : vector<1x1x1x128xf32> to vector<1x14x14x128xf32>
    %102 = arith.mulf %97, %101 : vector<1x14x14x128xf32>
    %103 = arith.addf %96, %102 : vector<1x14x14x128xf32>
    %c0_81 = arith.constant 0 : index
    %c0_82 = arith.constant 0 : index
    %c1_83 = arith.constant 1 : index
    %c0_84 = arith.constant 0 : index
    %104 = vector.load %arg6[%c0_81, %c0_82, %c1_83, %c0_84] : memref<1x16x16x128xf32, #tpu.memory_space<vmem>>, vector<1x14x14x128xf32>
    %105 = vector.extract_strided_slice %95 {offsets = [0, 1, 0], sizes = [1, 1, 128], strides = [1, 1, 1]} : vector<3x3x128xf32> to vector<1x1x128xf32>
    %106 = vector.shape_cast %105 : vector<1x1x128xf32> to vector<128xf32>
    %107 = vector.shape_cast %106 : vector<128xf32> to vector<1x1x1x128xf32>
    %108 = vector.broadcast %107 : vector<1x1x1x128xf32> to vector<1x14x14x128xf32>
    %109 = arith.mulf %104, %108 : vector<1x14x14x128xf32>
    %110 = arith.addf %103, %109 : vector<1x14x14x128xf32>
    %c0_85 = arith.constant 0 : index
    %c0_86 = arith.constant 0 : index
    %c2_87 = arith.constant 2 : index
    %c0_88 = arith.constant 0 : index
    %111 = vector.load %arg6[%c0_85, %c0_86, %c2_87, %c0_88] : memref<1x16x16x128xf32, #tpu.memory_space<vmem>>, vector<1x14x14x128xf32>
    %112 = vector.extract_strided_slice %95 {offsets = [0, 2, 0], sizes = [1, 1, 128], strides = [1, 1, 1]} : vector<3x3x128xf32> to vector<1x1x128xf32>
    %113 = vector.shape_cast %112 : vector<1x1x128xf32> to vector<128xf32>
    %114 = vector.shape_cast %113 : vector<128xf32> to vector<1x1x1x128xf32>
    %115 = vector.broadcast %114 : vector<1x1x1x128xf32> to vector<1x14x14x128xf32>
    %116 = arith.mulf %111, %115 : vector<1x14x14x128xf32>
    %117 = arith.addf %110, %116 : vector<1x14x14x128xf32>
    %c0_89 = arith.constant 0 : index
    %c1_90 = arith.constant 1 : index
    %c0_91 = arith.constant 0 : index
    %c0_92 = arith.constant 0 : index
    %118 = vector.load %arg6[%c0_89, %c1_90, %c0_91, %c0_92] : memref<1x16x16x128xf32, #tpu.memory_space<vmem>>, vector<1x14x14x128xf32>
    %119 = vector.extract_strided_slice %95 {offsets = [1, 0, 0], sizes = [1, 1, 128], strides = [1, 1, 1]} : vector<3x3x128xf32> to vector<1x1x128xf32>
    %120 = vector.shape_cast %119 : vector<1x1x128xf32> to vector<128xf32>
    %121 = vector.shape_cast %120 : vector<128xf32> to vector<1x1x1x128xf32>
    %122 = vector.broadcast %121 : vector<1x1x1x128xf32> to vector<1x14x14x128xf32>
    %123 = arith.mulf %118, %122 : vector<1x14x14x128xf32>
    %124 = arith.addf %117, %123 : vector<1x14x14x128xf32>
    %c0_93 = arith.constant 0 : index
    %c1_94 = arith.constant 1 : index
    %c1_95 = arith.constant 1 : index
    %c0_96 = arith.constant 0 : index
    %125 = vector.load %arg6[%c0_93, %c1_94, %c1_95, %c0_96] : memref<1x16x16x128xf32, #tpu.memory_space<vmem>>, vector<1x14x14x128xf32>
    %126 = vector.extract_strided_slice %95 {offsets = [1, 1, 0], sizes = [1, 1, 128], strides = [1, 1, 1]} : vector<3x3x128xf32> to vector<1x1x128xf32>
    %127 = vector.shape_cast %126 : vector<1x1x128xf32> to vector<128xf32>
    %128 = vector.shape_cast %127 : vector<128xf32> to vector<1x1x1x128xf32>
    %129 = vector.broadcast %128 : vector<1x1x1x128xf32> to vector<1x14x14x128xf32>
    %130 = arith.mulf %125, %129 : vector<1x14x14x128xf32>
    %131 = arith.addf %124, %130 : vector<1x14x14x128xf32>
    %c0_97 = arith.constant 0 : index
    %c1_98 = arith.constant 1 : index
    %c2_99 = arith.constant 2 : index
    %c0_100 = arith.constant 0 : index
    %132 = vector.load %arg6[%c0_97, %c1_98, %c2_99, %c0_100] : memref<1x16x16x128xf32, #tpu.memory_space<vmem>>, vector<1x14x14x128xf32>
    %133 = vector.extract_strided_slice %95 {offsets = [1, 2, 0], sizes = [1, 1, 128], strides = [1, 1, 1]} : vector<3x3x128xf32> to vector<1x1x128xf32>
    %134 = vector.shape_cast %133 : vector<1x1x128xf32> to vector<128xf32>
    %135 = vector.shape_cast %134 : vector<128xf32> to vector<1x1x1x128xf32>
    %136 = vector.broadcast %135 : vector<1x1x1x128xf32> to vector<1x14x14x128xf32>
    %137 = arith.mulf %132, %136 : vector<1x14x14x128xf32>
    %138 = arith.addf %131, %137 : vector<1x14x14x128xf32>
    %c0_101 = arith.constant 0 : index
    %c2_102 = arith.constant 2 : index
    %c0_103 = arith.constant 0 : index
    %c0_104 = arith.constant 0 : index
    %139 = vector.load %arg6[%c0_101, %c2_102, %c0_103, %c0_104] : memref<1x16x16x128xf32, #tpu.memory_space<vmem>>, vector<1x14x14x128xf32>
    %140 = vector.extract_strided_slice %95 {offsets = [2, 0, 0], sizes = [1, 1, 128], strides = [1, 1, 1]} : vector<3x3x128xf32> to vector<1x1x128xf32>
    %141 = vector.shape_cast %140 : vector<1x1x128xf32> to vector<128xf32>
    %142 = vector.shape_cast %141 : vector<128xf32> to vector<1x1x1x128xf32>
    %143 = vector.broadcast %142 : vector<1x1x1x128xf32> to vector<1x14x14x128xf32>
    %144 = arith.mulf %139, %143 : vector<1x14x14x128xf32>
    %145 = arith.addf %138, %144 : vector<1x14x14x128xf32>
    %c0_105 = arith.constant 0 : index
    %c2_106 = arith.constant 2 : index
    %c1_107 = arith.constant 1 : index
    %c0_108 = arith.constant 0 : index
    %146 = vector.load %arg6[%c0_105, %c2_106, %c1_107, %c0_108] : memref<1x16x16x128xf32, #tpu.memory_space<vmem>>, vector<1x14x14x128xf32>
    %147 = vector.extract_strided_slice %95 {offsets = [2, 1, 0], sizes = [1, 1, 128], strides = [1, 1, 1]} : vector<3x3x128xf32> to vector<1x1x128xf32>
    %148 = vector.shape_cast %147 : vector<1x1x128xf32> to vector<128xf32>
    %149 = vector.shape_cast %148 : vector<128xf32> to vector<1x1x1x128xf32>
    %150 = vector.broadcast %149 : vector<1x1x1x128xf32> to vector<1x14x14x128xf32>
    %151 = arith.mulf %146, %150 : vector<1x14x14x128xf32>
    %152 = arith.addf %145, %151 : vector<1x14x14x128xf32>
    %c0_109 = arith.constant 0 : index
    %c2_110 = arith.constant 2 : index
    %c2_111 = arith.constant 2 : index
    %c0_112 = arith.constant 0 : index
    %153 = vector.load %arg6[%c0_109, %c2_110, %c2_111, %c0_112] : memref<1x16x16x128xf32, #tpu.memory_space<vmem>>, vector<1x14x14x128xf32>
    %154 = vector.extract_strided_slice %95 {offsets = [2, 2, 0], sizes = [1, 1, 128], strides = [1, 1, 1]} : vector<3x3x128xf32> to vector<1x1x128xf32>
    %155 = vector.shape_cast %154 : vector<1x1x128xf32> to vector<128xf32>
    %156 = vector.shape_cast %155 : vector<128xf32> to vector<1x1x1x128xf32>
    %157 = vector.broadcast %156 : vector<1x1x1x128xf32> to vector<1x14x14x128xf32>
    %158 = arith.mulf %153, %157 : vector<1x14x14x128xf32>
    %159 = arith.addf %152, %158 : vector<1x14x14x128xf32>
    %cst_113 = arith.constant dense<0.000000e+00> : vector<128xf32>
    %160 = vector.multi_reduction <add>, %159, %cst_113 [0, 1, 2] : vector<1x14x14x128xf32> to vector<128xf32>
    %161 = vector.shape_cast %160 : vector<128xf32> to vector<1x1x1x128xf32>
    %cst_114 = arith.constant 1.960000e+02 : f32
    %162 = vector.broadcast %cst_114 : f32 to vector<1x1x1x128xf32>
    %163 = arith.divf %161, %162 : vector<1x1x1x128xf32>
    %164 = arith.mulf %159, %159 : vector<1x14x14x128xf32>
    %cst_115 = arith.constant dense<0.000000e+00> : vector<128xf32>
    %165 = vector.multi_reduction <add>, %164, %cst_115 [0, 1, 2] : vector<1x14x14x128xf32> to vector<128xf32>
    %166 = vector.shape_cast %165 : vector<128xf32> to vector<1x1x1x128xf32>
    %cst_116 = arith.constant 1.960000e+02 : f32
    %167 = vector.broadcast %cst_116 : f32 to vector<1x1x1x128xf32>
    %168 = arith.divf %166, %167 : vector<1x1x1x128xf32>
    %169 = arith.mulf %163, %163 : vector<1x1x1x128xf32>
    %170 = arith.subf %168, %169 : vector<1x1x1x128xf32>
    %cst_117 = arith.constant 9.99999974E-6 : f32
    %171 = vector.broadcast %cst_117 : f32 to vector<1x1x1x128xf32>
    %172 = arith.addf %170, %171 : vector<1x1x1x128xf32>
    %173 = math.rsqrt %172 : vector<1x1x1x128xf32>
    %c0_118 = arith.constant 0 : index
    %c0_119 = arith.constant 0 : index
    %c0_120 = arith.constant 0 : index
    %c128_121 = arith.constant 128 : index
    %174 = vector.load %arg3[%c0_118, %c0_119, %c0_120, %c128_121] : memref<1x1x1x384xf32, #tpu.memory_space<vmem>>, vector<1x1x1x128xf32>
    %175 = arith.mulf %174, %173 : vector<1x1x1x128xf32>
    %c0_122 = arith.constant 0 : index
    %c0_123 = arith.constant 0 : index
    %c0_124 = arith.constant 0 : index
    %c128_125 = arith.constant 128 : index
    %176 = vector.load %arg4[%c0_122, %c0_123, %c0_124, %c128_125] : memref<1x1x1x384xf32, #tpu.memory_space<vmem>>, vector<1x1x1x128xf32>
    %177 = arith.mulf %163, %175 : vector<1x1x1x128xf32>
    %178 = arith.subf %176, %177 : vector<1x1x1x128xf32>
    %179 = vector.broadcast %175 : vector<1x1x1x128xf32> to vector<1x14x14x128xf32>
    %180 = arith.mulf %159, %179 : vector<1x14x14x128xf32>
    %181 = vector.broadcast %178 : vector<1x1x1x128xf32> to vector<1x14x14x128xf32>
    %182 = arith.addf %180, %181 : vector<1x14x14x128xf32>
    %c0_126 = arith.constant 0 : index
    %c0_127 = arith.constant 0 : index
    %c0_128 = arith.constant 0 : index
    %c128_129 = arith.constant 128 : index
    %183 = vector.load %arg5[%c0_126, %c0_127, %c0_128, %c128_129] : memref<1x14x14x384xf32, #tpu.memory_space<vmem>>, vector<1x14x14x128xf32>
    tpu.vector_store %arg5[%c0_126, %c0_127, %c0_128, %c128_129], %182 {strides = array<i32>} : memref<1x14x14x384xf32, #tpu.memory_space<vmem>>, vector<1x14x14x128xf32>,
    %c0_130 = arith.constant 0 : index
    %c0_131 = arith.constant 0 : index
    %c0_132 = arith.constant 0 : index
    %c256 = arith.constant 256 : index
    %184 = vector.load %arg1[%c0_130, %c0_131, %c0_132, %c256] : memref<1x14x14x384xf32, #tpu.memory_space<vmem>>, vector<1x14x14x128xf32>
    %c0_133 = arith.constant 0 : index
    %c1_134 = arith.constant 1 : index
    %c1_135 = arith.constant 1 : index
    %c0_136 = arith.constant 0 : index
    %185 = vector.load %arg6[%c0_133, %c1_134, %c1_135, %c0_136] : memref<1x16x16x128xf32, #tpu.memory_space<vmem>>, vector<1x14x14x128xf32>
    tpu.vector_store %arg6[%c0_133, %c1_134, %c1_135, %c0_136], %184 {strides = array<i32>} : memref<1x16x16x128xf32, #tpu.memory_space<vmem>>, vector<1x14x14x128xf32>,
    %c0_137 = arith.constant 0 : index
    %c0_138 = arith.constant 0 : index
    %c256_139 = arith.constant 256 : index
    %186 = vector.load %arg2[%c0_137, %c0_138, %c256_139] : memref<3x3x384xf32, #tpu.memory_space<vmem>>, vector<3x3x128xf32>
    %cst_140 = arith.constant 0.000000e+00 : f32
    %187 = vector.broadcast %cst_140 : f32 to vector<1x14x14x128xf32>
    %c0_141 = arith.constant 0 : index
    %c0_142 = arith.constant 0 : index
    %c0_143 = arith.constant 0 : index
    %c0_144 = arith.constant 0 : index
    %188 = vector.load %arg6[%c0_141, %c0_142, %c0_143, %c0_144] : memref<1x16x16x128xf32, #tpu.memory_space<vmem>>, vector<1x14x14x128xf32>
    %189 = vector.extract_strided_slice %186 {offsets = [0, 0, 0], sizes = [1, 1, 128], strides = [1, 1, 1]} : vector<3x3x128xf32> to vector<1x1x128xf32>
    %190 = vector.shape_cast %189 : vector<1x1x128xf32> to vector<128xf32>
    %191 = vector.shape_cast %190 : vector<128xf32> to vector<1x1x1x128xf32>
    %192 = vector.broadcast %191 : vector<1x1x1x128xf32> to vector<1x14x14x128xf32>
    %193 = arith.mulf %188, %192 : vector<1x14x14x128xf32>
    %194 = arith.addf %187, %193 : vector<1x14x14x128xf32>
    %c0_145 = arith.constant 0 : index
    %c0_146 = arith.constant 0 : index
    %c1_147 = arith.constant 1 : index
    %c0_148 = arith.constant 0 : index
    %195 = vector.load %arg6[%c0_145, %c0_146, %c1_147, %c0_148] : memref<1x16x16x128xf32, #tpu.memory_space<vmem>>, vector<1x14x14x128xf32>
    %196 = vector.extract_strided_slice %186 {offsets = [0, 1, 0], sizes = [1, 1, 128], strides = [1, 1, 1]} : vector<3x3x128xf32> to vector<1x1x128xf32>
    %197 = vector.shape_cast %196 : vector<1x1x128xf32> to vector<128xf32>
    %198 = vector.shape_cast %197 : vector<128xf32> to vector<1x1x1x128xf32>
    %199 = vector.broadcast %198 : vector<1x1x1x128xf32> to vector<1x14x14x128xf32>
    %200 = arith.mulf %195, %199 : vector<1x14x14x128xf32>
    %201 = arith.addf %194, %200 : vector<1x14x14x128xf32>
    %c0_149 = arith.constant 0 : index
    %c0_150 = arith.constant 0 : index
    %c2_151 = arith.constant 2 : index
    %c0_152 = arith.constant 0 : index
    %202 = vector.load %arg6[%c0_149, %c0_150, %c2_151, %c0_152] : memref<1x16x16x128xf32, #tpu.memory_space<vmem>>, vector<1x14x14x128xf32>
    %203 = vector.extract_strided_slice %186 {offsets = [0, 2, 0], sizes = [1, 1, 128], strides = [1, 1, 1]} : vector<3x3x128xf32> to vector<1x1x128xf32>
    %204 = vector.shape_cast %203 : vector<1x1x128xf32> to vector<128xf32>
    %205 = vector.shape_cast %204 : vector<128xf32> to vector<1x1x1x128xf32>
    %206 = vector.broadcast %205 : vector<1x1x1x128xf32> to vector<1x14x14x128xf32>
    %207 = arith.mulf %202, %206 : vector<1x14x14x128xf32>
    %208 = arith.addf %201, %207 : vector<1x14x14x128xf32>
    %c0_153 = arith.constant 0 : index
    %c1_154 = arith.constant 1 : index
    %c0_155 = arith.constant 0 : index
    %c0_156 = arith.constant 0 : index
    %209 = vector.load %arg6[%c0_153, %c1_154, %c0_155, %c0_156] : memref<1x16x16x128xf32, #tpu.memory_space<vmem>>, vector<1x14x14x128xf32>
    %210 = vector.extract_strided_slice %186 {offsets = [1, 0, 0], sizes = [1, 1, 128], strides = [1, 1, 1]} : vector<3x3x128xf32> to vector<1x1x128xf32>
    %211 = vector.shape_cast %210 : vector<1x1x128xf32> to vector<128xf32>
    %212 = vector.shape_cast %211 : vector<128xf32> to vector<1x1x1x128xf32>
    %213 = vector.broadcast %212 : vector<1x1x1x128xf32> to vector<1x14x14x128xf32>
    %214 = arith.mulf %209, %213 : vector<1x14x14x128xf32>
    %215 = arith.addf %208, %214 : vector<1x14x14x128xf32>
    %c0_157 = arith.constant 0 : index
    %c1_158 = arith.constant 1 : index
    %c1_159 = arith.constant 1 : index
    %c0_160 = arith.constant 0 : index
    %216 = vector.load %arg6[%c0_157, %c1_158, %c1_159, %c0_160] : memref<1x16x16x128xf32, #tpu.memory_space<vmem>>, vector<1x14x14x128xf32>
    %217 = vector.extract_strided_slice %186 {offsets = [1, 1, 0], sizes = [1, 1, 128], strides = [1, 1, 1]} : vector<3x3x128xf32> to vector<1x1x128xf32>
    %218 = vector.shape_cast %217 : vector<1x1x128xf32> to vector<128xf32>
    %219 = vector.shape_cast %218 : vector<128xf32> to vector<1x1x1x128xf32>
    %220 = vector.broadcast %219 : vector<1x1x1x128xf32> to vector<1x14x14x128xf32>
    %221 = arith.mulf %216, %220 : vector<1x14x14x128xf32>
    %222 = arith.addf %215, %221 : vector<1x14x14x128xf32>
    %c0_161 = arith.constant 0 : index
    %c1_162 = arith.constant 1 : index
    %c2_163 = arith.constant 2 : index
    %c0_164 = arith.constant 0 : index
    %223 = vector.load %arg6[%c0_161, %c1_162, %c2_163, %c0_164] : memref<1x16x16x128xf32, #tpu.memory_space<vmem>>, vector<1x14x14x128xf32>
    %224 = vector.extract_strided_slice %186 {offsets = [1, 2, 0], sizes = [1, 1, 128], strides = [1, 1, 1]} : vector<3x3x128xf32> to vector<1x1x128xf32>
    %225 = vector.shape_cast %224 : vector<1x1x128xf32> to vector<128xf32>
    %226 = vector.shape_cast %225 : vector<128xf32> to vector<1x1x1x128xf32>
    %227 = vector.broadcast %226 : vector<1x1x1x128xf32> to vector<1x14x14x128xf32>
    %228 = arith.mulf %223, %227 : vector<1x14x14x128xf32>
    %229 = arith.addf %222, %228 : vector<1x14x14x128xf32>
    %c0_165 = arith.constant 0 : index
    %c2_166 = arith.constant 2 : index
    %c0_167 = arith.constant 0 : index
    %c0_168 = arith.constant 0 : index
    %230 = vector.load %arg6[%c0_165, %c2_166, %c0_167, %c0_168] : memref<1x16x16x128xf32, #tpu.memory_space<vmem>>, vector<1x14x14x128xf32>
    %231 = vector.extract_strided_slice %186 {offsets = [2, 0, 0], sizes = [1, 1, 128], strides = [1, 1, 1]} : vector<3x3x128xf32> to vector<1x1x128xf32>
    %232 = vector.shape_cast %231 : vector<1x1x128xf32> to vector<128xf32>
    %233 = vector.shape_cast %232 : vector<128xf32> to vector<1x1x1x128xf32>
    %234 = vector.broadcast %233 : vector<1x1x1x128xf32> to vector<1x14x14x128xf32>
    %235 = arith.mulf %230, %234 : vector<1x14x14x128xf32>
    %236 = arith.addf %229, %235 : vector<1x14x14x128xf32>
    %c0_169 = arith.constant 0 : index
    %c2_170 = arith.constant 2 : index
    %c1_171 = arith.constant 1 : index
    %c0_172 = arith.constant 0 : index
    %237 = vector.load %arg6[%c0_169, %c2_170, %c1_171, %c0_172] : memref<1x16x16x128xf32, #tpu.memory_space<vmem>>, vector<1x14x14x128xf32>
    %238 = vector.extract_strided_slice %186 {offsets = [2, 1, 0], sizes = [1, 1, 128], strides = [1, 1, 1]} : vector<3x3x128xf32> to vector<1x1x128xf32>
    %239 = vector.shape_cast %238 : vector<1x1x128xf32> to vector<128xf32>
    %240 = vector.shape_cast %239 : vector<128xf32> to vector<1x1x1x128xf32>
    %241 = vector.broadcast %240 : vector<1x1x1x128xf32> to vector<1x14x14x128xf32>
    %242 = arith.mulf %237, %241 : vector<1x14x14x128xf32>
    %243 = arith.addf %236, %242 : vector<1x14x14x128xf32>
    %c0_173 = arith.constant 0 : index
    %c2_174 = arith.constant 2 : index
    %c2_175 = arith.constant 2 : index
    %c0_176 = arith.constant 0 : index
    %244 = vector.load %arg6[%c0_173, %c2_174, %c2_175, %c0_176] : memref<1x16x16x128xf32, #tpu.memory_space<vmem>>, vector<1x14x14x128xf32>
    %245 = vector.extract_strided_slice %186 {offsets = [2, 2, 0], sizes = [1, 1, 128], strides = [1, 1, 1]} : vector<3x3x128xf32> to vector<1x1x128xf32>
    %246 = vector.shape_cast %245 : vector<1x1x128xf32> to vector<128xf32>
    %247 = vector.shape_cast %246 : vector<128xf32> to vector<1x1x1x128xf32>
    %248 = vector.broadcast %247 : vector<1x1x1x128xf32> to vector<1x14x14x128xf32>
    %249 = arith.mulf %244, %248 : vector<1x14x14x128xf32>
    %250 = arith.addf %243, %249 : vector<1x14x14x128xf32>
    %cst_177 = arith.constant dense<0.000000e+00> : vector<128xf32>
    %251 = vector.multi_reduction <add>, %250, %cst_177 [0, 1, 2] : vector<1x14x14x128xf32> to vector<128xf32>
    %252 = vector.shape_cast %251 : vector<128xf32> to vector<1x1x1x128xf32>
    %cst_178 = arith.constant 1.960000e+02 : f32
    %253 = vector.broadcast %cst_178 : f32 to vector<1x1x1x128xf32>
    %254 = arith.divf %252, %253 : vector<1x1x1x128xf32>
    %255 = arith.mulf %250, %250 : vector<1x14x14x128xf32>
    %cst_179 = arith.constant dense<0.000000e+00> : vector<128xf32>
    %256 = vector.multi_reduction <add>, %255, %cst_179 [0, 1, 2] : vector<1x14x14x128xf32> to vector<128xf32>
    %257 = vector.shape_cast %256 : vector<128xf32> to vector<1x1x1x128xf32>
    %cst_180 = arith.constant 1.960000e+02 : f32
    %258 = vector.broadcast %cst_180 : f32 to vector<1x1x1x128xf32>
    %259 = arith.divf %257, %258 : vector<1x1x1x128xf32>
    %260 = arith.mulf %254, %254 : vector<1x1x1x128xf32>
    %261 = arith.subf %259, %260 : vector<1x1x1x128xf32>
    %cst_181 = arith.constant 9.99999974E-6 : f32
    %262 = vector.broadcast %cst_181 : f32 to vector<1x1x1x128xf32>
    %263 = arith.addf %261, %262 : vector<1x1x1x128xf32>
    %264 = math.rsqrt %263 : vector<1x1x1x128xf32>
    %c0_182 = arith.constant 0 : index
    %c0_183 = arith.constant 0 : index
    %c0_184 = arith.constant 0 : index
    %c256_185 = arith.constant 256 : index
    %265 = vector.load %arg3[%c0_182, %c0_183, %c0_184, %c256_185] : memref<1x1x1x384xf32, #tpu.memory_space<vmem>>, vector<1x1x1x128xf32>
    %266 = arith.mulf %265, %264 : vector<1x1x1x128xf32>
    %c0_186 = arith.constant 0 : index
    %c0_187 = arith.constant 0 : index
    %c0_188 = arith.constant 0 : index
    %c256_189 = arith.constant 256 : index
    %267 = vector.load %arg4[%c0_186, %c0_187, %c0_188, %c256_189] : memref<1x1x1x384xf32, #tpu.memory_space<vmem>>, vector<1x1x1x128xf32>
    %268 = arith.mulf %254, %266 : vector<1x1x1x128xf32>
    %269 = arith.subf %267, %268 : vector<1x1x1x128xf32>
    %270 = vector.broadcast %266 : vector<1x1x1x128xf32> to vector<1x14x14x128xf32>
    %271 = arith.mulf %250, %270 : vector<1x14x14x128xf32>
    %272 = vector.broadcast %269 : vector<1x1x1x128xf32> to vector<1x14x14x128xf32>
    %273 = arith.addf %271, %272 : vector<1x14x14x128xf32>
    %c0_190 = arith.constant 0 : index
    %c0_191 = arith.constant 0 : index
    %c0_192 = arith.constant 0 : index
    %c256_193 = arith.constant 256 : index
    %274 = vector.load %arg5[%c0_190, %c0_191, %c0_192, %c256_193] : memref<1x14x14x384xf32, #tpu.memory_space<vmem>>, vector<1x14x14x128xf32>
    tpu.vector_store %arg5[%c0_190, %c0_191, %c0_192, %c256_193], %273 {strides = array<i32>} : memref<1x14x14x384xf32, #tpu.memory_space<vmem>>, vector<1x14x14x128xf32>,
    return
  }
  func.func @transform_0(%arg0: i32) -> (i32, i32, i32, i32) {
    %c0_i32 = arith.constant 0 : i32
    %c0_i32_0 = arith.constant 0 : i32
    %c0_i32_1 = arith.constant 0 : i32
    %c0_i32_2 = arith.constant 0 : i32
    return %c0_i32, %c0_i32_0, %c0_i32_1, %arg0 : i32, i32, i32, i32
  }
  func.func @transform_1(%arg0: i32) -> (i32, i32, i32) {
    %c0_i32 = arith.constant 0 : i32
    %c0_i32_0 = arith.constant 0 : i32
    %c0_i32_1 = arith.constant 0 : i32
    return %c0_i32, %c0_i32_0, %arg0 : i32, i32, i32
  }
  func.func @transform_2(%arg0: i32) -> (i32, i32, i32, i32) {
    %c0_i32 = arith.constant 0 : i32
    %c0_i32_0 = arith.constant 0 : i32
    %c0_i32_1 = arith.constant 0 : i32
    %c0_i32_2 = arith.constant 0 : i32
    return %c0_i32, %c0_i32_0, %c0_i32_1, %arg0 : i32, i32, i32, i32
  }
  func.func @transform_3(%arg0: i32) -> (i32, i32, i32, i32) {
    %c0_i32 = arith.constant 0 : i32
    %c0_i32_0 = arith.constant 0 : i32
    %c0_i32_1 = arith.constant 0 : i32
    %c0_i32_2 = arith.constant 0 : i32
    return %c0_i32, %c0_i32_0, %c0_i32_1, %arg0 : i32, i32, i32, i32
  }
  func.func @transform_4(%arg0: i32) -> (i32, i32, i32, i32) {
    %c0_i32 = arith.constant 0 : i32
    %c0_i32_0 = arith.constant 0 : i32
    %c0_i32_1 = arith.constant 0 : i32
    %c0_i32_2 = arith.constant 0 : i32
    return %c0_i32, %c0_i32_0, %c0_i32_1, %arg0 : i32, i32, i32, i32
  }
}

</mosaic_0001>

<bundles_post_ra>
// kernel: dwconv_bn.1
= control target key start
LH: loop header
LB: loop body
LE: loop exit
PB: predicated region body
PF: predicated region fallthrough
CT: control target
= control target key end

     0   :  { %s4166_s15 = smov 0   ;;  %s4168_s16 = smov 0   ;;  %s8254_s0 = inlined_call_operand.vmem [shape: f32[1,14,14,768], index: 0, kind: input, shape index: {}]   ;;  %s8255_s1 = inlined_call_operand.vmem [shape: f32[3,3,768], index: 1, kind: input, shape index: {}]   ;;  %s8256_s2 = inlined_call_operand.vmem [shape: f32[1,1,1,768], index: 2, kind: input, shape index: {}]   ;;  %s8257_s3 = inlined_call_operand.vmem [shape: f32[1,1,1,768], index: 3, kind: input, shape index: {}]   ;;  %s8258_s4 = inlined_call_operand.vmem [shape: f32[1,14,14,768], index: 4, kind: output, shape index: {}]  }
   0x1   :  { %s4170_s17 = smov 0  }
   0x2 LB: > { %s4182_s18 = sadd.s32 4294967295, %s4138_s17   ;;  %s4185_s19 = sadd.s32 1, %s4138_s17   ;;  %s4138_s17 = sphi %s4170_s17, %s9465_s17   ;;  %s4134_s16 = sphi %s4168_s16, %s9464_s16   ;;  %s4130_s15 = sphi %s4166_s15, %s9463_s15  }
   0x3   : > { %s18_s20 = ssub.s32 %s4138_s17, %s4185_s19  ;;  %s21_s21 = sadd.s32 1, %s4134_s16 }
   0x4   : > { %p19_p0 = scmp.eq.s32.totalorder %s18_s20, 0  ;;  %p28_p1 = scmp.ne.s32.totalorder %s4134_s16, %s4130_s15 }
   0x5   : > { %p29_p2 = scmp.eq.s32.totalorder %s4138_s17, 0  ;;  %p136_p3 = scmp.eq.s32.totalorder %s4182_s18, 1 }
   0x6   : > { %s4195_s22 = scalar_select %p19_p0, %s4134_s16, %s21_s21  }
   0x7   : > { %p4197_p4 = por %p29_p2, %p28_p1  ;;  %p4201_p5 = por %p136_p3, %p28_p1 }
   0x8   : > { %p4046_p6 = scmp.ge.s32.totalorder %s4138_s17, 2 }
   0xa   : > { %158 = sbr.rel (%p4046_p6) target bundleno = 72 (0x48), region = 16 }
  0x11   : > { %161 = sbr.rel (!%p4197_p4) target bundleno = 64 (0x40), region = 20  ;;  %s163_s25 = sand.u32 (%p4197_p4), 1, %s4134_s16  }
  0x12   : > { %s4059_s26 = smul.u32 (%p4197_p4), 24, %s4138_s17 }
  0x13   : > { %s4062_s27 = smul.u32 (%p4197_p4), 672, %s163_s25 }
  0x14   : > { %s4213_s30 = scalar_lea.vmem (%p4197_p4), %s8254_s0, %s4059_s26 }
  0x15   : > { %v181_v0 = vld [vmem:[%s4213_s30] sm:$0xff] (%p4197_p4)  ;;  %v183_v1 = vld [vmem:[%s4213_s30 + $0x8] sm:$0xff] (%p4197_p4)  ;;  %v185_v2 = vld [vmem:[%s4213_s30 + $0x10] sm:$0xff] (%p4197_p4)  ;;  %s4218_s5 = scalar_lea.vmem (%p4197_p4), [#allocation3], %s4062_s27 }
  0x16   : > { %182 = vst [vmem:[%s4218_s5] sm:$0xff] (%p4197_p4), %v181_v0  ;;  %184 = vst [vmem:[%s4218_s5 + $0x8] sm:$0xff] (%p4197_p4), %v183_v1  ;;  %v187_v3 = vld [vmem:[%s4213_s30 + $0x30] sm:$0xff] (%p4197_p4)  ;;  %v189_v4 = vld [vmem:[%s4213_s30 + $0x38] sm:$0xff] (%p4197_p4) }
  0x17   : > { %186 = vst [vmem:[%s4218_s5 + $0x10] sm:$0xff] (%p4197_p4), %v185_v2  ;;  %v191_v5 = vld [vmem:[%s4213_s30 + $0x40] sm:$0xff] (%p4197_p4)  ;;  %188 = vst [vmem:[%s4218_s5 + $0x18] sm:$0xff] (%p4197_p4), %v187_v3  ;;  %v195_v7 = vld [vmem:[%s4213_s30 + $0x68] sm:$0xff] (%p4197_p4) }
  0x18   : > { %190 = vst [vmem:[%s4218_s5 + $0x20] sm:$0xff] %v189_v4  ;;  %192 = vst [vmem:[%s4218_s5 + $0x28] sm:$0xff] %v191_v5  ;;  %v193_v6 = vld [vmem:[%s4213_s30 + $0x60] sm:$0xff]  ;;  %v197_v8 = vld [vmem:[%s4213_s30 + $0x70] sm:$0xff] }
  0x19   : > { %194 = vst [vmem:[%s4218_s5 + $0x30] sm:$0xff] %v193_v6  ;;  %196 = vst [vmem:[%s4218_s5 + $0x38] sm:$0xff] %v195_v7  ;;  %v199_v9 = vld [vmem:[%s4213_s30 + $0x90] sm:$0xff]  ;;  %v201_v10 = vld [vmem:[%s4213_s30 + $0x98] sm:$0xff] }
  0x1a   : > { %198 = vst [vmem:[%s4218_s5 + $0x40] sm:$0xff] %v197_v8  ;;  %v203_v11 = vld [vmem:[%s4213_s30 + $0xa0] sm:$0xff]  ;;  %200 = vst [vmem:[%s4218_s5 + $0x48] sm:$0xff] %v199_v9  ;;  %v207_v13 = vld [vmem:[%s4213_s30 + $0xc8] sm:$0xff] }
  0x1b   : > { %202 = vst [vmem:[%s4218_s5 + $0x50] sm:$0xff] %v201_v10  ;;  %204 = vst [vmem:[%s4218_s5 + $0x58] sm:$0xff] %v203_v11  ;;  %v205_v12 = vld [vmem:[%s4213_s30 + $0xc0] sm:$0xff]  ;;  %v209_v14 = vld [vmem:[%s4213_s30 + $0xd0] sm:$0xff] }
  0x1c   : > { %206 = vst [vmem:[%s4218_s5 + $0x60] sm:$0xff] %v205_v12  ;;  %208 = vst [vmem:[%s4218_s5 + $0x68] sm:$0xff] %v207_v13  ;;  %v211_v15 = vld [vmem:[%s4213_s30 + $0xf0] sm:$0xff]  ;;  %v213_v16 = vld [vmem:[%s4213_s30 + $0xf8] sm:$0xff] }
  0x1d   : > { %210 = vst [vmem:[%s4218_s5 + $0x70] sm:$0xff] %v209_v14  ;;  %v215_v17 = vld [vmem:[%s4213_s30 + $0x100] sm:$0xff]  ;;  %212 = vst [vmem:[%s4218_s5 + $0x78] sm:$0xff] %v211_v15  ;;  %v219_v19 = vld [vmem:[%s4213_s30 + $0x128] sm:$0xff] }
  0x1e   : > { %214 = vst [vmem:[%s4218_s5 + $0x80] sm:$0xff] %v213_v16  ;;  %216 = vst [vmem:[%s4218_s5 + $0x88] sm:$0xff] %v215_v17  ;;  %v217_v18 = vld [vmem:[%s4213_s30 + $0x120] sm:$0xff]  ;;  %v221_v20 = vld [vmem:[%s4213_s30 + $0x130] sm:$0xff] }
  0x1f   : > { %218 = vst [vmem:[%s4218_s5 + $0x90] sm:$0xff] %v217_v18  ;;  %220 = vst [vmem:[%s4218_s5 + $0x98] sm:$0xff] %v219_v19  ;;  %v223_v21 = vld [vmem:[%s4213_s30 + $0x150] sm:$0xff]  ;;  %v225_v22 = vld [vmem:[%s4213_s30 + $0x158] sm:$0xff] }
  0x20   : > { %222 = vst [vmem:[%s4218_s5 + $0xa0] sm:$0xff] %v221_v20  ;;  %v227_v23 = vld [vmem:[%s4213_s30 + $0x160] sm:$0xff]  ;;  %224 = vst [vmem:[%s4218_s5 + $0xa8] sm:$0xff] %v223_v21  ;;  %v231_v25 = vld [vmem:[%s4213_s30 + $0x188] sm:$0xff] }
  0x21   : > { %226 = vst [vmem:[%s4218_s5 + $0xb0] sm:$0xff] %v225_v22  ;;  %228 = vst [vmem:[%s4218_s5 + $0xb8] sm:$0xff] %v227_v23  ;;  %v229_v24 = vld [vmem:[%s4213_s30 + $0x180] sm:$0xff]  ;;  %v233_v26 = vld [vmem:[%s4213_s30 + $0x190] sm:$0xff] }
  0x22   : > { %230 = vst [vmem:[%s4218_s5 + $0xc0] sm:$0xff] %v229_v24  ;;  %232 = vst [vmem:[%s4218_s5 + $0xc8] sm:$0xff] %v231_v25  ;;  %v235_v27 = vld [vmem:[%s4213_s30 + $0x1b0] sm:$0xff]  ;;  %v237_v28 = vld [vmem:[%s4213_s30 + $0x1b8] sm:$0xff] }
  0x23   : > { %234 = vst [vmem:[%s4218_s5 + $0xd0] sm:$0xff] %v233_v26  ;;  %v239_v29 = vld [vmem:[%s4213_s30 + $0x1c0] sm:$0xff]  ;;  %236 = vst [vmem:[%s4218_s5 + $0xd8] sm:$0xff] %v235_v27  ;;  %v243_v31 = vld [vmem:[%s4213_s30 + $0x1e8] sm:$0xff] }
  0x24   : > { %238 = vst [vmem:[%s4218_s5 + $0xe0] sm:$0xff] %v237_v28  ;;  %240 = vst [vmem:[%s4218_s5 + $0xe8] sm:$0xff] %v239_v29  ;;  %v241_v30 = vld [vmem:[%s4213_s30 + $0x1e0] sm:$0xff]  ;;  %v245_v32 = vld [vmem:[%s4213_s30 + $0x1f0] sm:$0xff] }
  0x25   : > { %242 = vst [vmem:[%s4218_s5 + $0xf0] sm:$0xff] %v241_v30  ;;  %244 = vst [vmem:[%s4218_s5 + $0xf8] sm:$0xff] %v243_v31  ;;  %v247_v33 = vld [vmem:[%s4213_s30 + $0x210] sm:$0xff]  ;;  %v249_v34 = vld [vmem:[%s4213_s30 + $0x218] sm:$0xff] }
  0x26   : > { %246 = vst [vmem:[%s4218_s5 + $0x100] sm:$0xff] %v245_v32  ;;  %v251_v35 = vld [vmem:[%s4213_s30 + $0x220] sm:$0xff]  ;;  %248 = vst [vmem:[%s4218_s5 + $0x108] sm:$0xff] %v247_v33  ;;  %v255_v37 = vld [vmem:[%s4213_s30 + $0x248] sm:$0xff] }
  0x27   : > { %250 = vst [vmem:[%s4218_s5 + $0x110] sm:$0xff] %v249_v34  ;;  %252 = vst [vmem:[%s4218_s5 + $0x118] sm:$0xff] %v251_v35  ;;  %v253_v36 = vld [vmem:[%s4213_s30 + $0x240] sm:$0xff]  ;;  %v257_v38 = vld [vmem:[%s4213_s30 + $0x250] sm:$0xff] }
  0x28   : > { %254 = vst [vmem:[%s4218_s5 + $0x120] sm:$0xff] %v253_v36  ;;  %256 = vst [vmem:[%s4218_s5 + $0x128] sm:$0xff] %v255_v37  ;;  %v259_v39 = vld [vmem:[%s4213_s30 + $0x270] sm:$0xff]  ;;  %v261_v40 = vld [vmem:[%s4213_s30 + $0x278] sm:$0xff] }
  0x29   : > { %258 = vst [vmem:[%s4218_s5 + $0x130] sm:$0xff] %v257_v38  ;;  %v263_v41 = vld [vmem:[%s4213_s30 + $0x280] sm:$0xff]  ;;  %260 = vst [vmem:[%s4218_s5 + $0x138] sm:$0xff] %v259_v39  ;;  %v267_v43 = vld [vmem:[%s4213_s30 + $0x2a8] sm:$0xff] }
  0x2a   : > { %262 = vst [vmem:[%s4218_s5 + $0x140] sm:$0xff] %v261_v40  ;;  %264 = vst [vmem:[%s4218_s5 + $0x148] sm:$0xff] %v263_v41  ;;  %v265_v42 = vld [vmem:[%s4213_s30 + $0x2a0] sm:$0xff]  ;;  %v269_v44 = vld [vmem:[%s4213_s30 + $0x2b0] sm:$0xff] }
  0x2b   : > { %266 = vst [vmem:[%s4218_s5 + $0x150] sm:$0xff] %v265_v42  ;;  %268 = vst [vmem:[%s4218_s5 + $0x158] sm:$0xff] %v267_v43  ;;  %v271_v45 = vld [vmem:[%s4213_s30 + $0x2d0] sm:$0xff]  ;;  %v273_v46 = vld [vmem:[%s4213_s30 + $0x2d8] sm:$0xff] }
  0x2c   : > { %270 = vst [vmem:[%s4218_s5 + $0x160] sm:$0xff] %v269_v44  ;;  %v275_v47 = vld [vmem:[%s4213_s30 + $0x2e0] sm:$0xff]  ;;  %272 = vst [vmem:[%s4218_s5 + $0x168] sm:$0xff] %v271_v45  ;;  %v279_v49 = vld [vmem:[%s4213_s30 + $0x308] sm:$0xff] }
  0x2d   : > { %274 = vst [vmem:[%s4218_s5 + $0x170] sm:$0xff] %v273_v46  ;;  %276 = vst [vmem:[%s4218_s5 + $0x178] sm:$0xff] %v275_v47  ;;  %v277_v48 = vld [vmem:[%s4213_s30 + $0x300] sm:$0xff]  ;;  %v281_v50 = vld [vmem:[%s4213_s30 + $0x310] sm:$0xff] }
  0x2e   : > { %278 = vst [vmem:[%s4218_s5 + $0x180] sm:$0xff] %v277_v48  ;;  %280 = vst [vmem:[%s4218_s5 + $0x188] sm:$0xff] %v279_v49  ;;  %v283_v51 = vld [vmem:[%s4213_s30 + $0x330] sm:$0xff]  ;;  %v285_v52 = vld [vmem:[%s4213_s30 + $0x338] sm:$0xff] }
  0x2f   : > { %282 = vst [vmem:[%s4218_s5 + $0x190] sm:$0xff] %v281_v50  ;;  %v287_v53 = vld [vmem:[%s4213_s30 + $0x340] sm:$0xff]  ;;  %284 = vst [vmem:[%s4218_s5 + $0x198] sm:$0xff] %v283_v51  ;;  %v291_v55 = vld [vmem:[%s4213_s30 + $0x368] sm:$0xff] }
  0x30   : > { %286 = vst [vmem:[%s4218_s5 + $0x1a0] sm:$0xff] %v285_v52  ;;  %288 = vst [vmem:[%s4218_s5 + $0x1a8] sm:$0xff] %v287_v53  ;;  %v289_v54 = vld [vmem:[%s4213_s30 + $0x360] sm:$0xff]  ;;  %v293_v56 = vld [vmem:[%s4213_s30 + $0x370] sm:$0xff] }
  0x31   : > { %290 = vst [vmem:[%s4218_s5 + $0x1b0] sm:$0xff] %v289_v54  ;;  %292 = vst [vmem:[%s4218_s5 + $0x1b8] sm:$0xff] %v291_v55  ;;  %v295_v57 = vld [vmem:[%s4213_s30 + $0x390] sm:$0xff]  ;;  %v297_v58 = vld [vmem:[%s4213_s30 + $0x398] sm:$0xff] }
  0x32   : > { %294 = vst [vmem:[%s4218_s5 + $0x1c0] sm:$0xff] %v293_v56  ;;  %v299_v59 = vld [vmem:[%s4213_s30 + $0x3a0] sm:$0xff]  ;;  %296 = vst [vmem:[%s4218_s5 + $0x1c8] sm:$0xff] %v295_v57  ;;  %v303_v61 = vld [vmem:[%s4213_s30 + $0x3c8] sm:$0xff] }
  0x33   : > { %298 = vst [vmem:[%s4218_s5 + $0x1d0] sm:$0xff] %v297_v58  ;;  %300 = vst [vmem:[%s4218_s5 + $0x1d8] sm:$0xff] %v299_v59  ;;  %v301_v60 = vld [vmem:[%s4213_s30 + $0x3c0] sm:$0xff]  ;;  %v305_v62 = vld [vmem:[%s4213_s30 + $0x3d0] sm:$0xff] }
  0x34   : > { %302 = vst [vmem:[%s4218_s5 + $0x1e0] sm:$0xff] %v301_v60  ;;  %304 = vst [vmem:[%s4218_s5 + $0x1e8] sm:$0xff] %v303_v61  ;;  %v307_v63 = vld [vmem:[%s4213_s30 + $0x3f0] sm:$0xff]  ;;  %v309_v0 = vld [vmem:[%s4213_s30 + $0x3f8] sm:$0xff] }
  0x35   : > { %306 = vst [vmem:[%s4218_s5 + $0x1f0] sm:$0xff] %v305_v62  ;;  %v311_v1 = vld [vmem:[%s4213_s30 + $0x400] sm:$0xff]  ;;  %308 = vst [vmem:[%s4218_s5 + $0x1f8] sm:$0xff] %v307_v63  ;;  %v315_v3 = vld [vmem:[%s4213_s30 + $0x428] sm:$0xff] }
  0x36   : > { %310 = vst [vmem:[%s4218_s5 + $0x200] sm:$0xff] %v309_v0  ;;  %312 = vst [vmem:[%s4218_s5 + $0x208] sm:$0xff] %v311_v1  ;;  %v313_v2 = vld [vmem:[%s4213_s30 + $0x420] sm:$0xff]  ;;  %v317_v4 = vld [vmem:[%s4213_s30 + $0x430] sm:$0xff] }
  0x37   : > { %314 = vst [vmem:[%s4218_s5 + $0x210] sm:$0xff] %v313_v2  ;;  %316 = vst [vmem:[%s4218_s5 + $0x218] sm:$0xff] %v315_v3  ;;  %v319_v5 = vld [vmem:[%s4213_s30 + $0x450] sm:$0xff]  ;;  %v321_v6 = vld [vmem:[%s4213_s30 + $0x458] sm:$0xff] }
  0x38   : > { %318 = vst [vmem:[%s4218_s5 + $0x220] sm:$0xff] %v317_v4  ;;  %v323_v7 = vld [vmem:[%s4213_s30 + $0x460] sm:$0xff]  ;;  %320 = vst [vmem:[%s4218_s5 + $0x228] sm:$0xff] %v319_v5  ;;  %v327_v9 = vld [vmem:[%s4213_s30 + $0x488] sm:$0xff] }
  0x39   : > { %322 = vst [vmem:[%s4218_s5 + $0x230] sm:$0xff] %v321_v6  ;;  %324 = vst [vmem:[%s4218_s5 + $0x238] sm:$0xff] %v323_v7  ;;  %v325_v8 = vld [vmem:[%s4213_s30 + $0x480] sm:$0xff]  ;;  %v329_v10 = vld [vmem:[%s4213_s30 + $0x490] sm:$0xff] }
  0x3a   : > { %326 = vst [vmem:[%s4218_s5 + $0x240] sm:$0xff] %v325_v8  ;;  %328 = vst [vmem:[%s4218_s5 + $0x248] sm:$0xff] %v327_v9  ;;  %v331_v11 = vld [vmem:[%s4213_s30 + $0x4b0] sm:$0xff]  ;;  %v333_v12 = vld [vmem:[%s4213_s30 + $0x4b8] sm:$0xff] }
  0x3b   : > { %330 = vst [vmem:[%s4218_s5 + $0x250] sm:$0xff] %v329_v10  ;;  %v335_v13 = vld [vmem:[%s4213_s30 + $0x4c0] sm:$0xff]  ;;  %332 = vst [vmem:[%s4218_s5 + $0x258] sm:$0xff] %v331_v11  ;;  %v339_v15 = vld [vmem:[%s4213_s30 + $0x4e8] sm:$0xff] }
  0x3c   : > { %334 = vst [vmem:[%s4218_s5 + $0x260] sm:$0xff] %v333_v12  ;;  %336 = vst [vmem:[%s4218_s5 + $0x268] sm:$0xff] %v335_v13  ;;  %v337_v14 = vld [vmem:[%s4213_s30 + $0x4e0] sm:$0xff]  ;;  %v341_v16 = vld [vmem:[%s4213_s30 + $0x4f0] sm:$0xff] }
  0x3d   : > { %338 = vst [vmem:[%s4218_s5 + $0x270] sm:$0xff] %v337_v14  ;;  %340 = vst [vmem:[%s4218_s5 + $0x278] sm:$0xff] %v339_v15  ;;  %v343_v17 = vld [vmem:[%s4213_s30 + $0x510] sm:$0xff]  ;;  %v345_v18 = vld [vmem:[%s4213_s30 + $0x518] sm:$0xff] }
  0x3e   : > { %342 = vst [vmem:[%s4218_s5 + $0x280] sm:$0xff] %v341_v16  ;;  %v347_v19 = vld [vmem:[%s4213_s30 + $0x520] sm:$0xff]  ;;  %344 = vst [vmem:[%s4218_s5 + $0x288] sm:$0xff] %v343_v17 }
  0x3f   : > { %346 = vst [vmem:[%s4218_s5 + $0x290] sm:$0xff] %v345_v18  ;;  %348 = vst [vmem:[%s4218_s5 + $0x298] sm:$0xff] %v347_v19 }
  0x40 PF: > { %354 = sbr.rel (!%p4197_p4) target bundleno = 72 (0x48), region = 43  ;;  %s356_s6 = sand.u32 (%p4197_p4), 1, %s4134_s16  }
  0x41   : > { %s4060_s7 = smul.u32 (%p4197_p4), 12, %s4138_s17 }
  0x42   : > { %s4063_s8 = smul.u32 (%p4197_p4), 36, %s356_s6 }
  0x43   : > { %s361_s11 = scalar_lea.vmem (%p4197_p4), %s8255_s1, %s4060_s7 }
  0x44   : > { %v376_v20 = vld [vmem:[%s361_s11] sm:$0xff] (%p4197_p4)  ;;  %v378_v21 = vld [vmem:[%s361_s11 + $0x18] sm:$0xff] (%p4197_p4)  ;;  %v380_v22 = vld [vmem:[%s361_s11 + $0x30] sm:$0xff] (%p4197_p4)  ;;  %s358_s12 = scalar_lea.vmem (%p4197_p4), [#allocation4], %s4063_s8 }
  0x45   : > { %377 = vst [vmem:[%s358_s12] sm:$0xff] (%p4197_p4), %v376_v20  ;;  %379 = vst [vmem:[%s358_s12 + $0xc] sm:$0xff] (%p4197_p4), %v378_v21  ;;  %v4049_v23 = vld [vmem:[%s361_s11 + $0x8] sm:$0xf] (%p4197_p4)  ;;  %v4051_v24 = vld [vmem:[%s361_s11 + $0x20] sm:$0xf] (%p4197_p4) }
  0x46   : > { %381 = vst [vmem:[%s358_s12 + $0x18] sm:$0xff] (%p4197_p4), %v380_v22  ;;  %v4053_v25 = vld [vmem:[%s361_s11 + $0x38] sm:$0xf] (%p4197_p4)  ;;  %4050 = vst [vmem:[%s358_s12 + $0x8] sm:$0xf] (%p4197_p4), %v4049_v23 }
  0x47   : > { %4052 = vst [vmem:[%s358_s12 + $0x14] sm:$0xf] %v4051_v24  ;;  %4054 = vst [vmem:[%s358_s12 + $0x20] sm:$0xf] %v4053_v25 }
  0x48 PF: > { %p4055_p7 = scmp.ge.s32.totalorder %s4138_s17, 1  ;;  %p415_p8 = scmp.lt.s32.totalorder %s4138_s17, 3 }
  0x4a   : > { %p416_p9 = pnand %p4055_p7, %p415_p8 }
  0x4c   : > { %419 = sbr.rel (%p416_p9) target bundleno = 808 (0x328), region = 77 }
  0x53   : > { %s422_s13 = sand.u32 1, %s4130_s15   ;;  %v4140_v26 = vmov 0.0   ;;  %v598_v27 = vlaneseq  ;;  %vm1363_vm0 = vcmask 1045504   ;;  %s467_s21 = smul.u32 3, %s4182_s18 }
  0x54   : > { %478 = vst [vmem:[#allocation2] sm:$0xff] %v4140_v26  ;;  %479 = vst [vmem:[#allocation2 + $0x8] sm:$0xff] %v4140_v26  ;;  %s4397_s14 = smul.u32 672, %s422_s13 }
  0x55   : > { %480 = vst [vmem:[#allocation2 + $0x10] sm:$0xff] %v4140_v26  ;;  %481 = vst [vmem:[#allocation2 + $0x18] sm:$0xff] %v4140_v26  ;;  %s4065_s17 = smul.u32 36, %s422_s13  ;;  %v599_v28 = vshrl.u32 %v598_v27, 7  ;;  %p7382_p10 = scmp.lt.s32.totalorder %s467_s21, 5 }
  0x56   : > { %482 = vst [vmem:[#allocation2 + $0x20] sm:$0xff] %v4140_v26  ;;  %483 = vst [vmem:[#allocation2 + $0x28] sm:$0xff] %v4140_v26  ;;  %s4402_s20 = scalar_lea.vmem [#allocation3], %s4397_s14  ;;  %s7537_s5 = scalar_lea.vmem [#allocation5], %s4397_s14 }
  0x57   : > { %484 = vst [vmem:[#allocation2 + $0x30] sm:$0xff] %v4140_v26  ;;  %485 = vst [vmem:[#allocation2 + $0x38] sm:$0xff] %v4140_v26  ;;  %v4405_v29 = vld [vmem:[%s4402_s20] sm:$0xff]  ;;  %v511_v30 = vld [vmem:[%s4402_s20 + $0x18] sm:$0x3f]  ;;  %v4419_v35 = vsub.s32 0, %v599_v28 }
  0x58   : > { %486 = vst [vmem:[#allocation2 + $0x40] sm:$0xff] %v4140_v26  ;;  %487 = vst [vmem:[#allocation2 + $0x48] sm:$0xff] %v4140_v26  ;;  %v4409_v31 = vld [vmem:[%s4402_s20 + $0x30] sm:$0xff]  ;;  %v513_v32 = vld [vmem:[%s4402_s20 + $0x48] sm:$0x3f]  ;;  %v4421_v36 = vsub.s32 1, %v599_v28 }
  0x59   : > { %488 = vst [vmem:[#allocation2 + $0x50] sm:$0xff] %v4140_v26  ;;  %489 = vst [vmem:[#allocation2 + $0x58] sm:$0xff] %v4140_v26  ;;  %v4415_v33 = vld [vmem:[%s4402_s20 + $0x60] sm:$0xff]  ;;  %v515_v34 = vld [vmem:[%s4402_s20 + $0x78] sm:$0x3f]  ;;  %s4423_s15 = scalar_lea.vmem [#allocation4], %s4065_s17 }
  0x5a   : > { %490 = vst [vmem:[#allocation2 + $0x60] sm:$0xff] %v4140_v26  ;;  %491 = vst [vmem:[#allocation2 + $0x68] sm:$0xff] %v4140_v26  ;;  %v567_v37 = vld [vmem:[%s4423_s15] sm:$0x7]  ;;  %v4426_v38 = vsub.s32 2, %v599_v28  ;;  %v4446_v57 = vld [vmem:[%s4402_s20 + $0x90] sm:$0xff] }
  0x5b   : > { %492 = vst [vmem:[#allocation2 + $0x70] sm:$0xff] %v4140_v26  ;;  %493 = vst [vmem:[#allocation2 + $0x78] sm:$0xff] %v4140_v26  ;;  %v4429_v39 = vrot.slane %v567_v37, %v4419_v35  ;;  %v4432_v40 = vrot.slane %v567_v37, %v4421_v36  ;;  %v517_v58 = vld [vmem:[%s4402_s20 + $0xa8] sm:$0x3f]  ;;  %v4450_v59 = vld [vmem:[%s4402_s20 + $0xc0] sm:$0xff]  ;;  %s9467_s21 = smov (!%p7382_p10, %s467_s21), 5 }
  0x5c   : > { %494 = vst [vmem:[#allocation2 + $0x80] sm:$0xff] %v4140_v26  ;;  %495 = vst [vmem:[#allocation2 + $0x88] sm:$0xff] %v4140_v26  ;;  %v4435_v43 = vrot.slane %v567_v37, %v4426_v38  ;;  %v519_v60 = vld [vmem:[%s4402_s20 + $0xd8] sm:$0x3f]  ;;  %v4456_v61 = vld [vmem:[%s4402_s20 + $0xf0] sm:$0xff]  ;;  %s7422_s27 = scalar_lea.vmem %s8256_s2, %s9467_s21  ;;  %s7456_s30 = scalar_lea.vmem %s8257_s3, %s9467_s21 }
  0x5d   : > { %496 = vst [vmem:[#allocation2 + $0x90] sm:$0xff] %v4140_v26  ;;  %497 = vst [vmem:[#allocation2 + $0x98] sm:$0xff] %v4140_v26  ;;  %v521_v63 = vld [vmem:[%s4402_s20 + $0x108] sm:$0x3f]  ;;  %v4463_v0 = vld [vmem:[%s4402_s20 + $0x120] sm:$0xff]  ;;  %v700_v37 = vmul.f32 %v4432_v40, %v4450_v59  ;;  %s4061_s6 = smul.u32 (%p4201_p5), 24, %s4182_s18 }
  0x5e   : > { %498 = vst [vmem:[#allocation2 + $0xa0] sm:$0xff] %v4140_v26  ;;  %499 = vst [vmem:[#allocation2 + $0xa8] sm:$0xff] %v4140_v26  ;;  %v523_v1 = vld [vmem:[%s4402_s20 + $0x138] sm:$0x3f]  ;;  %v4484_v10 = vld [vmem:[%s4402_s20 + $0x150] sm:$0xff] }
  0x5f   : > { %500 = vst [vmem:[#allocation2 + $0xb0] sm:$0xff] %v4140_v26  ;;  %501 = vst [vmem:[#allocation2 + $0xb8] sm:$0xff] %v4140_v26  ;;  %v525_v11 = vld [vmem:[%s4402_s20 + $0x168] sm:$0x3f]  ;;  %v1595_v21 = vld [vmem:[%s4402_s20 + $0x20] sm:$0x3f]  ;;  %s8080_s8 = scalar_lea.vmem (%p4201_p5), %s8258_s4, %s4061_s6 }
  0x60   : > { %502 = vst [vmem:[#allocation2 + $0xc0] sm:$0xff] %v4140_v26  ;;  %503 = vst [vmem:[#allocation2 + $0xc8] sm:$0xff] %v4140_v26  ;;  %v4497_v16 = vld [vmem:[%s4402_s20 + $0x8] sm:$0xff]  ;;  %v4510_v22 = vld [vmem:[%s4402_s20 + $0x38] sm:$0xff] }
  0x61   : > { %504 = vst [vmem:[#allocation2 + $0xd0] sm:$0xff] %v4140_v26  ;;  %505 = vst [vmem:[#allocation2 + $0xd8] sm:$0xff] %v4140_v26  ;;  %v1597_v23 = vld [vmem:[%s4402_s20 + $0x50] sm:$0x3f] }
  0x62   : > { %506 = vst [vmem:[#allocation2 + $0xe0] sm:$0xff] %v4140_v26  ;;  %507 = vst [vmem:[#allocation2 + $0xe8] sm:$0xff] %v4140_v26  ;;  %v568_v24 = vld [vmem:[%s4423_s15 + $0xc] sm:$0x7] }
  0x63   : > { %508 = vst [vmem:[#allocation2 + $0xf0] sm:$0xff] %v4140_v26  ;;  %509 = vst [vmem:[#allocation2 + $0xf8] sm:$0xff] %v4140_v26 }
  0x64   : > { %8497 = vst [vmem:[#allocation6_spill] sm:$0xff] %v4405_v29  ;;  %8498 = vst [vmem:[#allocation7_spill] sm:$0xff] %v4409_v31 }
  0x65   : > { %539 = vst [vmem:[#allocation2 + $0x11] sm:$0xff] %v4405_v29  ;;  %540 = vst [vmem:[#allocation2 + $0x19] sm:$0x3f] %v511_v30 }
  0x66   : > { %541 = vst [vmem:[#allocation2 + $0x21] sm:$0xff] %v4409_v31  ;;  %8499 = vst [vmem:[#allocation8_spill] sm:$0xff] %v4415_v33 }
  0x67   : > { %542 = vst [vmem:[#allocation2 + $0x29] sm:$0x3f] %v513_v32  ;;  %543 = vst [vmem:[#allocation2 + $0x31] sm:$0xff] %v4415_v33  ;;  %v569_v32 = vld [vmem:[%s4423_s15 + $0x18] sm:$0x7] }
  0x68   : > { %544 = vst [vmem:[#allocation2 + $0x39] sm:$0x3f] %v515_v34  ;;  %8500 = vst [vmem:[#allocation9_spill] sm:$0xff] %v4419_v35 }
  0x69   : > { %8501 = vst [vmem:[#allocation10_spill] sm:$0xff] %v4421_v36  ;;  %8502 = vst [vmem:[#allocation11_spill] sm:$0xff] %v4426_v38 }
  0x6a   : > { %8503 = vst [vmem:[#allocation12_spill] sm:$0xff] %v4429_v39  ;;  %8504 = vst [vmem:[#allocation13_spill] sm:$0xff] %v4432_v40 }
  0x6b   : > { %8505 = vst [vmem:[#allocation14_spill] sm:$0xff] %v4435_v43  ;;  %8507 = vst [vmem:[#allocation16_spill] sm:$0xff] %v4446_v57 }
  0x6c   : > { %8508 = vst [vmem:[#allocation17_spill] sm:$0xff] %v4450_v59  ;;  %545 = vst [vmem:[#allocation2 + $0x41] sm:$0xff] %v4446_v57  ;;  %v4487_v12 = vld [vmem:[#allocation2 + $0x10] sm:$0xff]  ;;  %v4490_v13 = vld [vmem:[#allocation2 + $0x18] sm:$0x3f] }
  0x6d   : > { %546 = vst [vmem:[#allocation2 + $0x49] sm:$0x3f] %v517_v58  ;;  %547 = vst [vmem:[#allocation2 + $0x51] sm:$0xff] %v4450_v59  ;;  %v4466_v2 = vld [vmem:[#allocation2 + $0x20] sm:$0xff]  ;;  %v4492_v14 = vld [vmem:[#allocation2 + $0x12] sm:$0xff]  ;;  %v4545_v58 = vrot.slane %v569_v32, %v4419_v35 }
  0x6e   : > { %v575_v41 = vld [vmem:[#allocation2 + $0x28] sm:$0x3f]  ;;  %8509 = vst [vmem:[#allocation18_spill] sm:$0xff] %v4456_v61  ;;  %548 = vst [vmem:[#allocation2 + $0x59] sm:$0x3f] %v519_v60 }
  0x6f   : > { %v663_v42 = vld [vmem:[#allocation2 + $0x29] sm:$0x3f]  ;;  %v607_v44 = vmul.f32 %v4429_v39, %v575_v41  ;;  %v577_v49 = vld [vmem:[#allocation2 + $0x38] sm:$0x3f]  ;;  %549 = vst [vmem:[#allocation2 + $0x61] sm:$0xff] %v4456_v61  ;;  %8511 = vst [vmem:[#allocation20_spill] sm:$0xff] %v4466_v2  ;;  %v4522_v41 = vrot.slane %v568_v24, %v4419_v35 }
  0x70   : > { %v695_v45 = vmul.f32 %v4432_v40, %v663_v42  ;;  %v751_v46 = vld [vmem:[#allocation2 + $0x2a] sm:$0x3f]  ;;  %v609_v50 = vmul.f32 %v4429_v39, %v577_v49  ;;  %v665_v51 = vld [vmem:[#allocation2 + $0x39] sm:$0x3f]  ;;  %v4468_v3 = vld [vmem:[#allocation2 + $0x22] sm:$0xff]  ;;  %551 = vst [vmem:[#allocation2 + $0x71] sm:$0xff] %v4463_v0  ;;  %v4525_v42 = vrot.slane %v568_v24, %v4421_v36  ;;  %v4535_v49 = vrot.slane %v569_v32, %v4421_v36 }
  0x71   : > { %v783_v47 = vmul.f32 %v4435_v43, %v751_v46  ;;  %v753_v52 = vld [vmem:[#allocation2 + $0x3a] sm:$0x3f]  ;;  %v697_v54 = vmul.f32 %v4432_v40, %v665_v51  ;;  %8512 = vst [vmem:[#allocation21_spill] sm:$0xff] %v4468_v3  ;;  %v4470_v4 = vld [vmem:[#allocation2 + $0x28] sm:$0x3f]  ;;  %8518 = vst [vmem:[#allocation27_spill] sm:$0xff] %v4487_v12  ;;  %v4530_v46 = vrot.slane %v568_v24, %v4426_v38 }
  0x72   : > { %v723_v48 = vadd.f32 %v695_v45, %v607_v44  ;;  %v785_v55 = vmul.f32 %v4435_v43, %v753_v52  ;;  %v4472_v5 = vld [vmem:[#allocation2 + $0x29] sm:$0x3f]  ;;  %550 = vst [vmem:[#allocation2 + $0x69] sm:$0x3f] %v521_v63  ;;  %552 = vst [vmem:[#allocation2 + $0x79] sm:$0x3f] %v523_v1  ;;  %v4551_v24 = vrot.slane %v569_v32, %v4426_v38 }
  0x73   : > { %v725_v56 = vadd.f32 %v697_v54, %v609_v50  ;;  %8513 = vst [vmem:[#allocation22_spill] sm:$0xff] %v4472_v5  ;;  %v4474_v6 = vld [vmem:[#allocation2 + $0x2a] sm:$0x3f]  ;;  %553 = vst [vmem:[#allocation2 + $0x81] sm:$0xff] %v4484_v10  ;;  %v4494_v15 = vld [vmem:[#allocation2 + $0x18] sm:$0x3f]  ;;  %v702_v50 = vmul.f32 %v4432_v40, %v4456_v61  ;;  %v4566_v32 = vmul.f32 %v4535_v49, %v4463_v0 }
  0x74   : > { %v4441_v53 = vadd.f32 %v783_v47, %v723_v48  ;;  %8514 = vst [vmem:[#allocation23_spill] sm:$0xff] %v4474_v6  ;;  %v4476_v7 = vld [vmem:[#allocation2 + $0x28] sm:$0x3f]  ;;  %554 = vst [vmem:[#allocation2 + $0x89] sm:$0x3f] %v525_v11  ;;  %v4527_v45 = vld [vmem:[#allocation2 + $0x50] sm:$0xff] }
  0x75   : > { %v4458_v62 = vadd.f32 %v785_v55, %v725_v56  ;;  %8515 = vst [vmem:[#allocation24_spill] sm:$0xff] %v4476_v7  ;;  %v4478_v8 = vld [vmem:[#allocation2 + $0x29] sm:$0x3f]  ;;  %8519 = vst [vmem:[#allocation28_spill] sm:$0xff] %v4492_v14  ;;  %v4499_v17 = vld [vmem:[#allocation2 + $0x19] sm:$0x3f]  ;;  %v612_v47 = vmul.f32 %v4429_v39, %v4527_v45  ;;  %v964_v56 = vmul.f32 %v4525_v42, %v4456_v61 }
  0x76   : > { %8506 = vst [vmem:[#allocation15_spill] sm:$0xff] %v4441_v53  ;;  %8516 = vst [vmem:[#allocation25_spill] sm:$0xff] %v4478_v8  ;;  %v4480_v9 = vld [vmem:[#allocation2 + $0x2a] sm:$0x3f]  ;;  %v4501_v18 = vld [vmem:[#allocation2 + $0x1a] sm:$0x3f]  ;;  %v4583_v8 = vmul.f32 %v4535_v49, %v4484_v10 }
  0x77   : > { %8510 = vst [vmem:[#allocation19_spill] sm:$0xff] %v4458_v62  ;;  %8517 = vst [vmem:[#allocation26_spill] sm:$0xff] %v4480_v9  ;;  %v4504_v19 = vld [vmem:[#allocation2 + $0x19] sm:$0x3f]  ;;  %v579_v25 = vld [vmem:[#allocation2 + $0x48] sm:$0x3f]  ;;  %v728_v60 = vadd.f32 %v700_v37, %v612_v47  ;;  %v4570_v47 = vmul.f32 %v4432_v40, %v4484_v10 }
  0x78   : > { %8520 = vst [vmem:[#allocation29_spill] sm:$0xff] %v4494_v15  ;;  %8521 = vst [vmem:[#allocation30_spill] sm:$0xff] %v4497_v16  ;;  %v4506_v20 = vld [vmem:[#allocation2 + $0x1a] sm:$0x3f]  ;;  %v667_v26 = vld [vmem:[#allocation2 + $0x49] sm:$0x3f]  ;;  %v611_v27 = vmul.f32 %v4429_v39, %v579_v25 }
  0x79   : > { %1622 = vst [vmem:[#allocation2 + $0x11] sm:$0xff] %v4497_v16  ;;  %8522 = vst [vmem:[#allocation31_spill] sm:$0xff] %v4504_v19  ;;  %v699_v28 = vmul.f32 %v4432_v40, %v667_v26  ;;  %v755_v30 = vld [vmem:[#allocation2 + $0x4a] sm:$0x3f]  ;;  %v581_v48 = vld [vmem:[#allocation2 + $0x58] sm:$0x3f] }
  0x7a   : > { %8523 = vst [vmem:[#allocation32_spill] sm:$0xff] %v4506_v20  ;;  %1623 = vst [vmem:[#allocation2 + $0x19] sm:$0x3f] %v1595_v21  ;;  %v787_v34 = vmul.f32 %v4435_v43, %v755_v30  ;;  %v613_v52 = vmul.f32 %v4429_v39, %v581_v48  ;;  %v669_v54 = vld [vmem:[#allocation2 + $0x59] sm:$0x3f]  ;;  %v4558_v37 = vld [vmem:[#allocation2 + $0x60] sm:$0xff] }
  0x7b   : > { %8524 = vst [vmem:[#allocation33_spill] sm:$0xff] %v4510_v22  ;;  %1624 = vst [vmem:[#allocation2 + $0x21] sm:$0xff] %v4510_v22  ;;  %v727_v44 = vadd.f32 %v699_v28, %v611_v27  ;;  %v4540_v55 = vld [vmem:[#allocation2 + $0x52] sm:$0xff]  ;;  %v701_v63 = vmul.f32 %v4432_v40, %v669_v54  ;;  %v757_v1 = vld [vmem:[#allocation2 + $0x5a] sm:$0x3f]  ;;  %v704_v28 = vmul.f32 %v4432_v40, %v4463_v0 }
  0x7c   : > { %1625 = vst [vmem:[#allocation2 + $0x29] sm:$0x3f] %v1597_v23  ;;  %8525 = vst [vmem:[#allocation34_spill] sm:$0xff] %v4522_v41  ;;  %v788_v11 = vmul.f32 %v4435_v43, %v4540_v55  ;;  %v843_v21 = vld [vmem:[#allocation2 + $0x58] sm:$0x3f]  ;;  %v789_v25 = vmul.f32 %v4435_v43, %v757_v1  ;;  %v4587_v6 = vld [vmem:[#allocation2 + $0x62] sm:$0xff] }
  0x7d   : > { %8526 = vst [vmem:[#allocation35_spill] sm:$0xff] %v4525_v42  ;;  %8527 = vst [vmem:[#allocation36_spill] sm:$0xff] %v4527_v45  ;;  %v815_v51 = vadd.f32 %v787_v34, %v727_v44  ;;  %v931_v23 = vld [vmem:[#allocation2 + $0x59] sm:$0x3f]  ;;  %v875_v26 = vmul.f32 %v4522_v41, %v843_v21  ;;  %v729_v30 = vadd.f32 %v701_v63, %v613_v52  ;;  %v671_v9 = vld [vmem:[#allocation2 + $0x69] sm:$0x3f] }
  0x7e   : > { %8528 = vst [vmem:[#allocation37_spill] sm:$0xff] %v4530_v46  ;;  %8529 = vst [vmem:[#allocation38_spill] sm:$0xff] %v4535_v49  ;;  %v963_v27 = vmul.f32 %v4525_v42, %v931_v23  ;;  %v1019_v34 = vld [vmem:[#allocation2 + $0x5a] sm:$0x3f]  ;;  %v4562_v44 = vmul.f32 %v4525_v42, %v4463_v0  ;;  %v614_v52 = vmul.f32 %v4429_v39, %v4558_v37  ;;  %v583_v23 = vld [vmem:[#allocation2 + $0x68] sm:$0x3f] }
  0x7f   : > { %8530 = vst [vmem:[#allocation39_spill] sm:$0xff] %v4540_v55  ;;  %8531 = vst [vmem:[#allocation40_spill] sm:$0xff] %v4545_v58  ;;  %v903_v48 = vadd.f32 %v875_v26, %v815_v51  ;;  %v1051_v54 = vmul.f32 %v4530_v46, %v1019_v34  ;;  %v4577_v63 = vmul.f32 %v4525_v42, %v4484_v10  ;;  %v759_v20 = vld [vmem:[#allocation2 + $0x6a] sm:$0x3f]  ;;  %v4610_v55 = vld [vmem:[#allocation2 + $0x72] sm:$0xff] }
  0x80   : > { %8532 = vst [vmem:[#allocation41_spill] sm:$0xff] %v4551_v24  ;;  %8533 = vst [vmem:[#allocation42_spill] sm:$0xff] %v4558_v37  ;;  %v817_v1 = vadd.f32 %v789_v25, %v729_v30  ;;  %v816_v21 = vadd.f32 %v788_v11, %v728_v60  ;;  %v876_v0 = vmul.f32 %v4522_v41, %v4558_v37  ;;  %v845_v25 = vld [vmem:[#allocation2 + $0x68] sm:$0x3f]  ;;  %v1198_v19 = vld [vmem:[#allocation2 + $0x79] sm:$0x3f] }
  0x81   : > { %v991_v51 = vadd.f32 %v963_v27, %v903_v48  ;;  %v730_v26 = vadd.f32 %v702_v50, %v614_v52  ;;  %v615_v34 = vmul.f32 %v4429_v39, %v583_v23  ;;  %v703_v7 = vmul.f32 %v4432_v40, %v671_v9  ;;  %8534 = vst [vmem:[#allocation43_spill] sm:$0xff] %v4587_v6  ;;  %v933_v10 = vld [vmem:[#allocation2 + $0x69] sm:$0x3f]  ;;  %v1286_v16 = vld [vmem:[#allocation2 + $0x7a] sm:$0x3f]  ;;  %v586_v22 = vld [vmem:[#allocation2 + $0x80] sm:$0xff] }
  0x82   : > { %v904_v60 = vadd.f32 %v876_v0, %v816_v21  ;;  %v790_v11 = vmul.f32 %v4435_v43, %v4587_v6  ;;  %v791_v30 = vmul.f32 %v4435_v43, %v759_v20  ;;  %v877_v5 = vmul.f32 %v4522_v41, %v845_v25  ;;  %v1021_v48 = vld [vmem:[#allocation2 + $0x6a] sm:$0x3f]  ;;  %v584_v20 = vld [vmem:[#allocation2 + $0x70] sm:$0xff]  ;;  %8536 = vst [vmem:[#allocation45_spill] sm:$0xff] %v4610_v55  ;;  %v4657_v14 = vld [vmem:[#allocation2 + $0x58] sm:$0x3f] }
  0x83   : > { %v1079_v53 = vadd.f32 %v1051_v54, %v991_v51  ;;  %v731_v27 = vadd.f32 %v703_v7, %v615_v34  ;;  %v965_v50 = vmul.f32 %v4525_v42, %v933_v10  ;;  %v1052_v9 = vmul.f32 %v4530_v46, %v4587_v6  ;;  %v1108_v52 = vld [vmem:[#allocation2 + $0x68] sm:$0x3f]  ;;  %8554 = vst [vmem:[#allocation63_spill] sm:$0xff] %v4657_v14  ;;  %v4659_v61 = vld [vmem:[#allocation2 + $0x59] sm:$0x3f] }
  0x84   : > { %v992_v23 = vadd.f32 %v964_v56, %v904_v60  ;;  %v905_v15 = vadd.f32 %v877_v5, %v817_v1  ;;  %v1053_v21 = vmul.f32 %v4530_v46, %v1021_v48  ;;  %v1140_v0 = vmul.f32 %v4545_v58, %v1108_v52  ;;  %v1196_v3 = vld [vmem:[#allocation2 + $0x69] sm:$0x3f]  ;;  %v585_v56 = vld [vmem:[#allocation2 + $0x78] sm:$0x3f]  ;;  %8555 = vst [vmem:[#allocation64_spill] sm:$0xff] %v4659_v61 }
  0x85   : > { %v819_v37 = vadd.f32 %v791_v30, %v731_v27  ;;  %v1228_v25 = vmul.f32 %v4535_v49, %v1196_v3  ;;  %v616_v7 = vmul.f32 %v4429_v39, %v584_v20  ;;  %v4602_v54 = vmul.f32 %v4429_v39, %v4490_v13  ;;  %v673_v27 = vld [vmem:[#allocation2 + $0x79] sm:$0x3f]  ;;  %v587_v61 = vld [vmem:[#allocation2 + $0x88] sm:$0x3f] }
  0x86   : > { %v993_v51 = vadd.f32 %v965_v50, %v905_v15  ;;  %v1168_v34 = vadd.f32 %v1140_v0, %v1079_v53  ;;  %v818_v10 = vadd.f32 %v790_v11, %v730_v26  ;;  %v878_v5 = vmul.f32 %v4522_v41, %v584_v20  ;;  %v761_v53 = vld [vmem:[#allocation2 + $0x7a] sm:$0x3f]  ;;  %v4685_v12 = vld [vmem:[#allocation2 + $0x82] sm:$0xff] }
  0x87   : > { %v732_v1 = vadd.f32 %v704_v28, %v616_v7  ;;  %v1080_v60 = vadd.f32 %v1052_v9, %v992_v23  ;;  %v1141_v48 = vmul.f32 %v4545_v58, %v584_v20  ;;  %v617_v30 = vmul.f32 %v4429_v39, %v585_v56  ;;  %v847_v15 = vld [vmem:[#allocation2 + $0x78] sm:$0x3f]  ;;  %v4616_v23 = vld [vmem:[#allocation2 + $0x30] sm:$0xff]  ;;  %8559 = vst [vmem:[#allocation68_spill] sm:$0xff] %v4685_v12 }
  0x88   : > { %v1081_v3 = vadd.f32 %v1053_v21, %v993_v51  ;;  %v4607_v52 = vadd.f32 %v1228_v25, %v1168_v34  ;;  %v906_v6 = vadd.f32 %v878_v5, %v818_v10  ;;  %v705_v13 = vmul.f32 %v4432_v40, %v673_v27  ;;  %v935_v9 = vld [vmem:[#allocation2 + $0x79] sm:$0x3f]  ;;  %8537 = vst [vmem:[#allocation46_spill] sm:$0xff] %v4616_v23 }
  0x89   : > { %v1169_v26 = vadd.f32 %v1141_v48, %v1080_v60  ;;  %v792_v28 = vmul.f32 %v4435_v43, %v4610_v55  ;;  %v793_v11 = vmul.f32 %v4435_v43, %v761_v53  ;;  %v879_v50 = vmul.f32 %v4522_v41, %v847_v15  ;;  %v4618_v21 = vld [vmem:[#allocation2 + $0x32] sm:$0xff]  ;;  %v1023_v34 = vld [vmem:[#allocation2 + $0x7a] sm:$0x3f]  ;;  %v4636_v53 = vld [vmem:[#allocation2 + $0x40] sm:$0xff] }
  0x8a   : > { %8535 = vst [vmem:[#allocation44_spill] sm:$0xff] %v4607_v52  ;;  %8538 = vst [vmem:[#allocation47_spill] sm:$0xff] %v4618_v21  ;;  %v4620_v0 = vld [vmem:[#allocation2 + $0x38] sm:$0x3f]  ;;  %v994_v25 = vadd.f32 %v4562_v44, %v906_v6  ;;  %v733_v7 = vadd.f32 %v705_v13, %v617_v30  ;;  %v967_v51 = vmul.f32 %v4525_v42, %v935_v9  ;;  %v4638_v15 = vld [vmem:[#allocation2 + $0x42] sm:$0xff] }
  0x8b   : > { %8539 = vst [vmem:[#allocation48_spill] sm:$0xff] %v4620_v0  ;;  %v4622_v20 = vld [vmem:[#allocation2 + $0x38] sm:$0x3f]  ;;  %v1054_v10 = vmul.f32 %v4530_v46, %v4610_v55  ;;  %8545 = vst [vmem:[#allocation54_spill] sm:$0xff] %v4636_v53  ;;  %v4640_v6 = vld [vmem:[#allocation2 + $0x48] sm:$0x3f]  ;;  %v4653_v55 = vadd.f32 %v4566_v32, %v1169_v26  ;;  %v1318_v32 = vmul.f32 %v4551_v24, %v1286_v16 }
  0x8c   : > { %8540 = vst [vmem:[#allocation49_spill] sm:$0xff] %v4622_v20  ;;  %v1110_v5 = vld [vmem:[#allocation2 + $0x78] sm:$0x3f]  ;;  %8546 = vst [vmem:[#allocation55_spill] sm:$0xff] %v4638_v15  ;;  %v4642_v44 = vld [vmem:[#allocation2 + $0x49] sm:$0x3f]  ;;  %v880_v14 = vmul.f32 %v4522_v41, %v586_v22 }
  0x8d   : > { %v4628_v56 = vld [vmem:[#allocation2 + $0x39] sm:$0x3f]  ;;  %8547 = vst [vmem:[#allocation56_spill] sm:$0xff] %v4640_v6  ;;  %8548 = vst [vmem:[#allocation57_spill] sm:$0xff] %v4642_v44  ;;  %v4644_v30 = vld [vmem:[#allocation2 + $0x4a] sm:$0x3f]  ;;  %v1142_v20 = vmul.f32 %v4545_v58, %v1110_v5  ;;  %v1082_v16 = vadd.f32 %v1054_v10, %v994_v25 }
  0x8e   : > { %8541 = vst [vmem:[#allocation50_spill] sm:$0xff] %v4628_v56  ;;  %v4630_v60 = vld [vmem:[#allocation2 + $0x3a] sm:$0x3f]  ;;  %8549 = vst [vmem:[#allocation58_spill] sm:$0xff] %v4644_v30  ;;  %v4646_v13 = vld [vmem:[#allocation2 + $0x48] sm:$0x3f]  ;;  %v619_v30 = vmul.f32 %v4429_v39, %v587_v61 }
  0x8f   : > { %8542 = vst [vmem:[#allocation51_spill] sm:$0xff] %v4630_v60  ;;  %v4632_v48 = vld [vmem:[#allocation2 + $0x39] sm:$0x3f]  ;;  %8550 = vst [vmem:[#allocation59_spill] sm:$0xff] %v4646_v13  ;;  %v4648_v9 = vld [vmem:[#allocation2 + $0x49] sm:$0x3f]  ;;  %v1170_v5 = vadd.f32 %v1142_v20, %v1081_v3 }
  0x90   : > { %8543 = vst [vmem:[#allocation52_spill] sm:$0xff] %v4632_v48  ;;  %v4634_v27 = vld [vmem:[#allocation2 + $0x3a] sm:$0x3f]  ;;  %8551 = vst [vmem:[#allocation60_spill] sm:$0xff] %v4648_v9  ;;  %v4650_v52 = vld [vmem:[#allocation2 + $0x4a] sm:$0x3f]  ;;  %v1055_v48 = vmul.f32 %v4530_v46, %v1023_v34  ;;  %v4663_v9 = vadd.f32 %v793_v11, %v733_v7  ;;  %v1143_v7 = vmul.f32 %v4545_v58, %v586_v22 }
  0x91   : > { %8544 = vst [vmem:[#allocation53_spill] sm:$0xff] %v4634_v27  ;;  %8552 = vst [vmem:[#allocation61_spill] sm:$0xff] %v4650_v52  ;;  %v907_v27 = vadd.f32 %v879_v50, %v819_v37  ;;  %v4661_v13 = vld [vmem:[#allocation2 + $0x5a] sm:$0x3f]  ;;  %v1230_v52 = vmul.f32 %v4535_v49, %v1198_v19  ;;  %v618_v37 = vmul.f32 %v4429_v39, %v586_v22  ;;  %v4669_v26 = vld [vmem:[%s4423_s15 + $0x4] sm:$0x7] }
  0x92   : > { %8553 = vst [vmem:[#allocation62_spill] sm:$0xff] %v4653_v55  ;;  %8556 = vst [vmem:[#allocation65_spill] sm:$0xff] %v4661_v13  ;;  %v4671_v50 = vld [vmem:[#allocation2 + $0x6a] sm:$0x3f]  ;;  %v820_v55 = vadd.f32 %v792_v28, %v732_v1  ;;  %v1599_v25 = vld [vmem:[%s4402_s20 + $0x80] sm:$0x3f]  ;;  %v1171_v10 = vadd.f32 %v1143_v7, %v1082_v16 }
  0x93   : > { %8557 = vst [vmem:[#allocation66_spill] sm:$0xff] %v4671_v50  ;;  %v995_v34 = vadd.f32 %v967_v51, %v907_v27  ;;  %v675_v13 = vld [vmem:[#allocation2 + $0x89] sm:$0x3f]  ;;  %v4675_v19 = vadd.f32 %v4570_v47, %v618_v37  ;;  %v1258_v28 = vadd.f32 %v1230_v52, %v1170_v5  ;;  %v4690_v22 = vld [vmem:[%s4402_s20 + $0x98] sm:$0xff]  ;;  %v1601_v61 = vld [vmem:[%s4402_s20 + $0xb0] sm:$0x3f] }
  0x94   : > { %v763_v11 = vld [vmem:[#allocation2 + $0x8a] sm:$0x3f]  ;;  %v908_v20 = vadd.f32 %v880_v14, %v820_v55  ;;  %v707_v27 = vmul.f32 %v4432_v40, %v675_v13  ;;  %8560 = vst [vmem:[#allocation69_spill] sm:$0xff] %v4690_v22  ;;  %v4695_v52 = vld [vmem:[#allocation2 + $0x10] sm:$0xff]  ;;  %v4699_v13 = vmul.f32 %v4432_v40, %v4499_v17  ;;  %v4703_v5 = vld [vmem:[#allocation2 + $0x19] sm:$0x3f] }
  0x95   : > { %v849_v50 = vld [vmem:[#allocation2 + $0x88] sm:$0x3f]  ;;  %v4682_v1 = vadd.f32 %v1055_v48, %v995_v34  ;;  %v795_v59 = vmul.f32 %v4435_v43, %v763_v11  ;;  %8561 = vst [vmem:[#allocation70_spill] sm:$0xff] %v4695_v52  ;;  %v4701_v34 = vld [vmem:[#allocation2 + $0x18] sm:$0x3f]  ;;  %1628 = vst [vmem:[#allocation2 + $0x41] sm:$0xff] %v4690_v22  ;;  %v4720_v56 = vadd.f32 %v1318_v32, %v1258_v28 }
  0x96   : > { %v937_v51 = vld [vmem:[#allocation2 + $0x89] sm:$0x3f]  ;;  %v881_v48 = vmul.f32 %v4522_v41, %v849_v50  ;;  %v4705_v60 = vld [vmem:[#allocation2 + $0x12] sm:$0xff]  ;;  %v4707_v16 = vld [vmem:[#allocation2 + $0x1a] sm:$0x3f]  ;;  %v4723_v0 = vadd.f32 %v4577_v63, %v908_v20 }
  0x97   : > { %v4680_v3 = vld [vmem:[%s4402_s20 + $0x68] sm:$0xff]  ;;  %8562 = vst [vmem:[#allocation71_spill] sm:$0xff] %v4705_v60  ;;  %8563 = vst [vmem:[#allocation72_spill] sm:$0xff] %v4707_v16  ;;  %v4709_v11 = vld [vmem:[#allocation2 + $0x18] sm:$0x3f]  ;;  %v735_v60 = vadd.f32 %v707_v27, %v619_v30 }
  0x98   : > { %8558 = vst [vmem:[#allocation67_spill] sm:$0xff] %v4680_v3  ;;  %v1025_v47 = vld [vmem:[#allocation2 + $0x8a] sm:$0x3f]  ;;  %1626 = vst [vmem:[#allocation2 + $0x31] sm:$0xff] %v4680_v3  ;;  %v4711_v50 = vld [vmem:[#allocation2 + $0x19] sm:$0x3f] }
  0x99   : > { %v1112_v37 = vld [vmem:[#allocation2 + $0x88] sm:$0x3f]  ;;  %8564 = vst [vmem:[#allocation73_spill] sm:$0xff] %v4709_v11  ;;  %8565 = vst [vmem:[#allocation74_spill] sm:$0xff] %v4711_v50  ;;  %v4713_v7 = vld [vmem:[#allocation2 + $0x1a] sm:$0x3f]  ;;  %v969_v11 = vmul.f32 %v4525_v42, %v937_v51 }
  0x9a   : > { %v1200_v14 = vld [vmem:[#allocation2 + $0x89] sm:$0x3f]  ;;  %8566 = vst [vmem:[#allocation75_spill] sm:$0xff] %v4713_v7  ;;  %1627 = vst [vmem:[#allocation2 + $0x39] sm:$0x3f] %v1599_v25  ;;  %v4726_v50 = vld [vmem:[#allocation2 + $0x20] sm:$0xff] }
  0x9b   : > { %v1288_v55 = vld [vmem:[#allocation2 + $0x8a] sm:$0x3f]  ;;  %1629 = vst [vmem:[#allocation2 + $0x49] sm:$0x3f] %v1601_v61  ;;  %v1603_v52 = vld [vmem:[%s4402_s20 + $0xe0] sm:$0x3f] }
  0x9c   : > { %v4717_v17 = vld [vmem:[%s4402_s20 + $0xc8] sm:$0xff]  ;;  %8568 = vst [vmem:[#allocation77_spill] sm:$0xff] %v4720_v56  ;;  %8569 = vst [vmem:[#allocation78_spill] sm:$0xff] %v4726_v50  ;;  %v4748_v27 = vld [vmem:[%s4402_s20 + $0xf8] sm:$0xff] }
  0x9d   : > { %8567 = vst [vmem:[#allocation76_spill] sm:$0xff] %v4717_v17  ;;  %v1658_v25 = vld [vmem:[#allocation2 + $0x28] sm:$0x3f]  ;;  %1630 = vst [vmem:[#allocation2 + $0x51] sm:$0xff] %v4717_v17  ;;  %v1605_v56 = vld [vmem:[%s4402_s20 + $0x110] sm:$0x3f] }
  0x9e   : > { %v4728_v7 = vld [vmem:[#allocation2 + $0x29] sm:$0x3f]  ;;  %1631 = vst [vmem:[#allocation2 + $0x59] sm:$0x3f] %v1603_v52  ;;  %8577 = vst [vmem:[#allocation86_spill] sm:$0xff] %v4748_v27 }
  0x9f   : > { %v4730_v61 = vld [vmem:[#allocation2 + $0x22] sm:$0xff]  ;;  %v4732_v16 = vld [vmem:[#allocation2 + $0x2a] sm:$0x3f]  ;;  %1632 = vst [vmem:[#allocation2 + $0x61] sm:$0xff] %v4748_v27  ;;  %1633 = vst [vmem:[#allocation2 + $0x69] sm:$0x3f] %v1605_v56 }
  0xa0   : > { %8570 = vst [vmem:[#allocation79_spill] sm:$0xff] %v4730_v61  ;;  %v4734_v32 = vld [vmem:[#allocation2 + $0x28] sm:$0x3f]  ;;  %v527_v52 = vld [vmem:[%s4402_s20 + $0x198] sm:$0x3f]  ;;  %v4780_v56 = vld [vmem:[%s4402_s20 + $0x1b0] sm:$0xff] }
  0xa1   : > { %8571 = vst [vmem:[#allocation80_spill] sm:$0xff] %v4734_v32  ;;  %v4736_v28 = vld [vmem:[#allocation2 + $0x29] sm:$0x3f]  ;;  %v4752_v32 = vld [vmem:[%s4402_s20 + $0x180] sm:$0xff]  ;;  %556 = vst [vmem:[#allocation2 + $0x99] sm:$0x3f] %v527_v52 }
  0xa2   : > { %8572 = vst [vmem:[#allocation81_spill] sm:$0xff] %v4736_v28  ;;  %v4738_v63 = vld [vmem:[#allocation2 + $0x2a] sm:$0x3f]  ;;  %555 = vst [vmem:[#allocation2 + $0x91] sm:$0xff] %v4752_v32  ;;  %v1607_v61 = vld [vmem:[%s4402_s20 + $0x140] sm:$0x3f] }
  0xa3   : > { %8573 = vst [vmem:[#allocation82_spill] sm:$0xff] %v4738_v63  ;;  %v4740_v30 = vld [vmem:[#allocation2 + $0x28] sm:$0x3f]  ;;  %v4756_v63 = vrot.slane %v4669_v26, %v4419_v35  ;;  %1635 = vst [vmem:[#allocation2 + $0x79] sm:$0x3f] %v1607_v61  ;;  %v2674_v61 = vld [vmem:[%s4402_s20 + $0x10] sm:$0xff] }
  0xa4   : > { %8574 = vst [vmem:[#allocation83_spill] sm:$0xff] %v4740_v30  ;;  %v4742_v51 = vld [vmem:[#allocation2 + $0x29] sm:$0x3f]  ;;  %v4759_v30 = vadd.f32 %v4583_v8, %v1171_v10  ;;  %v4772_v8 = vrot.slane %v4669_v26, %v4421_v36  ;;  %v4774_v10 = vadd.f32 %v795_v59, %v735_v60  ;;  %v1320_v59 = vmul.f32 %v4551_v24, %v1288_v55  ;;  %v1748_v44 = vld [vmem:[#allocation2 + $0x39] sm:$0x3f] }
  0xa5   : > { %8575 = vst [vmem:[#allocation84_spill] sm:$0xff] %v4742_v51  ;;  %v4744_v20 = vld [vmem:[#allocation2 + $0x2a] sm:$0x3f]  ;;  %8578 = vst [vmem:[#allocation87_spill] sm:$0xff] %v4756_v63  ;;  %v909_v51 = vadd.f32 %v881_v48, %v4663_v9  ;;  %v1144_v9 = vmul.f32 %v4545_v58, %v1112_v37  ;;  %v781_v60 = vmul.f32 %v4435_v43, %v4501_v18  ;;  %v1836_v62 = vld [vmem:[#allocation2 + $0x3a] sm:$0x3f] }
  0xa6   : > { %8576 = vst [vmem:[#allocation85_spill] sm:$0xff] %v4744_v20  ;;  %8579 = vst [vmem:[#allocation88_spill] sm:$0xff] %v4759_v30  ;;  %v1057_v20 = vmul.f32 %v4530_v46, %v1025_v47  ;;  %v4767_v28 = vld [vmem:[%s4402_s20 + $0x128] sm:$0xff]  ;;  %v1232_v47 = vmul.f32 %v4535_v49, %v1200_v14  ;;  %v4784_v30 = vld [vmem:[%s4402_s20 + $0x158] sm:$0xff]  ;;  %v869_v37 = vmul.f32 %v4522_v41, %v4470_v4 }
  0xa7   : > { %8580 = vst [vmem:[#allocation89_spill] sm:$0xff] %v4772_v8  ;;  %1634 = vst [vmem:[#allocation2 + $0x71] sm:$0xff] %v4767_v28  ;;  %v529_v48 = vld [vmem:[%s4402_s20 + $0x1c8] sm:$0x3f]  ;;  %v997_v50 = vadd.f32 %v969_v11, %v909_v51  ;;  %v1609_v14 = vld [vmem:[%s4402_s20 + $0x170] sm:$0x3f]  ;;  %v1172_v11 = vadd.f32 %v1144_v9, %v4682_v1  ;;  %v721_v55 = vadd.f32 %v4699_v13, %v4602_v54 }
  0xa8   : > { %8581 = vst [vmem:[#allocation90_spill] sm:$0xff] %v4784_v30  ;;  %557 = vst [vmem:[#allocation2 + $0xa1] sm:$0xff] %v4780_v56  ;;  %v2675_v52 = vld [vmem:[%s4402_s20 + $0x28] sm:$0x3f]  ;;  %v1688_v18 = vmul.f32 %v4756_v63, %v4701_v34  ;;  %v1776_v4 = vmul.f32 %v4772_v8, %v4703_v5  ;;  %v2676_v51 = vld [vmem:[%s4402_s20 + $0x40] sm:$0xff]  ;;  %v4809_v1 = vrot.slane %v4669_v26, %v4426_v38 }
  0xa9   : > { %558 = vst [vmem:[#allocation2 + $0xa9] sm:$0x3f] %v529_v48  ;;  %1636 = vst [vmem:[#allocation2 + $0x81] sm:$0xff] %v4784_v30  ;;  %v2677_v48 = vld [vmem:[%s4402_s20 + $0x58] sm:$0x3f]  ;;  %v4805_v45 = vadd.f32 %v1057_v20, %v997_v50  ;;  %v1690_v54 = vmul.f32 %v4756_v63, %v1658_v25  ;;  %v4813_v13 = vld [vmem:[#allocation2 + $0x30] sm:$0xff]  ;;  %v1778_v50 = vmul.f32 %v4772_v8, %v4728_v7 }
  0xaa   : > { %1637 = vst [vmem:[#allocation2 + $0x89] sm:$0x3f] %v1609_v14  ;;  %2702 = vst [vmem:[#allocation2 + $0x11] sm:$0xff] %v2674_v61  ;;  %v1651_v9 = vld [vmem:[%s4423_s15 + $0x10] sm:$0x7]  ;;  %v1260_v14 = vadd.f32 %v1232_v47, %v1172_v11  ;;  %v809_v61 = vadd.f32 %v781_v60, %v721_v55  ;;  %v1866_v47 = vmul.f32 %v4809_v1, %v4732_v16 }
  0xab   : > { %2703 = vst [vmem:[#allocation2 + $0x19] sm:$0x3f] %v2675_v52  ;;  %8582 = vst [vmem:[#allocation91_spill] sm:$0xff] %v4809_v1  ;;  %v2678_v34 = vld [vmem:[%s4402_s20 + $0x70] sm:$0xff]  ;;  %v2679_v5 = vld [vmem:[%s4402_s20 + $0x88] sm:$0x3f]  ;;  %v4817_v52 = vadd.f32 %v1776_v4, %v1688_v18  ;;  %v4840_v4 = vrot.slane %v1651_v9, %v4419_v35 }
  0xac   : > { %8583 = vst [vmem:[#allocation92_spill] sm:$0xff] %v4813_v13  ;;  %2704 = vst [vmem:[#allocation2 + $0x21] sm:$0xff] %v2676_v51  ;;  %v1660_v20 = vld [vmem:[#allocation2 + $0x38] sm:$0x3f]  ;;  %v4825_v13 = vadd.f32 %v1320_v59, %v1260_v14  ;;  %v4827_v51 = vadd.f32 %v869_v37, %v809_v61  ;;  %v1780_v37 = vmul.f32 %v4772_v8, %v1748_v44 }
  0xad   : > { %2705 = vst [vmem:[#allocation2 + $0x29] sm:$0x3f] %v2677_v48  ;;  %8584 = vst [vmem:[#allocation93_spill] sm:$0xff] %v4817_v52  ;;  %v4821_v26 = vld [vmem:[#allocation2 + $0x32] sm:$0xff]  ;;  %v1806_v48 = vadd.f32 %v1778_v50, %v1690_v54  ;;  %v4831_v60 = vld [vmem:[#allocation2 + $0x3a] sm:$0x3f]  ;;  %v1692_v59 = vmul.f32 %v4756_v63, %v1660_v20  ;;  %v1868_v14 = vmul.f32 %v4809_v1, %v1836_v62 }
  0xae   : > { %8585 = vst [vmem:[#allocation94_spill] sm:$0xff] %v4821_v26  ;;  %v1922_v3 = vld [vmem:[#allocation2 + $0x38] sm:$0x3f]  ;;  %8587 = vst [vmem:[#allocation96_spill] sm:$0xff] %v4825_v13  ;;  %v4844_v54 = vld [vmem:[#allocation2 + $0x40] sm:$0xff]  ;;  %v4853_v20 = vrot.slane %v1651_v9, %v4421_v36 }
  0xaf   : > { %v4823_v25 = vld [vmem:[#allocation2 + $0x39] sm:$0x3f]  ;;  %8588 = vst [vmem:[#allocation97_spill] sm:$0xff] %v4827_v51  ;;  %8589 = vst [vmem:[#allocation98_spill] sm:$0xff] %v4831_v60  ;;  %v1894_v18 = vadd.f32 %v1866_v47, %v1806_v48  ;;  %v1808_v16 = vadd.f32 %v1780_v37, %v1692_v59  ;;  %v1954_v61 = vmul.f32 %v4840_v4, %v1922_v3  ;;  %v1662_v50 = vld [vmem:[#allocation2 + $0x48] sm:$0x3f] }
  0xb0   : > { %8586 = vst [vmem:[#allocation95_spill] sm:$0xff] %v4823_v25  ;;  %v4833_v11 = vld [vmem:[#allocation2 + $0x38] sm:$0x3f]  ;;  %8593 = vst [vmem:[#allocation102_spill] sm:$0xff] %v4840_v4  ;;  %v1781_v48 = vmul.f32 %v4772_v8, %v4690_v22  ;;  %v1694_v62 = vmul.f32 %v4756_v63, %v1662_v50  ;;  %v1838_v37 = vld [vmem:[#allocation2 + $0x4a] sm:$0x3f] }
  0xb1   : > { %8590 = vst [vmem:[#allocation99_spill] sm:$0xff] %v4833_v11  ;;  %v4835_v7 = vld [vmem:[#allocation2 + $0x39] sm:$0x3f]  ;;  %2706 = vst [vmem:[#allocation2 + $0x31] sm:$0xff] %v2678_v34  ;;  %v1693_v34 = vmul.f32 %v4756_v63, %v4844_v54  ;;  %v1896_v44 = vadd.f32 %v1868_v14, %v1808_v16  ;;  %v4855_v47 = vadd.f32 %v1954_v61, %v1894_v18  ;;  %v2012_v11 = vld [vmem:[#allocation2 + $0x49] sm:$0x3f] }
  0xb2   : > { %8591 = vst [vmem:[#allocation100_spill] sm:$0xff] %v4835_v7  ;;  %v4837_v55 = vld [vmem:[#allocation2 + $0x3a] sm:$0x3f]  ;;  %8594 = vst [vmem:[#allocation103_spill] sm:$0xff] %v4844_v54  ;;  %v1750_v7 = vld [vmem:[#allocation2 + $0x49] sm:$0x3f]  ;;  %v1870_v51 = vmul.f32 %v4809_v1, %v1838_v37  ;;  %v2044_v18 = vmul.f32 %v4853_v20, %v2012_v11  ;;  %v4867_v16 = vrot.slane %v1651_v9, %v4426_v38 }
  0xb3   : > { %8592 = vst [vmem:[#allocation101_spill] sm:$0xff] %v4837_v55  ;;  %2707 = vst [vmem:[#allocation2 + $0x39] sm:$0x3f] %v2679_v5  ;;  %v4857_v5 = vld [vmem:[#allocation2 + $0x42] sm:$0xff]  ;;  %v1809_v59 = vadd.f32 %v1781_v48, %v1693_v34  ;;  %v1782_v3 = vmul.f32 %v4772_v8, %v1750_v7  ;;  %v4869_v61 = vld [vmem:[#allocation2 + $0x50] sm:$0xff] }
  0xb4   : > { %8595 = vst [vmem:[#allocation104_spill] sm:$0xff] %v4853_v20  ;;  %8596 = vst [vmem:[#allocation105_spill] sm:$0xff] %v4855_v47  ;;  %v1924_v55 = vld [vmem:[#allocation2 + $0x48] sm:$0x3f]  ;;  %v1869_v52 = vmul.f32 %v4809_v1, %v4857_v5  ;;  %v1664_v7 = vld [vmem:[#allocation2 + $0x58] sm:$0x3f]  ;;  %v1957_v9 = vmul.f32 %v4840_v4, %v4869_v61 }
  0xb5   : > { %8597 = vst [vmem:[#allocation106_spill] sm:$0xff] %v4857_v5  ;;  %v1956_v60 = vmul.f32 %v4840_v4, %v1924_v55  ;;  %8598 = vst [vmem:[#allocation107_spill] sm:$0xff] %v4867_v16  ;;  %v1810_v14 = vadd.f32 %v1782_v3, %v1694_v62  ;;  %v1752_v50 = vld [vmem:[#allocation2 + $0x59] sm:$0x3f]  ;;  %v2100_v47 = vld [vmem:[#allocation2 + $0x4a] sm:$0x3f]  ;;  %v1695_v5 = vmul.f32 %v4756_v63, %v4869_v61 }
  0xb6   : > { %8599 = vst [vmem:[#allocation108_spill] sm:$0xff] %v4869_v61  ;;  %v1897_v34 = vadd.f32 %v1869_v52, %v1809_v59  ;;  %v1783_v55 = vmul.f32 %v4772_v8, %v4717_v17  ;;  %v2132_v11 = vmul.f32 %v4867_v16, %v2100_v47  ;;  %v2045_v62 = vmul.f32 %v4853_v20, %v4717_v17  ;;  %v4885_v13 = vld [vmem:[#allocation2 + $0x52] sm:$0xff]  ;;  %v2016_v26 = vld [vmem:[#allocation2 + $0x69] sm:$0x3f]  ;;  %v5037_v6 = vld [vmem:[#allocation2 + $0xa0] sm:$0xff] }
  0xb7   : > { %v1984_v48 = vadd.f32 %v1956_v60, %v1896_v44  ;;  %v1898_v37 = vadd.f32 %v1870_v51, %v1810_v14  ;;  %v1696_v52 = vmul.f32 %v4756_v63, %v1664_v7  ;;  %v1784_v60 = vmul.f32 %v4772_v8, %v1752_v50  ;;  %v4883_v44 = vld [vmem:[%s4423_s15 + $0x1c] sm:$0x7]  ;;  %8600 = vst [vmem:[#allocation109_spill] sm:$0xff] %v4885_v13  ;;  %v5039_v15 = vld [vmem:[#allocation2 + $0xa8] sm:$0x3f] }
  0xb8   : > { %v1811_v25 = vadd.f32 %v1783_v55, %v1695_v5  ;;  %v1985_v59 = vadd.f32 %v1957_v9, %v1897_v34  ;;  %v1840_v51 = vld [vmem:[#allocation2 + $0x5a] sm:$0x3f]  ;;  %v1871_v61 = vmul.f32 %v4809_v1, %v4885_v13  ;;  %v2133_v34 = vmul.f32 %v4867_v16, %v4885_v13  ;;  %v4897_v9 = vld [vmem:[%s4423_s15 + $0x8] sm:$0x7] }
  0xb9   : > { %v2072_v3 = vadd.f32 %v2044_v18, %v1984_v48  ;;  %v1812_v14 = vadd.f32 %v1784_v60, %v1696_v52  ;;  %v1872_v18 = vmul.f32 %v4809_v1, %v1840_v51  ;;  %v1926_v5 = vld [vmem:[#allocation2 + $0x58] sm:$0x3f]  ;;  %8602 = vst [vmem:[#allocation111_spill] sm:$0xff] %v4897_v9  ;;  %v1665_v51 = vld [vmem:[#allocation2 + $0x60] sm:$0xff]  ;;  %v5043_v21 = vld [vmem:[#allocation2 + $0xa8] sm:$0x3f] }
  0xba   : > { %v2014_v48 = vld [vmem:[#allocation2 + $0x59] sm:$0x3f]  ;;  %v2073_v7 = vadd.f32 %v2045_v62, %v1985_v59  ;;  %v1958_v55 = vmul.f32 %v4840_v4, %v1926_v5  ;;  %v1697_v5 = vmul.f32 %v4756_v63, %v1665_v51  ;;  %v1959_v13 = vmul.f32 %v4840_v4, %v1665_v51  ;;  %v5045_v57 = vld [vmem:[#allocation2 + $0xa8] sm:$0x3f] }
  0xbb   : > { %v4887_v47 = vadd.f32 %v2132_v11, %v2072_v3  ;;  %v2046_v50 = vmul.f32 %v4853_v20, %v2014_v48  ;;  %v4901_v11 = vrot.slane %v4883_v44, %v4419_v35  ;;  %v1899_v3 = vadd.f32 %v1871_v61, %v1811_v25  ;;  %v2102_v60 = vld [vmem:[#allocation2 + $0x5a] sm:$0x3f]  ;;  %8621 = vst [vmem:[#allocation130_spill] sm:$0xff] %v5045_v57  ;;  %v5059_v23 = vld [vmem:[#allocation2 + $0xaa] sm:$0x3f]  ;;  %v5075_v57 = vld [vmem:[#allocation2 + $0x82] sm:$0xff] }
  0xbc   : > { %v1900_v52 = vadd.f32 %v1872_v18, %v1812_v14  ;;  %v1986_v17 = vadd.f32 %v1958_v55, %v1898_v37  ;;  %v2134_v62 = vmul.f32 %v4867_v16, %v2102_v60  ;;  %v2161_v59 = vadd.f32 %v2133_v34, %v2073_v7  ;;  %v1666_v55 = vld [vmem:[#allocation2 + $0x68] sm:$0x3f]  ;;  %v2681_v53 = vld [vmem:[%s4402_s20 + $0xb8] sm:$0x3f]  ;;  %8630 = vst [vmem:[#allocation139_spill] sm:$0xff] %v5075_v57 }
  0xbd   : > { %8601 = vst [vmem:[#allocation110_spill] sm:$0xff] %v4887_v47  ;;  %8603 = vst [vmem:[#allocation112_spill] sm:$0xff] %v4901_v11  ;;  %v1785_v48 = vmul.f32 %v4772_v8, %v4748_v27  ;;  %v2047_v47 = vmul.f32 %v4853_v20, %v4748_v27  ;;  %v2221_v22 = vmul.f32 %v4901_v11, %v1665_v51  ;;  %v1754_v34 = vld [vmem:[#allocation2 + $0x69] sm:$0x3f] }
  0xbe   : > { %v4913_v25 = vrot.slane %v4897_v9, %v4419_v35  ;;  %v2074_v61 = vadd.f32 %v2046_v50, %v1986_v17  ;;  %v4917_v37 = vrot.slane %v4883_v44, %v4421_v36  ;;  %v1987_v18 = vadd.f32 %v1959_v13, %v1899_v3  ;;  %v4921_v60 = vld [vmem:[#allocation2 + $0x62] sm:$0xff]  ;;  %v1842_v35 = vld [vmem:[#allocation2 + $0x6a] sm:$0x3f] }
  0xbf   : > { %v1813_v14 = vadd.f32 %v1785_v48, %v1697_v5  ;;  %v4919_v7 = vadd.f32 %v2221_v22, %v2161_v59  ;;  %8606 = vst [vmem:[#allocation115_spill] sm:$0xff] %v4921_v60  ;;  %v1698_v51 = vmul.f32 %v4756_v63, %v1666_v55  ;;  %v1786_v54 = vmul.f32 %v4772_v8, %v1754_v34  ;;  %v1928_v50 = vld [vmem:[#allocation2 + $0x68] sm:$0x3f] }
  0xc0   : > { %8604 = vst [vmem:[#allocation113_spill] sm:$0xff] %v4913_v25  ;;  %v2162_v27 = vadd.f32 %v2134_v62, %v2074_v61  ;;  %v1873_v17 = vmul.f32 %v4809_v1, %v4921_v60  ;;  %v2075_v25 = vadd.f32 %v2047_v47, %v1987_v18  ;;  %v1874_v13 = vmul.f32 %v4809_v1, %v1842_v35  ;;  %v2104_v61 = vld [vmem:[#allocation2 + $0x6a] sm:$0x3f] }
  0xc1   : > { %8605 = vst [vmem:[#allocation114_spill] sm:$0xff] %v4919_v7  ;;  %v1960_v22 = vmul.f32 %v4840_v4, %v1928_v50  ;;  %v2048_v3 = vmul.f32 %v4853_v20, %v2016_v26  ;;  %v4932_v62 = vrot.slane %v4897_v9, %v4421_v36  ;;  %v794_v59 = vmul.f32 %v4435_v43, %v4685_v12  ;;  %v2190_v55 = vld [vmem:[#allocation2 + $0x68] sm:$0x3f]  ;;  %v588_v50 = vld [vmem:[#allocation2 + $0x90] sm:$0xff] }
  0xc2   : > { %v1056_v5 = vmul.f32 %v4530_v46, %v4685_v12  ;;  %v1814_v48 = vadd.f32 %v1786_v54, %v1698_v51  ;;  %v2278_v47 = vld [vmem:[#allocation2 + $0x69] sm:$0x3f]  ;;  %v2136_v35 = vmul.f32 %v4867_v16, %v2104_v61  ;;  %v2222_v34 = vmul.f32 %v4901_v11, %v2190_v55 }
  0xc3   : > { %8607 = vst [vmem:[#allocation116_spill] sm:$0xff] %v4932_v62  ;;  %v1988_v18 = vadd.f32 %v1960_v22, %v1900_v52  ;;  %v2310_v26 = vmul.f32 %v4917_v37, %v2278_v47  ;;  %v4943_v7 = vmul.f32 %v4432_v40, %v4409_v31  ;;  %v620_v12 = vmul.f32 %v4429_v39, %v588_v50  ;;  %v5061_v30 = vld [vmem:[#allocation2 + $0xa9] sm:$0x3f] }
  0xc4   : > { %v4945_v36 = vadd.f32 %v1874_v13, %v1814_v48  ;;  %v708_v54 = vmul.f32 %v4432_v40, %v4752_v32  ;;  %v4952_v52 = vmul.f32 %v4432_v40, %v4415_v33  ;;  %v4954_v51 = vadd.f32 %v1873_v17, %v1813_v14  ;;  %v589_v17 = vld [vmem:[#allocation2 + $0x98] sm:$0x3f]  ;;  %8623 = vst [vmem:[#allocation132_spill] sm:$0xff] %v5061_v30  ;;  %v5079_v30 = vld [vmem:[#allocation2 + $0x88] sm:$0x3f] }
  0xc5   : > { %8608 = vst [vmem:[#allocation117_spill] sm:$0xff] %v4943_v7  ;;  %v2076_v22 = vadd.f32 %v2048_v3, %v1988_v18  ;;  %v2250_v61 = vadd.f32 %v2222_v34, %v2162_v27  ;;  %v2135_v55 = vmul.f32 %v4867_v16, %v4921_v60  ;;  %v822_v13 = vadd.f32 %v794_v59, %v4675_v19  ;;  %v4969_v27 = vld [vmem:[#allocation2 + $0x48] sm:$0x3f]  ;;  %v677_v18 = vld [vmem:[#allocation2 + $0x99] sm:$0x3f] }
  0xc6   : > { %8609 = vst [vmem:[#allocation118_spill] sm:$0xff] %v4952_v52  ;;  %v4958_v47 = vadd.f32 %v708_v54, %v620_v12  ;;  %v882_v48 = vmul.f32 %v4522_v41, %v588_v50  ;;  %v970_v62 = vmul.f32 %v4525_v42, %v4752_v32  ;;  %v1084_v14 = vadd.f32 %v1056_v5, %v4723_v0  ;;  %v851_v34 = vld [vmem:[#allocation2 + $0x98] sm:$0x3f]  ;;  %v4977_v54 = vld [vmem:[#allocation2 + $0x4a] sm:$0x3f]  ;;  %v5041_v52 = vld [vmem:[#allocation2 + $0xa2] sm:$0xff] }
  0xc7   : > { %v4962_v31 = vadd.f32 %v2136_v35, %v2076_v22  ;;  %v4964_v7 = vadd.f32 %v2310_v26, %v2250_v61  ;;  %8611 = vst [vmem:[#allocation120_spill] sm:$0xff] %v4969_v27  ;;  %v1145_v12 = vmul.f32 %v4545_v58, %v588_v50  ;;  %v1233_v19 = vmul.f32 %v4535_v49, %v4752_v32  ;;  %v765_v35 = vld [vmem:[#allocation2 + $0x9a] sm:$0x3f]  ;;  %v4975_v26 = vld [vmem:[#allocation2 + $0x49] sm:$0x3f] }
  0xc8   : > { %v910_v3 = vadd.f32 %v882_v48, %v822_v13  ;;  %v621_v59 = vmul.f32 %v4429_v39, %v589_v17  ;;  %8612 = vst [vmem:[#allocation121_spill] sm:$0xff] %v4975_v26  ;;  %8613 = vst [vmem:[#allocation122_spill] sm:$0xff] %v4977_v54  ;;  %v4979_v22 = vld [vmem:[#allocation2 + $0x58] sm:$0x3f]  ;;  %v4983_v0 = vrot.slane %v4883_v44, %v4426_v38  ;;  %v5083_v2 = vld [vmem:[#allocation2 + $0x8a] sm:$0x3f] }
  0xc9   : > { %8610 = vst [vmem:[#allocation119_spill] sm:$0xff] %v4964_v7  ;;  %8614 = vst [vmem:[#allocation123_spill] sm:$0xff] %v4979_v22  ;;  %v709_v5 = vmul.f32 %v4432_v40, %v677_v18  ;;  %v797_v50 = vmul.f32 %v4435_v43, %v765_v35  ;;  %v883_v32 = vmul.f32 %v4522_v41, %v851_v34  ;;  %v939_v61 = vld [vmem:[#allocation2 + $0x99] sm:$0x3f]  ;;  %v4994_v7 = vld [vmem:[#allocation2 + $0x6a] sm:$0x3f] }
  0xca   : > { %v4988_v13 = vld [vmem:[#allocation2 + $0x59] sm:$0x3f]  ;;  %v4992_v17 = vadd.f32 %v2135_v55, %v2075_v25  ;;  %8617 = vst [vmem:[#allocation126_spill] sm:$0xff] %v4994_v7  ;;  %v4996_v60 = vadd.f32 %v970_v62, %v910_v3  ;;  %v1173_v54 = vadd.f32 %v1145_v12, %v1084_v14  ;;  %v971_v18 = vmul.f32 %v4525_v42, %v939_v61  ;;  %v1667_v7 = vld [vmem:[#allocation2 + $0x70] sm:$0xff]  ;;  %v2683_v57 = vld [vmem:[%s4402_s20 + $0xe8] sm:$0x3f] }
  0xcb   : > { %8615 = vst [vmem:[#allocation124_spill] sm:$0xff] %v4988_v13  ;;  %v4990_v48 = vld [vmem:[#allocation2 + $0x5a] sm:$0x3f]  ;;  %v4998_v44 = vld [vmem:[#allocation2 + $0x92] sm:$0xff]  ;;  %v737_v27 = vadd.f32 %v709_v5, %v621_v59  ;;  %v911_v34 = vadd.f32 %v883_v32, %v4774_v10  ;;  %v1699_v33 = vmul.f32 %v4756_v63, %v1667_v7  ;;  %8620 = vst [vmem:[#allocation129_spill] sm:$0xff] %v5041_v52 }
  0xcc   : > { %8616 = vst [vmem:[#allocation125_spill] sm:$0xff] %v4990_v48  ;;  %v1027_v26 = vld [vmem:[#allocation2 + $0x9a] sm:$0x3f]  ;;  %v1261_v62 = vadd.f32 %v1233_v19, %v1173_v54  ;;  %v1321_v3 = vmul.f32 %v4551_v24, %v4998_v44  ;;  %v5073_v52 = vld [vmem:[#allocation2 + $0x89] sm:$0x3f]  ;;  %8632 = vst [vmem:[#allocation141_spill] sm:$0xff] %v5079_v30 }
  0xcd   : > { %v1114_v35 = vld [vmem:[#allocation2 + $0x98] sm:$0x3f]  ;;  %v1059_v13 = vmul.f32 %v4530_v46, %v1027_v26  ;;  %v5033_v22 = vadd.f32 %v797_v50, %v737_v27  ;;  %v999_v9 = vadd.f32 %v971_v18, %v911_v34  ;;  %v2682_v27 = vld [vmem:[%s4402_s20 + $0xd0] sm:$0xff]  ;;  %v2049_v18 = vmul.f32 %v4853_v20, %v4767_v28  ;;  %v5057_v34 = vld [vmem:[#allocation2 + $0xa9] sm:$0x3f]  ;;  %8629 = vst [vmem:[#allocation138_spill] sm:$0xff] %v5073_v52 }
  0xce   : > { %v1146_v48 = vmul.f32 %v4545_v58, %v1114_v35  ;;  %v1202_v25 = vld [vmem:[#allocation2 + $0x99] sm:$0x3f]  ;;  %v5050_v50 = vadd.f32 %v1321_v3, %v1261_v62  ;;  %v5067_v62 = vld [vmem:[#allocation2 + $0xaa] sm:$0x3f]  ;;  %v5069_v3 = vld [vmem:[#allocation2 + $0x80] sm:$0xff]  ;;  %8634 = vst [vmem:[#allocation143_spill] sm:$0xff] %v5083_v2  ;;  %v2311_v2 = vmul.f32 %v4917_v37, %v4767_v28 }
  0xcf   : > { %v1290_v55 = vld [vmem:[#allocation2 + $0x9a] sm:$0x3f]  ;;  %v1234_v14 = vmul.f32 %v4535_v49, %v1202_v25  ;;  %v5014_v26 = vld [vmem:[#allocation2 + $0x72] sm:$0xff]  ;;  %8619 = vst [vmem:[#allocation128_spill] sm:$0xff] %v5033_v22  ;;  %8626 = vst [vmem:[#allocation135_spill] sm:$0xff] %v5067_v62 }
  0xd0   : > { %v5008_v12 = vmul.f32 %v4551_v24, %v1290_v55  ;;  %v5010_v59 = vld [vmem:[#allocation2 + $0x78] sm:$0x3f]  ;;  %v5031_v55 = vld [vmem:[%s4402_s20 + $0xa0] sm:$0xff]  ;;  %v1174_v38 = vadd.f32 %v1146_v48, %v4805_v45  ;;  %8622 = vst [vmem:[#allocation131_spill] sm:$0xff] %v5050_v50  ;;  %v1787_v45 = vmul.f32 %v4772_v8, %v4767_v28  ;;  %v1961_v48 = vmul.f32 %v4840_v4, %v1667_v7  ;;  %v5063_v24 = vld [vmem:[#allocation2 + $0xaa] sm:$0x3f] }
  0xd1   : > { %v5012_v10 = vld [vmem:[#allocation2 + $0x79] sm:$0x3f]  ;;  %8618 = vst [vmem:[#allocation127_spill] sm:$0xff] %v5031_v55  ;;  %2708 = vst [vmem:[#allocation2 + $0x41] sm:$0xff] %v5031_v55  ;;  %v5065_v55 = vld [vmem:[#allocation2 + $0xa9] sm:$0x3f]  ;;  %v1700_v28 = vmul.f32 %v4756_v63, %v5010_v59 }
  0xd2   : > { %v5016_v5 = vld [vmem:[#allocation2 + $0x7a] sm:$0x3f]  ;;  %8624 = vst [vmem:[#allocation133_spill] sm:$0xff] %v5063_v24  ;;  %8625 = vst [vmem:[#allocation134_spill] sm:$0xff] %v5065_v55  ;;  %v5071_v50 = vld [vmem:[#allocation2 + $0x88] sm:$0x3f]  ;;  %v1262_v30 = vadd.f32 %v1234_v14, %v1174_v38  ;;  %v1989_v38 = vadd.f32 %v1961_v48, %v4954_v51  ;;  %v1875_v14 = vmul.f32 %v4809_v1, %v5014_v26 }
  0xd3   : > { %v5018_v32 = vld [vmem:[#allocation2 + $0x78] sm:$0x3f]  ;;  %8627 = vst [vmem:[#allocation136_spill] sm:$0xff] %v5069_v3  ;;  %8628 = vst [vmem:[#allocation137_spill] sm:$0xff] %v5071_v50  ;;  %v5077_v22 = vld [vmem:[#allocation2 + $0x8a] sm:$0x3f]  ;;  %v5094_v3 = vadd.f32 %v1059_v13, %v999_v9  ;;  %v1815_v13 = vadd.f32 %v1787_v45, %v1699_v33  ;;  %v1876_v59 = vmul.f32 %v4809_v1, %v5016_v5 }
  0xd4   : > { %v5020_v61 = vld [vmem:[#allocation2 + $0x79] sm:$0x3f]  ;;  %8631 = vst [vmem:[#allocation140_spill] sm:$0xff] %v5077_v22  ;;  %v5081_v24 = vld [vmem:[#allocation2 + $0x89] sm:$0x3f]  ;;  %2710 = vst [vmem:[#allocation2 + $0x51] sm:$0xff] %v2682_v27  ;;  %v5117_v33 = vadd.f32 %v5008_v12, %v1262_v30  ;;  %v2077_v30 = vadd.f32 %v2049_v18, %v1989_v38  ;;  %v796_v18 = vmul.f32 %v4435_v43, %v4998_v44 }
  0xd5   : > { %v5022_v19 = vld [vmem:[#allocation2 + $0x7a] sm:$0x3f]  ;;  %8633 = vst [vmem:[#allocation142_spill] sm:$0xff] %v5081_v24  ;;  %v5085_v55 = vld [vmem:[#allocation2 + $0x88] sm:$0x3f]  ;;  %v2684_v52 = vld [vmem:[%s4402_s20 + $0x100] sm:$0xff]  ;;  %v2223_v24 = vmul.f32 %v4901_v11, %v1667_v7  ;;  %v1058_v38 = vmul.f32 %v4530_v46, %v4998_v44 }
  0xd6   : > { %v5024_v54 = vld [vmem:[#allocation2 + $0x78] sm:$0x3f]  ;;  %v5087_v62 = vld [vmem:[#allocation2 + $0x89] sm:$0x3f]  ;;  %2709 = vst [vmem:[#allocation2 + $0x49] sm:$0x3f] %v2681_v53  ;;  %v2138_v44 = vmul.f32 %v4867_v16, %v5022_v19 }
  0xd7   : > { %v5026_v35 = vld [vmem:[#allocation2 + $0x79] sm:$0x3f]  ;;  %8635 = vst [vmem:[#allocation144_spill] sm:$0xff] %v5087_v62  ;;  %v5089_v50 = vld [vmem:[#allocation2 + $0x8a] sm:$0x3f]  ;;  %2712 = vst [vmem:[#allocation2 + $0x61] sm:$0xff] %v2684_v52  ;;  %v2251_v51 = vadd.f32 %v2223_v24, %v4992_v17  ;;  %v1962_v24 = vmul.f32 %v4840_v4, %v5018_v32  ;;  %v2050_v17 = vmul.f32 %v4853_v20, %v5020_v61 }
  0xd8   : > { %v5028_v25 = vld [vmem:[#allocation2 + $0x7a] sm:$0x3f]  ;;  %8636 = vst [vmem:[#allocation145_spill] sm:$0xff] %v5089_v50  ;;  %2711 = vst [vmem:[#allocation2 + $0x59] sm:$0x3f] %v2683_v57  ;;  %v5100_v50 = vld [vmem:[%s4402_s20 + $0x1e0] sm:$0xff]  ;;  %v1788_v57 = vmul.f32 %v4772_v8, %v5012_v10  ;;  %v5146_v32 = vadd.f32 %v1875_v14, %v1815_v13 }
  0xd9   : > { %v2685_v22 = vld [vmem:[%s4402_s20 + $0x118] sm:$0x3f]  ;;  %v5104_v27 = vld [vmem:[%s4402_s20 + $0x188] sm:$0xff]  ;;  %559 = vst [vmem:[#allocation2 + $0xb1] sm:$0xff] %v5100_v50  ;;  %v1611_v7 = vld [vmem:[%s4402_s20 + $0x1a0] sm:$0x3f]  ;;  %v2400_v19 = vmul.f32 %v4983_v0, %v5028_v25  ;;  %v1086_v25 = vadd.f32 %v1058_v38, %v4996_v60  ;;  %v711_v60 = vmul.f32 %v4432_v40, %v5057_v34 }
  0xda   : > { %2713 = vst [vmem:[#allocation2 + $0x69] sm:$0x3f] %v2685_v22  ;;  %v531_v53 = vld [vmem:[%s4402_s20 + $0x1f8] sm:$0x3f]  ;;  %8637 = vst [vmem:[#allocation146_spill] sm:$0xff] %v5104_v27  ;;  %v2686_v52 = vld [vmem:[%s4402_s20 + $0x130] sm:$0xff]  ;;  %v1816_v12 = vadd.f32 %v1788_v57, %v1700_v28  ;;  %v5144_v28 = vadd.f32 %v2311_v2, %v2251_v51  ;;  %v2224_v51 = vmul.f32 %v4901_v11, %v5024_v54 }
  0xdb   : > { %v571_v62 = vld [vmem:[#allocation2 + $0x8] sm:$0x3f]  ;;  %560 = vst [vmem:[#allocation2 + $0xb9] sm:$0x3f] %v531_v53  ;;  %1638 = vst [vmem:[#allocation2 + $0x91] sm:$0xff] %v5104_v27  ;;  %v5125_v10 = vld [vmem:[%s4402_s20 + $0x210] sm:$0xff]  ;;  %v884_v54 = vmul.f32 %v4522_v41, %v5037_v6 }
  0xdc   : > { %v659_v9 = vld [vmem:[#allocation2 + $0x9] sm:$0x3f]  ;;  %8638 = vst [vmem:[#allocation147_spill] sm:$0xff] %v5117_v33  ;;  %1639 = vst [vmem:[#allocation2 + $0x99] sm:$0x3f] %v1611_v7  ;;  %v5129_v48 = vld [vmem:[%s4402_s20 + $0x1b8] sm:$0xff]  ;;  %v5161_v2 = vmul.f32 %v4429_v39, %v571_v62  ;;  %v2252_v62 = vadd.f32 %v2224_v51, %v4962_v31 }
  0xdd   : > { %v2687_v22 = vld [vmem:[%s4402_s20 + $0x148] sm:$0x3f]  ;;  %2714 = vst [vmem:[#allocation2 + $0x71] sm:$0xff] %v2686_v52  ;;  %8639 = vst [vmem:[#allocation148_spill] sm:$0xff] %v5125_v10  ;;  %v1613_v5 = vld [vmem:[%s4402_s20 + $0x1d0] sm:$0x3f]  ;;  %v5152_v52 = vadd.f32 %v1876_v59, %v1816_v12  ;;  %v5164_v13 = vmul.f32 %v4432_v40, %v659_v9  ;;  %v622_v12 = vmul.f32 %v4429_v39, %v5037_v6 }
  0xde   : > { %2715 = vst [vmem:[#allocation2 + $0x79] sm:$0x3f] %v2687_v22  ;;  %v533_v45 = vld [vmem:[%s4402_s20 + $0x228] sm:$0x3f]  ;;  %8640 = vst [vmem:[#allocation149_spill] sm:$0xff] %v5129_v48  ;;  %v2688_v53 = vld [vmem:[%s4402_s20 + $0x160] sm:$0xff]  ;;  %v1990_v22 = vadd.f32 %v1962_v24, %v4945_v36  ;;  %v2312_v36 = vmul.f32 %v4917_v37, %v5026_v35  ;;  %v710_v9 = vmul.f32 %v4432_v40, %v4780_v56 }
  0xdf   : > { %561 = vst [vmem:[#allocation2 + $0xc1] sm:$0xff] %v5125_v10  ;;  %562 = vst [vmem:[#allocation2 + $0xc9] sm:$0x3f] %v533_v45  ;;  %v2689_v7 = vld [vmem:[%s4402_s20 + $0x178] sm:$0x3f]  ;;  %v5149_v61 = vld [vmem:[%s4402_s20 + $0x240] sm:$0xff]  ;;  %v2137_v45 = vmul.f32 %v4867_v16, %v5014_v26  ;;  %v824_v24 = vadd.f32 %v796_v18, %v4958_v47  ;;  %v972_v35 = vmul.f32 %v4525_v42, %v4780_v56 }
  0xe0   : > { %1640 = vst [vmem:[#allocation2 + $0xa1] sm:$0xff] %v5129_v48  ;;  %8641 = vst [vmem:[#allocation150_spill] sm:$0xff] %v5144_v28  ;;  %v535_v57 = vld [vmem:[%s4402_s20 + $0x258] sm:$0x3f]  ;;  %v2078_v14 = vadd.f32 %v2050_v17, %v1990_v22  ;;  %v2340_v17 = vadd.f32 %v2312_v36, %v2252_v62  ;;  %v5187_v31 = vadd.f32 %v710_v9, %v622_v12  ;;  %v8649_v12 = vld [vmem:[#allocation133_spill] sm:$0xff] }
  0xe1   : > { %1641 = vst [vmem:[#allocation2 + $0xa9] sm:$0x3f] %v1613_v5  ;;  %2716 = vst [vmem:[#allocation2 + $0x81] sm:$0xff] %v2688_v53  ;;  %v2165_v59 = vadd.f32 %v2137_v45, %v2077_v30  ;;  %v1147_v30 = vmul.f32 %v4545_v58, %v5037_v6  ;;  %v912_v53 = vadd.f32 %v884_v54, %v824_v24  ;;  %v8646_v45 = vld [vmem:[#allocation20_spill] sm:$0xff]  ;;  %v8650_v9 = vld [vmem:[#allocation130_spill] sm:$0xff] }
  0xe2   : > { %2717 = vst [vmem:[#allocation2 + $0x89] sm:$0x3f] %v2689_v7  ;;  %8642 = vst [vmem:[#allocation151_spill] sm:$0xff] %v5149_v61  ;;  %v5180_v5 = vadd.f32 %v2138_v44, %v2078_v14  ;;  %v1235_v47 = vmul.f32 %v4535_v49, %v4780_v56  ;;  %v5193_v7 = vmul.f32 %v4432_v40, %v4405_v29  ;;  %v8647_v36 = vld [vmem:[#allocation132_spill] sm:$0xff]  ;;  %v8651_v24 = vld [vmem:[#allocation134_spill] sm:$0xff] }
  0xe3   : > { %563 = vst [vmem:[#allocation2 + $0xd1] sm:$0xff] %v5149_v61  ;;  %564 = vst [vmem:[#allocation2 + $0xd9] sm:$0x3f] %v535_v57  ;;  %v1175_v18 = vadd.f32 %v1147_v30, %v1086_v25  ;;  %v623_v57 = vmul.f32 %v4429_v39, %v5039_v15  ;;  %v5199_v38 = vadd.f32 %v2400_v19, %v2340_v17  ;;  %v8648_v14 = vld [vmem:[#allocation128_spill] sm:$0xff]  ;;  %v8654_v25 = vld [vmem:[#allocation41_spill] sm:$0xff] }
  0xe4   : > { %8643 = vst [vmem:[#allocation152_spill] sm:$0xff] %v5161_v2  ;;  %8644 = vst [vmem:[#allocation153_spill] sm:$0xff] %v5164_v13  ;;  %v5201_v6 = vadd.f32 %v972_v35, %v912_v53  ;;  %v799_v56 = vmul.f32 %v4435_v43, %v5059_v23  ;;  %v885_v22 = vmul.f32 %v4522_v41, %v5043_v21  ;;  %v8653_v35 = vld [vmem:[#allocation129_spill] sm:$0xff]  ;;  %v8655_v17 = vld [vmem:[#allocation135_spill] sm:$0xff] }
  0xe5   : > { %8645 = vst [vmem:[#allocation154_spill] sm:$0xff] %v5199_v38  ;;  %v5209_v44 = vmul.f32 %v4429_v39, %v8646_v45  ;;  %v1263_v15 = vadd.f32 %v1235_v47, %v1175_v18  ;;  %v739_v51 = vadd.f32 %v711_v60, %v623_v57  ;;  %v973_v34 = vmul.f32 %v4525_v42, %v8647_v36  ;;  %v8656_v47 = vld [vmem:[#allocation136_spill] sm:$0xff]  ;;  %v5229_v57 = vld [vmem:[%s4402_s20 + $0x1e8] sm:$0xff]  ;;  %v1615_v60 = vld [vmem:[%s4402_s20 + $0x200] sm:$0x3f] }
  0xe6   : > { %v913_v19 = vadd.f32 %v885_v22, %v8648_v14  ;;  %v1061_v62 = vmul.f32 %v4530_v46, %v8649_v12  ;;  %v1148_v23 = vmul.f32 %v4545_v58, %v8650_v9  ;;  %v1236_v21 = vmul.f32 %v4535_v49, %v8651_v24  ;;  %8657 = vst [vmem:[#allocation128_spill] sm:$0xff] %v5229_v57  ;;  %v8658_v14 = vld [vmem:[#allocation90_spill] sm:$0xff]  ;;  %v5239_v9 = vld [vmem:[#allocation2 + $0xb8] sm:$0x3f]  ;;  %v8670_v10 = vld [vmem:[#allocation137_spill] sm:$0xff] }
  0xe7   : > { %v5220_v54 = vadd.f32 %v799_v56, %v739_v51  ;;  %v1323_v30 = vmul.f32 %v8654_v25, %v8653_v35  ;;  %v1324_v53 = vmul.f32 %v8654_v25, %v8655_v17  ;;  %v1701_v18 = vmul.f32 %v4756_v63, %v8656_v47  ;;  %v5237_v51 = vld [vmem:[#allocation2 + $0xb0] sm:$0xff]  ;;  %8659 = vst [vmem:[#allocation133_spill] sm:$0xff] %v5239_v9  ;;  %v5241_v24 = vld [vmem:[#allocation2 + $0xb9] sm:$0x3f]  ;;  %v5413_v9 = vld [vmem:[#allocation2] sm:$0xff] }
  0xe8   : > { %v1001_v22 = vadd.f32 %v973_v34, %v913_v19  ;;  %v1176_v36 = vadd.f32 %v1148_v23, %v5094_v3  ;;  %v1789_v12 = vmul.f32 %v4772_v8, %v8658_v14  ;;  %v1963_v56 = vmul.f32 %v4840_v4, %v8656_v47  ;;  %8660 = vst [vmem:[#allocation130_spill] sm:$0xff] %v5241_v24  ;;  %v5251_v19 = vld [vmem:[#allocation2 + $0xb2] sm:$0xff]  ;;  %v5253_v23 = vld [vmem:[#allocation2 + $0xba] sm:$0x3f] }
  0xe9   : > { %8652 = vst [vmem:[#allocation132_spill] sm:$0xff] %v5220_v54  ;;  %v5243_v17 = vadd.f32 %v1323_v30, %v1263_v15  ;;  %v2051_v38 = vmul.f32 %v4853_v20, %v8658_v14  ;;  %v2225_v3 = vmul.f32 %v4901_v11, %v8656_v47  ;;  %v2313_v34 = vmul.f32 %v4917_v37, %v8658_v14  ;;  %v5255_v28 = vld [vmem:[#allocation2 + $0xb8] sm:$0x3f]  ;;  %v8669_v14 = vld [vmem:[#allocation46_spill] sm:$0xff]  ;;  %v8734_v24 = vld [vmem:[#allocation103_spill] sm:$0xff] }
  0xea   : > { %8662 = vst [vmem:[#allocation129_spill] sm:$0xff] %v5251_v19  ;;  %8663 = vst [vmem:[#allocation135_spill] sm:$0xff] %v5253_v23  ;;  %v5257_v29 = vadd.f32 %v1061_v62, %v1001_v22  ;;  %v1264_v15 = vadd.f32 %v1236_v21, %v1176_v36  ;;  %v1817_v30 = vadd.f32 %v1789_v12, %v1701_v18  ;;  %v5260_v13 = vld [vmem:[#allocation2 + $0xb9] sm:$0x3f]  ;;  %v8671_v19 = vld [vmem:[#allocation138_spill] sm:$0xff] }
  0xeb   : > { %8661 = vst [vmem:[#allocation134_spill] sm:$0xff] %v5243_v17  ;;  %8664 = vst [vmem:[#allocation136_spill] sm:$0xff] %v5255_v28  ;;  %v1991_v45 = vadd.f32 %v1963_v56, %v5146_v32  ;;  %v5262_v2 = vld [vmem:[#allocation2 + $0xba] sm:$0x3f]  ;;  %v608_v61 = vmul.f32 %v4429_v39, %v8669_v14  ;;  %v2253_v48 = vadd.f32 %v2225_v3, %v2165_v59  ;;  %v2690_v32 = vld [vmem:[%s4402_s20 + $0x190] sm:$0xff] }
  0xec   : > { %8665 = vst [vmem:[#allocation90_spill] sm:$0xff] %v5257_v29  ;;  %8666 = vst [vmem:[#allocation155_spill] sm:$0xff] %v5260_v13  ;;  %v5264_v47 = vld [vmem:[#allocation2 + $0xb8] sm:$0x3f]  ;;  %v1702_v27 = vmul.f32 %v4756_v63, %v8670_v10  ;;  %v1790_v62 = vmul.f32 %v4772_v8, %v8671_v19  ;;  %v5278_v22 = vadd.f32 %v1324_v53, %v1264_v15  ;;  %v8675_v12 = vld [vmem:[#allocation139_spill] sm:$0xff] }
  0xed   : > { %8667 = vst [vmem:[#allocation156_spill] sm:$0xff] %v5262_v2  ;;  %8668 = vst [vmem:[#allocation157_spill] sm:$0xff] %v5264_v47  ;;  %v5272_v21 = vld [vmem:[#allocation2 + $0xb9] sm:$0x3f]  ;;  %v2079_v36 = vadd.f32 %v2051_v38, %v1991_v45  ;;  %v1877_v56 = vmul.f32 %v4809_v1, %v8675_v12  ;;  %v5284_v10 = vld [vmem:[#allocation2 + $0x90] sm:$0xff] }
  0xee   : > { %8672 = vst [vmem:[#allocation137_spill] sm:$0xff] %v5272_v21  ;;  %v5274_v18 = vld [vmem:[#allocation2 + $0xba] sm:$0x3f]  ;;  %1642 = vst [vmem:[#allocation2 + $0xb1] sm:$0xff] %v5229_v57  ;;  %v5288_v19 = vld [vmem:[#allocation2 + $0x92] sm:$0xff]  ;;  %v1818_v21 = vadd.f32 %v1790_v62, %v1702_v27 }
  0xef   : > { %8673 = vst [vmem:[#allocation138_spill] sm:$0xff] %v5274_v18  ;;  %8674 = vst [vmem:[#allocation158_spill] sm:$0xff] %v5278_v22  ;;  %v8676_v59 = vld [vmem:[#allocation140_spill] sm:$0xff]  ;;  %v2341_v18 = vadd.f32 %v2313_v34, %v2253_v48  ;;  %v8680_v57 = vld [vmem:[#allocation141_spill] sm:$0xff]  ;;  %v2139_v48 = vmul.f32 %v4867_v16, %v8675_v12 }
  0xf0   : > { %v1878_v3 = vmul.f32 %v4809_v1, %v8676_v59  ;;  %8677 = vst [vmem:[#allocation139_spill] sm:$0xff] %v5284_v10  ;;  %v5286_v29 = vld [vmem:[#allocation2 + $0x98] sm:$0x3f]  ;;  %8679 = vst [vmem:[#allocation159_spill] sm:$0xff] %v5288_v19  ;;  %v1964_v53 = vmul.f32 %v4840_v4, %v8680_v57  ;;  %v8681_v15 = vld [vmem:[#allocation142_spill] sm:$0xff] }
  0xf1   : > { %8678 = vst [vmem:[#allocation140_spill] sm:$0xff] %v5286_v29  ;;  %1643 = vst [vmem:[#allocation2 + $0xb9] sm:$0x3f] %v1615_v60  ;;  %v2052_v38 = vmul.f32 %v4853_v20, %v8681_v15  ;;  %v5294_v45 = vld [vmem:[#allocation2 + $0x98] sm:$0x3f]  ;;  %v8683_v47 = vld [vmem:[#allocation54_spill] sm:$0xff]  ;;  %v5300_v29 = vadd.f32 %v1877_v56, %v1817_v30  ;;  %v2226_v15 = vmul.f32 %v4901_v11, %v5085_v55 }
  0xf2   : > { %8682 = vst [vmem:[#allocation141_spill] sm:$0xff] %v5294_v45  ;;  %v610_v59 = vmul.f32 %v4429_v39, %v8683_v47  ;;  %v8684_v54 = vld [vmem:[#allocation16_spill] sm:$0xff]  ;;  %v5306_v60 = vadd.f32 %v1878_v3, %v1818_v21  ;;  %v1992_v57 = vadd.f32 %v1964_v53, %v5152_v52  ;;  %v8688_v34 = vld [vmem:[#allocation143_spill] sm:$0xff]  ;;  %v5315_v56 = vadd.f32 %v2139_v48, %v2079_v36  ;;  %v1654_v3 = vld [vmem:[#allocation2 + $0x8] sm:$0x3f] }
  0xf3   : > { %v698_v10 = vmul.f32 %v4432_v40, %v8684_v54  ;;  %8685 = vst [vmem:[#allocation142_spill] sm:$0xff] %v5300_v29  ;;  %v5304_v27 = vld [vmem:[#allocation2 + $0x98] sm:$0x3f]  ;;  %v2140_v62 = vmul.f32 %v4867_v16, %v8688_v34  ;;  %v8689_v45 = vld [vmem:[#allocation47_spill] sm:$0xff]  ;;  %v2401_v21 = vmul.f32 %v4983_v0, %v8675_v12  ;;  %v1742_v52 = vld [vmem:[#allocation2 + $0x9] sm:$0x3f] }
  0xf4   : > { %8686 = vst [vmem:[#allocation160_spill] sm:$0xff] %v5304_v27  ;;  %8687 = vst [vmem:[#allocation161_spill] sm:$0xff] %v5306_v60  ;;  %v784_v30 = vmul.f32 %v4435_v43, %v8689_v45  ;;  %v8691_v19 = vld [vmem:[#allocation144_spill] sm:$0xff]  ;;  %v8692_v53 = vld [vmem:[#allocation118_spill] sm:$0xff]  ;;  %v2080_v34 = vadd.f32 %v2052_v38, %v1992_v57  ;;  %v2254_v60 = vadd.f32 %v2226_v15, %v5180_v5 }
  0xf5   : > { %2718 = vst [vmem:[#allocation2 + $0x91] sm:$0xff] %v2690_v32  ;;  %8690 = vst [vmem:[#allocation143_spill] sm:$0xff] %v5315_v56  ;;  %v2314_v29 = vmul.f32 %v4917_v37, %v8691_v19  ;;  %v724_v27 = vadd.f32 %v8692_v53, %v608_v61  ;;  %v8693_v55 = vld [vmem:[#allocation145_spill] sm:$0xff]  ;;  %v2734_v2 = vld [vmem:[#allocation2 + $0x8] sm:$0x3f]  ;;  %v726_v36 = vadd.f32 %v698_v10, %v610_v59 }
  0xf6   : > { %v2402_v32 = vmul.f32 %v4983_v0, %v8693_v55  ;;  %v2822_v45 = vld [vmem:[#allocation2 + $0x9] sm:$0x3f]  ;;  %v8694_v48 = vld [vmem:[#allocation55_spill] sm:$0xff]  ;;  %v8695_v19 = vld [vmem:[#allocation56_spill] sm:$0xff]  ;;  %v5329_v12 = vadd.f32 %v2401_v21, %v2341_v18  ;;  %v5335_v57 = vadd.f32 %v2140_v62, %v2080_v34  ;;  %v5338_v53 = vmul.f32 %v4756_v63, %v1654_v3  ;;  %8735 = vst [vmem:[#allocation166_spill] sm:$0xff] %v5413_v9 }
  0xf7   : > { %v786_v56 = vmul.f32 %v4435_v43, %v8694_v48  ;;  %v873_v13 = vmul.f32 %v4522_v41, %v8695_v19  ;;  %v8697_v28 = vld [vmem:[#allocation92_spill] sm:$0xff]  ;;  %v8698_v38 = vld [vmem:[#allocation67_spill] sm:$0xff]  ;;  %v2342_v15 = vadd.f32 %v2314_v29, %v2254_v60  ;;  %v5341_v10 = vmul.f32 %v4772_v8, %v1742_v52  ;;  %v8711_v29 = vld [vmem:[#allocation117_spill] sm:$0xff] }
  0xf8   : > { %8696 = vst [vmem:[#allocation144_spill] sm:$0xff] %v5329_v12  ;;  %v1691_v61 = vmul.f32 %v4756_v63, %v8697_v28  ;;  %v1779_v5 = vmul.f32 %v4772_v8, %v8698_v38  ;;  %8699 = vst [vmem:[#allocation118_spill] sm:$0xff] %v5335_v57  ;;  %v8702_v59 = vld [vmem:[#allocation8_spill] sm:$0xff]  ;;  %v8704_v18 = vld [vmem:[#allocation11_spill] sm:$0xff]  ;;  %v5359_v60 = vadd.f32 %v8711_v29, %v5209_v44 }
  0xf9   : > { %8700 = vst [vmem:[#allocation145_spill] sm:$0xff] %v5338_v53  ;;  %8701 = vst [vmem:[#allocation56_spill] sm:$0xff] %v5341_v10  ;;  %v5345_v55 = vmul.f32 %v4525_v42, %v8702_v59  ;;  %v8705_v21 = vld [vmem:[#allocation111_spill] sm:$0xff]  ;;  %v8707_v12 = vld [vmem:[#allocation113_spill] sm:$0xff]  ;;  %v5361_v3 = vadd.f32 %v2402_v32, %v2342_v15  ;;  %v812_v10 = vadd.f32 %v784_v30, %v724_v27 }
  0xfa   : > { %v5349_v19 = vrot.slane %v8705_v21, %v8704_v18  ;;  %v5352_v48 = vmul.f32 %v8707_v12, %v2734_v2  ;;  %v8709_v62 = vld [vmem:[#allocation116_spill] sm:$0xff]  ;;  %8712 = vst [vmem:[#allocation117_spill] sm:$0xff] %v5359_v60  ;;  %v872_v53 = vmul.f32 %v4522_v41, %v8683_v47  ;;  %v8715_v21 = vld [vmem:[#allocation19_spill] sm:$0xff]  ;;  %v1807_v44 = vadd.f32 %v1779_v5, %v1691_v61  ;;  %v8718_v29 = vld [vmem:[#allocation94_spill] sm:$0xff] }
  0xfb   : > { %8703 = vst [vmem:[#allocation162_spill] sm:$0xff] %v5345_v55  ;;  %v5355_v34 = vmul.f32 %v8709_v62, %v2822_v45  ;;  %8713 = vst [vmem:[#allocation163_spill] sm:$0xff] %v5361_v3  ;;  %v5363_v52 = vld [vmem:[#allocation2 + $0xf1] sm:$0xff]  ;;  %v901_v59 = vadd.f32 %v873_v13, %v8715_v21  ;;  %v8716_v55 = vld [vmem:[#allocation57_spill] sm:$0xff]  ;;  %v814_v45 = vadd.f32 %v786_v56, %v726_v36 }
  0xfc   : > { %8706 = vst [vmem:[#allocation111_spill] sm:$0xff] %v5349_v19  ;;  %8708 = vst [vmem:[#allocation113_spill] sm:$0xff] %v5352_v48  ;;  %v961_v2 = vmul.f32 %v4525_v42, %v8716_v55  ;;  %v1214_v48 = vld [vmem:[#allocation2 + $0xf9] sm:$0x3f]  ;;  %v1867_v32 = vmul.f32 %v4809_v1, %v8718_v29  ;;  %v5376_v27 = vmul.f32 %v4522_v41, %v8669_v14  ;;  %v8722_v13 = vld [vmem:[#allocation50_spill] sm:$0xff] }
  0xfd   : > { %8710 = vst [vmem:[#allocation116_spill] sm:$0xff] %v5355_v34  ;;  %8714 = vst [vmem:[#allocation164_spill] sm:$0xff] %v5363_v52  ;;  %v8717_v34 = vld [vmem:[#allocation36_spill] sm:$0xff]  ;;  %v5384_v55 = vmul.f32 %v4525_v42, %v8722_v13  ;;  %v8724_v56 = vld [vmem:[#allocation51_spill] sm:$0xff]  ;;  %v960_v29 = vmul.f32 %v4525_v42, %v8684_v54 }
  0xfe   : > { %v874_v57 = vmul.f32 %v4522_v41, %v8717_v34  ;;  %8719 = vst [vmem:[#allocation19_spill] sm:$0xff] %v5376_v27  ;;  %v8720_v30 = vld [vmem:[#allocation48_spill] sm:$0xff]  ;;  %v5388_v36 = vmul.f32 %v4530_v46, %v8724_v56  ;;  %v8727_v34 = vld [vmem:[#allocation17_spill] sm:$0xff]  ;;  %v8729_v13 = vld [vmem:[#allocation27_spill] sm:$0xff]  ;;  %v989_v56 = vadd.f32 %v961_v2, %v901_v59  ;;  %v5405_v27 = vmul.f32 %v4535_v49, %v1214_v48 }
  0xff   : > { %v5380_v15 = vmul.f32 %v4522_v41, %v8720_v30  ;;  %8723 = vst [vmem:[#allocation48_spill] sm:$0xff] %v5384_v55  ;;  %v1126_v61 = vld [vmem:[#allocation2 + $0xf8] sm:$0x3f]  ;;  %v962_v47 = vmul.f32 %v4525_v42, %v8727_v34  ;;  %v5398_v30 = vmul.f32 %v4535_v49, %v5363_v52  ;;  %v604_v14 = vmul.f32 %v4429_v39, %v8729_v13  ;;  %v8732_v54 = vld [vmem:[#allocation18_spill] sm:$0xff] }
 0x100   : > { %8725 = vst [vmem:[#allocation50_spill] sm:$0xff] %v5388_v36  ;;  %v5390_v5 = vld [vmem:[#allocation2 + $0xf2] sm:$0xff]  ;;  %v1302_v21 = vld [vmem:[#allocation2 + $0xfa] sm:$0x3f]  ;;  %v900_v55 = vadd.f32 %v872_v53, %v812_v10  ;;  %v8730_v36 = vld [vmem:[#allocation58_spill] sm:$0xff]  ;;  %v902_v60 = vadd.f32 %v874_v57, %v814_v45  ;;  %v5409_v23 = vmul.f32 %v4535_v49, %v8732_v54  ;;  %v1895_v34 = vadd.f32 %v1867_v32, %v1807_v44 }
 0x101   : > { %8721 = vst [vmem:[#allocation57_spill] sm:$0xff] %v5380_v15  ;;  %8726 = vst [vmem:[#allocation51_spill] sm:$0xff] %v5390_v5  ;;  %v1049_v15 = vmul.f32 %v4530_v46, %v8730_v36  ;;  %v5417_v53 = vmul.f32 %v5413_v9, %v4545_v58  ;;  %v5420_v10 = vmul.f32 %v4545_v58, %v1126_v61  ;;  %v8740_v59 = vld [vmem:[#allocation28_spill] sm:$0xff]  ;;  %v8741_v45 = vld [vmem:[#allocation78_spill] sm:$0xff] }
 0x102   : > { %8728 = vst [vmem:[#allocation165_spill] sm:$0xff] %v5398_v30  ;;  %8731 = vst [vmem:[#allocation58_spill] sm:$0xff] %v5405_v27  ;;  %v1955_v30 = vmul.f32 %v4840_v4, %v8734_v24  ;;  %v5424_v48 = vmul.f32 %v8654_v25, %v5390_v5  ;;  %v5427_v54 = vmul.f32 %v8654_v25, %v1302_v21  ;;  %v8742_v32 = vld [vmem:[#allocation33_spill] sm:$0xff]  ;;  %v8747_v21 = vld [vmem:[#allocation31_spill] sm:$0xff] }
 0x103   : > { %8733 = vst [vmem:[#allocation18_spill] sm:$0xff] %v5409_v23  ;;  %8736 = vst [vmem:[#allocation167_spill] sm:$0xff] %v5417_v53  ;;  %v720_v57 = vadd.f32 %v5193_v7, %v604_v14  ;;  %v780_v2 = vmul.f32 %v4435_v43, %v8740_v59  ;;  %v1689_v44 = vmul.f32 %v4756_v63, %v8741_v45  ;;  %v8745_v23 = vld [vmem:[#allocation30_spill] sm:$0xff] }
 0x104   : > { %8737 = vst [vmem:[#allocation168_spill] sm:$0xff] %v5420_v10  ;;  %8738 = vst [vmem:[#allocation169_spill] sm:$0xff] %v5424_v48  ;;  %v1777_v36 = vmul.f32 %v4772_v8, %v8742_v32  ;;  %v5436_v61 = vadd.f32 %v960_v29, %v900_v55  ;;  %v5438_v24 = vadd.f32 %v1049_v15, %v989_v56  ;;  %v8752_v32 = vld [vmem:[#allocation69_spill] sm:$0xff]  ;;  %v5456_v15 = vld [vmem:[#allocation2 + $0xf8] sm:$0x3f] }
 0x105   : > { %8739 = vst [vmem:[#allocation170_spill] sm:$0xff] %v5427_v54  ;;  %v5442_v48 = vmul.f32 %v4772_v8, %v8745_v23  ;;  %v5446_v7 = vmul.f32 %v4525_v42, %v8747_v21  ;;  %v5448_v14 = vadd.f32 %v962_v47, %v902_v60  ;;  %v8750_v54 = vld [vmem:[#allocation39_spill] sm:$0xff]  ;;  %v1983_v59 = vadd.f32 %v1955_v30, %v1895_v34  ;;  %v8753_v55 = vld [vmem:[#allocation64_spill] sm:$0xff]  ;;  %v8755_v23 = vld [vmem:[#allocation42_spill] sm:$0xff] }
 0x106   : > { %8743 = vst [vmem:[#allocation171_spill] sm:$0xff] %v5436_v61  ;;  %8744 = vst [vmem:[#allocation172_spill] sm:$0xff] %v5438_v24  ;;  %v5452_v45 = vmul.f32 %v4530_v46, %v8750_v54  ;;  %v2043_v29 = vmul.f32 %v4853_v20, %v8752_v32  ;;  %v5460_v56 = vmul.f32 %v4535_v49, %v8753_v55  ;;  %v8757_v47 = vld [vmem:[#allocation66_spill] sm:$0xff]  ;;  %v5474_v30 = vld [vmem:[#allocation2 + $0xf9] sm:$0x3f] }
 0x107   : > { %8746 = vst [vmem:[#allocation173_spill] sm:$0xff] %v5442_v48  ;;  %8748 = vst [vmem:[#allocation31_spill] sm:$0xff] %v5446_v7  ;;  %v5464_v21 = vmul.f32 %v4545_v58, %v8755_v23  ;;  %v5468_v60 = vmul.f32 %v8654_v25, %v8757_v47  ;;  %v8759_v48 = vld [vmem:[#allocation68_spill] sm:$0xff]  ;;  %v5476_v32 = vadd.f32 %v780_v2, %v720_v57  ;;  %v8762_v54 = vld [vmem:[#allocation70_spill] sm:$0xff] }
 0x108   : > { %8749 = vst [vmem:[#allocation174_spill] sm:$0xff] %v5448_v14  ;;  %8751 = vst [vmem:[#allocation175_spill] sm:$0xff] %v5452_v45  ;;  %v5472_v34 = vmul.f32 %v8654_v25, %v8759_v48  ;;  %v5480_v55 = vmul.f32 %v4756_v63, %v8762_v54  ;;  %v5488_v47 = vld [vmem:[#allocation2 + $0x99] sm:$0x3f]  ;;  %v5516_v24 = vmul.f32 %v4840_v4, %v8697_v28  ;;  %v5518_v61 = vld [vmem:[#allocation2 + $0x20] sm:$0xff] }
 0x109   : > { %8754 = vst [vmem:[#allocation64_spill] sm:$0xff] %v5460_v56  ;;  %8756 = vst [vmem:[#allocation42_spill] sm:$0xff] %v5464_v21  ;;  %v8764_v56 = vld [vmem:[#allocation72_spill] sm:$0xff]  ;;  %v5486_v21 = vadd.f32 %v1777_v36, %v1689_v44  ;;  %v8769_v44 = vld [vmem:[#allocation79_spill] sm:$0xff]  ;;  %v5552_v53 = vmul.f32 %v4853_v20, %v8698_v38 }
 0x10a   : > { %8758 = vst [vmem:[#allocation66_spill] sm:$0xff] %v5468_v60  ;;  %8760 = vst [vmem:[#allocation68_spill] sm:$0xff] %v5472_v34  ;;  %v5484_v23 = vmul.f32 %v4809_v1, %v8764_v56  ;;  %v5490_v60 = vld [vmem:[#allocation2 + $0x9a] sm:$0x3f]  ;;  %v5508_v36 = vmul.f32 %v4809_v1, %v8769_v44  ;;  %v5520_v45 = vld [vmem:[#allocation2 + $0xc0] sm:$0xff] }
 0x10b   : > { %8761 = vst [vmem:[#allocation176_spill] sm:$0xff] %v5476_v32  ;;  %8763 = vst [vmem:[#allocation177_spill] sm:$0xff] %v5480_v55  ;;  %v5492_v48 = vld [vmem:[#allocation2 + $0x99] sm:$0x3f]  ;;  %v5522_v14 = vld [vmem:[#allocation2 + $0xc8] sm:$0x3f] }
 0x10c   : > { %8765 = vst [vmem:[#allocation72_spill] sm:$0xff] %v5484_v23  ;;  %8766 = vst [vmem:[#allocation178_spill] sm:$0xff] %v5486_v21  ;;  %v5494_v34 = vld [vmem:[#allocation2 + $0x9a] sm:$0x3f]  ;;  %v5528_v44 = vld [vmem:[#allocation2 + $0xca] sm:$0x3f] }
 0x10d   : > { %v5496_v57 = vld [vmem:[#allocation2 + $0x99] sm:$0x3f]  ;;  %8770 = vst [vmem:[#allocation180_spill] sm:$0xff] %v5508_v36  ;;  %8773 = vst [vmem:[#allocation181_spill] sm:$0xff] %v5516_v24  ;;  %v5530_v36 = vld [vmem:[#allocation2 + $0xc8] sm:$0x3f] }
 0x10e   : > { %v5498_v2 = vld [vmem:[#allocation2 + $0x9a] sm:$0x3f]  ;;  %8774 = vst [vmem:[#allocation182_spill] sm:$0xff] %v5520_v45  ;;  %8775 = vst [vmem:[#allocation183_spill] sm:$0xff] %v5522_v14  ;;  %v5536_v28 = vld [vmem:[#allocation2 + $0xc8] sm:$0x3f] }
 0x10f   : > { %v5500_v54 = vld [vmem:[#allocation2 + $0xfa] sm:$0x3f]  ;;  %8778 = vst [vmem:[#allocation186_spill] sm:$0xff] %v5528_v44  ;;  %8779 = vst [vmem:[#allocation187_spill] sm:$0xff] %v5530_v36  ;;  %v5538_v24 = vld [vmem:[#allocation2 + $0xc9] sm:$0x3f] }
 0x110   : > { %v8767_v55 = vld [vmem:[#allocation96_spill] sm:$0xff]  ;;  %8782 = vst [vmem:[#allocation190_spill] sm:$0xff] %v5536_v28  ;;  %8783 = vst [vmem:[#allocation191_spill] sm:$0xff] %v5538_v24  ;;  %v5540_v7 = vld [vmem:[#allocation2 + $0xca] sm:$0x3f] }
 0x111   : > { %v5504_v56 = vmul.f32 %v8767_v55, %v8767_v55  ;;  %v8771_v21 = vld [vmem:[#allocation80_spill] sm:$0xff]  ;;  %v5524_v55 = vld [vmem:[#allocation2 + $0xc9] sm:$0x3f]  ;;  %8784 = vst [vmem:[#allocation192_spill] sm:$0xff] %v5540_v7  ;;  %v5542_v32 = vld [vmem:[#allocation2 + $0xa0] sm:$0xff]  ;;  %v5562_v7 = vadd.f32 %v2043_v29, %v1983_v59 }
 0x112   : > { %v5512_v23 = vmul.f32 %v4840_v4, %v8771_v21  ;;  %8776 = vst [vmem:[#allocation184_spill] sm:$0xff] %v5524_v55  ;;  %v5532_v21 = vld [vmem:[#allocation2 + $0xc9] sm:$0x3f]  ;;  %8785 = vst [vmem:[#allocation193_spill] sm:$0xff] %v5542_v32  ;;  %v8804_v59 = vld [vmem:[#allocation108_spill] sm:$0xff] }
 0x113   : > { %8768 = vst [vmem:[#allocation179_spill] sm:$0xff] %v5504_v56  ;;  %v5526_v56 = vld [vmem:[#allocation2 + $0xc2] sm:$0xff]  ;;  %8780 = vst [vmem:[#allocation188_spill] sm:$0xff] %v5532_v21  ;;  %v5584_v29 = vmul.f32 %v4901_v11, %v8804_v59  ;;  %v5604_v59 = vld [vmem:[#allocation2 + $0xd9] sm:$0x3f] }
 0x114   : > { %8772 = vst [vmem:[#allocation80_spill] sm:$0xff] %v5512_v23  ;;  %8777 = vst [vmem:[#allocation185_spill] sm:$0xff] %v5526_v56  ;;  %v5534_v23 = vld [vmem:[#allocation2 + $0xca] sm:$0x3f]  ;;  %v5546_v13 = vld [vmem:[#allocation2 + $0xa2] sm:$0xff] }
 0x115   : > { %8781 = vst [vmem:[#allocation189_spill] sm:$0xff] %v5534_v23  ;;  %v5544_v27 = vld [vmem:[#allocation2 + $0xa8] sm:$0x3f]  ;;  %8787 = vst [vmem:[#allocation195_spill] sm:$0xff] %v5546_v13  ;;  %v8790_v56 = vld [vmem:[#allocation95_spill] sm:$0xff] }
 0x116   : > { %8786 = vst [vmem:[#allocation194_spill] sm:$0xff] %v5544_v27  ;;  %v5548_v10 = vld [vmem:[#allocation2 + $0xa8] sm:$0x3f]  ;;  %8789 = vst [vmem:[#allocation197_spill] sm:$0xff] %v5552_v53  ;;  %v5556_v23 = vmul.f32 %v4853_v20, %v8790_v56  ;;  %v5616_v21 = vld [vmem:[#allocation2 + $0xd8] sm:$0x3f] }
 0x117   : > { %8788 = vst [vmem:[#allocation196_spill] sm:$0xff] %v5548_v10  ;;  %v8792_v28 = vld [vmem:[#allocation98_spill] sm:$0xff]  ;;  %8794 = vst [vmem:[#allocation198_spill] sm:$0xff] %v5562_v7  ;;  %v5588_v7 = vmul.f32 %v5413_v9, %v4901_v11  ;;  %v5618_v36 = vld [vmem:[#allocation2 + $0xd9] sm:$0x3f] }
 0x118   : > { %8791 = vst [vmem:[#allocation95_spill] sm:$0xff] %v5556_v23  ;;  %v5560_v24 = vmul.f32 %v4867_v16, %v8792_v28  ;;  %v5564_v32 = vld [vmem:[#allocation2 + $0xa9] sm:$0x3f]  ;;  %8805 = vst [vmem:[#allocation108_spill] sm:$0xff] %v5584_v29  ;;  %v5606_v29 = vld [vmem:[#allocation2 + $0xd2] sm:$0xff] }
 0x119   : > { %8795 = vst [vmem:[#allocation199_spill] sm:$0xff] %v5564_v32  ;;  %v5566_v27 = vld [vmem:[#allocation2 + $0xaa] sm:$0x3f]  ;;  %8806 = vst [vmem:[#allocation207_spill] sm:$0xff] %v5588_v7  ;;  %v5608_v7 = vld [vmem:[#allocation2 + $0xda] sm:$0x3f] }
 0x11a   : > { %8793 = vst [vmem:[#allocation98_spill] sm:$0xff] %v5560_v24  ;;  %8796 = vst [vmem:[#allocation200_spill] sm:$0xff] %v5566_v27  ;;  %v5568_v13 = vld [vmem:[#allocation2 + $0xa9] sm:$0x3f]  ;;  %v1428_v24 = vmul.f32 %v5117_v33, %v5117_v33  ;;  %v5612_v27 = vld [vmem:[#allocation2 + $0xd9] sm:$0x3f] }
 0x11b   : > { %8797 = vst [vmem:[#allocation201_spill] sm:$0xff] %v5568_v13  ;;  %v5570_v10 = vld [vmem:[#allocation2 + $0xaa] sm:$0x3f]  ;;  %8809 = vst [vmem:[#allocation210_spill] sm:$0xff] %v5604_v59  ;;  %v5610_v13 = vld [vmem:[#allocation2 + $0xd8] sm:$0x3f] }
 0x11c   : > { %8798 = vst [vmem:[#allocation202_spill] sm:$0xff] %v5570_v10  ;;  %v5572_v38 = vld [vmem:[#allocation2 + $0xa8] sm:$0x3f]  ;;  %8810 = vst [vmem:[#allocation211_spill] sm:$0xff] %v5606_v29  ;;  %v5614_v32 = vld [vmem:[#allocation2 + $0xda] sm:$0x3f] }
 0x11d   : > { %8799 = vst [vmem:[#allocation203_spill] sm:$0xff] %v5572_v38  ;;  %v5574_v53 = vld [vmem:[#allocation2 + $0xa9] sm:$0x3f]  ;;  %v5592_v38 = vld [vmem:[#allocation2 + $0x18] sm:$0x3f]  ;;  %8811 = vst [vmem:[#allocation212_spill] sm:$0xff] %v5608_v7 }
 0x11e   : > { %8800 = vst [vmem:[#allocation204_spill] sm:$0xff] %v5574_v53  ;;  %v5576_v56 = vld [vmem:[#allocation2 + $0xaa] sm:$0x3f]  ;;  %v5594_v53 = vld [vmem:[#allocation2 + $0x19] sm:$0x3f]  ;;  %8812 = vst [vmem:[#allocation213_spill] sm:$0xff] %v5610_v13 }
 0x11f   : > { %8801 = vst [vmem:[#allocation205_spill] sm:$0xff] %v5576_v56  ;;  %v8802_v23 = vld [vmem:[#allocation106_spill] sm:$0xff]  ;;  %8813 = vst [vmem:[#allocation214_spill] sm:$0xff] %v5612_v27  ;;  %v5620_v44 = vld [vmem:[#allocation2 + $0xda] sm:$0x3f] }
 0x120   : > { %v5580_v28 = vmul.f32 %v4867_v16, %v8802_v23  ;;  %v5596_v56 = vld [vmem:[#allocation2 + $0x28] sm:$0x3f]  ;;  %v5600_v23 = vld [vmem:[#allocation2 + $0xd0] sm:$0xff]  ;;  %8814 = vst [vmem:[#allocation215_spill] sm:$0xff] %v5614_v32  ;;  %8815 = vst [vmem:[#allocation216_spill] sm:$0xff] %v5616_v21  ;;  %v5634_v32 = vmul.f32 %v4901_v11, %v5456_v15  ;;  %v5704_v21 = vsel %vm1363_vm0, %v5117_v33, 0.0 }
 0x121   : > { %v5598_v10 = vld [vmem:[#allocation2 + $0x29] sm:$0x3f]  ;;  %8807 = vst [vmem:[#allocation208_spill] sm:$0xff] %v5600_v23  ;;  %8816 = vst [vmem:[#allocation217_spill] sm:$0xff] %v5618_v36  ;;  %v5622_v23 = vld [vmem:[#allocation2 + $0xb0] sm:$0xff] }
 0x122   : > { %8803 = vst [vmem:[#allocation206_spill] sm:$0xff] %v5580_v28  ;;  %v5602_v28 = vld [vmem:[#allocation2 + $0xd8] sm:$0x3f]  ;;  %8817 = vst [vmem:[#allocation218_spill] sm:$0xff] %v5620_v44  ;;  %v8824_v27 = vld [vmem:[#allocation123_spill] sm:$0xff] }
 0x123   : > { %8808 = vst [vmem:[#allocation209_spill] sm:$0xff] %v5602_v28  ;;  %8818 = vst [vmem:[#allocation219_spill] sm:$0xff] %v5622_v23  ;;  %v5624_v28 = vld [vmem:[#allocation2 + $0xb8] sm:$0x3f]  ;;  %v5638_v29 = vmul.f32 %v4901_v11, %v8824_v27  ;;  %v2694_v33 = vld [vmem:[%s4402_s20 + $0x1f0] sm:$0xff] }
 0x124   : > { %8819 = vst [vmem:[#allocation220_spill] sm:$0xff] %v5624_v28  ;;  %v5626_v59 = vld [vmem:[#allocation2 + $0xb2] sm:$0xff]  ;;  %8823 = vst [vmem:[#allocation224_spill] sm:$0xff] %v5634_v32  ;;  %v5652_v15 = vld [vmem:[#allocation2 + $0xba] sm:$0x3f] }
 0x125   : > { %8820 = vst [vmem:[#allocation221_spill] sm:$0xff] %v5626_v59  ;;  %v5628_v7 = vld [vmem:[#allocation2 + $0xb8] sm:$0x3f]  ;;  %8825 = vst [vmem:[#allocation123_spill] sm:$0xff] %v5638_v29  ;;  %v5646_v59 = vmul.f32 %v4917_v37, %v5363_v52  ;;  %v8836_v28 = vld [vmem:[#allocation86_spill] sm:$0xff] }
 0x126   : > { %8821 = vst [vmem:[#allocation222_spill] sm:$0xff] %v5628_v7  ;;  %v5630_v13 = vld [vmem:[#allocation2 + $0xb8] sm:$0x3f]  ;;  %v5648_v7 = vld [vmem:[#allocation2 + $0x30] sm:$0xff]  ;;  %8830 = vst [vmem:[#allocation227_spill] sm:$0xff] %v5652_v15  ;;  %v5669_v36 = vmul.f32 %v4917_v37, %v8836_v28  ;;  %v5686_v28 = vmul.f32 %v4983_v0, %v5500_v54 }
 0x127   : > { %8822 = vst [vmem:[#allocation223_spill] sm:$0xff] %v5630_v13  ;;  %v8826_v44 = vld [vmem:[#allocation124_spill] sm:$0xff]  ;;  %8828 = vst [vmem:[#allocation225_spill] sm:$0xff] %v5646_v59  ;;  %v5665_v59 = vmul.f32 %v4917_v37, %v5474_v30  ;;  %v1617_v30 = vld [vmem:[%s4402_s20 + $0x230] sm:$0x3f] }
 0x128   : > { %v5642_v23 = vmul.f32 %v4917_v37, %v8826_v44  ;;  %v5650_v13 = vld [vmem:[#allocation2 + $0xb9] sm:$0x3f]  ;;  %8837 = vst [vmem:[#allocation86_spill] sm:$0xff] %v5669_v36  ;;  %8842 = vst [vmem:[#allocation235_spill] sm:$0xff] %v5686_v28  ;;  %v4098_v36 = vld [vmem:[#allocation2 + $0x21] sm:$0xff] }
 0x129   : > { %8829 = vst [vmem:[#allocation226_spill] sm:$0xff] %v5650_v13  ;;  %v5654_v32 = vld [vmem:[#allocation2 + $0xb9] sm:$0x3f]  ;;  %8835 = vst [vmem:[#allocation232_spill] sm:$0xff] %v5665_v59  ;;  %v8838_v13 = vld [vmem:[#allocation126_spill] sm:$0xff] }
 0x12a   : > { %8827 = vst [vmem:[#allocation124_spill] sm:$0xff] %v5642_v23  ;;  %8831 = vst [vmem:[#allocation228_spill] sm:$0xff] %v5654_v32  ;;  %v5656_v27 = vld [vmem:[#allocation2 + $0xba] sm:$0x3f]  ;;  %v2691_v23 = vld [vmem:[%s4402_s20 + $0x1a8] sm:$0x3f]  ;;  %v5673_v15 = vmul.f32 %v4983_v0, %v8838_v13  ;;  %v1430_v13 = vmul.f32 %v5278_v22, %v5278_v22 }
 0x12b   : > { %8832 = vst [vmem:[#allocation229_spill] sm:$0xff] %v5656_v27  ;;  %v5658_v29 = vld [vmem:[#allocation2 + $0xb9] sm:$0x3f]  ;;  %v5677_v27 = vmul.f32 %v4983_v0, %v5390_v5  ;;  %2719 = vst [vmem:[#allocation2 + $0x99] sm:$0x3f] %v2691_v23  ;;  %v2692_v59 = vld [vmem:[%s4402_s20 + $0x1c0] sm:$0xff] }
 0x12c   : > { %8833 = vst [vmem:[#allocation230_spill] sm:$0xff] %v5658_v29  ;;  %v5660_v44 = vld [vmem:[#allocation2 + $0xba] sm:$0x3f]  ;;  %8839 = vst [vmem:[#allocation126_spill] sm:$0xff] %v5673_v15  ;;  %v2769_v15 = vmul.f32 %v8707_v12, %v5518_v61  ;;  %v5699_v28 = vld [vmem:[%s4402_s20 + $0x270] sm:$0xff]  ;;  %v5707_v61 = vsel %vm1363_vm0, %v1428_v24, 0.0  ;;  %v2768_v24 = vmul.f32 %v8707_v12, %v5592_v38  ;;  %v5735_v38 = vmul.f32 %v5243_v17, %v5243_v17 }
 0x12d   : > { %8834 = vst [vmem:[#allocation231_spill] sm:$0xff] %v5660_v44  ;;  %8840 = vst [vmem:[#allocation233_spill] sm:$0xff] %v5677_v27  ;;  %v2913_v44 = vld [vmem:[#allocation2 + $0x22] sm:$0xff]  ;;  %v5680_v32 = vld [vmem:[%s4402_s20 + $0x218] sm:$0xff]  ;;  %v2857_v27 = vmul.f32 %v4098_v36, %v8709_v62  ;;  %v5711_v36 = vmul.f32 %v4983_v0, %v5014_v26  ;;  %v2856_v26 = vmul.f32 %v8709_v62, %v5594_v53 }
 0x12e   : > { %8841 = vst [vmem:[#allocation234_spill] sm:$0xff] %v5680_v32  ;;  %v5694_v23 = vld [vmem:[%s4423_s15 + $0x14] sm:$0x7]  ;;  %1644 = vst [vmem:[#allocation2 + $0xc1] sm:$0xff] %v5680_v32  ;;  %v537_v29 = vld [vmem:[%s4402_s20 + $0x288] sm:$0x3f]  ;;  %v798_v32 = vmul.f32 %v4435_v43, %v8653_v35 }
 0x12f   : > { %1645 = vst [vmem:[#allocation2 + $0xc9] sm:$0x3f] %v1617_v30  ;;  %2720 = vst [vmem:[#allocation2 + $0xa1] sm:$0xff] %v2692_v59  ;;  %v2693_v54 = vld [vmem:[%s4402_s20 + $0x1d8] sm:$0x3f]  ;;  %v5717_v59 = vld [vmem:[%s4402_s20 + $0x248] sm:$0xff] }
 0x130   : > { %8843 = vst [vmem:[#allocation236_spill] sm:$0xff] %v5699_v28  ;;  %8844 = vst [vmem:[#allocation237_spill] sm:$0xff] %v5704_v21  ;;  %v1619_v30 = vld [vmem:[%s4402_s20 + $0x260] sm:$0x3f]  ;;  %v2735_v21 = vld [vmem:[#allocation2 + $0x10] sm:$0xff] }
 0x131   : > { %8845 = vst [vmem:[#allocation238_spill] sm:$0xff] %v5707_v61  ;;  %8846 = vst [vmem:[#allocation239_spill] sm:$0xff] %v5711_v36  ;;  %v2911_v36 = vld [vmem:[#allocation2 + $0x12] sm:$0xff]  ;;  %v2770_v61 = vmul.f32 %v8707_v12, %v5596_v56  ;;  %v2912_v53 = vld [vmem:[#allocation2 + $0x1a] sm:$0x3f]  ;;  %v2771_v56 = vmul.f32 %v8707_v12, %v5648_v7  ;;  %v5749_v14 = vmul.f32 %v8707_v12, %v2735_v21 }
 0x132   : > { %2721 = vst [vmem:[#allocation2 + $0xa9] sm:$0x3f] %v2693_v54  ;;  %565 = vst [vmem:[#allocation2 + $0xe1] sm:$0xff] %v5699_v28  ;;  %v2858_v54 = vmul.f32 %v8709_v62, %v5598_v10  ;;  %v1060_v28 = vmul.f32 %v4530_v46, %v8653_v35  ;;  %v2914_v5 = vld [vmem:[#allocation2 + $0x2a] sm:$0x3f]  ;;  %v4099_v52 = vld [vmem:[#allocation2 + $0x31] sm:$0xff] }
 0x133   : > { %566 = vst [vmem:[#allocation2 + $0xe9] sm:$0x3f] %v537_v29  ;;  %8847 = vst [vmem:[#allocation240_spill] sm:$0xff] %v5717_v59  ;;  %v2695_v29 = vld [vmem:[%s4402_s20 + $0x208] sm:$0x3f]  ;;  %v2859_v10 = vmul.f32 %v4099_v52, %v8709_v62  ;;  %v5745_v35 = vsel %vm1363_vm0, %v1430_v13, 0.0  ;;  %v2946_v21 = vmul.f32 %v5349_v19, %v2914_v5 }
 0x134   : > { %1646 = vst [vmem:[#allocation2 + $0xd1] sm:$0xff] %v5717_v59  ;;  %1647 = vst [vmem:[#allocation2 + $0xd9] sm:$0x3f] %v1619_v30  ;;  %v2740_v55 = vld [vmem:[#allocation2 + $0x38] sm:$0x3f]  ;;  %v2885_v30 = vadd.f32 %v2857_v27, %v2769_v15  ;;  %v5761_v15 = vadd.f32 %v2856_v26, %v2768_v24  ;;  %v5764_v27 = vmul.f32 %v5349_v19, %v2912_v53  ;;  %v8859_v53 = vld [vmem:[#allocation10_spill] sm:$0xff] }
 0x135   : > { %2722 = vst [vmem:[#allocation2 + $0xb1] sm:$0xff] %v2694_v33  ;;  %8848 = vst [vmem:[#allocation241_spill] sm:$0xff] %v5735_v38  ;;  %v5742_v33 = vsel %vm1363_vm0, %v5278_v22, 0.0  ;;  %v2945_v38 = vmul.f32 %v5349_v19, %v2913_v44  ;;  %v2828_v17 = vld [vmem:[#allocation2 + $0x39] sm:$0x3f]  ;;  %v4100_v45 = vld [vmem:[#allocation2 + $0x11] sm:$0xff]  ;;  %v2886_v44 = vadd.f32 %v2858_v54, %v2770_v61  ;;  %v5772_v24 = vmul.f32 %v5361_v3, %v5361_v3 }
 0x136   : > { %2723 = vst [vmem:[#allocation2 + $0xb9] sm:$0x3f] %v2695_v29  ;;  %8849 = vst [vmem:[#allocation242_spill] sm:$0xff] %v5742_v33  ;;  %v2915_v59 = vld [vmem:[#allocation2 + $0x32] sm:$0xff]  ;;  %v5752_v9 = vmul.f32 %v4100_v45, %v8709_v62  ;;  %v5755_v29 = vmul.f32 %v5349_v19, %v2911_v36  ;;  %v8854_v22 = vld [vmem:[#allocation9_spill] sm:$0xff]  ;;  %v2772_v45 = vmul.f32 %v8707_v12, %v2740_v55 }
 0x137   : > { %8850 = vst [vmem:[#allocation243_spill] sm:$0xff] %v5745_v35  ;;  %8851 = vst [vmem:[#allocation244_spill] sm:$0xff] %v5749_v14  ;;  %v5759_v33 = vrot.slane %v5694_v23, %v8854_v22  ;;  %v3000_v13 = vld [vmem:[#allocation2 + $0x28] sm:$0x3f]  ;;  %v2887_v14 = vadd.f32 %v2859_v10, %v2771_v56  ;;  %v2860_v36 = vmul.f32 %v8709_v62, %v2828_v17  ;;  %v5780_v5 = vld [vmem:[#allocation2 + $0x40] sm:$0xff] }
 0x138   : > { %8852 = vst [vmem:[#allocation245_spill] sm:$0xff] %v5752_v9  ;;  %8853 = vst [vmem:[#allocation246_spill] sm:$0xff] %v5755_v29  ;;  %v2916_v29 = vld [vmem:[#allocation2 + $0x3a] sm:$0x3f]  ;;  %v2947_v9 = vmul.f32 %v5349_v19, %v2915_v59  ;;  %v5774_v26 = vadd.f32 %v2945_v38, %v2885_v30  ;;  %v5778_v61 = vrot.slane %v5694_v23, %v8859_v53  ;;  %v2696_v54 = vld [vmem:[%s4402_s20 + $0x220] sm:$0xff] }
 0x139   : > { %8855 = vst [vmem:[#allocation247_spill] sm:$0xff] %v5761_v15  ;;  %8856 = vst [vmem:[#allocation248_spill] sm:$0xff] %v5764_v27  ;;  %v624_v55 = vmul.f32 %v4429_v39, %v5237_v51  ;;  %v5786_v17 = vmul.f32 %v5759_v33, %v3000_v13  ;;  %v5790_v59 = vmul.f32 %v5759_v33, %v5648_v7  ;;  %v5795_v10 = vld [vmem:[#allocation2 + $0xc0] sm:$0xff]  ;;  %v5797_v30 = vld [vmem:[#allocation2 + $0xc8] sm:$0x3f] }
 0x13a   : > { %8857 = vst [vmem:[#allocation249_spill] sm:$0xff] %v5772_v24  ;;  %8858 = vst [vmem:[#allocation250_spill] sm:$0xff] %v5774_v26  ;;  %v712_v38 = vmul.f32 %v4432_v40, %v5100_v50  ;;  %v826_v56 = vadd.f32 %v798_v32, %v5187_v31  ;;  %v2697_v24 = vld [vmem:[%s4402_s20 + $0x238] sm:$0x3f]  ;;  %v5800_v26 = vadd.f32 %v2946_v21, %v2886_v44  ;;  %v5814_v31 = vld [vmem:[#allocation2 + $0xca] sm:$0x3f] }
 0x13b   : > { %8860 = vst [vmem:[#allocation251_spill] sm:$0xff] %v5786_v17  ;;  %8861 = vst [vmem:[#allocation252_spill] sm:$0xff] %v5790_v59  ;;  %v5803_v27 = vmul.f32 %v4099_v52, %v5778_v61  ;;  %v2948_v13 = vmul.f32 %v5349_v19, %v2916_v29  ;;  %v5808_v7 = vrot.slane %v5694_v23, %v8704_v18  ;;  %v5810_v59 = vld [vmem:[#allocation2 + $0xc9] sm:$0x3f] }
 0x13c   : > { %8862 = vst [vmem:[#allocation253_spill] sm:$0xff] %v5795_v10  ;;  %8863 = vst [vmem:[#allocation254_spill] sm:$0xff] %v5797_v30  ;;  %v5812_v17 = vld [vmem:[#allocation2 + $0xc2] sm:$0xff]  ;;  %v2888_v32 = vadd.f32 %v2860_v36, %v2772_v45  ;;  %v5816_v15 = vadd.f32 %v2947_v9, %v2887_v14  ;;  %v5818_v44 = vadd.f32 %v712_v38, %v624_v55  ;;  %v5826_v23 = vld [vmem:[#allocation2 + $0xca] sm:$0x3f] }
 0x13d   : > { %8864 = vst [vmem:[#allocation255_spill] sm:$0xff] %v5803_v27  ;;  %8865 = vst [vmem:[#allocation256_spill] sm:$0xff] %v5808_v7  ;;  %v886_v52 = vmul.f32 %v4522_v41, %v5237_v51  ;;  %v5822_v21 = vld [vmem:[#allocation2 + $0xc8] sm:$0x3f]  ;;  %v974_v27 = vmul.f32 %v4525_v42, %v5100_v50  ;;  %v1088_v3 = vadd.f32 %v1060_v28, %v5201_v6  ;;  %v8880_v30 = vld [vmem:[#allocation127_spill] sm:$0xff] }
 0x13e   : > { %8866 = vst [vmem:[#allocation257_spill] sm:$0xff] %v5810_v59  ;;  %8867 = vst [vmem:[#allocation258_spill] sm:$0xff] %v5812_v17  ;;  %v5824_v29 = vld [vmem:[#allocation2 + $0xc9] sm:$0x3f]  ;;  %v1149_v9 = vmul.f32 %v4545_v58, %v5237_v51  ;;  %v1237_v14 = vmul.f32 %v4535_v49, %v5100_v50  ;;  %v2773_v38 = vmul.f32 %v8707_v12, %v5780_v5  ;;  %v8877_v50 = vld [vmem:[#allocation135_spill] sm:$0xff] }
 0x13f   : > { %8868 = vst [vmem:[#allocation259_spill] sm:$0xff] %v5814_v31  ;;  %8869 = vst [vmem:[#allocation260_spill] sm:$0xff] %v5822_v21  ;;  %v5835_v45 = vld [vmem:[#allocation2 + $0xc8] sm:$0x3f]  ;;  %v914_v35 = vadd.f32 %v886_v52, %v826_v56  ;;  %v801_v31 = vmul.f32 %v4435_v43, %v8877_v50  ;;  %v8878_v17 = vld [vmem:[#allocation136_spill] sm:$0xff]  ;;  %v2861_v56 = vmul.f32 %v8709_v62, %v8880_v30 }
 0x140   : > { %8870 = vst [vmem:[#allocation261_spill] sm:$0xff] %v5824_v29  ;;  %8871 = vst [vmem:[#allocation262_spill] sm:$0xff] %v5826_v23  ;;  %v5837_v36 = vld [vmem:[#allocation2 + $0xc9] sm:$0x3f]  ;;  %v8875_v23 = vld [vmem:[#allocation133_spill] sm:$0xff]  ;;  %v1177_v51 = vadd.f32 %v1149_v9, %v1088_v3  ;;  %v2976_v53 = vadd.f32 %v2948_v13, %v2888_v32 }
 0x141   : > { %8872 = vst [vmem:[#allocation263_spill] sm:$0xff] %v5835_v45  ;;  %8873 = vst [vmem:[#allocation264_spill] sm:$0xff] %v5837_v36  ;;  %v5839_v55 = vld [vmem:[#allocation2 + $0xca] sm:$0x3f]  ;;  %v625_v29 = vmul.f32 %v4429_v39, %v8875_v23  ;;  %v887_v36 = vmul.f32 %v4522_v41, %v8878_v17  ;;  %v5855_v52 = vadd.f32 %v974_v27, %v914_v35  ;;  %v8881_v21 = vld [vmem:[#allocation156_spill] sm:$0xff] }
 0x142   : > { %8874 = vst [vmem:[#allocation265_spill] sm:$0xff] %v5839_v55  ;;  %v8876_v6 = vld [vmem:[#allocation130_spill] sm:$0xff]  ;;  %2724 = vst [vmem:[#allocation2 + $0xc1] sm:$0xff] %v2696_v54  ;;  %v8879_v55 = vld [vmem:[#allocation155_spill] sm:$0xff]  ;;  %v1063_v54 = vmul.f32 %v4530_v46, %v8881_v21 }
 0x143   : > { %v713_v28 = vmul.f32 %v4432_v40, %v8876_v6  ;;  %2725 = vst [vmem:[#allocation2 + $0xc9] sm:$0x3f] %v2697_v24  ;;  %v975_v59 = vmul.f32 %v4525_v42, %v8879_v55  ;;  %v1265_v24 = vadd.f32 %v1237_v14, %v1177_v51  ;;  %v8882_v3 = vld [vmem:[#allocation132_spill] sm:$0xff]  ;;  %v8883_v6 = vld [vmem:[#allocation157_spill] sm:$0xff]  ;;  %v8887_v35 = vld [vmem:[#allocation138_spill] sm:$0xff]  ;;  %v1792_v42 = vmul.f32 %v4772_v8, %v5488_v47 }
 0x144   : > { %v915_v9 = vadd.f32 %v887_v36, %v8882_v3  ;;  %v1150_v50 = vmul.f32 %v4545_v58, %v8883_v6  ;;  %v8884_v45 = vld [vmem:[#allocation137_spill] sm:$0xff]  ;;  %v1326_v27 = vmul.f32 %v8654_v25, %v8887_v35  ;;  %v8890_v51 = vld [vmem:[#allocation146_spill] sm:$0xff]  ;;  %v2054_v47 = vmul.f32 %v4853_v20, %v5492_v48 }
 0x145   : > { %v741_v23 = vadd.f32 %v713_v28, %v625_v29  ;;  %v1238_v17 = vmul.f32 %v4535_v49, %v8884_v45  ;;  %v8886_v55 = vld [vmem:[#allocation129_spill] sm:$0xff]  ;;  %v8888_v29 = vld [vmem:[#allocation139_spill] sm:$0xff]  ;;  %v8889_v28 = vld [vmem:[#allocation90_spill] sm:$0xff]  ;;  %v1791_v3 = vmul.f32 %v4772_v8, %v8890_v51  ;;  %v2315_v35 = vmul.f32 %v4917_v37, %v8890_v51 }
 0x146   : > { %v1325_v30 = vmul.f32 %v8654_v25, %v8886_v55  ;;  %v1703_v21 = vmul.f32 %v4756_v63, %v8888_v29  ;;  %v1003_v14 = vadd.f32 %v975_v59, %v915_v9  ;;  %v1178_v36 = vadd.f32 %v1150_v50, %v8889_v28  ;;  %v8892_v28 = vld [vmem:[#allocation142_spill] sm:$0xff] }
 0x147   : > { %v5864_v10 = vadd.f32 %v801_v31, %v741_v23  ;;  %v1965_v45 = vmul.f32 %v4840_v4, %v8888_v29  ;;  %v2053_v23 = vmul.f32 %v4853_v20, %v8890_v51  ;;  %v2227_v6 = vmul.f32 %v4901_v11, %v8888_v29  ;;  %v3004_v25 = vld [vmem:[#allocation2 + $0x48] sm:$0x3f]  ;;  %v8896_v51 = vld [vmem:[#allocation159_spill] sm:$0xff] }
 0x148   : > { %v5877_v31 = vadd.f32 %v1325_v30, %v1265_v24  ;;  %v5885_v59 = vadd.f32 %v1063_v54, %v1003_v14  ;;  %v1266_v9 = vadd.f32 %v1238_v17, %v1178_v36  ;;  %v1819_v50 = vadd.f32 %v1791_v3, %v1703_v21  ;;  %v8894_v30 = vld [vmem:[#allocation140_spill] sm:$0xff]  ;;  %v5899_v13 = vld [vmem:[#allocation2 + $0x42] sm:$0xff] }
 0x149   : > { %8885 = vst [vmem:[#allocation133_spill] sm:$0xff] %v5864_v10  ;;  %v1993_v18 = vadd.f32 %v1965_v45, %v8892_v28  ;;  %v8893_v10 = vld [vmem:[#allocation143_spill] sm:$0xff]  ;;  %v1879_v54 = vmul.f32 %v4809_v1, %v8896_v51  ;;  %v1880_v17 = vmul.f32 %v4809_v1, %v5490_v60  ;;  %v2889_v21 = vadd.f32 %v2861_v56, %v2773_v38  ;;  %v2742_v36 = vld [vmem:[#allocation2 + $0x48] sm:$0x3f]  ;;  %v3090_v38 = vld [vmem:[#allocation2 + $0x39] sm:$0x3f] }
 0x14a   : > { %8891 = vst [vmem:[#allocation130_spill] sm:$0xff] %v5877_v31  ;;  %v2255_v24 = vadd.f32 %v2227_v6, %v8893_v10  ;;  %v1704_v31 = vmul.f32 %v4756_v63, %v8894_v30  ;;  %v5893_v29 = vadd.f32 %v1326_v27, %v1266_v9  ;;  %v8897_v10 = vld [vmem:[#allocation141_spill] sm:$0xff]  ;;  %v3002_v27 = vld [vmem:[#allocation2 + $0x38] sm:$0x3f]  ;;  %v3036_v3 = vmul.f32 %v5759_v33, %v3004_v25  ;;  %v5910_v56 = vld [vmem:[#allocation2 + $0x50] sm:$0xff] }
 0x14b   : > { %v2081_v40 = vadd.f32 %v2053_v23, %v1993_v18  ;;  %v1966_v14 = vmul.f32 %v4840_v4, %v8897_v10  ;;  %v2830_v18 = vld [vmem:[#allocation2 + $0x49] sm:$0x3f]  ;;  %v5906_v23 = vadd.f32 %v1879_v54, %v1819_v50  ;;  %v2141_v60 = vmul.f32 %v4867_v16, %v8896_v51  ;;  %v8899_v6 = vld [vmem:[#allocation161_spill] sm:$0xff]  ;;  %v8900_v28 = vld [vmem:[#allocation160_spill] sm:$0xff] }
 0x14c   : > { %8895 = vst [vmem:[#allocation135_spill] sm:$0xff] %v5893_v29  ;;  %v1820_v32 = vadd.f32 %v1792_v42, %v1704_v31  ;;  %v2343_v45 = vadd.f32 %v2315_v35, %v2255_v24  ;;  %v3092_v42 = vld [vmem:[#allocation2 + $0x49] sm:$0x3f]  ;;  %v2142_v48 = vmul.f32 %v4867_v16, %v5494_v34  ;;  %v2228_v25 = vmul.f32 %v4901_v11, %v8900_v28  ;;  %v5920_v35 = vld [vmem:[%s4402_s20 + $0x278] sm:$0xff]  ;;  %v5962_v1 = vld [vmem:[%s4423_s15 + $0x20] sm:$0x7] }
 0x14d   : > { %v1994_v9 = vadd.f32 %v1966_v14, %v8899_v6  ;;  %8901 = vst [vmem:[#allocation155_spill] sm:$0xff] %v5920_v35  ;;  %v2918_v50 = vld [vmem:[#allocation2 + $0x4a] sm:$0x3f]  ;;  %v2949_v24 = vmul.f32 %v5349_v19, %v5899_v13  ;;  %v5924_v30 = vadd.f32 %v2141_v60, %v2081_v40  ;;  %v2316_v54 = vmul.f32 %v4917_v37, %v5496_v57  ;;  %v5932_v34 = vld [vmem:[#allocation2 + $0xd8] sm:$0x3f]  ;;  %v5946_v57 = vld [vmem:[#allocation2 + $0xe0] sm:$0xff] }
 0x14e   : > { %v5912_v31 = vadd.f32 %v1880_v17, %v1820_v32  ;;  %v2403_v17 = vmul.f32 %v4983_v0, %v8896_v51  ;;  %v5930_v32 = vld [vmem:[#allocation2 + $0xd0] sm:$0xff]  ;;  %8903 = vst [vmem:[#allocation156_spill] sm:$0xff] %v5932_v34  ;;  %v5934_v10 = vld [vmem:[#allocation2 + $0xd9] sm:$0x3f]  ;;  %8910 = vst [vmem:[#allocation90_spill] sm:$0xff] %v5946_v57  ;;  %v3124_v57 = vmul.f32 %v5778_v61, %v3092_v42 }
 0x14f   : > { %8902 = vst [vmem:[#allocation127_spill] sm:$0xff] %v5930_v32  ;;  %8904 = vst [vmem:[#allocation132_spill] sm:$0xff] %v5934_v10  ;;  %v5936_v14 = vld [vmem:[#allocation2 + $0xd2] sm:$0xff]  ;;  %v5938_v6 = vld [vmem:[#allocation2 + $0xda] sm:$0x3f]  ;;  %v2774_v32 = vmul.f32 %v8707_v12, %v2742_v36  ;;  %v2082_v34 = vadd.f32 %v2054_v47, %v1994_v9 }
 0x150   : > { %8898 = vst [vmem:[#allocation136_spill] sm:$0xff] %v5912_v31  ;;  %8905 = vst [vmem:[#allocation157_spill] sm:$0xff] %v5936_v14  ;;  %v5940_v28 = vld [vmem:[#allocation2 + $0xd8] sm:$0x3f]  ;;  %v1621_v51 = vld [vmem:[%s4402_s20 + $0x290] sm:$0x3f]  ;;  %v2404_v14 = vmul.f32 %v4983_v0, %v5498_v2  ;;  %v5964_v47 = vadd.f32 %v2403_v17, %v2343_v45 }
 0x151   : > { %8906 = vst [vmem:[#allocation137_spill] sm:$0xff] %v5938_v6  ;;  %8907 = vst [vmem:[#allocation129_spill] sm:$0xff] %v5940_v28  ;;  %v5942_v40 = vld [vmem:[#allocation2 + $0xd9] sm:$0x3f]  ;;  %v3180_v29 = vld [vmem:[#allocation2 + $0x4a] sm:$0x3f] }
 0x152   : > { %8908 = vst [vmem:[#allocation138_spill] sm:$0xff] %v5942_v40  ;;  %v5944_v60 = vld [vmem:[#allocation2 + $0xda] sm:$0x3f]  ;;  %v8911_v16 = vld [vmem:[#allocation118_spill] sm:$0xff]  ;;  %v3064_v40 = vadd.f32 %v3036_v3, %v2976_v53  ;;  %8915 = vst [vmem:[#allocation140_spill] sm:$0xff] %v5964_v47  ;;  %v3035_v53 = vmul.f32 %v5759_v33, %v5780_v5 }
 0x153   : > { %8909 = vst [vmem:[#allocation139_spill] sm:$0xff] %v5944_v60  ;;  %v2256_v10 = vadd.f32 %v2228_v25, %v8911_v16  ;;  %v5953_v6 = vld [vmem:[#allocation2 + $0xd8] sm:$0x3f]  ;;  %v2862_v60 = vmul.f32 %v8709_v62, %v2830_v18  ;;  %v5966_v16 = vld [vmem:[#allocation2 + $0xe8] sm:$0x3f]  ;;  %v3034_v25 = vmul.f32 %v5759_v33, %v3002_v27  ;;  %v5975_v18 = vadd.f32 %v2142_v48, %v2082_v34 }
 0x154   : > { %8912 = vst [vmem:[#allocation146_spill] sm:$0xff] %v5953_v6  ;;  %v5955_v28 = vld [vmem:[#allocation2 + $0xd9] sm:$0x3f]  ;;  %8916 = vst [vmem:[#allocation159_spill] sm:$0xff] %v5966_v16  ;;  %v5968_v9 = vld [vmem:[#allocation2 + $0xe2] sm:$0xff]  ;;  %v2775_v27 = vmul.f32 %v8707_v12, %v5910_v56 }
 0x155   : > { %8913 = vst [vmem:[#allocation142_spill] sm:$0xff] %v5955_v28  ;;  %v5957_v31 = vld [vmem:[#allocation2 + $0xda] sm:$0x3f]  ;;  %8917 = vst [vmem:[#allocation141_spill] sm:$0xff] %v5968_v9  ;;  %v5970_v2 = vld [vmem:[#allocation2 + $0xe8] sm:$0x3f]  ;;  %v2344_v3 = vadd.f32 %v2316_v54, %v2256_v10  ;;  %v5985_v9 = vmul.f32 %v5778_v61, %v3090_v38  ;;  %v3063_v10 = vadd.f32 %v3035_v53, %v5816_v15 }
 0x156   : > { %8914 = vst [vmem:[#allocation143_spill] sm:$0xff] %v5957_v31  ;;  %v2744_v36 = vld [vmem:[#allocation2 + $0x58] sm:$0x3f]  ;;  %8918 = vst [vmem:[#allocation161_spill] sm:$0xff] %v5970_v2  ;;  %v5978_v45 = vld [vmem:[#allocation2 + $0xe9] sm:$0x3f]  ;;  %v2977_v2 = vadd.f32 %v2949_v24, %v2889_v21  ;;  %v3152_v31 = vadd.f32 %v3124_v57, %v3064_v40  ;;  %v3037_v15 = vmul.f32 %v5759_v33, %v5910_v56 }
 0x157   : > { %1648 = vst [vmem:[#allocation2 + $0xe1] sm:$0xff] %v5920_v35  ;;  %8919 = vst [vmem:[#allocation160_spill] sm:$0xff] %v5978_v45  ;;  %v5980_v42 = vld [vmem:[#allocation2 + $0xea] sm:$0x3f]  ;;  %v4101_v16 = vld [vmem:[#allocation2 + $0x51] sm:$0xff]  ;;  %v5997_v21 = vadd.f32 %v2404_v14, %v2344_v3  ;;  %v2890_v35 = vadd.f32 %v2862_v60, %v2774_v32  ;;  %v2776_v14 = vmul.f32 %v8707_v12, %v2744_v36 }
 0x158   : > { %8920 = vst [vmem:[#allocation118_spill] sm:$0xff] %v5980_v42  ;;  %v5982_v17 = vld [vmem:[#allocation2 + $0xe9] sm:$0x3f]  ;;  %8922 = vst [vmem:[#allocation267_spill] sm:$0xff] %v5985_v9  ;;  %v2863_v5 = vmul.f32 %v4101_v16, %v8709_v62  ;;  %v2698_v54 = vld [vmem:[%s4402_s20 + $0x250] sm:$0xff]  ;;  %v3125_v53 = vmul.f32 %v4101_v16, %v5778_v61  ;;  %v3065_v40 = vadd.f32 %v3037_v15, %v2977_v2 }
 0x159   : > { %8921 = vst [vmem:[#allocation266_spill] sm:$0xff] %v5982_v17  ;;  %v5990_v48 = vld [vmem:[#allocation2 + $0xea] sm:$0x3f]  ;;  %v4102_v45 = vld [vmem:[#allocation2 + $0x41] sm:$0xff]  ;;  %v2950_v17 = vmul.f32 %v5349_v19, %v2918_v50  ;;  %v2832_v38 = vld [vmem:[#allocation2 + $0x59] sm:$0x3f]  ;;  %v6005_v50 = vrot.slane %v5962_v1, %v8854_v22  ;;  %v6013_v57 = vadd.f32 %v3034_v25, %v5800_v26  ;;  %v6020_v36 = vmul.f32 %v5808_v7, %v5899_v13 }
 0x15a   : > { %8923 = vst [vmem:[#allocation268_spill] sm:$0xff] %v5990_v48  ;;  %v2699_v34 = vld [vmem:[%s4402_s20 + $0x268] sm:$0x3f]  ;;  %v3123_v42 = vmul.f32 %v4102_v45, %v5778_v61  ;;  %v2919_v9 = vld [vmem:[#allocation2 + $0x52] sm:$0xff]  ;;  %8924 = vst [vmem:[#allocation269_spill] sm:$0xff] %v5997_v21  ;;  %v3212_v48 = vmul.f32 %v5808_v7, %v3180_v29  ;;  %v2891_v32 = vadd.f32 %v2863_v5, %v2775_v27 }
 0x15b   : > { %1649 = vst [vmem:[#allocation2 + $0xe9] sm:$0x3f] %v1621_v51  ;;  %2726 = vst [vmem:[#allocation2 + $0xd1] sm:$0xff] %v2698_v54  ;;  %v3178_v24 = vld [vmem:[#allocation2 + $0x3a] sm:$0x3f]  ;;  %v800_v51 = vmul.f32 %v4435_v43, %v8886_v55  ;;  %v2864_v29 = vmul.f32 %v8709_v62, %v2832_v38  ;;  %v2951_v60 = vmul.f32 %v5349_v19, %v2919_v9  ;;  %v8931_v13 = vld [vmem:[#allocation166_spill] sm:$0xff] }
 0x15c   : > { %2727 = vst [vmem:[#allocation2 + $0xd9] sm:$0x3f] %v2699_v34  ;;  %v2920_v3 = vld [vmem:[#allocation2 + $0x5a] sm:$0x3f]  ;;  %8925 = vst [vmem:[#allocation270_spill] sm:$0xff] %v6013_v57  ;;  %v6016_v16 = vmul.f32 %v5808_v7, %v3178_v24  ;;  %v1062_v27 = vmul.f32 %v4530_v46, %v8886_v55  ;;  %v6024_v2 = vadd.f32 %v3123_v42, %v3063_v10  ;;  %v2700_v42 = vld [vmem:[%s4402_s20 + $0x280] sm:$0xff] }
 0x15d   : > { %v3288_v45 = vld [vmem:[#allocation2 + $0xf8] sm:$0x3f]  ;;  %8927 = vst [vmem:[#allocation272_spill] sm:$0xff] %v6020_v36  ;;  %v2978_v5 = vadd.f32 %v2950_v17, %v2890_v35  ;;  %v6026_v54 = vadd.f32 %v3212_v48, %v3152_v31  ;;  %v2952_v26 = vmul.f32 %v5349_v19, %v2920_v3  ;;  %v6031_v24 = vmul.f32 %v6005_v50, %v5910_v56  ;;  %v8935_v56 = vld [vmem:[#allocation182_spill] sm:$0xff]  ;;  %v8945_v36 = vld [vmem:[#allocation13_spill] sm:$0xff] }
 0x15e   : > { %8926 = vst [vmem:[#allocation271_spill] sm:$0xff] %v6016_v16  ;;  %8928 = vst [vmem:[#allocation273_spill] sm:$0xff] %v6024_v2  ;;  %v3006_v25 = vld [vmem:[#allocation2 + $0x58] sm:$0x3f]  ;;  %v6035_v15 = vmul.f32 %v8931_v13, %v6005_v50  ;;  %v6038_v55 = vmul.f32 %v6005_v50, %v3288_v45  ;;  %v828_v35 = vadd.f32 %v800_v51, %v5818_v44  ;;  %v6041_v31 = vld [vmem:[#allocation2 + $0xe0] sm:$0xff] }
 0x15f   : > { %8929 = vst [vmem:[#allocation274_spill] sm:$0xff] %v6026_v54  ;;  %v3094_v34 = vld [vmem:[#allocation2 + $0x59] sm:$0x3f]  ;;  %8930 = vst [vmem:[#allocation275_spill] sm:$0xff] %v6031_v24  ;;  %v6045_v48 = vadd.f32 %v3125_v53, %v3065_v40  ;;  %v2892_v10 = vadd.f32 %v2864_v29, %v2776_v14  ;;  %v6047_v3 = vadd.f32 %v2951_v60, %v2891_v32 }
 0x160   : > { %v3182_v38 = vld [vmem:[#allocation2 + $0x5a] sm:$0x3f]  ;;  %8932 = vst [vmem:[#allocation166_spill] sm:$0xff] %v6035_v15  ;;  %8933 = vst [vmem:[#allocation276_spill] sm:$0xff] %v6038_v55  ;;  %v888_v22 = vmul.f32 %v4522_v41, %v8935_v56  ;;  %v3038_v44 = vmul.f32 %v5759_v33, %v3006_v25  ;;  %v6059_v51 = vmul.f32 %v5778_v61, %v3094_v34  ;;  %v8943_v25 = vld [vmem:[#allocation183_spill] sm:$0xff] }
 0x161   : > { %8934 = vst [vmem:[#allocation277_spill] sm:$0xff] %v6041_v31  ;;  %v2701_v17 = vld [vmem:[%s4402_s20 + $0x298] sm:$0x3f]  ;;  %v1090_v53 = vadd.f32 %v1062_v27, %v5855_v52  ;;  %v1151_v14 = vmul.f32 %v4545_v58, %v8935_v56  ;;  %v627_v34 = vmul.f32 %v4429_v39, %v8943_v25  ;;  %v6081_v2 = vmul.f32 %v5808_v7, %v2919_v9 }
 0x162   : > { %v6051_v54 = vld [vmem:[#allocation2 + $0xe8] sm:$0x3f]  ;;  %v6070_v60 = vadd.f32 %v888_v22, %v828_v35  ;;  %v8942_v15 = vld [vmem:[#allocation148_spill] sm:$0xff]  ;;  %v6084_v16 = vmul.f32 %v5808_v7, %v3182_v38 }
 0x163   : > { %8936 = vst [vmem:[#allocation182_spill] sm:$0xff] %v6051_v54  ;;  %v6053_v13 = vld [vmem:[#allocation2 + $0xe9] sm:$0x3f]  ;;  %v1239_v55 = vmul.f32 %v4535_v49, %v8942_v15  ;;  %v8944_v24 = vld [vmem:[#allocation184_spill] sm:$0xff]  ;;  %v1179_v22 = vadd.f32 %v1151_v14, %v1090_v53  ;;  %v6098_v14 = vld [vmem:[#allocation2 + $0x60] sm:$0xff] }
 0x164   : > { %8937 = vst [vmem:[#allocation278_spill] sm:$0xff] %v6053_v13  ;;  %v6055_v45 = vld [vmem:[#allocation2 + $0xe2] sm:$0xff]  ;;  %v6064_v32 = vld [vmem:[#allocation2 + $0xea] sm:$0x3f]  ;;  %v715_v52 = vmul.f32 %v8945_v36, %v8944_v24  ;;  %v3066_v13 = vadd.f32 %v3038_v44, %v2978_v5 }
 0x165   : > { %8938 = vst [vmem:[#allocation279_spill] sm:$0xff] %v6055_v45  ;;  %8939 = vst [vmem:[#allocation280_spill] sm:$0xff] %v6064_v32  ;;  %v6066_v40 = vld [vmem:[#allocation2 + $0xe8] sm:$0x3f]  ;;  %v6088_v32 = vadd.f32 %v2952_v26, %v2892_v10  ;;  %v8949_v45 = vld [vmem:[#allocation188_spill] sm:$0xff]  ;;  %v1267_v9 = vadd.f32 %v1239_v55, %v1179_v22 }
 0x166   : > { %8940 = vst [vmem:[#allocation281_spill] sm:$0xff] %v6066_v40  ;;  %v6068_v29 = vld [vmem:[#allocation2 + $0xe9] sm:$0x3f]  ;;  %2728 = vst [vmem:[#allocation2 + $0xe1] sm:$0xff] %v2700_v42  ;;  %v743_v25 = vadd.f32 %v715_v52, %v627_v34  ;;  %v8951_v40 = vld [vmem:[#allocation189_spill] sm:$0xff] }
 0x167   : > { %8941 = vst [vmem:[#allocation282_spill] sm:$0xff] %v6068_v29  ;;  %v6078_v27 = vld [vmem:[#allocation2 + $0xea] sm:$0x3f]  ;;  %v8948_v29 = vld [vmem:[#allocation187_spill] sm:$0xff]  ;;  %v1065_v38 = vmul.f32 %v4530_v46, %v8951_v40  ;;  %v8954_v26 = vld [vmem:[#allocation133_spill] sm:$0xff] }
 0x168   : > { %8946 = vst [vmem:[#allocation148_spill] sm:$0xff] %v6078_v27  ;;  %v8947_v35 = vld [vmem:[#allocation186_spill] sm:$0xff]  ;;  %2729 = vst [vmem:[#allocation2 + $0xe9] sm:$0x3f] %v2701_v17  ;;  %v889_v24 = vmul.f32 %v4522_v41, %v8948_v29  ;;  %v8950_v27 = vld [vmem:[#allocation35_spill] sm:$0xff] }
 0x169   : > { %v803_v57 = vmul.f32 %v4435_v43, %v8947_v35  ;;  %v977_v42 = vmul.f32 %v8950_v27, %v8949_v45  ;;  %v8952_v54 = vld [vmem:[#allocation190_spill] sm:$0xff]  ;;  %v8955_v34 = vld [vmem:[#allocation191_spill] sm:$0xff]  ;;  %v8956_v52 = vld [vmem:[#allocation185_spill] sm:$0xff] }
 0x16a   : > { %v1152_v53 = vmul.f32 %v4545_v58, %v8952_v54  ;;  %v917_v10 = vadd.f32 %v889_v24, %v8954_v26  ;;  %v1240_v29 = vmul.f32 %v4535_v49, %v8955_v34  ;;  %v8957_v35 = vld [vmem:[#allocation41_spill] sm:$0xff]  ;;  %v8958_v55 = vld [vmem:[#allocation192_spill] sm:$0xff] }
 0x16b   : > { %v6100_v17 = vadd.f32 %v803_v57, %v743_v25  ;;  %v1327_v45 = vmul.f32 %v8957_v35, %v8956_v52  ;;  %v1328_v44 = vmul.f32 %v8957_v35, %v8958_v55  ;;  %v8959_v40 = vld [vmem:[#allocation193_spill] sm:$0xff]  ;;  %v8965_v35 = vld [vmem:[#allocation199_spill] sm:$0xff] }
 0x16c   : > { %v1180_v5 = vadd.f32 %v1152_v53, %v5885_v59  ;;  %v1705_v54 = vmul.f32 %v4756_v63, %v8959_v40  ;;  %v8960_v22 = vld [vmem:[#allocation149_spill] sm:$0xff]  ;;  %v1005_v25 = vadd.f32 %v977_v42, %v917_v10  ;;  %v1967_v24 = vmul.f32 %v4840_v4, %v8959_v40  ;;  %v8963_v10 = vld [vmem:[#allocation194_spill] sm:$0xff] }
 0x16d   : > { %8953 = vst [vmem:[#allocation183_spill] sm:$0xff] %v6100_v17  ;;  %v1793_v57 = vmul.f32 %v4772_v8, %v8960_v22  ;;  %v6114_v31 = vadd.f32 %v1327_v45, %v1267_v9  ;;  %v2055_v26 = vmul.f32 %v4853_v20, %v8960_v22  ;;  %v2777_v59 = vmul.f32 %v8707_v12, %v6098_v14 }
 0x16e   : > { %v1268_v53 = vadd.f32 %v1240_v29, %v1180_v5  ;;  %v2229_v34 = vmul.f32 %v4901_v11, %v8959_v40  ;;  %v2317_v55 = vmul.f32 %v4917_v37, %v8960_v22  ;;  %v6126_v17 = vadd.f32 %v1065_v38, %v1005_v25  ;;  %v8966_v5 = vld [vmem:[#allocation195_spill] sm:$0xff]  ;;  %v8968_v22 = vld [vmem:[#allocation200_spill] sm:$0xff] }
 0x16f   : > { %8961 = vst [vmem:[#allocation184_spill] sm:$0xff] %v6114_v31  ;;  %v1821_v42 = vadd.f32 %v1793_v57, %v1705_v54  ;;  %v1995_v9 = vadd.f32 %v1967_v24, %v5906_v23  ;;  %v1706_v45 = vmul.f32 %v4756_v63, %v8963_v10  ;;  %v1794_v29 = vmul.f32 %v4772_v8, %v8965_v35  ;;  %v8967_v40 = vld [vmem:[#allocation91_spill] sm:$0xff]  ;;  %v8969_v54 = vld [vmem:[#allocation196_spill] sm:$0xff]  ;;  %v8970_v57 = vld [vmem:[#allocation201_spill] sm:$0xff] }
 0x170   : > { %8962 = vst [vmem:[#allocation186_spill] sm:$0xff] %v6126_v17  ;;  %v6131_v28 = vadd.f32 %v1328_v44, %v1268_v53  ;;  %v2257_v6 = vadd.f32 %v2229_v34, %v5924_v30  ;;  %v1881_v41 = vmul.f32 %v8967_v40, %v8966_v5  ;;  %v1882_v38 = vmul.f32 %v8967_v40, %v8968_v22  ;;  %v4103_v44 = vld [vmem:[#allocation2 + $0x61] sm:$0xff]  ;;  %v8972_v22 = vld [vmem:[#allocation107_spill] sm:$0xff]  ;;  %v2834_v8 = vld [vmem:[#allocation2 + $0x69] sm:$0x3f] }
 0x171   : > { %v2083_v49 = vadd.f32 %v2055_v26, %v1995_v9  ;;  %v1968_v23 = vmul.f32 %v4840_v4, %v8969_v54  ;;  %v2056_v25 = vmul.f32 %v4853_v20, %v8970_v57  ;;  %v2865_v24 = vmul.f32 %v4103_v44, %v8709_v62  ;;  %v3008_v34 = vld [vmem:[#allocation2 + $0x68] sm:$0x3f]  ;;  %v8971_v26 = vld [vmem:[#allocation136_spill] sm:$0xff]  ;;  %v8974_v17 = vld [vmem:[#allocation203_spill] sm:$0xff] }
 0x172   : > { %8964 = vst [vmem:[#allocation187_spill] sm:$0xff] %v6131_v28  ;;  %v3039_v30 = vmul.f32 %v5759_v33, %v6098_v14  ;;  %v2345_v35 = vadd.f32 %v2317_v55, %v2257_v6  ;;  %v1822_v53 = vadd.f32 %v1794_v29, %v1706_v45  ;;  %v6147_v10 = vadd.f32 %v1881_v41, %v1821_v42  ;;  %v8973_v54 = vld [vmem:[#allocation202_spill] sm:$0xff]  ;;  %v8975_v55 = vld [vmem:[#allocation204_spill] sm:$0xff] }
 0x173   : > { %v1996_v9 = vadd.f32 %v1968_v23, %v8971_v26  ;;  %v2143_v40 = vmul.f32 %v8972_v22, %v8966_v5  ;;  %v2144_v4 = vmul.f32 %v8972_v22, %v8973_v54  ;;  %v3127_v57 = vmul.f32 %v4103_v44, %v5778_v61  ;;  %v2746_v20 = vld [vmem:[#allocation2 + $0x68] sm:$0x3f]  ;;  %v8976_v22 = vld [vmem:[#allocation205_spill] sm:$0xff] }
 0x174   : > { %v6155_v63 = vadd.f32 %v1882_v38, %v1822_v53  ;;  %v2230_v6 = vmul.f32 %v4901_v11, %v8974_v17  ;;  %v2318_v41 = vmul.f32 %v4917_v37, %v8975_v55  ;;  %v3154_v42 = vadd.f32 %v6059_v51, %v3066_v13  ;;  %v2921_v54 = vld [vmem:[#allocation2 + $0x62] sm:$0xff] }
 0x175   : > { %v2084_v45 = vadd.f32 %v2056_v25, %v1996_v9  ;;  %v6162_v29 = vadd.f32 %v2143_v40, %v2083_v49  ;;  %v2405_v23 = vmul.f32 %v4983_v0, %v8966_v5  ;;  %v3067_v26 = vadd.f32 %v3039_v30, %v6047_v3  ;;  %v3096_v51 = vld [vmem:[#allocation2 + $0x69] sm:$0x3f] }
 0x176   : > { %v3040_v38 = vmul.f32 %v5759_v33, %v3008_v34  ;;  %v2258_v53 = vadd.f32 %v2230_v6, %v5975_v18  ;;  %v2406_v17 = vmul.f32 %v4983_v0, %v8976_v22  ;;  %v2778_v55 = vmul.f32 %v8707_v12, %v2746_v20  ;;  %v8978_v5 = vld [vmem:[#allocation10_spill] sm:$0xff]  ;;  %v3376_v22 = vld [vmem:[#allocation2 + $0xf9] sm:$0x3f] }
 0x177   : > { %v2866_v13 = vmul.f32 %v8709_v62, %v2834_v8  ;;  %v6173_v49 = vadd.f32 %v2144_v4, %v2084_v45  ;;  %v6175_v40 = vadd.f32 %v2405_v23, %v2345_v35  ;;  %v3241_v3 = vadd.f32 %v6081_v2, %v6045_v48  ;;  %v2922_v30 = vld [vmem:[#allocation2 + $0x6a] sm:$0x3f]  ;;  %v3268_v8 = vld [vmem:[#allocation2 + $0x58] sm:$0x3f] }
 0x178   : > { %v6181_v25 = vrot.slane %v5962_v1, %v8978_v5  ;;  %v2893_v18 = vadd.f32 %v2865_v24, %v2777_v59  ;;  %v3270_v34 = vld [vmem:[#allocation2 + $0x68] sm:$0x3f]  ;;  %v2346_v9 = vadd.f32 %v2318_v41, %v2258_v53  ;;  %v3242_v20 = vadd.f32 %v6084_v16, %v3154_v42  ;;  %v3356_v6 = vld [vmem:[#allocation2 + $0x59] sm:$0x3f] }
 0x179   : > { %8977 = vst [vmem:[#allocation188_spill] sm:$0xff] %v6175_v40  ;;  %v3301_v4 = vmul.f32 %v6005_v50, %v6098_v14  ;;  %v2953_v35 = vmul.f32 %v5349_v19, %v2921_v54  ;;  %v976_v2 = vmul.f32 %v8950_v27, %v8942_v15  ;;  %v3155_v48 = vadd.f32 %v3127_v57, %v3067_v26  ;;  %v3184_v42 = vld [vmem:[#allocation2 + $0x6a] sm:$0x3f]  ;;  %v8983_v57 = vld [vmem:[#allocation164_spill] sm:$0xff] }
 0x17a   : > { %8979 = vst [vmem:[#allocation189_spill] sm:$0xff] %v6181_v25  ;;  %v3068_v45 = vadd.f32 %v3040_v38, %v6088_v32  ;;  %v3128_v59 = vmul.f32 %v5778_v61, %v3096_v51  ;;  %v6191_v24 = vadd.f32 %v2406_v17, %v2346_v9  ;;  %v2894_v41 = vadd.f32 %v2866_v13, %v2778_v55  ;;  %v3358_v38 = vld [vmem:[#allocation2 + $0x69] sm:$0x3f]  ;;  %v2747_v51 = vld [vmem:[#allocation2 + $0x70] sm:$0xff]  ;;  %v3464_v9 = vld [vmem:[#allocation2 + $0xfa] sm:$0x3f] }
 0x17b   : > { %v2954_v16 = vmul.f32 %v5349_v19, %v2922_v30  ;;  %v3215_v23 = vmul.f32 %v5808_v7, %v2921_v54  ;;  %v3302_v14 = vmul.f32 %v6005_v50, %v3270_v34  ;;  %v6197_v53 = vmul.f32 %v6005_v50, %v3268_v8  ;;  %v3446_v13 = vld [vmem:[#allocation2 + $0x6a] sm:$0x3f] }
 0x17c   : > { %8980 = vst [vmem:[#allocation190_spill] sm:$0xff] %v6191_v24  ;;  %v6200_v5 = vmul.f32 %v6181_v25, %v3356_v6  ;;  %v6204_v32 = vmul.f32 %v6181_v25, %v8983_v57  ;;  %v6207_v26 = vmul.f32 %v6181_v25, %v3376_v22  ;;  %v6209_v17 = vadd.f32 %v3301_v4, %v3241_v3  ;;  %v8988_v22 = vld [vmem:[#allocation11_spill] sm:$0xff]  ;;  %v3010_v3 = vld [vmem:[#allocation2 + $0x78] sm:$0x3f] }
 0x17d   : > { %8981 = vst [vmem:[#allocation133_spill] sm:$0xff] %v6197_v53  ;;  %v6212_v55 = vmul.f32 %v4103_v44, %v6181_v25  ;;  %v1004_v30 = vadd.f32 %v976_v2, %v6070_v60  ;;  %v1064_v34 = vmul.f32 %v4530_v46, %v8956_v52  ;;  %v2981_v8 = vadd.f32 %v2953_v35, %v2893_v18  ;;  %v8992_v18 = vld [vmem:[#allocation51_spill] sm:$0xff] }
 0x17e   : > { %8982 = vst [vmem:[#allocation191_spill] sm:$0xff] %v6200_v5  ;;  %8984 = vst [vmem:[#allocation185_spill] sm:$0xff] %v6204_v32  ;;  %v3156_v6 = vadd.f32 %v3128_v59, %v3068_v45  ;;  %v3216_v57 = vmul.f32 %v5808_v7, %v3184_v42  ;;  %v6220_v32 = vrot.slane %v5962_v1, %v8988_v22  ;;  %v3272_v1 = vld [vmem:[#allocation2 + $0x78] sm:$0x3f] }
 0x17f   : > { %8985 = vst [vmem:[#allocation192_spill] sm:$0xff] %v6207_v26  ;;  %8986 = vst [vmem:[#allocation193_spill] sm:$0xff] %v6209_v17  ;;  %v2982_v4 = vadd.f32 %v2954_v16, %v2894_v41  ;;  %v3243_v44 = vadd.f32 %v3215_v23, %v3155_v48  ;;  %v3330_v26 = vadd.f32 %v3302_v14, %v3242_v20  ;;  %v2748_v48 = vld [vmem:[#allocation2 + $0x78] sm:$0x3f]  ;;  %v8996_v14 = vld [vmem:[#allocation135_spill] sm:$0xff] }
 0x180   : > { %8987 = vst [vmem:[#allocation149_spill] sm:$0xff] %v6212_v55  ;;  %8989 = vst [vmem:[#allocation194_spill] sm:$0xff] %v6220_v32  ;;  %v3390_v5 = vmul.f32 %v6181_v25, %v3358_v38  ;;  %v6224_v60 = vmul.f32 %v6220_v32, %v2921_v54  ;;  %v6227_v2 = vmul.f32 %v6220_v32, %v3446_v13  ;;  %v2836_v20 = vld [vmem:[#allocation2 + $0x79] sm:$0x3f]  ;;  %v4104_v22 = vld [vmem:[#allocation2 + $0x71] sm:$0xff] }
 0x181   : > { %v6231_v35 = vmul.f32 %v6220_v32, %v8992_v18  ;;  %v3041_v45 = vmul.f32 %v5759_v33, %v2747_v51  ;;  %v6235_v59 = vmul.f32 %v6220_v32, %v3464_v9  ;;  %v3042_v41 = vmul.f32 %v5759_v33, %v3010_v3  ;;  %v8995_v54 = vld [vmem:[#allocation208_spill] sm:$0xff] }
 0x182   : > { %8990 = vst [vmem:[#allocation199_spill] sm:$0xff] %v6224_v60  ;;  %8991 = vst [vmem:[#allocation195_spill] sm:$0xff] %v6227_v2  ;;  %v1092_v16 = vadd.f32 %v1064_v34, %v1004_v30  ;;  %v1153_v42 = vmul.f32 %v4545_v58, %v8995_v54  ;;  %v3244_v23 = vadd.f32 %v3216_v57, %v3156_v6  ;;  %v2923_v60 = vld [vmem:[#allocation2 + $0x72] sm:$0xff] }
 0x183   : > { %8993 = vst [vmem:[#allocation200_spill] sm:$0xff] %v6231_v35  ;;  %8994 = vst [vmem:[#allocation196_spill] sm:$0xff] %v6235_v59  ;;  %v1432_v38 = vmul.f32 %v8996_v14, %v8996_v14  ;;  %v2779_v13 = vmul.f32 %v8707_v12, %v2747_v51  ;;  %v2867_v18 = vmul.f32 %v4104_v22, %v8709_v62  ;;  %v3098_v35 = vld [vmem:[#allocation2 + $0x79] sm:$0x3f] }
 0x184   : > { %v6244_v9 = vadd.f32 %v3390_v5, %v3330_v26  ;;  %v3303_v59 = vmul.f32 %v6005_v50, %v2747_v51  ;;  %v3304_v3 = vmul.f32 %v6005_v50, %v3272_v1  ;;  %v6248_v30 = vadd.f32 %v1153_v42, %v1092_v16  ;;  %v3360_v55 = vld [vmem:[#allocation2 + $0x79] sm:$0x3f] }
 0x185   : > { %v3069_v34 = vadd.f32 %v3041_v45, %v2981_v8  ;;  %v3129_v6 = vmul.f32 %v4104_v22, %v5778_v61  ;;  %v2780_v57 = vmul.f32 %v8707_v12, %v2748_v48  ;;  %v2868_v2 = vmul.f32 %v8709_v62, %v2836_v20  ;;  %v2924_v5 = vld [vmem:[#allocation2 + $0x7a] sm:$0x3f]  ;;  %v8999_v8 = vld [vmem:[#allocation130_spill] sm:$0xff] }
 0x186   : > { %8997 = vst [vmem:[#allocation201_spill] sm:$0xff] %v6244_v9  ;;  %v3331_v17 = vadd.f32 %v3303_v59, %v3243_v44  ;;  %v3391_v53 = vmul.f32 %v4104_v22, %v6181_v25  ;;  %v3070_v26 = vadd.f32 %v3042_v41, %v2982_v4  ;;  %v3130_v51 = vmul.f32 %v5778_v61, %v3098_v35  ;;  %v3186_v16 = vld [vmem:[#allocation2 + $0x7a] sm:$0x3f] }
 0x187   : > { %v6257_v1 = vsel %vm1363_vm0, %v8996_v14, 0.0  ;;  %v6261_v45 = vmul.f32 %v8999_v8, %v8999_v8  ;;  %v6264_v48 = vsel %vm1363_vm0, %v1432_v38, 0.0  ;;  %v2895_v20 = vadd.f32 %v2867_v18, %v2779_v13  ;;  %v2749_v14 = vld [vmem:[#allocation2 + $0x80] sm:$0xff]  ;;  %v3448_v18 = vld [vmem:[#allocation2 + $0x7a] sm:$0x3f] }
 0x188   : > { %8998 = vst [vmem:[#allocation136_spill] sm:$0xff] %v6257_v1  ;;  %9001 = vst [vmem:[#allocation203_spill] sm:$0xff] %v6264_v48  ;;  %v2508_v44 = vmul.f32 %v5997_v21, %v5997_v21  ;;  %v2955_v4 = vmul.f32 %v5349_v19, %v2923_v60  ;;  %v3332_v59 = vadd.f32 %v3304_v3, %v3244_v23  ;;  %v6276_v1 = vsel %vm1363_vm0, %v5997_v21, 0.0 }
 0x189   : > { %9000 = vst [vmem:[#allocation202_spill] sm:$0xff] %v6261_v45  ;;  %v3392_v35 = vmul.f32 %v6181_v25, %v3360_v55  ;;  %v3157_v41 = vadd.f32 %v3129_v6, %v3069_v34  ;;  %v2896_v42 = vadd.f32 %v2868_v2, %v2780_v57  ;;  %v2956_v22 = vmul.f32 %v5349_v19, %v2924_v5  ;;  %v2838_v6 = vld [vmem:[#allocation2 + $0x89] sm:$0x3f] }
 0x18a   : > { %v3217_v9 = vmul.f32 %v5808_v7, %v2923_v60  ;;  %v3419_v45 = vadd.f32 %v3391_v53, %v3331_v17  ;;  %v3158_v38 = vadd.f32 %v3130_v51, %v3070_v26  ;;  %v3218_v13 = vmul.f32 %v5808_v7, %v3186_v16  ;;  %9002 = vst [vmem:[#allocation204_spill] sm:$0xff] %v6276_v1  ;;  %v2750_v17 = vld [vmem:[#allocation2 + $0x88] sm:$0x3f]  ;;  %v9034_v1 = vld [vmem:[#allocation220_spill] sm:$0xff] }
 0x18b   : > { %v3479_v48 = vmul.f32 %v6220_v32, %v2923_v60  ;;  %v6280_v55 = vmul.f32 %v5964_v47, %v5964_v47  ;;  %v626_v2 = vmul.f32 %v4429_v39, %v8935_v56  ;;  %v714_v53 = vmul.f32 %v8945_v36, %v8942_v15  ;;  %v3012_v57 = vld [vmem:[#allocation2 + $0x88] sm:$0x3f] }
 0x18c   : > { %v6287_v23 = vsel %vm1363_vm0, %v2508_v44, 0.0  ;;  %v2983_v3 = vadd.f32 %v2955_v4, %v2895_v20  ;;  %v3420_v60 = vadd.f32 %v3392_v35, %v3332_v59  ;;  %v3043_v34 = vmul.f32 %v5759_v33, %v2749_v14  ;;  %v2925_v35 = vld [vmem:[#allocation2 + $0x82] sm:$0xff] }
 0x18d   : > { %9003 = vst [vmem:[#allocation205_spill] sm:$0xff] %v6280_v55  ;;  %9004 = vst [vmem:[#allocation10_spill] sm:$0xff] %v6287_v23  ;;  %v2984_v5 = vadd.f32 %v2956_v22, %v2896_v42  ;;  %v3245_v26 = vadd.f32 %v3217_v9, %v3157_v41  ;;  %v3480_v51 = vmul.f32 %v6220_v32, %v3448_v18  ;;  %v4105_v55 = vld [vmem:[#allocation2 + $0x81] sm:$0xff]  ;;  %v2926_v22 = vld [vmem:[#allocation2 + $0x8a] sm:$0x3f] }
 0x18e   : > { %v3305_v16 = vmul.f32 %v6005_v50, %v2749_v14  ;;  %v3246_v56 = vadd.f32 %v3218_v13, %v3158_v38  ;;  %v6292_v21 = vadd.f32 %v3479_v48, %v3419_v45  ;;  %v2781_v15 = vmul.f32 %v8707_v12, %v2749_v14  ;;  %v3274_v41 = vld [vmem:[#allocation2 + $0x88] sm:$0x3f] }
 0x18f   : > { %v2869_v44 = vmul.f32 %v4105_v55, %v8709_v62  ;;  %v6296_v20 = vadd.f32 %v714_v53, %v626_v2  ;;  %v2782_v4 = vmul.f32 %v8707_v12, %v2750_v17  ;;  %v2870_v59 = vmul.f32 %v8709_v62, %v2838_v6  ;;  %v3100_v38 = vld [vmem:[#allocation2 + $0x89] sm:$0x3f] }
 0x190   : > { %9005 = vst [vmem:[#allocation164_spill] sm:$0xff] %v6292_v21  ;;  %v3044_v9 = vmul.f32 %v5759_v33, %v3012_v57  ;;  %v6301_v42 = vadd.f32 %v3480_v51, %v3420_v60  ;;  %v1434_v45 = vmul.f32 %v6131_v28, %v6131_v28  ;;  %v3071_v48 = vadd.f32 %v3043_v34, %v2983_v3  ;;  %v3188_v21 = vld [vmem:[#allocation2 + $0x8a] sm:$0x3f] }
 0x191   : > { %v3131_v14 = vmul.f32 %v4105_v55, %v5778_v61  ;;  %v6308_v13 = vmul.f32 %v4435_v43, %v8956_v52  ;;  %v6312_v18 = vmul.f32 %v6114_v31, %v6114_v31  ;;  %v3333_v2 = vadd.f32 %v3305_v16, %v3245_v26 }
 0x192   : > { %9006 = vst [vmem:[#allocation11_spill] sm:$0xff] %v6301_v42  ;;  %v3393_v53 = vmul.f32 %v4105_v55, %v6181_v25  ;;  %v6317_v17 = vsel %vm1363_vm0, %v6131_v28, 0.0  ;;  %v2897_v3 = vadd.f32 %v2869_v44, %v2781_v15  ;;  %v2957_v60 = vmul.f32 %v5349_v19, %v2925_v35  ;;  %v3362_v42 = vld [vmem:[#allocation2 + $0x89] sm:$0x3f] }
 0x193   : > { %9007 = vst [vmem:[#allocation51_spill] sm:$0xff] %v6312_v18  ;;  %9008 = vst [vmem:[#allocation208_spill] sm:$0xff] %v6317_v17  ;;  %v3306_v34 = vmul.f32 %v6005_v50, %v3274_v41  ;;  %v2898_v6 = vadd.f32 %v2870_v59, %v2782_v4  ;;  %v2958_v52 = vmul.f32 %v5349_v19, %v2926_v22  ;;  %v6324_v26 = vsel %vm1363_vm0, %v1434_v45, 0.0  ;;  %v3450_v59 = vld [vmem:[#allocation2 + $0x8a] sm:$0x3f]  ;;  %v9037_v17 = vld [vmem:[#allocation213_spill] sm:$0xff] }
 0x194   : > { %v3072_v57 = vadd.f32 %v3044_v9, %v2984_v5  ;;  %v3132_v51 = vmul.f32 %v5778_v61, %v3100_v38  ;;  %9009 = vst [vmem:[#allocation283_spill] sm:$0xff] %v6324_v26  ;;  %v2510_v55 = vmul.f32 %v6191_v24, %v6191_v24  ;;  %v3159_v16 = vadd.f32 %v3131_v14, %v3071_v48  ;;  %v9011_v9 = vld [vmem:[#allocation216_spill] sm:$0xff]  ;;  %v9013_v14 = vld [vmem:[#allocation151_spill] sm:$0xff]  ;;  %v9014_v38 = vld [vmem:[#allocation38_spill] sm:$0xff] }
 0x195   : > { %v3219_v15 = vmul.f32 %v5808_v7, %v2925_v35  ;;  %v6331_v44 = vmul.f32 %v6175_v40, %v6175_v40  ;;  %v3421_v4 = vadd.f32 %v3393_v53, %v3333_v2  ;;  %v3481_v5 = vmul.f32 %v6220_v32, %v2925_v35  ;;  %v9033_v40 = vld [vmem:[#allocation218_spill] sm:$0xff] }
 0x196   : > { %v1154_v41 = vmul.f32 %v4545_v58, %v9011_v9  ;;  %v6338_v45 = vsel %vm1363_vm0, %v6191_v24, 0.0  ;;  %v3334_v22 = vadd.f32 %v3306_v34, %v3246_v56  ;;  %v3394_v48 = vmul.f32 %v6181_v25, %v3362_v42  ;;  %v9035_v26 = vld [vmem:[#allocation226_spill] sm:$0xff]  ;;  %v9050_v58 = vld [vmem:[#allocation227_spill] sm:$0xff] }
 0x197   : > { %9010 = vst [vmem:[#allocation284_spill] sm:$0xff] %v6331_v44  ;;  %9012 = vst [vmem:[#allocation216_spill] sm:$0xff] %v6338_v45  ;;  %v1241_v28 = vmul.f32 %v9014_v38, %v9013_v14  ;;  %v6343_v23 = vadd.f32 %v2957_v60, %v2897_v3  ;;  %v6345_v44 = vadd.f32 %v2958_v52, %v2898_v6  ;;  %v6349_v53 = vsel %vm1363_vm0, %v2510_v55, 0.0  ;;  %v9018_v60 = vld [vmem:[#allocation186_spill] sm:$0xff] }
 0x198   : > { %v3160_v2 = vadd.f32 %v3132_v51, %v3072_v57  ;;  %v3220_v35 = vmul.f32 %v5808_v7, %v3188_v21  ;;  %9015 = vst [vmem:[#allocation151_spill] sm:$0xff] %v6349_v53  ;;  %v6351_v9 = vadd.f32 %v3219_v15, %v3159_v16  ;;  %v3482_v24 = vmul.f32 %v6220_v32, %v3450_v59  ;;  %v9019_v21 = vld [vmem:[#allocation217_spill] sm:$0xff]  ;;  %v9020_v57 = vld [vmem:[#allocation34_spill] sm:$0xff]  ;;  %v9021_v16 = vld [vmem:[#allocation211_spill] sm:$0xff] }
 0x199   : > { %v6356_v56 = vmul.f32 %v4429_v39, %v8995_v54  ;;  %v6358_v42 = vadd.f32 %v3481_v5, %v3421_v4  ;;  %v6362_v3 = vmul.f32 %v8945_v36, %v9013_v14  ;;  %v1182_v34 = vadd.f32 %v1154_v41, %v9018_v60  ;;  %v9022_v15 = vld [vmem:[#allocation41_spill] sm:$0xff]  ;;  %v9024_v41 = vld [vmem:[#allocation210_spill] sm:$0xff] }
 0x19a   : > { %v1242_v6 = vmul.f32 %v9014_v38, %v9019_v21  ;;  %v3422_v52 = vadd.f32 %v3394_v48, %v3334_v22  ;;  %v6369_v51 = vmul.f32 %v9020_v57, %v8995_v54  ;;  %v1269_v55 = vadd.f32 %v1241_v28, %v6248_v30  ;;  %v9026_v22 = vld [vmem:[#allocation219_spill] sm:$0xff]  ;;  %v9027_v54 = vld [vmem:[#allocation212_spill] sm:$0xff] }
 0x19b   : > { %9016 = vst [vmem:[#allocation285_spill] sm:$0xff] %v6358_v42  ;;  %9017 = vst [vmem:[#allocation286_spill] sm:$0xff] %v6362_v3  ;;  %v1329_v4 = vmul.f32 %v9022_v15, %v9021_v16  ;;  %v6374_v59 = vadd.f32 %v3220_v35, %v3160_v2  ;;  %v6378_v5 = vmul.f32 %v8950_v27, %v9013_v14  ;;  %v9029_v28 = vld [vmem:[#allocation87_spill] sm:$0xff]  ;;  %v9030_v2 = vld [vmem:[#allocation128_spill] sm:$0xff] }
 0x19c   : > { %v6382_v60 = vmul.f32 %v8945_v36, %v9024_v41  ;;  %v2231_v48 = vmul.f32 %v4901_v11, %v9026_v22  ;;  %v6388_v21 = vmul.f32 %v4435_v43, %v9027_v54  ;;  %v1707_v30 = vmul.f32 %v9029_v28, %v9026_v22  ;;  %v9031_v35 = vld [vmem:[#allocation89_spill] sm:$0xff]  ;;  %v9032_v14 = vld [vmem:[#allocation102_spill] sm:$0xff]  ;;  %v9040_v36 = vld [vmem:[#allocation223_spill] sm:$0xff] }
 0x19d   : > { %9023 = vst [vmem:[#allocation186_spill] sm:$0xff] %v6378_v5  ;;  %v1795_v42 = vmul.f32 %v9031_v35, %v9030_v2  ;;  %v1969_v53 = vmul.f32 %v9032_v14, %v9026_v22  ;;  %v1270_v45 = vadd.f32 %v1242_v6, %v1182_v34  ;;  %v1330_v41 = vmul.f32 %v9022_v15, %v9033_v40  ;;  %v9041_v6 = vld [vmem:[#allocation214_spill] sm:$0xff]  ;;  %v9045_v15 = vld [vmem:[#allocation221_spill] sm:$0xff] }
 0x19e   : > { %9025 = vst [vmem:[#allocation217_spill] sm:$0xff] %v6382_v60  ;;  %9028 = vst [vmem:[#allocation210_spill] sm:$0xff] %v6388_v21  ;;  %v1708_v47 = vmul.f32 %v9029_v28, %v9034_v1  ;;  %v1796_v54 = vmul.f32 %v9031_v35, %v9035_v26  ;;  %v6402_v18 = vadd.f32 %v3482_v24, %v3422_v52  ;;  %v9043_v24 = vld [vmem:[#allocation222_spill] sm:$0xff]  ;;  %v9047_v21 = vld [vmem:[#allocation215_spill] sm:$0xff] }
 0x19f   : > { %v6406_v31 = vmul.f32 %v9020_v57, %v9037_v17  ;;  %v6408_v8 = vadd.f32 %v1329_v4, %v1269_v55  ;;  %v2232_v34 = vmul.f32 %v4901_v11, %v9040_v36  ;;  %v6414_v40 = vmul.f32 %v8950_v27, %v9041_v6  ;;  %v9044_v55 = vld [vmem:[#allocation104_spill] sm:$0xff]  ;;  %v9046_v36 = vld [vmem:[#allocation91_spill] sm:$0xff]  ;;  %v3366_v57 = vld [vmem:[#allocation2 + $0xa9] sm:$0x3f] }
 0x1a0   : > { %9036 = vst [vmem:[#allocation219_spill] sm:$0xff] %v6402_v18  ;;  %v2259_v1 = vadd.f32 %v2231_v48, %v6162_v29  ;;  %v2319_v26 = vmul.f32 %v4917_v37, %v9030_v2  ;;  %v1970_v52 = vmul.f32 %v9032_v14, %v9043_v24  ;;  %v1823_v22 = vadd.f32 %v1795_v42, %v1707_v30  ;;  %v2751_v24 = vld [vmem:[#allocation2 + $0x90] sm:$0xff]  ;;  %v9053_v30 = vld [vmem:[#allocation230_spill] sm:$0xff] }
 0x1a1   : > { %9038 = vst [vmem:[#allocation212_spill] sm:$0xff] %v6406_v31  ;;  %9039 = vst [vmem:[#allocation87_spill] sm:$0xff] %v6408_v8  ;;  %v1997_v17 = vadd.f32 %v1969_v53, %v6147_v10  ;;  %v2057_v4 = vmul.f32 %v9044_v55, %v9030_v2  ;;  %v1883_v38 = vmul.f32 %v9046_v36, %v9045_v15  ;;  %v9054_v2 = vld [vmem:[#allocation228_spill] sm:$0xff]  ;;  %v3454_v3 = vld [vmem:[#allocation2 + $0xaa] sm:$0x3f] }
 0x1a2   : > { %9042 = vst [vmem:[#allocation128_spill] sm:$0xff] %v6414_v40  ;;  %v6428_v6 = vmul.f32 %v4530_v46, %v9047_v21  ;;  %v6430_v29 = vadd.f32 %v1330_v41, %v1270_v45  ;;  %v1824_v48 = vadd.f32 %v1796_v54, %v1708_v47  ;;  %v1884_v27 = vmul.f32 %v9046_v36, %v9050_v58  ;;  %v9058_v40 = vld [vmem:[#allocation229_spill] sm:$0xff]  ;;  %v3364_v46 = vld [vmem:[#allocation2 + $0x99] sm:$0x3f] }
 0x1a3   : > { %v6436_v10 = vmul.f32 %v6402_v18, %v6402_v18  ;;  %v6440_v53 = vmul.f32 %v6408_v8, %v6408_v8  ;;  %v2260_v42 = vadd.f32 %v2232_v34, %v6173_v49  ;;  %v2320_v21 = vmul.f32 %v4917_v37, %v9053_v30  ;;  %v9055_v18 = vld [vmem:[#allocation107_spill] sm:$0xff]  ;;  %v3276_v34 = vld [vmem:[#allocation2 + $0x98] sm:$0x3f] }
 0x1a4   : > { %9048 = vst [vmem:[#allocation218_spill] sm:$0xff] %v6428_v6  ;;  %9049 = vst [vmem:[#allocation220_spill] sm:$0xff] %v6430_v29  ;;  %v2347_v45 = vadd.f32 %v2319_v26, %v2259_v1  ;;  %v1998_v47 = vadd.f32 %v1970_v52, %v6155_v63  ;;  %v2058_v58 = vmul.f32 %v9044_v55, %v9054_v2  ;;  %v6457_v1 = vsel %vm1363_vm0, %v6430_v29, 0.0  ;;  %v4106_v30 = vld [vmem:[#allocation2 + $0x91] sm:$0xff]  ;;  %v2840_v6 = vld [vmem:[#allocation2 + $0x99] sm:$0x3f] }
 0x1a5   : > { %9051 = vst [vmem:[#allocation226_spill] sm:$0xff] %v6436_v10  ;;  %9052 = vst [vmem:[#allocation213_spill] sm:$0xff] %v6440_v53  ;;  %v2407_v41 = vmul.f32 %v4983_v0, %v9045_v15  ;;  %v2085_v54 = vadd.f32 %v2057_v4, %v1997_v17  ;;  %v6450_v10 = vadd.f32 %v1883_v38, %v1823_v22  ;;  %v3014_v17 = vld [vmem:[#allocation2 + $0x98] sm:$0x3f]  ;;  %v9057_v22 = vld [vmem:[#allocation231_spill] sm:$0xff] }
 0x1a6   : > { %v2145_v53 = vmul.f32 %v9055_v18, %v9045_v15  ;;  %v3045_v49 = vmul.f32 %v5759_v33, %v2751_v24  ;;  %9056 = vst [vmem:[#allocation223_spill] sm:$0xff] %v6457_v1  ;;  %v1436_v63 = vmul.f32 %v6430_v29, %v6430_v29  ;;  %v6461_v26 = vadd.f32 %v1884_v27, %v1824_v48  ;;  %v2752_v8 = vld [vmem:[#allocation2 + $0x98] sm:$0x3f] }
 0x1a7   : > { %v3307_v52 = vmul.f32 %v6005_v50, %v2751_v24  ;;  %v2348_v38 = vadd.f32 %v2320_v21, %v2260_v42  ;;  %v2408_v4 = vmul.f32 %v4983_v0, %v9057_v22  ;;  %v2783_v15 = vmul.f32 %v8707_v12, %v2751_v24  ;;  %v2927_v48 = vld [vmem:[#allocation2 + $0x92] sm:$0xff] }
 0x1a8   : > { %v2871_v2 = vmul.f32 %v4106_v30, %v8709_v62  ;;  %v2086_v1 = vadd.f32 %v2058_v58, %v1998_v47  ;;  %v2146_v29 = vmul.f32 %v9055_v18, %v9058_v40  ;;  %v6470_v27 = vadd.f32 %v2407_v41, %v2347_v45  ;;  %v2928_v45 = vld [vmem:[#allocation2 + $0x9a] sm:$0x3f] }
 0x1a9   : > { %v3308_v60 = vmul.f32 %v6005_v50, %v3276_v34  ;;  %v2173_v42 = vadd.f32 %v2145_v53, %v2085_v54  ;;  %v3073_v21 = vadd.f32 %v3045_v49, %v6343_v23  ;;  %v3133_v22 = vmul.f32 %v4106_v30, %v5778_v61  ;;  %v3102_v41 = vld [vmem:[#allocation2 + $0x99] sm:$0x3f] }
 0x1aa   : > { %9059 = vst [vmem:[#allocation214_spill] sm:$0xff] %v6470_v27  ;;  %v3046_v24 = vmul.f32 %v5759_v33, %v3014_v17  ;;  %v3335_v5 = vadd.f32 %v3307_v52, %v6351_v9  ;;  %v3395_v47 = vmul.f32 %v4106_v30, %v6181_v25  ;;  %v2784_v58 = vmul.f32 %v8707_v12, %v2752_v8 }
 0x1ab   : > { %v2872_v40 = vmul.f32 %v8709_v62, %v2840_v6  ;;  %v6481_v34 = vsel %vm1363_vm0, %v1436_v63, 0.0  ;;  %v6483_v53 = vadd.f32 %v2408_v4, %v2348_v38  ;;  %v2899_v23 = vadd.f32 %v2871_v2, %v2783_v15  ;;  %v3190_v4 = vld [vmem:[#allocation2 + $0x9a] sm:$0x3f] }
 0x1ac   : > { %9060 = vst [vmem:[#allocation222_spill] sm:$0xff] %v6481_v34  ;;  %v2959_v54 = vmul.f32 %v5349_v19, %v2927_v48  ;;  %v2174_v49 = vadd.f32 %v2146_v29, %v2086_v1  ;;  %v6488_v9 = vmul.f32 %v6470_v27, %v6470_v27  ;;  %v3336_v52 = vadd.f32 %v3308_v60, %v6374_v59  ;;  %v3452_v15 = vld [vmem:[#allocation2 + $0x9a] sm:$0x3f]  ;;  %v9063_v1 = vld [vmem:[#allocation253_spill] sm:$0xff] }
 0x1ad   : > { %9061 = vst [vmem:[#allocation104_spill] sm:$0xff] %v6483_v53  ;;  %v3396_v8 = vmul.f32 %v6181_v25, %v3364_v46  ;;  %v3161_v6 = vadd.f32 %v3133_v22, %v3073_v21  ;;  %v2960_v17 = vmul.f32 %v5349_v19, %v2928_v45  ;;  %v3074_v63 = vadd.f32 %v3046_v24, %v6345_v44 }
 0x1ae   : > { %9062 = vst [vmem:[#allocation221_spill] sm:$0xff] %v6488_v9  ;;  %v3134_v38 = vmul.f32 %v5778_v61, %v3102_v41  ;;  %v3423_v30 = vadd.f32 %v3395_v47, %v3335_v5  ;;  %v2900_v2 = vadd.f32 %v2872_v40, %v2784_v58  ;;  %v3483_v29 = vmul.f32 %v6220_v32, %v2927_v48  ;;  %v9065_v40 = vld [vmem:[#allocation234_spill] sm:$0xff]  ;;  %v9066_v41 = vld [vmem:[#allocation263_spill] sm:$0xff] }
 0x1af   : > { %v1971_v9 = vmul.f32 %v9032_v14, %v9063_v1  ;;  %v6500_v59 = vsel %vm1363_vm0, %v6483_v53, 0.0  ;;  %v2512_v46 = vmul.f32 %v6483_v53, %v6483_v53  ;;  %v2987_v60 = vadd.f32 %v2959_v54, %v2899_v23 }
 0x1b0   : > { %9064 = vst [vmem:[#allocation215_spill] sm:$0xff] %v6500_v59  ;;  %v2233_v44 = vmul.f32 %v4901_v11, %v9063_v1  ;;  %v3221_v21 = vmul.f32 %v5808_v7, %v2927_v48  ;;  %v3222_v5 = vmul.f32 %v5808_v7, %v3190_v4  ;;  %v3424_v22 = vadd.f32 %v3396_v8, %v3336_v52  ;;  %v9069_v4 = vld [vmem:[#allocation260_spill] sm:$0xff]  ;;  %v2929_v59 = vld [vmem:[#allocation2 + $0xa2] sm:$0xff] }
 0x1b1   : > { %v3484_v24 = vmul.f32 %v6220_v32, %v3452_v15  ;;  %v3162_v47 = vadd.f32 %v3134_v38, %v3074_v63  ;;  %v1709_v58 = vmul.f32 %v9029_v28, %v9063_v1  ;;  %v1797_v45 = vmul.f32 %v9031_v35, %v9065_v40 }
 0x1b2   : > { %v2234_v23 = vmul.f32 %v4901_v11, %v9066_v41  ;;  %v6515_v54 = vadd.f32 %v2960_v17, %v2900_v2  ;;  %v6517_v53 = vadd.f32 %v3483_v29, %v3423_v30  ;;  %v1999_v48 = vadd.f32 %v1971_v9, %v6450_v10  ;;  %v9071_v30 = vld [vmem:[#allocation254_spill] sm:$0xff]  ;;  %v9072_v10 = vld [vmem:[#allocation257_spill] sm:$0xff] }
 0x1b3   : > { %v2059_v52 = vmul.f32 %v9044_v55, %v9065_v40  ;;  %v6523_v8 = vsel %vm1363_vm0, %v2512_v46, 0.0  ;;  %v2261_v63 = vadd.f32 %v2233_v44, %v2173_v42  ;;  %v2321_v38 = vmul.f32 %v4917_v37, %v9065_v40  ;;  %v2753_v44 = vld [vmem:[#allocation2 + $0xa0] sm:$0xff] }
 0x1b4   : > { %9067 = vst [vmem:[#allocation227_spill] sm:$0xff] %v6517_v53  ;;  %9068 = vst [vmem:[#allocation230_spill] sm:$0xff] %v6523_v8  ;;  %v1972_v15 = vmul.f32 %v9032_v14, %v9069_v4  ;;  %v3249_v1 = vadd.f32 %v3221_v21, %v3161_v6  ;;  %v6529_v17 = vadd.f32 %v3484_v24, %v3424_v22  ;;  %v9073_v8 = vld [vmem:[#allocation264_spill] sm:$0xff]  ;;  %v9075_v21 = vld [vmem:[#allocation258_spill] sm:$0xff] }
 0x1b5   : > { %v1710_v2 = vmul.f32 %v9029_v28, %v9071_v30  ;;  %v1798_v9 = vmul.f32 %v9031_v35, %v9072_v10  ;;  %v3250_v29 = vadd.f32 %v3222_v5, %v3162_v47  ;;  %v1825_v41 = vadd.f32 %v1797_v45, %v1709_v58  ;;  %v9076_v24 = vld [vmem:[#allocation259_spill] sm:$0xff]  ;;  %v9077_v47 = vld [vmem:[#allocation261_spill] sm:$0xff]  ;;  %v3278_v45 = vld [vmem:[#allocation2 + $0xa8] sm:$0x3f] }
 0x1b6   : > { %9070 = vst [vmem:[#allocation228_spill] sm:$0xff] %v6529_v17  ;;  %v2262_v46 = vadd.f32 %v2234_v23, %v2174_v49  ;;  %v2322_v42 = vmul.f32 %v4917_v37, %v9073_v8  ;;  %v6539_v40 = vmul.f32 %v6517_v53, %v6517_v53  ;;  %v2087_v6 = vadd.f32 %v2059_v52, %v1999_v48  ;;  %v9079_v52 = vld [vmem:[#allocation265_spill] sm:$0xff]  ;;  %v3016_v53 = vld [vmem:[#allocation2 + $0xa8] sm:$0x3f] }
 0x1b7   : > { %v1885_v22 = vmul.f32 %v9046_v36, %v9075_v21  ;;  %v1886_v4 = vmul.f32 %v9046_v36, %v9076_v24  ;;  %v2349_v30 = vadd.f32 %v2321_v38, %v2261_v63  ;;  %v2000_v5 = vadd.f32 %v1972_v15, %v6461_v26  ;;  %v2754_v63 = vld [vmem:[#allocation2 + $0xa8] sm:$0x3f] }
 0x1b8   : > { %9074 = vst [vmem:[#allocation107_spill] sm:$0xff] %v6539_v40  ;;  %v2060_v49 = vmul.f32 %v9044_v55, %v9077_v47  ;;  %v2409_v58 = vmul.f32 %v4983_v0, %v9075_v21  ;;  %v6552_v23 = vsel %vm1363_vm0, %v6529_v17, 0.0  ;;  %v1826_v48 = vadd.f32 %v1798_v9, %v1710_v2  ;;  %v2842_v38 = vld [vmem:[#allocation2 + $0xa9] sm:$0x3f]  ;;  %v4107_v24 = vld [vmem:[#allocation2 + $0xa1] sm:$0xff] }
 0x1b9   : > { %9078 = vst [vmem:[#allocation231_spill] sm:$0xff] %v6552_v23  ;;  %v2410_v8 = vmul.f32 %v4983_v0, %v9079_v52  ;;  %v3047_v10 = vmul.f32 %v5759_v33, %v2753_v44  ;;  %v2350_v26 = vadd.f32 %v2322_v42, %v2262_v46  ;;  %v2785_v15 = vmul.f32 %v8707_v12, %v2753_v44  ;;  %v9081_v9 = vld [vmem:[#allocation262_spill] sm:$0xff] }
 0x1ba   : > { %v2873_v47 = vmul.f32 %v4107_v24, %v8709_v62  ;;  %v3309_v40 = vmul.f32 %v6005_v50, %v2753_v44  ;;  %v6562_v23 = vmul.f32 %v6529_v17, %v6529_v17  ;;  %v2147_v2 = vmul.f32 %v9055_v18, %v9075_v21  ;;  %v2930_v21 = vld [vmem:[#allocation2 + $0xaa] sm:$0x3f] }
 0x1bb   : > { %v2148_v52 = vmul.f32 %v9055_v18, %v9081_v9  ;;  %v3310_v46 = vmul.f32 %v6005_v50, %v3278_v45  ;;  %v2088_v42 = vadd.f32 %v2060_v49, %v2000_v5  ;;  %v6569_v27 = vadd.f32 %v2409_v58, %v2349_v30  ;;  %v3104_v5 = vld [vmem:[#allocation2 + $0xa9] sm:$0x3f] }
 0x1bc   : > { %9080 = vst [vmem:[#allocation229_spill] sm:$0xff] %v6562_v23  ;;  %v2786_v34 = vmul.f32 %v8707_v12, %v2754_v63  ;;  %v2874_v44 = vmul.f32 %v8709_v62, %v2842_v38  ;;  %v3075_v31 = vadd.f32 %v3047_v10, %v2987_v60  ;;  %v3135_v17 = vmul.f32 %v4107_v24, %v5778_v61 }
 0x1bd   : > { %9082 = vst [vmem:[#allocation253_spill] sm:$0xff] %v6569_v27  ;;  %v3397_v23 = vmul.f32 %v4107_v24, %v6181_v25  ;;  %v3048_v39 = vmul.f32 %v5759_v33, %v3016_v53  ;;  %v6576_v9 = vadd.f32 %v2410_v8, %v2350_v26  ;;  %v2901_v43 = vadd.f32 %v2873_v47, %v2785_v15 }
 0x1be   : > { %v3337_v45 = vadd.f32 %v3309_v40, %v3249_v1  ;;  %v2961_v30 = vmul.f32 %v5349_v19, %v2929_v59  ;;  %v1913_v49 = vadd.f32 %v1885_v22, %v1825_v41  ;;  %v1914_v58 = vadd.f32 %v1886_v4, %v1826_v48  ;;  %v3192_v41 = vld [vmem:[#allocation2 + $0xaa] sm:$0x3f] }
 0x1bf   : > { %9083 = vst [vmem:[#allocation234_spill] sm:$0xff] %v6576_v9  ;;  %v3338_v63 = vadd.f32 %v3310_v46, %v3250_v29  ;;  %v3398_v38 = vmul.f32 %v6181_v25, %v3366_v57  ;;  %v2175_v60 = vadd.f32 %v2147_v2, %v2087_v6  ;;  %v2176_v10 = vadd.f32 %v2148_v52, %v2088_v42  ;;  %v9088_v52 = vld [vmem:[#allocation240_spill] sm:$0xff] }
 0x1c0   : > { %v2902_v16 = vadd.f32 %v2874_v44, %v2786_v34  ;;  %v2962_v24 = vmul.f32 %v5349_v19, %v2930_v21  ;;  %v6583_v53 = vmul.f32 %v6569_v27, %v6569_v27  ;;  %v3163_v8 = vadd.f32 %v3135_v17, %v3075_v31  ;;  %v9086_v34 = vld [vmem:[#allocation127_spill] sm:$0xff]  ;;  %v9089_v42 = vld [vmem:[#allocation156_spill] sm:$0xff] }
 0x1c1   : > { %v3076_v1 = vadd.f32 %v3048_v39, %v6515_v54  ;;  %v3136_v40 = vmul.f32 %v5778_v61, %v3104_v5  ;;  %v6589_v29 = vsel %vm1363_vm0, %v6576_v9, 0.0  ;;  %v3425_v57 = vadd.f32 %v3397_v23, %v3337_v45  ;;  %v9087_v23 = vld [vmem:[#allocation146_spill] sm:$0xff]  ;;  %v9090_v21 = vld [vmem:[#allocation132_spill] sm:$0xff] }
 0x1c2   : > { %9084 = vst [vmem:[#allocation263_spill] sm:$0xff] %v6583_v53  ;;  %9085 = vst [vmem:[#allocation260_spill] sm:$0xff] %v6589_v29  ;;  %v2989_v6 = vadd.f32 %v2961_v30, %v2901_v43  ;;  %v1973_v22 = vmul.f32 %v9032_v14, %v9086_v34  ;;  %v2514_v4 = vmul.f32 %v6576_v9, %v6576_v9 }
 0x1c3   : > { %v3426_v48 = vadd.f32 %v3398_v38, %v3338_v63  ;;  %v3486_v31 = vmul.f32 %v6220_v32, %v3454_v3  ;;  %v2235_v39 = vmul.f32 %v4901_v11, %v9086_v34  ;;  %v6598_v54 = vadd.f32 %v2962_v24, %v2902_v16 }
 0x1c4   : > { %v3223_v17 = vmul.f32 %v5808_v7, %v2929_v59  ;;  %v3224_v26 = vmul.f32 %v5808_v7, %v3192_v41  ;;  %v2236_v43 = vmul.f32 %v4901_v11, %v9087_v23  ;;  %v3164_v15 = vadd.f32 %v3136_v40, %v3076_v1  ;;  %v9094_v40 = vld [vmem:[#allocation142_spill] sm:$0xff] }
 0x1c5   : > { %v3485_v47 = vmul.f32 %v6220_v32, %v2929_v59  ;;  %v1711_v2 = vmul.f32 %v9029_v28, %v9086_v34  ;;  %v1799_v3 = vmul.f32 %v9031_v35, %v9088_v52  ;;  %v2001_v46 = vadd.f32 %v1973_v22, %v1913_v49  ;;  %v9093_v49 = vld [vmem:[#allocation129_spill] sm:$0xff]  ;;  %v2755_v34 = vld [vmem:[#allocation2 + $0xb0] sm:$0xff] }
 0x1c6   : > { %v2061_v16 = vmul.f32 %v9044_v55, %v9088_v52  ;;  %v1712_v44 = vmul.f32 %v9029_v28, %v9089_v42  ;;  %v1800_v45 = vmul.f32 %v9031_v35, %v9090_v21  ;;  %v6616_v30 = vsel %vm1363_vm0, %v2514_v4, 0.0  ;;  %v9096_v42 = vld [vmem:[#allocation157_spill] sm:$0xff]  ;;  %v9142_v35 = vld [vmem:[#allocation118_spill] sm:$0xff] }
 0x1c7   : > { %9091 = vst [vmem:[#allocation254_spill] sm:$0xff] %v6616_v30  ;;  %v6618_v59 = vadd.f32 %v3486_v31, %v3426_v48  ;;  %v2263_v5 = vadd.f32 %v2235_v39, %v2175_v60  ;;  %v2323_v63 = vmul.f32 %v4917_v37, %v9088_v52  ;;  %v3251_v38 = vadd.f32 %v3223_v17, %v3163_v8  ;;  %v9097_v39 = vld [vmem:[#allocation137_spill] sm:$0xff]  ;;  %v9098_v17 = vld [vmem:[#allocation138_spill] sm:$0xff] }
 0x1c8   : > { %v1974_v24 = vmul.f32 %v9032_v14, %v9093_v49  ;;  %v2264_v1 = vadd.f32 %v2236_v43, %v2176_v10  ;;  %v2324_v41 = vmul.f32 %v4917_v37, %v9094_v40  ;;  %v3252_v22 = vadd.f32 %v3224_v26, %v3164_v15  ;;  %v3018_v10 = vld [vmem:[#allocation2 + $0xb8] sm:$0x3f]  ;;  %v3108_v30 = vld [vmem:[#allocation2 + $0xc9] sm:$0x3f] }
 0x1c9   : > { %9092 = vst [vmem:[#allocation257_spill] sm:$0xff] %v6618_v59  ;;  %v6626_v23 = vadd.f32 %v3485_v47, %v3425_v57  ;;  %v1827_v4 = vadd.f32 %v1799_v3, %v1711_v2  ;;  %v1887_v48 = vmul.f32 %v9046_v36, %v9096_v42  ;;  %v2089_v60 = vadd.f32 %v2061_v16, %v2001_v46  ;;  %v2756_v15 = vld [vmem:[#allocation2 + $0xb8] sm:$0x3f] }
 0x1ca   : > { %v1828_v31 = vadd.f32 %v1800_v45, %v1712_v44  ;;  %v1888_v8 = vmul.f32 %v9046_v36, %v9097_v39  ;;  %v2062_v52 = vmul.f32 %v9044_v55, %v9098_v17  ;;  %v6636_v43 = vsel %vm1363_vm0, %v6618_v59, 0.0  ;;  %v2844_v47 = vld [vmem:[#allocation2 + $0xb9] sm:$0x3f]  ;;  %v9100_v44 = vld [vmem:[#allocation143_spill] sm:$0xff] }
 0x1cb   : > { %9095 = vst [vmem:[#allocation264_spill] sm:$0xff] %v6626_v23  ;;  %9099 = vst [vmem:[#allocation258_spill] sm:$0xff] %v6636_v43  ;;  %v2351_v26 = vadd.f32 %v2323_v63, %v2263_v5  ;;  %v3049_v57 = vmul.f32 %v5759_v33, %v2755_v34  ;;  %v830_v2 = vadd.f32 %v6308_v13, %v6296_v20  ;;  %v3280_v45 = vld [vmem:[#allocation2 + $0xb8] sm:$0x3f] }
 0x1cc   : > { %v2002_v3 = vadd.f32 %v1974_v24, %v1914_v58  ;;  %v2352_v46 = vadd.f32 %v2324_v41, %v2264_v1  ;;  %v2411_v16 = vmul.f32 %v4983_v0, %v9096_v42  ;;  %v2412_v21 = vmul.f32 %v4983_v0, %v9100_v44  ;;  %v4108_v13 = vld [vmem:[#allocation2 + $0xb1] sm:$0xff]  ;;  %v3106_v41 = vld [vmem:[#allocation2 + $0xb9] sm:$0x3f] }
 0x1cd   : > { %v6645_v49 = vadd.f32 %v1887_v48, %v1827_v4  ;;  %v3311_v5 = vmul.f32 %v6005_v50, %v2755_v34  ;;  %v3050_v63 = vmul.f32 %v5759_v33, %v3018_v10  ;;  %v6650_v40 = vadd.f32 %v6369_v51, %v830_v2  ;;  %v2931_v17 = vld [vmem:[#allocation2 + $0xb2] sm:$0xff]  ;;  %v2932_v10 = vld [vmem:[#allocation2 + $0xba] sm:$0x3f] }
 0x1ce   : > { %v2787_v20 = vmul.f32 %v8707_v12, %v2755_v34  ;;  %v2875_v58 = vmul.f32 %v4108_v13, %v8709_v62  ;;  %v2788_v24 = vmul.f32 %v8707_v12, %v2756_v15  ;;  %v2876_v1 = vmul.f32 %v8709_v62, %v2844_v47  ;;  %v9101_v34 = vld [vmem:[#allocation139_spill] sm:$0xff]  ;;  %v3368_v47 = vld [vmem:[#allocation2 + $0xb9] sm:$0x3f] }
 0x1cf   : > { %v2149_v4 = vmul.f32 %v9055_v18, %v9096_v42  ;;  %v3077_v48 = vadd.f32 %v3049_v57, %v2989_v6  ;;  %v3137_v39 = vmul.f32 %v4108_v13, %v5778_v61  ;;  %v3312_v51 = vmul.f32 %v6005_v50, %v3280_v45 }
 0x1d0   : > { %v2090_v2 = vadd.f32 %v2062_v52, %v2002_v3  ;;  %v2150_v44 = vmul.f32 %v9055_v18, %v9101_v34  ;;  %v6662_v9 = vadd.f32 %v2411_v16, %v2351_v26  ;;  %v6664_v15 = vadd.f32 %v2412_v21, %v2352_v46  ;;  %v3194_v3 = vld [vmem:[#allocation2 + $0xba] sm:$0x3f] }
 0x1d1   : > { %v3339_v59 = vadd.f32 %v3311_v5, %v3251_v38  ;;  %v3399_v43 = vmul.f32 %v4108_v13, %v6181_v25  ;;  %v3078_v6 = vadd.f32 %v3050_v63, %v6598_v54  ;;  %v3138_v42 = vmul.f32 %v5778_v61, %v3106_v41  ;;  %v2757_v38 = vld [vmem:[#allocation2 + $0xc0] sm:$0xff] }
 0x1d2   : > { %9102 = vst [vmem:[#allocation259_spill] sm:$0xff] %v6662_v9  ;;  %9103 = vst [vmem:[#allocation261_spill] sm:$0xff] %v6664_v15  ;;  %v2903_v57 = vadd.f32 %v2875_v58, %v2787_v20  ;;  %v2904_v23 = vadd.f32 %v2876_v1, %v2788_v24  ;;  %v2963_v45 = vmul.f32 %v5349_v19, %v2931_v17  ;;  %v3456_v20 = vld [vmem:[#allocation2 + $0xba] sm:$0x3f] }
 0x1d3   : > { %v2964_v52 = vmul.f32 %v5349_v19, %v2932_v10  ;;  %v3165_v34 = vadd.f32 %v3137_v39, %v3077_v48  ;;  %v3225_v26 = vmul.f32 %v5808_v7, %v2931_v17  ;;  %v3340_v46 = vadd.f32 %v3312_v51, %v3252_v22  ;;  %v2758_v10 = vld [vmem:[#allocation2 + $0xc8] sm:$0x3f] }
 0x1d4   : > { %v3400_v16 = vmul.f32 %v6181_v25, %v3368_v47  ;;  %v6673_v21 = vadd.f32 %v1888_v8, %v1828_v31  ;;  %v6675_v5 = vadd.f32 %v2149_v4, %v2089_v60  ;;  %v6677_v54 = vadd.f32 %v2150_v44, %v2090_v2  ;;  %v2846_v51 = vld [vmem:[#allocation2 + $0xc9] sm:$0x3f]  ;;  %v9108_v47 = vld [vmem:[#allocation211_spill] sm:$0xff] }
 0x1d5   : > { %v2516_v63 = vmul.f32 %v6664_v15, %v6664_v15  ;;  %v6683_v13 = vmul.f32 %v6662_v9, %v6662_v9  ;;  %v3427_v58 = vadd.f32 %v3399_v43, %v3339_v59  ;;  %v3166_v24 = vadd.f32 %v3138_v42, %v3078_v6  ;;  %v9107_v2 = vld [vmem:[#allocation286_spill] sm:$0xff]  ;;  %v9118_v9 = vld [vmem:[#allocation37_spill] sm:$0xff] }
 0x1d6   : > { %v3226_v22 = vmul.f32 %v5808_v7, %v3194_v3  ;;  %v6688_v31 = vsel %vm1363_vm0, %v6664_v15, 0.0  ;;  %v2991_v60 = vadd.f32 %v2963_v45, %v2903_v57  ;;  %v2992_v8 = vadd.f32 %v2964_v52, %v2904_v23  ;;  %v9109_v23 = vld [vmem:[#allocation14_spill] sm:$0xff]  ;;  %v9113_v15 = vld [vmem:[#allocation183_spill] sm:$0xff] }
 0x1d7   : > { %9104 = vst [vmem:[#allocation265_spill] sm:$0xff] %v6683_v13  ;;  %9105 = vst [vmem:[#allocation262_spill] sm:$0xff] %v6688_v31  ;;  %v3051_v1 = vmul.f32 %v5759_v33, %v2757_v38  ;;  %v3253_v41 = vadd.f32 %v3225_v26, %v3165_v34  ;;  %v3428_v4 = vadd.f32 %v3400_v16, %v3340_v46  ;;  %v6694_v59 = vsel %vm1363_vm0, %v2516_v63, 0.0  ;;  %v4109_v45 = vld [vmem:[#allocation2 + $0xc1] sm:$0xff]  ;;  %v9111_v63 = vld [vmem:[#allocation12_spill] sm:$0xff] }
 0x1d8   : > { %v3488_v48 = vmul.f32 %v6220_v32, %v3456_v20  ;;  %v3313_v39 = vmul.f32 %v6005_v50, %v2757_v38  ;;  %9106 = vst [vmem:[#allocation127_spill] sm:$0xff] %v6694_v59  ;;  %v3487_v43 = vmul.f32 %v6220_v32, %v2931_v17  ;;  %v744_v44 = vadd.f32 %v9107_v2, %v6356_v56  ;;  %v2933_v46 = vld [vmem:[#allocation2 + $0xc2] sm:$0xff]  ;;  %v9114_v59 = vld [vmem:[#allocation212_spill] sm:$0xff] }
 0x1d9   : > { %v804_v6 = vmul.f32 %v9109_v23, %v9108_v47  ;;  %v6701_v42 = vadd.f32 %v3226_v22, %v3166_v24  ;;  %v2789_v57 = vmul.f32 %v8707_v12, %v2757_v38  ;;  %v2877_v52 = vmul.f32 %v4109_v45, %v8709_v62  ;;  %v3020_v16 = vld [vmem:[#allocation2 + $0xc8] sm:$0x3f]  ;;  %v9110_v56 = vld [vmem:[#allocation209_spill] sm:$0xff] }
 0x1da   : > { %v3139_v3 = vmul.f32 %v4109_v45, %v5778_v61  ;;  %v3079_v34 = vadd.f32 %v3051_v1, %v2991_v60  ;;  %v2790_v26 = vmul.f32 %v8707_v12, %v2758_v10  ;;  %v2878_v17 = vmul.f32 %v8709_v62, %v2846_v51  ;;  %v2934_v22 = vld [vmem:[#allocation2 + $0xca] sm:$0x3f] }
 0x1db   : > { %v629_v20 = vmul.f32 %v9111_v63, %v9110_v56  ;;  %v6710_v2 = vadd.f32 %v3488_v48, %v3428_v4  ;;  %v3341_v24 = vadd.f32 %v3313_v39, %v3253_v41  ;;  %v3401_v38 = vmul.f32 %v4109_v45, %v6181_v25  ;;  %v9115_v1 = vld [vmem:[#allocation90_spill] sm:$0xff] }
 0x1dc   : > { %v919_v13 = vadd.f32 %v9114_v59, %v9113_v15  ;;  %v832_v60 = vadd.f32 %v804_v6, %v744_v44  ;;  %v9116_v10 = vld [vmem:[#allocation34_spill] sm:$0xff]  ;;  %v1066_v56 = vmul.f32 %v9118_v9, %v9108_v47  ;;  %v6721_v4 = vadd.f32 %v3487_v43, %v3427_v58  ;;  %v9120_v44 = vld [vmem:[#allocation217_spill] sm:$0xff]  ;;  %v9122_v47 = vld [vmem:[#allocation128_spill] sm:$0xff] }
 0x1dd   : > { %9112 = vst [vmem:[#allocation146_spill] sm:$0xff] %v6710_v2  ;;  %v892_v53 = vmul.f32 %v9116_v10, %v9115_v1  ;;  %v9117_v51 = vld [vmem:[#allocation186_spill] sm:$0xff]  ;;  %v2905_v41 = vadd.f32 %v2877_v52, %v2789_v57  ;;  %v2965_v48 = vmul.f32 %v5349_v19, %v2933_v46  ;;  %v3052_v39 = vmul.f32 %v5759_v33, %v3020_v16 }
 0x1de   : > { %v1006_v31 = vadd.f32 %v9117_v51, %v6650_v40  ;;  %9119 = vst [vmem:[#allocation240_spill] sm:$0xff] %v6721_v4  ;;  %v6725_v45 = vadd.f32 %v3139_v3, %v3079_v34  ;;  %v2906_v15 = vadd.f32 %v2878_v17, %v2790_v26  ;;  %v2966_v59 = vmul.f32 %v5349_v19, %v2934_v22  ;;  %v3196_v43 = vld [vmem:[#allocation2 + $0xca] sm:$0x3f]  ;;  %v9123_v3 = vld [vmem:[#allocation236_spill] sm:$0xff]  ;;  %v9124_v34 = vld [vmem:[#allocation35_spill] sm:$0xff] }
 0x1df   : > { %v745_v6 = vadd.f32 %v9120_v44, %v629_v20  ;;  %v6731_v40 = vsel %vm1363_vm0, %v6710_v2, 0.0  ;;  %v6733_v51 = vadd.f32 %v3401_v38, %v3341_v24  ;;  %v3140_v58 = vmul.f32 %v5778_v61, %v3108_v30  ;;  %v3282_v52 = vld [vmem:[#allocation2 + $0xc8] sm:$0x3f]  ;;  %v9125_v22 = vld [vmem:[#allocation40_spill] sm:$0xff]  ;;  %v9126_v38 = vld [vmem:[#allocation277_spill] sm:$0xff] }
 0x1e0   : > { %9121 = vst [vmem:[#allocation156_spill] sm:$0xff] %v6731_v40  ;;  %v1007_v57 = vadd.f32 %v9122_v47, %v919_v13  ;;  %v920_v16 = vadd.f32 %v892_v53, %v832_v60  ;;  %v980_v26 = vmul.f32 %v9124_v34, %v9123_v3  ;;  %v1094_v17 = vadd.f32 %v1066_v56, %v1006_v31  ;;  %v9127_v13 = vld [vmem:[#allocation159_spill] sm:$0xff]  ;;  %v9128_v31 = vld [vmem:[#allocation210_spill] sm:$0xff]  ;;  %v9135_v19 = vld [vmem:[#allocation281_spill] sm:$0xff] }
 0x1e1   : > { %v1155_v20 = vmul.f32 %v9125_v22, %v9115_v1  ;;  %v6741_v44 = vadd.f32 %v2965_v48, %v2905_v41  ;;  %v3080_v2 = vadd.f32 %v3052_v39, %v2992_v8  ;;  %v3227_v24 = vmul.f32 %v5808_v7, %v2933_v46  ;;  %v9129_v41 = vld [vmem:[#allocation161_spill] sm:$0xff]  ;;  %v9130_v48 = vld [vmem:[#allocation218_spill] sm:$0xff] }
 0x1e2   : > { %v1975_v30 = vmul.f32 %v9032_v14, %v9126_v38  ;;  %v3228_v40 = vmul.f32 %v5808_v7, %v3196_v43  ;;  %v893_v53 = vmul.f32 %v9116_v10, %v9127_v13  ;;  %v2237_v60 = vmul.f32 %v4901_v11, %v9126_v38  ;;  %v9131_v47 = vld [vmem:[#allocation182_spill] sm:$0xff]  ;;  %v9132_v43 = vld [vmem:[#allocation141_spill] sm:$0xff] }
 0x1e3   : > { %v833_v56 = vadd.f32 %v9128_v31, %v745_v6  ;;  %v3314_v1 = vmul.f32 %v6005_v50, %v3282_v52  ;;  %v1156_v8 = vmul.f32 %v9125_v22, %v9129_v41  ;;  %v1095_v39 = vadd.f32 %v9130_v48, %v1007_v57  ;;  %v9133_v7 = vld [vmem:[#allocation38_spill] sm:$0xff]  ;;  %v9134_v31 = vld [vmem:[#allocation155_spill] sm:$0xff] }
 0x1e4   : > { %v1976_v4 = vmul.f32 %v9032_v14, %v9131_v47  ;;  %v1008_v29 = vadd.f32 %v980_v26, %v920_v16  ;;  %v1068_v27 = vmul.f32 %v9118_v9, %v9132_v43  ;;  %v1183_v13 = vadd.f32 %v1155_v20, %v1094_v17  ;;  %v9136_v17 = vld [vmem:[#allocation160_spill] sm:$0xff]  ;;  %v9137_v47 = vld [vmem:[#allocation266_spill] sm:$0xff] }
 0x1e5   : > { %v1243_v38 = vmul.f32 %v9133_v7, %v9123_v3  ;;  %v3489_v6 = vmul.f32 %v6220_v32, %v2933_v46  ;;  %v2003_v52 = vadd.f32 %v1975_v30, %v6645_v49  ;;  %v2063_v41 = vmul.f32 %v9044_v55, %v9134_v31  ;;  %v9138_v30 = vld [vmem:[#allocation278_spill] sm:$0xff] }
 0x1e6   : > { %v2238_v57 = vmul.f32 %v4901_v11, %v9135_v19  ;;  %v2265_v48 = vadd.f32 %v2237_v60, %v6675_v5  ;;  %v2325_v16 = vmul.f32 %v4917_v37, %v9134_v31  ;;  %v921_v26 = vadd.f32 %v893_v53, %v833_v56  ;;  %v9139_v5 = vld [vmem:[#allocation41_spill] sm:$0xff]  ;;  %v3370_v31 = vld [vmem:[#allocation2 + $0xc9] sm:$0x3f]  ;;  %v9140_v56 = vld [vmem:[#allocation279_spill] sm:$0xff] }
 0x1e7   : > { %v981_v20 = vmul.f32 %v9124_v34, %v9136_v17  ;;  %v1184_v3 = vadd.f32 %v1156_v8, %v1095_v39  ;;  %v1244_v46 = vmul.f32 %v9133_v7, %v9137_v47  ;;  %v2004_v49 = vadd.f32 %v1976_v4, %v6673_v21  ;;  %v9141_v39 = vld [vmem:[#allocation282_spill] sm:$0xff] }
 0x1e8   : > { %v2064_v14 = vmul.f32 %v9044_v55, %v9138_v30  ;;  %v3168_v36 = vadd.f32 %v3140_v58, %v3080_v2  ;;  %v1096_v19 = vadd.f32 %v1068_v27, %v1008_v29  ;;  %v1271_v11 = vadd.f32 %v1243_v38, %v1183_v13  ;;  %v3458_v29 = vld [vmem:[#allocation2 + $0xca] sm:$0x3f] }
 0x1e9   : > { %v1331_v60 = vmul.f32 %v9139_v5, %v9132_v43  ;;  %v2091_v53 = vadd.f32 %v2063_v41, %v2003_v52  ;;  %v2151_v17 = vmul.f32 %v9055_v18, %v9140_v56  ;;  %v2266_v8 = vadd.f32 %v2238_v57, %v6677_v54  ;;  %v9143_v43 = vld [vmem:[#allocation268_spill] sm:$0xff] }
 0x1ea   : > { %v2326_v47 = vmul.f32 %v4917_v37, %v9141_v39  ;;  %v2353_v21 = vadd.f32 %v2325_v16, %v2265_v48  ;;  %v1009_v4 = vadd.f32 %v981_v20, %v921_v26  ;;  %v1069_v2 = vmul.f32 %v9118_v9, %v9142_v35  ;;  %v9144_v52 = vld [vmem:[#allocation280_spill] sm:$0xff]  ;;  %v9146_v35 = vld [vmem:[#allocation167_spill] sm:$0xff] }
 0x1eb   : > { %v2413_v27 = vmul.f32 %v4983_v0, %v9140_v56  ;;  %v1272_v58 = vadd.f32 %v1244_v46, %v1184_v3  ;;  %v1332_v13 = vmul.f32 %v9139_v5, %v9143_v43  ;;  %v2092_v38 = vadd.f32 %v2064_v14, %v2004_v49  ;;  %v9147_v3 = vld [vmem:[#allocation148_spill] sm:$0xff]  ;;  %v9157_v39 = vld [vmem:[#allocation207_spill] sm:$0xff]  ;;  %v9160_v43 = vld [vmem:[#allocation13_spill] sm:$0xff] }
 0x1ec   : > { %v2152_v54 = vmul.f32 %v9055_v18, %v9144_v52  ;;  %v6793_v41 = vadd.f32 %v2966_v59, %v2906_v15  ;;  %v3342_v57 = vadd.f32 %v3314_v1, %v6701_v42  ;;  %v3402_v48 = vmul.f32 %v6181_v25, %v3370_v31  ;;  %v2759_v42 = vld [vmem:[#allocation2 + $0xd0] sm:$0xff]  ;;  %v6817_v31 = vld [vmem:[#allocation2 + $0x1] sm:$0xff]  ;;  %v9161_v52 = vld [vmem:[#allocation224_spill] sm:$0xff] }
 0x1ed   : > { %v6797_v16 = vadd.f32 %v1331_v60, %v1271_v11  ;;  %v1185_v26 = vadd.f32 %v9146_v35, %v1096_v19  ;;  %v2179_v20 = vadd.f32 %v2151_v17, %v2091_v53  ;;  %v2354_v30 = vadd.f32 %v2326_v47, %v2266_v8  ;;  %v4110_v56 = vld [vmem:[#allocation2 + $0xd1] sm:$0xff]  ;;  %v9156_v17 = vld [vmem:[#allocation165_spill] sm:$0xff] }
 0x1ee   : > { %9145 = vst [vmem:[#allocation132_spill] sm:$0xff] %v6793_v41  ;;  %v2414_v46 = vmul.f32 %v4983_v0, %v9147_v3  ;;  %v6803_v14 = vadd.f32 %v3227_v24, %v6725_v45  ;;  %v6806_v49 = vmul.f32 %v6220_v32, %v3458_v29  ;;  %v1097_v15 = vadd.f32 %v1069_v2, %v1009_v4  ;;  %v9159_v2 = vld [vmem:[#allocation168_spill] sm:$0xff]  ;;  %v6839_v29 = vld [vmem:[#allocation2] sm:$0xff] }
 0x1ef   : > { %v6808_v59 = vadd.f32 %v2413_v27, %v2353_v21  ;;  %v6810_v1 = vadd.f32 %v3228_v40, %v3168_v36  ;;  %v6813_v11 = vadd.f32 %v3489_v6, %v6733_v51  ;;  %v6815_v19 = vadd.f32 %v1332_v13, %v1272_v58  ;;  %v6827_v40 = vld [vmem:[#allocation2 + $0x2] sm:$0xff]  ;;  %v747_v51 = vld [vmem:[#allocation2 + $0xa] sm:$0x3f] }
 0x1f0   : > { %9148 = vst [vmem:[#allocation129_spill] sm:$0xff] %v6803_v14  ;;  %9149 = vst [vmem:[#allocation142_spill] sm:$0xff] %v6806_v49  ;;  %v2180_v60 = vadd.f32 %v2152_v54, %v2092_v38  ;;  %v6819_v53 = vadd.f32 %v3402_v48, %v3342_v57  ;;  %v6823_v45 = vmul.f32 %v6797_v16, %v6797_v16  ;;  %v9162_v57 = vld [vmem:[#allocation152_spill] sm:$0xff]  ;;  %v9163_v48 = vld [vmem:[#allocation153_spill] sm:$0xff] }
 0x1f1   : > { %9150 = vst [vmem:[#allocation157_spill] sm:$0xff] %v6808_v59  ;;  %9151 = vst [vmem:[#allocation137_spill] sm:$0xff] %v6810_v1  ;;  %v2791_v24 = vmul.f32 %v8707_v12, %v2759_v42  ;;  %v2879_v36 = vmul.f32 %v4110_v56, %v8709_v62  ;;  %v6829_v6 = vadd.f32 %v2414_v46, %v2354_v30  ;;  %v9176_v49 = vld [vmem:[#allocation15_spill] sm:$0xff]  ;;  %v9178_v1 = vld [vmem:[#allocation176_spill] sm:$0xff] }
 0x1f2   : > { %9152 = vst [vmem:[#allocation138_spill] sm:$0xff] %v6813_v11  ;;  %9153 = vst [vmem:[#allocation143_spill] sm:$0xff] %v6815_v19  ;;  %v1273_v8 = vadd.f32 %v9156_v17, %v1185_v26  ;;  %v2267_v47 = vadd.f32 %v9157_v39, %v2179_v20  ;;  %v3053_v21 = vmul.f32 %v5759_v33, %v2759_v42  ;;  %v6856_v20 = vsel %vm1363_vm0, %v6815_v19, 0.0  ;;  %v9167_v39 = vld [vmem:[#allocation27_spill] sm:$0xff] }
 0x1f3   : > { %9154 = vst [vmem:[#allocation139_spill] sm:$0xff] %v6819_v53  ;;  %9155 = vst [vmem:[#allocation286_spill] sm:$0xff] %v6829_v6  ;;  %v6836_v4 = vmul.f32 %v6808_v59, %v6808_v59  ;;  %v1186_v27 = vadd.f32 %v9159_v2, %v1097_v15  ;;  %v602_v58 = vmul.f32 %v6839_v29, %v9111_v63  ;;  %v6863_v46 = vsel %vm1363_vm0, %v6829_v6, 0.0  ;;  %v9253_v59 = vld [vmem:[#allocation180_spill] sm:$0xff] }
 0x1f4   : > { %v690_v13 = vmul.f32 %v9160_v43, %v6817_v31  ;;  %v1438_v38 = vmul.f32 %v6815_v19, %v6815_v19  ;;  %v6848_v54 = vadd.f32 %v9161_v52, %v2180_v60  ;;  %v719_v35 = vadd.f32 %v9163_v48, %v9162_v57  ;;  %9165 = vst [vmem:[#allocation209_spill] sm:$0xff] %v6863_v46  ;;  %v9166_v60 = vld [vmem:[#allocation21_spill] sm:$0xff]  ;;  %v9172_v48 = vld [vmem:[#allocation20_spill] sm:$0xff] }
 0x1f5   : > { %9158 = vst [vmem:[#allocation211_spill] sm:$0xff] %v6836_v4  ;;  %v778_v26 = vmul.f32 %v9109_v23, %v6827_v40  ;;  %v6858_v63 = vadd.f32 %v2879_v36, %v2791_v24  ;;  %v779_v3 = vmul.f32 %v9109_v23, %v747_v51  ;;  %v3081_v15 = vadd.f32 %v3053_v21, %v6741_v44  ;;  %v9208_v19 = vld [vmem:[#allocation25_spill] sm:$0xff]  ;;  %v9209_v46 = vld [vmem:[#allocation8_spill] sm:$0xff] }
 0x1f6   : > { %v718_v30 = vadd.f32 %v690_v13, %v602_v58  ;;  %v782_v17 = vmul.f32 %v9109_v23, %v9166_v60  ;;  %v866_v2 = vmul.f32 %v9116_v10, %v9167_v39  ;;  %v2518_v43 = vmul.f32 %v6829_v6, %v6829_v6  ;;  %v9168_v58 = vld [vmem:[#allocation29_spill] sm:$0xff]  ;;  %v9175_v6 = vld [vmem:[#allocation19_spill] sm:$0xff] }
 0x1f7   : > { %9164 = vst [vmem:[#allocation14_spill] sm:$0xff] %v6858_v63  ;;  %v807_v36 = vadd.f32 %v779_v3, %v719_v35  ;;  %v867_v51 = vmul.f32 %v9116_v10, %v9168_v58  ;;  %v6875_v13 = vsel %vm1363_vm0, %v1438_v38, 0.0  ;;  %v3141_v52 = vmul.f32 %v4110_v56, %v5778_v61  ;;  %v9170_v23 = vld [vmem:[#allocation117_spill] sm:$0xff]  ;;  %v9173_v3 = vld [vmem:[#allocation58_spill] sm:$0xff]  ;;  %v9190_v63 = vld [vmem:[#allocation28_spill] sm:$0xff] }
 0x1f8   : > { %v806_v24 = vadd.f32 %v778_v26, %v718_v30  ;;  %v6879_v44 = vmul.f32 %v6005_v50, %v2759_v42  ;;  %v810_v21 = vadd.f32 %v782_v17, %v9170_v23  ;;  %v6883_v57 = vmul.f32 %v4110_v56, %v6181_v25  ;;  %v9174_v58 = vld [vmem:[#allocation169_spill] sm:$0xff]  ;;  %v9179_v23 = vld [vmem:[#allocation6_spill] sm:$0xff] }
 0x1f9   : > { %v868_v26 = vmul.f32 %v9116_v10, %v9172_v48  ;;  %v895_v30 = vadd.f32 %v867_v51, %v807_v36  ;;  %v1274_v39 = vadd.f32 %v9173_v3, %v1186_v27  ;;  %v6889_v38 = vadd.f32 %v9174_v58, %v1273_v8  ;;  %v9177_v42 = vld [vmem:[#allocation57_spill] sm:$0xff]  ;;  %v9185_v51 = vld [vmem:[#allocation162_spill] sm:$0xff]  ;;  %v9187_v58 = vld [vmem:[#allocation48_spill] sm:$0xff] }
 0x1fa   : > { %9169 = vst [vmem:[#allocation12_spill] sm:$0xff] %v6879_v44  ;;  %9171 = vst [vmem:[#allocation183_spill] sm:$0xff] %v6883_v57  ;;  %v894_v35 = vadd.f32 %v866_v2, %v806_v24  ;;  %v898_v11 = vadd.f32 %v9175_v6, %v810_v21  ;;  %v899_v53 = vadd.f32 %v9177_v42, %v9176_v49  ;;  %v9180_v57 = vld [vmem:[#allocation7_spill] sm:$0xff]  ;;  %v9181_v2 = vld [vmem:[#allocation22_spill] sm:$0xff]  ;;  %v6902_v27 = vsel %vm1363_vm0, %v2518_v43, 0.0 }
 0x1fb   : > { %v896_v17 = vadd.f32 %v868_v26, %v9178_v1  ;;  %v954_v56 = vmul.f32 %v9124_v34, %v9179_v23  ;;  %v956_v10 = vmul.f32 %v9124_v34, %v9180_v57  ;;  %v957_v24 = vmul.f32 %v9124_v34, %v9181_v2  ;;  %9182 = vst [vmem:[#allocation212_spill] sm:$0xff] %v6902_v27  ;;  %v9184_v6 = vld [vmem:[#allocation31_spill] sm:$0xff]  ;;  %v9186_v26 = vld [vmem:[#allocation97_spill] sm:$0xff]  ;;  %v9191_v43 = vld [vmem:[#allocation32_spill] sm:$0xff] }
 0x1fc   : > { %v6904_v8 = vadd.f32 %v3141_v52, %v3081_v15  ;;  %v983_v36 = vadd.f32 %v9184_v6, %v895_v30  ;;  %v986_v49 = vadd.f32 %v9185_v51, %v898_v11  ;;  %v987_v42 = vadd.f32 %v9187_v58, %v899_v53  ;;  %v9188_v23 = vld [vmem:[#allocation225_spill] sm:$0xff]  ;;  %v9192_v30 = vld [vmem:[#allocation23_spill] sm:$0xff]  ;;  %v9196_v6 = vld [vmem:[#allocation174_spill] sm:$0xff] }
 0x1fd   : > { %v982_v21 = vadd.f32 %v954_v56, %v894_v35  ;;  %v984_v1 = vadd.f32 %v956_v10, %v896_v17  ;;  %v985_v3 = vadd.f32 %v957_v24, %v9186_v26  ;;  %v6911_v41 = vadd.f32 %v9188_v23, %v2267_v47  ;;  %v9193_v35 = vld [vmem:[#allocation47_spill] sm:$0xff]  ;;  %v9195_v47 = vld [vmem:[#allocation50_spill] sm:$0xff]  ;;  %v9199_v44 = vld [vmem:[#allocation24_spill] sm:$0xff] }
 0x1fe   : > { %9183 = vst [vmem:[#allocation90_spill] sm:$0xff] %v6904_v8  ;;  %v1042_v34 = vmul.f32 %v9118_v9, %v9190_v63  ;;  %v1043_v15 = vmul.f32 %v9118_v9, %v9191_v43  ;;  %v1044_v52 = vmul.f32 %v9118_v9, %v9166_v60  ;;  %v1045_v11 = vmul.f32 %v9118_v9, %v9192_v30  ;;  %v9194_v56 = vld [vmem:[#allocation55_spill] sm:$0xff]  ;;  %v9200_v27 = vld [vmem:[#allocation46_spill] sm:$0xff]  ;;  %v9256_v25 = vld [vmem:[#allocation73_spill] sm:$0xff] }
 0x1ff   : > { %9189 = vst [vmem:[#allocation34_spill] sm:$0xff] %v6911_v41  ;;  %v1046_v17 = vmul.f32 %v9118_v9, %v9193_v35  ;;  %v1048_v53 = vmul.f32 %v9118_v9, %v9194_v56  ;;  %v1075_v10 = vadd.f32 %v9195_v47, %v987_v42  ;;  %v9197_v51 = vld [vmem:[#allocation175_spill] sm:$0xff]  ;;  %v1131_v30 = vmul.f32 %v9125_v22, %v9172_v48  ;;  %v9201_v42 = vld [vmem:[#allocation49_spill] sm:$0xff]  ;;  %v2760_v47 = vld [vmem:[#allocation2 + $0xd8] sm:$0x3f] }
 0x200   : > { %v1070_v2 = vadd.f32 %v1042_v34, %v982_v21  ;;  %v1071_v24 = vadd.f32 %v1043_v15, %v983_v36  ;;  %v1072_v63 = vadd.f32 %v1044_v52, %v984_v1  ;;  %v1078_v26 = vadd.f32 %v9197_v51, %v9196_v6  ;;  %v9198_v43 = vld [vmem:[#allocation171_spill] sm:$0xff]  ;;  %v9202_v21 = vld [vmem:[#allocation54_spill] sm:$0xff] }
 0x201   : > { %v1073_v58 = vadd.f32 %v1045_v11, %v985_v3  ;;  %v1074_v23 = vadd.f32 %v1046_v17, %v986_v49  ;;  %v1076_v8 = vadd.f32 %v1048_v53, %v9198_v43  ;;  %v1132_v14 = vmul.f32 %v9125_v22, %v9199_v44  ;;  %v9203_v34 = vld [vmem:[#allocation59_spill] sm:$0xff]  ;;  %v9204_v3 = vld [vmem:[#allocation36_spill] sm:$0xff] }
 0x202   : > { %v1133_v9 = vmul.f32 %v9125_v22, %v9200_v27  ;;  %v1134_v36 = vmul.f32 %v9125_v22, %v9201_v42  ;;  %v1135_v1 = vmul.f32 %v9125_v22, %v9202_v21  ;;  %v1136_v49 = vmul.f32 %v9125_v22, %v9203_v34  ;;  %v9205_v52 = vld [vmem:[#allocation63_spill] sm:$0xff]  ;;  %v9206_v43 = vld [vmem:[#allocation172_spill] sm:$0xff]  ;;  %v9207_v21 = vld [vmem:[#allocation42_spill] sm:$0xff] }
 0x203   : > { %v1137_v15 = vmul.f32 %v9125_v22, %v9204_v3  ;;  %v1138_v48 = vmul.f32 %v9125_v22, %v9205_v52  ;;  %v1159_v11 = vadd.f32 %v1131_v30, %v1070_v2  ;;  %v1160_v44 = vadd.f32 %v1132_v14, %v1071_v24  ;;  %v9210_v14 = vld [vmem:[#allocation52_spill] sm:$0xff] }
 0x204   : > { %v1161_v17 = vadd.f32 %v1133_v9, %v1072_v63  ;;  %v1162_v53 = vadd.f32 %v1134_v36, %v1073_v58  ;;  %v1163_v27 = vadd.f32 %v1135_v1, %v1074_v23  ;;  %v1164_v6 = vadd.f32 %v1136_v49, %v1075_v10  ;;  %v9211_v24 = vld [vmem:[#allocation16_spill] sm:$0xff]  ;;  %v9213_v58 = vld [vmem:[#allocation17_spill] sm:$0xff]  ;;  %v9217_v1 = vld [vmem:[#allocation170_spill] sm:$0xff] }
 0x205   : > { %v1165_v51 = vadd.f32 %v1137_v15, %v1076_v8  ;;  %v1166_v42 = vadd.f32 %v1138_v48, %v9206_v43  ;;  %v1167_v4 = vadd.f32 %v9207_v21, %v1078_v26  ;;  %v1219_v34 = vmul.f32 %v9133_v7, %v9180_v57  ;;  %v9212_v8 = vld [vmem:[#allocation60_spill] sm:$0xff]  ;;  %v9218_v48 = vld [vmem:[#allocation18_spill] sm:$0xff] }
 0x206   : > { %v1220_v3 = vmul.f32 %v9133_v7, %v9208_v19  ;;  %v1221_v22 = vmul.f32 %v9133_v7, %v9209_v46  ;;  %v1222_v2 = vmul.f32 %v9133_v7, %v9210_v14  ;;  %v1223_v10 = vmul.f32 %v9133_v7, %v9211_v24  ;;  %v9214_v23 = vld [vmem:[#allocation64_spill] sm:$0xff] }
 0x207   : > { %v1224_v63 = vmul.f32 %v9133_v7, %v9212_v8  ;;  %v1225_v26 = vmul.f32 %v9133_v7, %v9213_v58  ;;  %v1254_v57 = vadd.f32 %v9214_v23, %v1166_v42  ;;  %v9215_v30 = vld [vmem:[#allocation232_spill] sm:$0xff]  ;;  %v6965_v9 = vmul.f32 %v8707_v12, %v2760_v47  ;;  %v9219_v42 = vld [vmem:[#allocation26_spill] sm:$0xff]  ;;  %v9221_v47 = vld [vmem:[#allocation65_spill] sm:$0xff] }
 0x208   : > { %v2356_v19 = vadd.f32 %v9215_v30, %v6848_v54  ;;  %v1247_v46 = vadd.f32 %v1219_v34, %v1159_v11  ;;  %v1248_v36 = vadd.f32 %v1220_v3, %v1160_v44  ;;  %v6968_v49 = vadd.f32 %v9217_v1, %v1274_v39  ;;  %v9220_v44 = vld [vmem:[#allocation53_spill] sm:$0xff]  ;;  %v9233_v23 = vld [vmem:[#allocation66_spill] sm:$0xff]  ;;  %v9238_v1 = vld [vmem:[#allocation68_spill] sm:$0xff] }
 0x209   : > { %9216 = vst [vmem:[#allocation186_spill] sm:$0xff] %v6965_v9  ;;  %v1249_v15 = vadd.f32 %v1221_v22, %v1161_v17  ;;  %v1250_v52 = vadd.f32 %v1222_v2, %v1162_v53  ;;  %v1255_v43 = vadd.f32 %v9218_v48, %v1167_v4  ;;  %v1251_v21 = vadd.f32 %v1223_v10, %v1163_v27  ;;  %v9222_v53 = vld [vmem:[#allocation61_spill] sm:$0xff]  ;;  %v9223_v27 = vld [vmem:[#allocation39_spill] sm:$0xff] }
 0x20a   : > { %v1252_v14 = vadd.f32 %v1224_v63, %v1164_v6  ;;  %v1307_v7 = vmul.f32 %v9139_v5, %v9166_v60  ;;  %v1308_v54 = vmul.f32 %v9139_v5, %v9219_v42  ;;  %v1253_v24 = vadd.f32 %v1225_v26, %v1165_v51  ;;  %v9227_v22 = vld [vmem:[#allocation45_spill] sm:$0xff]  ;;  %v9232_v26 = vld [vmem:[#allocation44_spill] sm:$0xff] }
 0x20b   : > { %v1309_v11 = vmul.f32 %v9139_v5, %v9193_v35  ;;  %v1310_v39 = vmul.f32 %v9139_v5, %v9220_v44  ;;  %v1314_v17 = vmul.f32 %v9139_v5, %v9221_v47  ;;  %v1312_v4 = vmul.f32 %v9139_v5, %v9222_v53  ;;  %v9226_v35 = vld [vmem:[#allocation43_spill] sm:$0xff] }
 0x20c   : > { %v1313_v6 = vmul.f32 %v9139_v5, %v9223_v27  ;;  %v6985_v60 = vadd.f32 %v1307_v7, %v1247_v46  ;;  %v6987_v34 = vadd.f32 %v1308_v54, %v1248_v36  ;;  %v1311_v51 = vmul.f32 %v9139_v5, %v9194_v56  ;;  %v9235_v46 = vld [vmem:[#allocation235_spill] sm:$0xff] }
 0x20d   : > { %v1315_v3 = vmul.f32 %v9139_v5, %v9226_v35  ;;  %v1317_v2 = vmul.f32 %v9139_v5, %v9227_v22  ;;  %v6995_v10 = vadd.f32 %v1310_v39, %v1250_v52  ;;  %v6997_v8 = vadd.f32 %v1309_v11, %v1249_v15  ;;  %v9237_v5 = vld [vmem:[#allocation88_spill] sm:$0xff] }
 0x20e   : > { %9224 = vst [vmem:[#allocation37_spill] sm:$0xff] %v6985_v60  ;;  %9225 = vst [vmem:[#allocation217_spill] sm:$0xff] %v6987_v34  ;;  %v6999_v63 = vadd.f32 %v1312_v4, %v1252_v14  ;;  %v7001_v58 = vadd.f32 %v1314_v17, %v1254_v57  ;;  %v7005_v30 = vadd.f32 %v9233_v23, %v9232_v26  ;;  %v1364_v15 = vsel %vm1363_vm0, %v6987_v34, 0.0  ;;  %v9241_v17 = vld [vmem:[#allocation77_spill] sm:$0xff] }
 0x20f   : > { %9228 = vst [vmem:[#allocation128_spill] sm:$0xff] %v6995_v10  ;;  %9229 = vst [vmem:[#allocation236_spill] sm:$0xff] %v6997_v8  ;;  %v7009_v56 = vmul.f32 %v6889_v38, %v6889_v38  ;;  %v7012_v36 = vadd.f32 %v9235_v46, %v2356_v19  ;;  %v7016_v52 = vadd.f32 %v9238_v1, %v9237_v5  ;;  %v9240_v19 = vld [vmem:[#allocation62_spill] sm:$0xff]  ;;  %v1367_v11 = vsel %vm1363_vm0, %v6995_v10, 0.0 }
 0x210   : > { %9230 = vst [vmem:[#allocation35_spill] sm:$0xff] %v6999_v63  ;;  %9231 = vst [vmem:[#allocation40_spill] sm:$0xff] %v7001_v58  ;;  %v7022_v57 = vmul.f32 %v6968_v49, %v6968_v49  ;;  %v7024_v48 = vadd.f32 %v1311_v51, %v1251_v21  ;;  %v7026_v14 = vadd.f32 %v1313_v6, %v1253_v24  ;;  %v1370_v21 = vsel %vm1363_vm0, %v6999_v63, 0.0  ;;  %v9242_v51 = vld [vmem:[#allocation96_spill] sm:$0xff]  ;;  %v1830_v5 = vld [vmem:[#allocation2 + $0xa] sm:$0x3f] }
 0x211   : > { %9234 = vst [vmem:[#allocation277_spill] sm:$0xff] %v7005_v30  ;;  %9236 = vst [vmem:[#allocation159_spill] sm:$0xff] %v7012_v36  ;;  %v1365_v7 = vadd.f32 %v1364_v15, %v6985_v60  ;;  %v7029_v42 = vadd.f32 %v1315_v3, %v1255_v43  ;;  %v7032_v54 = vadd.f32 %v1317_v2, %v9240_v19  ;;  %v1373_v24 = vsel %vm1363_vm0, %v7001_v58, 0.0  ;;  %v9255_v36 = vld [vmem:[#allocation102_spill] sm:$0xff] }
 0x212   : > { %9239 = vst [vmem:[#allocation210_spill] sm:$0xff] %v7024_v48  ;;  %v1414_v44 = vmul.f32 %v6987_v34, %v6987_v34  ;;  %v1413_v43 = vmul.f32 %v6985_v60, %v6985_v60  ;;  %v1376_v47 = vsel %vm1363_vm0, %v7005_v30, 0.0  ;;  %v7049_v53 = vsel %vm1363_vm0, %v9241_v17, 0.0 }
 0x213   : > { %v1366_v39 = vadd.f32 %v1365_v7, %v6997_v8  ;;  %v1416_v4 = vmul.f32 %v6995_v10, %v6995_v10  ;;  %v1418_v27 = vmul.f32 %v6999_v63, %v6999_v63  ;;  %v7057_v35 = vsel %vm1363_vm0, %v9242_v51, 0.0  ;;  %v9244_v63 = vld [vmem:[#allocation145_spill] sm:$0xff] }
 0x214   : > { %v1415_v3 = vmul.f32 %v6997_v8, %v6997_v8  ;;  %v1417_v22 = vmul.f32 %v7024_v48, %v7024_v48  ;;  %v1419_v2 = vmul.f32 %v7026_v14, %v7026_v14  ;;  %v1420_v26 = vmul.f32 %v7001_v58, %v7001_v58  ;;  %v9243_v58 = vld [vmem:[#allocation89_spill] sm:$0xff] }
 0x215   : > { %v1368_v6 = vadd.f32 %v1367_v11, %v1366_v39  ;;  %v1421_v23 = vmul.f32 %v7029_v42, %v7029_v42  ;;  %v1441_v46 = vsel %vm1363_vm0, %v1414_v44, 0.0  ;;  %v1422_v15 = vmul.f32 %v7005_v30, %v7005_v30  ;;  %v9246_v8 = vld [vmem:[#allocation177_spill] sm:$0xff] }
 0x216   : > { %v7075_v7 = vmul.f32 %v7032_v54, %v7032_v54  ;;  %v1442_v19 = vadd.f32 %v1441_v46, %v1413_v43  ;;  %v1424_v11 = vmul.f32 %v9241_v17, %v9241_v17  ;;  %v1444_v39 = vsel %vm1363_vm0, %v1416_v4, 0.0  ;;  %v9247_v43 = vld [vmem:[#allocation173_spill] sm:$0xff]  ;;  %v9248_v17 = vld [vmem:[#allocation91_spill] sm:$0xff] }
 0x217   : > { %v1369_v1 = vadd.f32 %v1368_v6, %v7024_v48  ;;  %v1447_v9 = vsel %vm1363_vm0, %v1418_v27, 0.0  ;;  %v1685_v44 = vmul.f32 %v6839_v29, %v9029_v28  ;;  %v1773_v30 = vmul.f32 %v9243_v58, %v6817_v31  ;;  %v9245_v48 = vld [vmem:[#allocation56_spill] sm:$0xff]  ;;  %v9249_v27 = vld [vmem:[#allocation71_spill] sm:$0xff] }
 0x218   : > { %v1443_v6 = vadd.f32 %v1442_v19, %v1415_v3  ;;  %v1802_v10 = vadd.f32 %v9245_v48, %v9244_v63  ;;  %v1803_v46 = vadd.f32 %v9247_v43, %v9246_v8  ;;  %v1861_v34 = vmul.f32 %v9248_v17, %v6827_v40  ;;  %v9251_v31 = vld [vmem:[#allocation72_spill] sm:$0xff]  ;;  %v9252_v48 = vld [vmem:[#allocation178_spill] sm:$0xff] }
 0x219   : > { %v1371_v51 = vadd.f32 %v1370_v21, %v1369_v1  ;;  %v1862_v4 = vmul.f32 %v9248_v17, %v1830_v5  ;;  %v1863_v60 = vmul.f32 %v9248_v17, %v9249_v27  ;;  %v1801_v3 = vadd.f32 %v1773_v30, %v1685_v44  ;;  %v9250_v1 = vld [vmem:[#allocation93_spill] sm:$0xff]  ;;  %v9254_v43 = vld [vmem:[#allocation70_spill] sm:$0xff] }
 0x21a   : > { %v1445_v21 = vadd.f32 %v1444_v39, %v1443_v6  ;;  %v1892_v58 = vadd.f32 %v9251_v31, %v9250_v1  ;;  %v1893_v8 = vadd.f32 %v9253_v59, %v9252_v48  ;;  %v1949_v40 = vmul.f32 %v9255_v36, %v9254_v43  ;;  %v9258_v39 = vld [vmem:[#allocation80_spill] sm:$0xff]  ;;  %v9259_v6 = vld [vmem:[#allocation181_spill] sm:$0xff]  ;;  %v9263_v48 = vld [vmem:[#allocation74_spill] sm:$0xff] }
 0x21b   : > { %v1372_v28 = vadd.f32 %v1371_v51, %v7026_v14  ;;  %v1890_v19 = vadd.f32 %v1862_v4, %v1802_v10  ;;  %v1891_v63 = vadd.f32 %v1863_v60, %v1803_v46  ;;  %v1889_v32 = vadd.f32 %v1861_v34, %v1801_v3  ;;  %v9257_v51 = vld [vmem:[#allocation78_spill] sm:$0xff]  ;;  %v9265_v43 = vld [vmem:[#allocation105_spill] sm:$0xff] }
 0x21c   : > { %v1446_v5 = vadd.f32 %v1445_v21, %v1417_v22  ;;  %v1950_v17 = vmul.f32 %v9255_v36, %v9256_v25  ;;  %v1951_v30 = vmul.f32 %v9255_v36, %v9257_v51  ;;  %v1980_v44 = vadd.f32 %v9258_v39, %v1892_v58  ;;  %v9260_v60 = vld [vmem:[#allocation30_spill] sm:$0xff]  ;;  %v9261_v22 = vld [vmem:[#allocation131_spill] sm:$0xff] }
 0x21d   : > { %v1374_v41 = vadd.f32 %v1373_v24, %v1372_v28  ;;  %v1981_v10 = vadd.f32 %v9259_v6, %v1893_v8  ;;  %v2037_v46 = vmul.f32 %v9044_v55, %v9260_v60  ;;  %v1977_v1 = vadd.f32 %v1949_v40, %v1889_v32  ;;  %v9262_v28 = vld [vmem:[#allocation33_spill] sm:$0xff]  ;;  %v9266_v40 = vld [vmem:[#allocation95_spill] sm:$0xff]  ;;  %v9268_v6 = vld [vmem:[#allocation94_spill] sm:$0xff] }
 0x21e   : > { %v1448_v4 = vadd.f32 %v1447_v9, %v1446_v5  ;;  %v1978_v24 = vadd.f32 %v1950_v17, %v1890_v19  ;;  %v1425_v34 = vmul.f32 %v7016_v52, %v7016_v52  ;;  %v7114_v25 = vmul.f32 %v9261_v22, %v9261_v22  ;;  %v9264_v9 = vld [vmem:[#allocation81_spill] sm:$0xff] }
 0x21f   : > { %v1375_v59 = vadd.f32 %v1374_v41, %v7029_v42  ;;  %v1979_v36 = vadd.f32 %v1951_v30, %v1891_v63  ;;  %v2039_v21 = vmul.f32 %v9044_v55, %v9262_v28  ;;  %v1450_v58 = vsel %vm1363_vm0, %v1420_v26, 0.0 }
 0x220   : > { %v1449_v31 = vadd.f32 %v1448_v4, %v1419_v2  ;;  %v2038_v41 = vmul.f32 %v9044_v55, %v9263_v48  ;;  %v1453_v32 = vsel %vm1363_vm0, %v1422_v15, 0.0  ;;  %v2040_v19 = vmul.f32 %v9044_v55, %v9264_v9 }
 0x221   : > { %v1377_v3 = vadd.f32 %v1376_v47, %v1375_v59  ;;  %v2065_v8 = vadd.f32 %v2037_v46, %v1977_v1  ;;  %v2070_v5 = vadd.f32 %v9266_v40, %v9265_v43  ;;  %v9267_v47 = vld [vmem:[#allocation197_spill] sm:$0xff]  ;;  %v2067_v39 = vadd.f32 %v2039_v21, %v1979_v36  ;;  %v9269_v59 = vld [vmem:[#allocation98_spill] sm:$0xff]  ;;  %v9270_v1 = vld [vmem:[#allocation75_spill] sm:$0xff] }
 0x222   : > { %v1451_v17 = vadd.f32 %v1450_v58, %v1449_v31  ;;  %v2066_v30 = vadd.f32 %v2038_v41, %v1978_v24  ;;  %v2069_v2 = vadd.f32 %v9267_v47, %v1981_v10  ;;  %v2068_v26 = vadd.f32 %v2040_v19, %v1980_v44  ;;  %v9271_v31 = vld [vmem:[#allocation179_spill] sm:$0xff]  ;;  %v9273_v21 = vld [vmem:[#allocation82_spill] sm:$0xff] }
 0x223   : > { %v1378_v63 = vadd.f32 %v1377_v3, %v7032_v54  ;;  %v2129_v60 = vmul.f32 %v9055_v18, %v9268_v6  ;;  %v2158_v15 = vadd.f32 %v9269_v59, %v2070_v5  ;;  %v2125_v46 = vmul.f32 %v9055_v18, %v9249_v27  ;;  %v9272_v44 = vld [vmem:[#allocation79_spill] sm:$0xff]  ;;  %v9274_v43 = vld [vmem:[#allocation198_spill] sm:$0xff] }
 0x224   : > { %v1452_v55 = vadd.f32 %v1451_v17, %v1421_v23  ;;  %v2126_v3 = vmul.f32 %v9055_v18, %v9270_v1  ;;  %v1456_v24 = vsel %vm1363_vm0, %v1424_v11, 0.0  ;;  %v1459_v10 = vsel %vm1363_vm0, %v9271_v31, 0.0  ;;  %v9275_v40 = vld [vmem:[#allocation206_spill] sm:$0xff]  ;;  %v9276_v17 = vld [vmem:[#allocation112_spill] sm:$0xff]  ;;  %v9277_v59 = vld [vmem:[#allocation83_spill] sm:$0xff] }
 0x225   : > { %v1380_v4 = vadd.f32 %v7049_v53, %v1378_v63  ;;  %v2127_v36 = vmul.f32 %v9055_v18, %v9272_v44  ;;  %v2128_v58 = vmul.f32 %v9055_v18, %v9273_v21  ;;  %v2153_v48 = vadd.f32 %v2125_v46, %v2065_v8  ;;  %v9279_v8 = vld [vmem:[#allocation99_spill] sm:$0xff] }
 0x226   : > { %v1454_v23 = vadd.f32 %v1453_v32, %v1452_v55  ;;  %v2154_v41 = vadd.f32 %v2126_v3, %v2066_v30  ;;  %v2157_v19 = vadd.f32 %v2129_v60, %v2069_v2  ;;  %v2159_v11 = vadd.f32 %v9275_v40, %v9274_v43  ;;  %v9280_v2 = vld [vmem:[#allocation103_spill] sm:$0xff] }
 0x227   : > { %v1381_v53 = vadd.f32 %v1380_v4, %v7016_v52  ;;  %v2155_v27 = vadd.f32 %v2127_v36, %v2067_v39  ;;  %v2156_v9 = vadd.f32 %v2128_v58, %v2068_v26  ;;  %v2213_v47 = vmul.f32 %v9276_v17, %v9257_v51  ;;  %v9278_v4 = vld [vmem:[#allocation92_spill] sm:$0xff]  ;;  %v9282_v51 = vld [vmem:[#allocation110_spill] sm:$0xff]  ;;  %v9283_v46 = vld [vmem:[#allocation123_spill] sm:$0xff] }
 0x228   : > { %v1455_v63 = vadd.f32 %v1454_v23, %v7075_v7  ;;  %v2214_v18 = vmul.f32 %v9276_v17, %v9277_v59  ;;  %v2215_v32 = vmul.f32 %v9276_v17, %v9278_v4  ;;  %v2216_v30 = vmul.f32 %v9276_v17, %v9279_v8  ;;  %v9281_v26 = vld [vmem:[#allocation120_spill] sm:$0xff]  ;;  %v9284_v58 = vld [vmem:[#allocation237_spill] sm:$0xff]  ;;  %v9285_v40 = vld [vmem:[#allocation67_spill] sm:$0xff] }
 0x229   : > { %v1383_v5 = vadd.f32 %v7057_v35, %v1381_v53  ;;  %v2217_v39 = vmul.f32 %v9276_v17, %v9280_v2  ;;  %v2218_v35 = vmul.f32 %v9276_v17, %v9281_v26  ;;  %v2241_v55 = vadd.f32 %v2213_v47, %v2153_v48  ;;  %v9287_v48 = vld [vmem:[#allocation69_spill] sm:$0xff]  ;;  %v9291_v4 = vld [vmem:[#allocation76_spill] sm:$0xff]  ;;  %v9295_v26 = vld [vmem:[#allocation86_spill] sm:$0xff] }
 0x22a   : > { %v1457_v60 = vadd.f32 %v1456_v24, %v1455_v63  ;;  %v2248_v1 = vadd.f32 %v9283_v46, %v9282_v51  ;;  %v2242_v3 = vadd.f32 %v2214_v18, %v2154_v41  ;;  %v2243_v31 = vadd.f32 %v2215_v32, %v2155_v27  ;;  %v9288_v41 = vld [vmem:[#allocation121_spill] sm:$0xff]  ;;  %v9292_v32 = vld [vmem:[#allocation100_spill] sm:$0xff] }
 0x22b   : > { %v1384_v7 = vadd.f32 %v1383_v5, %v9261_v22  ;;  %v2244_v36 = vadd.f32 %v2216_v30, %v2156_v9  ;;  %v2245_v21 = vadd.f32 %v2217_v39, %v2157_v19  ;;  %v2301_v43 = vmul.f32 %v4917_v37, %v9262_v28  ;;  %v9286_v5 = vld [vmem:[#allocation84_spill] sm:$0xff]  ;;  %v9289_v9 = vld [vmem:[#allocation134_spill] sm:$0xff] }
 0x22c   : > { %v1458_v23 = vadd.f32 %v1457_v60, %v1425_v34  ;;  %v2303_v17 = vmul.f32 %v4917_v37, %v9285_v40  ;;  %v2246_v59 = vadd.f32 %v2218_v35, %v2158_v15  ;;  %v2302_v24 = vmul.f32 %v4917_v37, %v9286_v5  ;;  %v9290_v34 = vld [vmem:[#allocation108_spill] sm:$0xff]  ;;  %v9294_v39 = vld [vmem:[#allocation114_spill] sm:$0xff] }
 0x22d   : > { %v1386_v53 = vadd.f32 %v9284_v58, %v1384_v7  ;;  %v2305_v63 = vmul.f32 %v4917_v37, %v9287_v48  ;;  %v2306_v27 = vmul.f32 %v4917_v37, %v9288_v41  ;;  %v2247_v18 = vadd.f32 %v9290_v34, %v2159_v11  ;;  %v9293_v30 = vld [vmem:[#allocation124_spill] sm:$0xff]  ;;  %v9296_v7 = vld [vmem:[#allocation242_spill] sm:$0xff]  ;;  %v9306_v34 = vld [vmem:[#allocation115_spill] sm:$0xff] }
 0x22e   : > { %v1460_v47 = vadd.f32 %v1459_v10, %v1458_v23  ;;  %v2307_v28 = vmul.f32 %v4917_v37, %v9291_v4  ;;  %v2304_v15 = vmul.f32 %v4917_v37, %v9292_v32  ;;  %v2330_v8 = vadd.f32 %v2302_v24, %v2242_v3  ;;  %v9297_v23 = vld [vmem:[#allocation85_spill] sm:$0xff]  ;;  %v9298_v5 = vld [vmem:[#allocation130_spill] sm:$0xff]  ;;  %v9309_v32 = vld [vmem:[#allocation184_spill] sm:$0xff] }
 0x22f   : > { %v1387_v19 = vadd.f32 %v1386_v53, %v9289_v9  ;;  %v2336_v2 = vadd.f32 %v9293_v30, %v2248_v1  ;;  %v2337_v35 = vadd.f32 %v9295_v26, %v9294_v39  ;;  %v2329_v46 = vadd.f32 %v2301_v43, %v2241_v55  ;;  %v9299_v3 = vld [vmem:[#allocation238_spill] sm:$0xff]  ;;  %v9302_v43 = vld [vmem:[#allocation136_spill] sm:$0xff]  ;;  %v9311_v39 = vld [vmem:[#allocation119_spill] sm:$0xff] }
 0x230   : > { %v1461_v51 = vadd.f32 %v1460_v47, %v7114_v25  ;;  %v2331_v10 = vadd.f32 %v2303_v17, %v2243_v31  ;;  %v2332_v58 = vadd.f32 %v2304_v15, %v2244_v36  ;;  %v2333_v11 = vadd.f32 %v2305_v63, %v2245_v21  ;;  %v9300_v25 = vld [vmem:[#allocation101_spill] sm:$0xff]  ;;  %v9301_v31 = vld [vmem:[#allocation122_spill] sm:$0xff] }
 0x231   : > { %v1389_v60 = vadd.f32 %v9296_v7, %v1387_v19  ;;  %v2334_v53 = vadd.f32 %v2306_v27, %v2246_v59  ;;  %v2390_v40 = vmul.f32 %v4983_v0, %v9297_v23  ;;  %v2335_v1 = vadd.f32 %v2307_v28, %v2247_v18  ;;  %v9303_v59 = vld [vmem:[#allocation241_spill] sm:$0xff]  ;;  %v9312_v26 = vld [vmem:[#allocation126_spill] sm:$0xff] }
 0x232   : > { %v1463_v24 = vadd.f32 %v9299_v3, %v1461_v51  ;;  %v2389_v48 = vmul.f32 %v4983_v0, %v9272_v44  ;;  %v2391_v41 = vmul.f32 %v4983_v0, %v9268_v6  ;;  %v2392_v55 = vmul.f32 %v4983_v0, %v9300_v25  ;;  %v9304_v27 = vld [vmem:[#allocation109_spill] sm:$0xff]  ;;  %v9315_v51 = vld [vmem:[#allocation239_spill] sm:$0xff]  ;;  %v9316_v23 = vld [vmem:[#allocation106_spill] sm:$0xff] }
 0x233   : > { %v1390_v37 = vadd.f32 %v1389_v60, %v9298_v5  ;;  %v2394_v36 = vmul.f32 %v4983_v0, %v9301_v31  ;;  %v7197_v21 = vadd.f32 %v2390_v40, %v2330_v8  ;;  %v2395_v19 = vmul.f32 %v4983_v0, %v9304_v27  ;;  %v9305_v44 = vld [vmem:[#allocation125_spill] sm:$0xff]  ;;  %v9310_v8 = vld [vmem:[#allocation243_spill] sm:$0xff]  ;;  %v9314_v60 = vld [vmem:[#allocation150_spill] sm:$0xff] }
 0x234   : > { %v1464_v63 = vadd.f32 %v1463_v24, %v9303_v59  ;;  %v7203_v47 = vadd.f32 %v2389_v48, %v2329_v46  ;;  %v2396_v6 = vmul.f32 %v4983_v0, %v9305_v44  ;;  %v2397_v18 = vmul.f32 %v4983_v0, %v9306_v34  ;;  %v9319_v24 = vld [vmem:[#allocation208_spill] sm:$0xff]  ;;  %v9326_v34 = vld [vmem:[#allocation51_spill] sm:$0xff] }
 0x235   : > { %v1392_v17 = vadd.f32 %v9302_v43, %v1390_v37  ;;  %v7209_v4 = vadd.f32 %v2391_v41, %v2331_v10  ;;  %v7211_v28 = vadd.f32 %v2392_v55, %v2332_v58  ;;  %v7217_v7 = vadd.f32 %v9312_v26, %v9311_v39  ;;  %v9320_v41 = vld [vmem:[#allocation202_spill] sm:$0xff]  ;;  %v9328_v39 = vld [vmem:[#allocation163_spill] sm:$0xff] }
 0x236   : > { %v1466_v30 = vadd.f32 %v9310_v8, %v1464_v63  ;;  %v7221_v46 = vadd.f32 %v9315_v51, %v9314_v60  ;;  %v2393_v40 = vmul.f32 %v4983_v0, %v9316_v23  ;;  %v7225_v37 = vadd.f32 %v2394_v36, %v2334_v53  ;;  %v9323_v36 = vld [vmem:[#allocation87_spill] sm:$0xff]  ;;  %v9327_v8 = vld [vmem:[#allocation154_spill] sm:$0xff] }
 0x237   : > { %9307 = vst [vmem:[#allocation161_spill] sm:$0xff] %v7209_v4  ;;  %9308 = vst [vmem:[#allocation218_spill] sm:$0xff] %v7211_v28  ;;  %v1393_v15 = vadd.f32 %v1392_v17, %v9309_v32  ;;  %v7227_v10 = vadd.f32 %v2396_v6, %v2336_v2  ;;  %v2445_v58 = vsel %vm1363_vm0, %v7197_v21, 0.0  ;;  %v1403_v3 = vsel %vm1363_vm0, %v6968_v49, 0.0  ;;  %v9324_v17 = vld [vmem:[#allocation203_spill] sm:$0xff] }
 0x238   : > { %9313 = vst [vmem:[#allocation182_spill] sm:$0xff] %v7217_v7  ;;  %9317 = vst [vmem:[#allocation141_spill] sm:$0xff] %v7225_v37  ;;  %v1467_v25 = vadd.f32 %v1466_v30, %v9320_v41  ;;  %v2446_v55 = vadd.f32 %v2445_v58, %v7203_v47  ;;  %v7238_v31 = vsel %vm1363_vm0, %v7022_v57, 0.0  ;;  %v7240_v0 = vadd.f32 %v2393_v40, %v2333_v11  ;;  %v9329_v40 = vld [vmem:[#allocation283_spill] sm:$0xff] }
 0x239   : > { %9318 = vst [vmem:[#allocation38_spill] sm:$0xff] %v7227_v10  ;;  %v1395_v48 = vadd.f32 %v9319_v24, %v1393_v15  ;;  %v7242_v2 = vadd.f32 %v2395_v19, %v2335_v1  ;;  %v2448_v53 = vsel %vm1363_vm0, %v7211_v28, 0.0  ;;  %v7248_v63 = vadd.f32 %v2397_v18, %v2337_v35  ;;  %v9325_v19 = vld [vmem:[#allocation223_spill] sm:$0xff] }
 0x23a   : > { %9321 = vst [vmem:[#allocation155_spill] sm:$0xff] %v7240_v0  ;;  %v1469_v59 = vadd.f32 %v9324_v17, %v1467_v25  ;;  %v2447_v27 = vadd.f32 %v2446_v55, %v7209_v4  ;;  %v2451_v44 = vsel %vm1363_vm0, %v7225_v37, 0.0  ;;  %v2454_v57 = vsel %vm1363_vm0, %v7227_v10, 0.0  ;;  %v9330_v17 = vld [vmem:[#allocation213_spill] sm:$0xff] }
 0x23b   : > { %9322 = vst [vmem:[#allocation281_spill] sm:$0xff] %v7242_v2  ;;  %v1396_v43 = vadd.f32 %v1395_v48, %v9323_v36  ;;  %v2457_v11 = vsel %vm1363_vm0, %v7217_v7, 0.0  ;;  %v2494_v1 = vmul.f32 %v7197_v21, %v7197_v21  ;;  %v2493_v18 = vmul.f32 %v7203_v47, %v7203_v47 }
 0x23c   : > { %v1470_v15 = vadd.f32 %v1469_v59, %v9326_v34  ;;  %v2449_v35 = vadd.f32 %v2448_v53, %v2447_v27  ;;  %v7265_v30 = vsel %vm1363_vm0, %v9327_v8, 0.0  ;;  %v7269_v26 = vsel %vm1363_vm0, %v9328_v39, 0.0 }
 0x23d   : > { %v1398_v6 = vadd.f32 %v9325_v19, %v1396_v43  ;;  %v2495_v60 = vmul.f32 %v7209_v4, %v7209_v4  ;;  %v2496_v51 = vmul.f32 %v7211_v28, %v7211_v28  ;;  %v2497_v48 = vmul.f32 %v7240_v0, %v7240_v0 }
 0x23e   : > { %v1472_v58 = vadd.f32 %v9329_v40, %v1470_v15  ;;  %v2450_v24 = vadd.f32 %v2449_v35, %v7240_v0  ;;  %v2498_v41 = vmul.f32 %v7225_v37, %v7225_v37  ;;  %v2499_v25 = vmul.f32 %v7242_v2, %v7242_v2 }
 0x23f   : > { %v1399_v23 = vadd.f32 %v1398_v6, %v6797_v16  ;;  %v2500_v55 = vmul.f32 %v7227_v10, %v7227_v10  ;;  %v2521_v53 = vsel %vm1363_vm0, %v2494_v1, 0.0  ;;  %v2821_v6 = vld [vmem:[#allocation2 + $0x1] sm:$0xff]  ;;  %v7291_v34 = vmul.f32 %v7248_v63, %v7248_v63  ;;  %v2910_v1 = vld [vmem:[#allocation2 + $0xa] sm:$0x3f]  ;;  %v9335_v10 = vld [vmem:[#allocation111_spill] sm:$0xff] }
 0x240   : > { %v1473_v59 = vadd.f32 %v1472_v58, %v9330_v17  ;;  %v2452_v27 = vadd.f32 %v2451_v44, %v2450_v24  ;;  %v2522_v19 = vadd.f32 %v2521_v53, %v2493_v18  ;;  %v2502_v15 = vmul.f32 %v7217_v7, %v7217_v7  ;;  %v2909_v24 = vld [vmem:[#allocation2 + $0x2] sm:$0xff] }
 0x241   : > { %v1401_v43 = vadd.f32 %v6856_v20, %v1399_v23  ;;  %v2524_v35 = vsel %vm1363_vm0, %v2496_v51, 0.0  ;;  %v2765_v40 = vmul.f32 %v6839_v29, %v8707_v12  ;;  %v9331_v23 = vld [vmem:[#allocation222_spill] sm:$0xff]  ;;  %v7303_v53 = vmul.f32 %v7221_v46, %v7221_v46  ;;  %v9332_v51 = vld [vmem:[#allocation144_spill] sm:$0xff] }
 0x242   : > { %v1475_v58 = vadd.f32 %v9331_v23, %v1473_v59  ;;  %v2453_v44 = vadd.f32 %v2452_v27, %v7242_v2  ;;  %v2523_v18 = vadd.f32 %v2522_v19, %v2495_v60  ;;  %v2504_v17 = vmul.f32 %v9327_v8, %v9327_v8  ;;  %v9333_v19 = vld [vmem:[#allocation113_spill] sm:$0xff]  ;;  %v9334_v23 = vld [vmem:[#allocation116_spill] sm:$0xff] }
 0x243   : > { %v1402_v20 = vadd.f32 %v1401_v43, %v6889_v38  ;;  %v7309_v39 = vmul.f32 %v9332_v51, %v9332_v51  ;;  %v2853_v12 = vmul.f32 %v8709_v62, %v2821_v6  ;;  %v2882_v7 = vadd.f32 %v9334_v23, %v9333_v19  ;;  %v2997_v6 = vld [vmem:[#allocation2 + $0x10] sm:$0xff] }
 0x244   : > { %v1476_v43 = vadd.f32 %v1475_v58, %v6823_v45  ;;  %v2455_v59 = vadd.f32 %v2454_v57, %v2453_v44  ;;  %v2525_v27 = vadd.f32 %v2524_v35, %v2523_v18  ;;  %v2941_v2 = vmul.f32 %v9335_v10, %v2909_v24  ;;  %v9336_v35 = vld [vmem:[#allocation244_spill] sm:$0xff]  ;;  %v9338_v58 = vld [vmem:[#allocation247_spill] sm:$0xff] }
 0x245   : > { %v1404_v29 = vadd.f32 %v1403_v3, %v1402_v20  ;;  %v2881_v60 = vadd.f32 %v2853_v12, %v2765_v40  ;;  %v2942_v37 = vmul.f32 %v9335_v10, %v2910_v1  ;;  %v2998_v3 = vld [vmem:[#allocation2 + $0x18] sm:$0x3f]  ;;  %v2527_v45 = vsel %vm1363_vm0, %v2498_v41, 0.0  ;;  %v9337_v40 = vld [vmem:[#allocation245_spill] sm:$0xff] }
 0x246   : > { %v1478_v0 = vadd.f32 %v6875_v13, %v1476_v43  ;;  %v2456_v28 = vadd.f32 %v2455_v59, %v7248_v63  ;;  %v2526_v4 = vadd.f32 %v2525_v27, %v2497_v48  ;;  %v2530_v57 = vsel %vm1363_vm0, %v2500_v55, 0.0  ;;  %v9339_v44 = vld [vmem:[#allocation248_spill] sm:$0xff] }
 0x247   : > { %v1405_v8 = vrot.slane %v1404_v29, 4  ;;  %v2883_v20 = vadd.f32 %v9337_v40, %v9336_v35  ;;  %v2972_v18 = vadd.f32 %v9339_v44, %v9338_v58  ;;  %v2969_v43 = vadd.f32 %v2941_v2, %v2881_v60  ;;  %v3086_v35 = vld [vmem:[#allocation2 + $0x19] sm:$0x3f]  ;;  %v7339_v44 = vld [vmem:[#allocation2 + $0x21] sm:$0xff] }
 0x248   : > { %v1479_v1 = vadd.f32 %v1478_v0, %v7009_v56  ;;  %v2458_v12 = vadd.f32 %v2457_v11, %v2456_v28  ;;  %v2528_v13 = vadd.f32 %v2527_v45, %v2526_v4  ;;  %v2970_v59 = vadd.f32 %v2942_v37, %v2882_v7  ;;  %v9340_v56 = vld [vmem:[#allocation246_spill] sm:$0xff]  ;;  %v4112_v4 = vld [vmem:[#allocation2 + $0x20] sm:$0xff] }
 0x249   : > { %v1406_v24 = vadd.f32 %v1405_v8, %v1404_v29  ;;  %v3029_v48 = vmul.f32 %v5759_v33, %v2997_v6  ;;  %v3030_v27 = vmul.f32 %v5759_v33, %v2998_v3  ;;  %v2533_v40 = vsel %vm1363_vm0, %v2502_v15, 0.0  ;;  %v3088_v37 = vld [vmem:[#allocation2 + $0x29] sm:$0x3f] }
 0x24a   : > { %v1481_v55 = vadd.f32 %v7238_v31, %v1479_v1  ;;  %v2459_v19 = vadd.f32 %v2458_v12, %v7221_v46  ;;  %v2529_v23 = vadd.f32 %v2528_v13, %v2499_v25  ;;  %v2536_v8 = vsel %vm1363_vm0, %v2504_v17, 0.0  ;;  %v3085_v31 = vld [vmem:[#allocation2 + $0x11] sm:$0xff]  ;;  %v9342_v1 = vld [vmem:[#allocation250_spill] sm:$0xff] }
 0x24b   : > { %v1407_v41 = vrot.slane %v1406_v24, 2  ;;  %v2971_v28 = vadd.f32 %v9340_v56, %v2883_v20  ;;  %v3031_v7 = vmul.f32 %v4112_v4, %v5759_v33  ;;  %v3057_v60 = vadd.f32 %v3029_v48, %v2969_v43  ;;  %v9341_v25 = vld [vmem:[#allocation251_spill] sm:$0xff]  ;;  %v9343_v12 = vld [vmem:[#allocation252_spill] sm:$0xff] }
 0x24c   : > { %v1482_v2 = vrot.slane %v1481_v55, 4  ;;  %v2461_v11 = vadd.f32 %v7265_v30, %v2459_v19  ;;  %v2531_v29 = vadd.f32 %v2530_v57, %v2529_v23  ;;  %v3058_v6 = vadd.f32 %v3030_v27, %v2970_v59  ;;  %v9344_v27 = vld [vmem:[#allocation249_spill] sm:$0xff]  ;;  %v3174_v23 = vld [vmem:[#allocation2 + $0x1a] sm:$0x3f] }
 0x24d   : > { %v1408_v0 = vadd.f32 %v1407_v41, %v1406_v24  ;;  %v3060_v3 = vadd.f32 %v9341_v25, %v2972_v18  ;;  %v3118_v15 = vmul.f32 %v5778_v61, %v3086_v35  ;;  %v3059_v24 = vadd.f32 %v3031_v7, %v2971_v28  ;;  %v9345_v28 = vld [vmem:[#allocation140_spill] sm:$0xff]  ;;  %v9348_v25 = vld [vmem:[#allocation267_spill] sm:$0xff] }
 0x24e   : > { %v1483_v17 = vadd.f32 %v1482_v2, %v1481_v55  ;;  %v2462_v20 = vadd.f32 %v2461_v11, %v9332_v51  ;;  %v2532_v58 = vadd.f32 %v2531_v29, %v7291_v34  ;;  %v3061_v30 = vadd.f32 %v9343_v12, %v9342_v1  ;;  %v9346_v11 = vld [vmem:[#allocation255_spill] sm:$0xff] }
 0x24f   : > { %v1409_v45 = vrot.slane %v1408_v0, 1  ;;  %v3117_v57 = vmul.f32 %v5778_v61, %v3085_v31  ;;  %v3120_v13 = vmul.f32 %v5778_v61, %v3088_v37  ;;  %v2539_v41 = vsel %vm1363_vm0, %v9344_v27, 0.0  ;;  %v3173_v37 = vld [vmem:[#allocation2 + $0x12] sm:$0xff]  ;;  %v9347_v31 = vld [vmem:[#allocation270_spill] sm:$0xff] }
 0x250   : > { %v1484_v18 = vrot.slane %v1483_v17, 2  ;;  %v2464_v59 = vadd.f32 %v7269_v26, %v2462_v20  ;;  %v2534_v48 = vadd.f32 %v2533_v40, %v2532_v58  ;;  %v3119_v34 = vmul.f32 %v5778_v61, %v7339_v44  ;;  %v3176_v26 = vld [vmem:[#allocation2 + $0x2a] sm:$0x3f]  ;;  %v4113_v20 = vld [vmem:[#allocation2 + $0x32] sm:$0xff] }
 0x251   : > { %v1410_v43 = vadd.f32 %v1409_v45, %v1408_v0  ;;  %v3145_v55 = vadd.f32 %v3117_v57, %v3057_v60  ;;  %v3146_v19 = vadd.f32 %v3118_v15, %v3058_v6  ;;  %v7354_v0 = vld [vmem:[#allocation2 + $0x22] sm:$0xff]  ;;  %v3148_v2 = vadd.f32 %v3120_v13, %v3060_v3  ;;  %v9349_v15 = vld [vmem:[#allocation204_spill] sm:$0xff] }
 0x252   : > { %v1485_v56 = vadd.f32 %v1484_v18, %v1483_v17  ;;  %v2465_v4 = vadd.f32 %v2464_v59, %v9345_v28  ;;  %v2535_v7 = vadd.f32 %v2534_v48, %v7303_v53  ;;  %v3147_v40 = vadd.f32 %v3119_v34, %v3059_v24  ;;  %v9350_v58 = vld [vmem:[#allocation256_spill] sm:$0xff]  ;;  %v3261_v59 = vld [vmem:[#allocation2 + $0x20] sm:$0xff] }
 0x253   : > { %v7350_v35 = vmul.f32 0.0051020407, %v1410_v43  ;;  %v3149_v29 = vadd.f32 %v9346_v11, %v3061_v30  ;;  %v3150_v60 = vadd.f32 %v9348_v25, %v9347_v31  ;;  %v3209_v1 = vmul.f32 %v4113_v20, %v9350_v58  ;;  %v3266_v30 = vld [vmem:[#allocation2 + $0x48] sm:$0x3f]  ;;  %v9351_v43 = vld [vmem:[#allocation188_spill] sm:$0xff]  ;;  %v3263_v31 = vld [vmem:[#allocation2 + $0x30] sm:$0xff] }
 0x254   : > { %v1486_v6 = vrot.slane %v1485_v56, 1  ;;  %v2467_v45 = vadd.f32 %v9349_v15, %v2465_v4  ;;  %v2537_v17 = vadd.f32 %v2536_v8, %v2535_v7  ;;  %v3205_v53 = vmul.f32 %v9350_v58, %v3173_v37  ;;  %v3262_v4 = vld [vmem:[#allocation2 + $0x28] sm:$0x3f]  ;;  %v9352_v37 = vld [vmem:[#allocation216_spill] sm:$0xff]  ;;  %v9353_v15 = vld [vmem:[#allocation271_spill] sm:$0xff] }
 0x255   : > { %v3206_v12 = vmul.f32 %v9350_v58, %v3174_v23  ;;  %v3207_v3 = vmul.f32 %v9350_v58, %v7354_v0  ;;  %v3208_v24 = vmul.f32 %v9350_v58, %v3176_v26  ;;  %v1489_v13 = vmul.f32 %v7350_v35, %v7350_v35  ;;  %v3264_v25 = vld [vmem:[#allocation2 + $0x38] sm:$0x3f]  ;;  %v9354_v20 = vld [vmem:[#allocation273_spill] sm:$0xff] }
 0x256   : > { %v1487_v57 = vadd.f32 %v1486_v6, %v1485_v56  ;;  %v2468_v18 = vadd.f32 %v2467_v45, %v9351_v43  ;;  %v2538_v8 = vadd.f32 %v2537_v17, %v7309_v39  ;;  %v3233_v48 = vadd.f32 %v3205_v53, %v3145_v55  ;;  %v3265_v6 = vld [vmem:[#allocation2 + $0x40] sm:$0xff]  ;;  %v9355_v39 = vld [vmem:[#allocation272_spill] sm:$0xff] }
 0x257   : > { %v3234_v27 = vadd.f32 %v3206_v12, %v3146_v19  ;;  %v3235_v34 = vadd.f32 %v3207_v3, %v3147_v40  ;;  %v3236_v23 = vadd.f32 %v3208_v24, %v3148_v2  ;;  %v3237_v56 = vadd.f32 %v3209_v1, %v3149_v29  ;;  %v9356_v2 = vld [vmem:[#allocation214_spill] sm:$0xff]  ;;  %v9357_v12 = vld [vmem:[#allocation205_spill] sm:$0xff] }
 0x258   : > { %v1488_v7 = vmul.f32 0.0051020407, %v1487_v57  ;;  %v2470_v26 = vadd.f32 %v9352_v37, %v2468_v18  ;;  %v2540_v11 = vadd.f32 %v2539_v41, %v2538_v8  ;;  %v3238_v45 = vadd.f32 %v9353_v15, %v3150_v60  ;;  %v9359_v57 = vld [vmem:[#allocation215_spill] sm:$0xff]  ;;  %v9360_v18 = vld [vmem:[#allocation10_spill] sm:$0xff] }
 0x259   : > { %v3239_v17 = vadd.f32 %v9355_v39, %v9354_v20  ;;  %v3293_v55 = vmul.f32 %v6005_v50, %v3261_v59  ;;  %v3298_v19 = vmul.f32 %v6005_v50, %v3266_v30  ;;  %v3294_v41 = vmul.f32 %v6005_v50, %v3262_v4  ;;  %v3350_v4 = vld [vmem:[#allocation2 + $0x29] sm:$0x3f]  ;;  %v3353_v39 = vld [vmem:[#allocation2 + $0x41] sm:$0xff] }
 0x25a   : > { %v1490_v40 = vsub.f32 %v1488_v7, %v1489_v13  ;;  %v2471_v53 = vadd.f32 %v2470_v26, %v9356_v2  ;;  %v2541_v3 = vadd.f32 %v2540_v11, %v9357_v12  ;;  %v3295_v29 = vmul.f32 %v6005_v50, %v3263_v31  ;;  %v3352_v7 = vld [vmem:[#allocation2 + $0x39] sm:$0x3f]  ;;  %v3351_v31 = vld [vmem:[#allocation2 + $0x31] sm:$0xff] }
 0x25b   : > { %v3296_v60 = vmul.f32 %v6005_v50, %v3264_v25  ;;  %v3297_v1 = vmul.f32 %v6005_v50, %v3265_v6  ;;  %v3321_v24 = vadd.f32 %v3293_v55, %v3233_v48  ;;  %v3322_v59 = vadd.f32 %v3294_v41, %v3234_v27  ;;  %v9361_v25 = vld [vmem:[#allocation253_spill] sm:$0xff]  ;;  %v9362_v6 = vld [vmem:[#allocation284_spill] sm:$0xff]  ;;  %v9364_v27 = vld [vmem:[#allocation275_spill] sm:$0xff] }
 0x25c   : > { %v1491_v30 = vadd.f32 1e-05, %v1490_v40  ;;  %v2473_v13 = vadd.f32 %v9359_v57, %v2471_v53  ;;  %v2543_v8 = vadd.f32 %v9360_v18, %v2541_v3  ;;  %v3323_v37 = vadd.f32 %v3295_v29, %v3235_v34  ;;  %v9363_v55 = vld [vmem:[#allocation189_spill] sm:$0xff]  ;;  %v9365_v34 = vld [vmem:[#allocation274_spill] sm:$0xff]  ;;  %v9367_v12 = vld [vmem:[#allocation260_spill] sm:$0xff] }
 0x25d   : > { %v3324_v26 = vadd.f32 %v3296_v60, %v3236_v23  ;;  %v3325_v11 = vadd.f32 %v3297_v1, %v3237_v56  ;;  %v3326_v15 = vadd.f32 %v3298_v19, %v3238_v45  ;;  %v3381_v40 = vmul.f32 %v9363_v55, %v7339_v44  ;;  %v9366_v23 = vld [vmem:[#allocation133_spill] sm:$0xff]  ;;  %v9368_v41 = vld [vmem:[#allocation151_spill] sm:$0xff]  ;;  %v3354_v60 = vld [vmem:[#allocation2 + $0x49] sm:$0x3f] }
 0x25e   : > { %4091 = vrsqrt.f32 %v1491_v30  ;;  %v2474_v20 = vadd.f32 %v2473_v13, %v9361_v25  ;;  %v2544_v48 = vadd.f32 %v2543_v8, %v9362_v6  ;;  %v3327_v53 = vadd.f32 %v9364_v27, %v3239_v17  ;;  %v3438_v30 = vld [vmem:[#allocation2 + $0x2a] sm:$0x3f]  ;;  %v3440_v57 = vld [vmem:[#allocation2 + $0x3a] sm:$0x3f]  ;;  %v9369_v8 = vld [vmem:[#allocation193_spill] sm:$0xff] }
 0x25f   : > { %v3328_v56 = vadd.f32 %v9366_v23, %v9365_v34  ;;  %v3382_v45 = vmul.f32 %v9363_v55, %v3350_v4  ;;  %v3384_v19 = vmul.f32 %v9363_v55, %v3352_v7  ;;  %v3383_v44 = vmul.f32 %v9363_v55, %v3351_v31  ;;  %v9370_v6 = vld [vmem:[#allocation149_spill] sm:$0xff]  ;;  %v3439_v7 = vld [vmem:[#allocation2 + $0x32] sm:$0xff] }
 0x260   : > { %v2476_v3 = vadd.f32 %v9367_v12, %v2474_v20  ;;  %v2546_v29 = vadd.f32 %v9368_v41, %v2544_v48  ;;  %v3409_v1 = vadd.f32 %v3381_v40, %v3321_v24  ;;  %v3385_v17 = vmul.f32 %v9363_v55, %v3353_v39  ;;  %v9371_v27 = vld [vmem:[#allocation259_spill] sm:$0xff]  ;;  %v9372_v34 = vld [vmem:[#allocation221_spill] sm:$0xff]  ;;  %v9373_v12 = vld [vmem:[#allocation194_spill] sm:$0xff] }
 0x261   : > { %v3410_v13 = vadd.f32 %v3382_v45, %v3322_v59  ;;  %v3412_v18 = vadd.f32 %v3384_v19, %v3324_v26  ;;  %v7412_v4 = vadd.f32 %v9370_v6, %v9369_v8  ;;  %v3411_v48 = vadd.f32 %v3383_v44, %v3323_v37  ;;  %v4114_v59 = vld [vmem:[#allocation2 + $0x51] sm:$0xff]  ;;  %v9374_v45 = vld [vmem:[#allocation262_spill] sm:$0xff]  ;;  %v9377_v44 = vld [vmem:[#allocation233_spill] sm:$0xff] }
 0x262   : > { %v2477_v20 = vadd.f32 %v2476_v3, %v9371_v27  ;;  %v2547_v23 = vadd.f32 %v2546_v29, %v9372_v34  ;;  %v3469_v31 = vmul.f32 %v9373_v12, %v7354_v0  ;;  %v3386_v24 = vmul.f32 %v9363_v55, %v3354_v60  ;;  %v9375_v19 = vld [vmem:[#allocation230_spill] sm:$0xff]  ;;  %v9378_v60 = vld [vmem:[#allocation159_spill] sm:$0xff] }
 0x263   : > { %v3387_v26 = vmul.f32 %v4114_v59, %v9363_v55  ;;  %v3470_v39 = vmul.f32 %v9373_v12, %v3438_v30  ;;  %v3472_v40 = vmul.f32 %v9373_v12, %v3440_v57  ;;  %v3471_v3 = vmul.f32 %v9373_v12, %v3439_v7  ;;  %v9376_v29 = vld [vmem:[#allocation34_spill] sm:$0xff] }
 0x264   : > { %v2479_v37 = vadd.f32 %v9374_v45, %v2477_v20  ;;  %v2549_v0 = vadd.f32 %v9375_v19, %v2547_v23  ;;  %v7431_v41 = vadd.f32 %v3469_v31, %v3409_v1  ;;  %v7435_v8 = vadd.f32 %v9377_v44, %v9376_v29  ;;  %v1493_v20 = vld [vmem:[%s7422_s27] sm:$0x1]  ;;  %v9380_v1 = vld [vmem:[#allocation263_spill] sm:$0xff]  ;;  %v3441_v59 = vld [vmem:[#allocation2 + $0x42] sm:$0xff] }
 0x265   : > { %v2484_v6 = vsel %vm1363_vm0, %v9378_v60, 0.0  ;;  %v7439_v34 = vadd.f32 %v3470_v39, %v3410_v13  ;;  %v7441_v30 = vadd.f32 %v3472_v40, %v3412_v18  ;;  %v7445_v57 = vmul.f32 %v9378_v60, %v9378_v60  ;;  %v9379_v23 = vld [vmem:[#allocation157_spill] sm:$0xff]  ;;  %v3442_v45 = vld [vmem:[#allocation2 + $0x4a] sm:$0x3f]  ;;  %v3443_v40 = vld [vmem:[#allocation2 + $0x52] sm:$0xff] }
 0x266   : > { %v2480_v7 = vadd.f32 %v2479_v37, %v9379_v23  ;;  %v2550_v31 = vadd.f32 %v2549_v0, %v9380_v1  ;;  %v7450_v19 = vadd.f32 %v3471_v3, %v3411_v48  ;;  %v3413_v13 = vadd.f32 %v3385_v17, %v3325_v11  ;;  %v3444_v0 = vld [vmem:[#allocation2 + $0x5a] sm:$0x3f]  ;;  %v9381_v44 = vld [vmem:[#allocation209_spill] sm:$0xff]  ;;  %v9382_v48 = vld [vmem:[#allocation254_spill] sm:$0xff] }
 0x267   : > { %v3414_v18 = vadd.f32 %v3386_v24, %v3326_v15  ;;  %v7458_v39 = vadd.f32 %v3387_v26, %v3327_v53  ;;  %v3525_v37 = vsel %vm1363_vm0, %v7439_v34, 0.0  ;;  %v9383_v60 = vld [vmem:[#allocation191_spill] sm:$0xff]  ;;  %v3473_v11 = vmul.f32 %v9373_v12, %v3441_v59  ;;  %v1495_v17 = vld [vmem:[%s7456_s30] sm:$0x1] }
 0x268   : > { %v4092_v29 = vpop.eup %4091  ;;  %v2482_v1 = vadd.f32 %v9381_v44, %v2480_v7  ;;  %v2552_v3 = vadd.f32 %v9382_v48, %v2550_v31  ;;  %v7465_v23 = vadd.f32 %v9383_v60, %v3328_v56  ;;  %v3526_v27 = vadd.f32 %v3525_v37, %v7431_v41  ;;  %v9384_v26 = vld [vmem:[#allocation265_spill] sm:$0xff]  ;;  %v9386_v44 = vld [vmem:[#allocation127_spill] sm:$0xff] }
 0x269   : > { %v1494_v25 = vmul.f32 %v4092_v29, %v1493_v20  ;;  %v3474_v15 = vmul.f32 %v9373_v12, %v3442_v45  ;;  %v3528_v53 = vsel %vm1363_vm0, %v7441_v30, 0.0  ;;  %v7476_v31 = vmul.f32 %v9373_v12, %v3443_v40  ;;  %v9385_v20 = vld [vmem:[#allocation9_spill] sm:$0xff] }
 0x26a   : > { %v2483_v24 = vadd.f32 %v2482_v1, %v7435_v8  ;;  %v2553_v7 = vadd.f32 %v2552_v3, %v9384_v26  ;;  %v3527_v56 = vadd.f32 %v3526_v27, %v7450_v19  ;;  %v7484_v59 = vmul.f32 %v9373_v12, %v3444_v0  ;;  %v9387_v3 = vld [vmem:[#allocation37_spill] sm:$0xff]  ;;  %v9389_v0 = vld [vmem:[#allocation236_spill] sm:$0xff] }
 0x26b   : > { %v1496_v60 = vmul.f32 %v1494_v25, %v7350_v35  ;;  %v7481_v37 = vrot.slane %v1494_v25, %v9385_v20  ;;  %v7486_v45 = vadd.f32 %v3473_v11, %v3413_v13  ;;  %v7493_v48 = vadd.f32 %v3474_v15, %v3414_v18  ;;  %v9388_v25 = vld [vmem:[#allocation217_spill] sm:$0xff]  ;;  %v9390_v11 = vld [vmem:[#allocation128_spill] sm:$0xff]  ;;  %v9392_v18 = vld [vmem:[#allocation35_spill] sm:$0xff] }
 0x26c   : > { %v7488_v29 = vadd.f32 %v2484_v6, %v2483_v24  ;;  %v7491_v1 = vadd.f32 %v9386_v44, %v2553_v7  ;;  %v7495_v40 = vadd.f32 %v3528_v53, %v3527_v56  ;;  %v9391_v24 = vld [vmem:[#allocation210_spill] sm:$0xff]  ;;  %v9393_v56 = vld [vmem:[#allocation40_spill] sm:$0xff] }
 0x26d   : > { %v1497_v27 = vsub.f32 %v1495_v17, %v1496_v60  ;;  %v1504_v35 = vmul.f32 %v7481_v37, %v9387_v3  ;;  %v1505_v26 = vmul.f32 %v7481_v37, %v9388_v25  ;;  %v1506_v13 = vmul.f32 %v7481_v37, %v9389_v0  ;;  %v9394_v3 = vld [vmem:[#allocation277_spill] sm:$0xff] }
 0x26e   : > { %v1507_v6 = vmul.f32 %v7481_v37, %v9390_v11  ;;  %v1508_v7 = vmul.f32 %v7481_v37, %v9391_v24  ;;  %v1509_v15 = vmul.f32 %v7481_v37, %v9392_v18  ;;  %v1510_v53 = vmul.f32 %v7481_v37, %v7026_v14  ;;  %v9395_v11 = vld [vmem:[#allocation77_spill] sm:$0xff] }
 0x26f   : > { %v7512_v17 = vrot.slane %v1497_v27, %v9385_v20  ;;  %v1511_v60 = vmul.f32 %v7481_v37, %v9393_v56  ;;  %v1512_v44 = vmul.f32 %v7481_v37, %v7029_v42  ;;  %v1513_v25 = vmul.f32 %v7481_v37, %v9394_v3  ;;  %v9396_v27 = vld [vmem:[#allocation96_spill] sm:$0xff] }
 0x270   : > { %v1514_v0 = vmul.f32 %v7481_v37, %v7032_v54  ;;  %v1515_v24 = vmul.f32 %v7481_v37, %v9395_v11  ;;  %v1516_v14 = vmul.f32 %v7481_v37, %v7016_v52  ;;  %v1517_v18 = vmul.f32 %v7481_v37, %v9396_v27 }
 0x271   : > { %v1538_v56 = vadd.f32 %v7512_v17, %v1504_v35  ;;  %v1539_v2 = vadd.f32 %v7512_v17, %v1505_v26  ;;  %v1540_v42 = vadd.f32 %v7512_v17, %v1506_v13  ;;  %v1541_v3 = vadd.f32 %v7512_v17, %v1507_v6 }
 0x272   : > { %v1542_v43 = vadd.f32 %v7512_v17, %v1508_v7  ;;  %v1543_v54 = vadd.f32 %v7512_v17, %v1509_v15  ;;  %v1544_v11 = vadd.f32 %v7512_v17, %v1510_v53  ;;  %v1545_v28 = vadd.f32 %v7512_v17, %v1511_v60  ;;  %v9397_v15 = vld [vmem:[#allocation147_spill] sm:$0xff] }
 0x273   : > { %1566 = vst [vmem:[%s7537_s5] sm:$0xff] %v1538_v56  ;;  %1567 = vst [vmem:[%s7537_s5 + $0x18] sm:$0x3f] %v1539_v2  ;;  %v1546_v52 = vadd.f32 %v7512_v17, %v1512_v44  ;;  %v1547_v35 = vadd.f32 %v7512_v17, %v1513_v25  ;;  %v1548_v26 = vadd.f32 %v7512_v17, %v1514_v0  ;;  %v9399_v25 = vld [vmem:[#allocation135_spill] sm:$0xff] }
 0x274   : > { %1568 = vst [vmem:[%s7537_s5 + $0x30] sm:$0xff] %v1540_v42  ;;  %1569 = vst [vmem:[%s7537_s5 + $0x48] sm:$0x3f] %v1541_v3  ;;  %v1549_v13 = vadd.f32 %v7512_v17, %v1515_v24  ;;  %v1550_v2 = vadd.f32 %v7512_v17, %v1516_v14  ;;  %v1551_v6 = vadd.f32 %v7512_v17, %v1517_v18  ;;  %v9400_v14 = vld [vmem:[#allocation187_spill] sm:$0xff] }
 0x275   : > { %1570 = vst [vmem:[%s7537_s5 + $0x60] sm:$0xff] %v1542_v43  ;;  %1571 = vst [vmem:[%s7537_s5 + $0x78] sm:$0x3f] %v1543_v54  ;;  %v1518_v7 = vmul.f32 %v7481_v37, %v9261_v22  ;;  %v1519_v53 = vmul.f32 %v7481_v37, %v9397_v15  ;;  %v1520_v43 = vmul.f32 %v7481_v37, %v9289_v9  ;;  %v9403_v15 = vld [vmem:[#allocation211_spill] sm:$0xff] }
 0x276   : > { %1572 = vst [vmem:[%s7537_s5 + $0x90] sm:$0xff] %v1544_v11  ;;  %1573 = vst [vmem:[%s7537_s5 + $0xa8] sm:$0x3f] %v1545_v28  ;;  %v9398_v28 = vld [vmem:[#allocation158_spill] sm:$0xff]  ;;  %v1522_v44 = vmul.f32 %v7481_v37, %v9298_v5  ;;  %v1523_v22 = vmul.f32 %v7481_v37, %v9399_v25  ;;  %v1524_v9 = vmul.f32 %v7481_v37, %v9309_v32  ;;  %v9401_v11 = vld [vmem:[#allocation220_spill] sm:$0xff] }
 0x277   : > { %1574 = vst [vmem:[%s7537_s5 + $0xc0] sm:$0xff] %v1546_v52  ;;  %1575 = vst [vmem:[%s7537_s5 + $0xd8] sm:$0x3f] %v1547_v35  ;;  %v1521_v60 = vmul.f32 %v7481_v37, %v9398_v28  ;;  %v1552_v0 = vadd.f32 %v7512_v17, %v1518_v7  ;;  %v1553_v24 = vadd.f32 %v7512_v17, %v1519_v53  ;;  %v2848_v28 = vld [vmem:[#allocation2 + $0xd9] sm:$0x3f] }
 0x278   : > { %1576 = vst [vmem:[%s7537_s5 + $0xf0] sm:$0xff] %v1548_v26  ;;  %1577 = vst [vmem:[%s7537_s5 + $0x108] sm:$0x3f] %v1549_v13  ;;  %v1525_v27 = vmul.f32 %v7481_v37, %v9400_v14  ;;  %v1554_v5 = vadd.f32 %v7512_v17, %v1520_v43  ;;  %v1556_v56 = vadd.f32 %v7512_v17, %v1522_v44  ;;  %v9402_v26 = vld [vmem:[#allocation143_spill] sm:$0xff] }
 0x279   : > { %1578 = vst [vmem:[%s7537_s5 + $0x120] sm:$0xff] %v1550_v2  ;;  %1579 = vst [vmem:[%s7537_s5 + $0x138] sm:$0x3f] %v1551_v6  ;;  %v1555_v18 = vadd.f32 %v7512_v17, %v1521_v60  ;;  %v1557_v42 = vadd.f32 %v7512_v17, %v1523_v22  ;;  %v1558_v3 = vadd.f32 %v7512_v17, %v1524_v9  ;;  %v7612_v60 = vld [vmem:[#allocation2 + $0xd2] sm:$0xff] }
 0x27a   : > { %1580 = vst [vmem:[%s7537_s5 + $0x150] sm:$0xff] %v1552_v0  ;;  %1581 = vst [vmem:[%s7537_s5 + $0x168] sm:$0x3f] %v1553_v24  ;;  %v1559_v54 = vadd.f32 %v7512_v17, %v1525_v27  ;;  %v1526_v32 = vmul.f32 %v7481_v37, %v9323_v36  ;;  %v1527_v52 = vmul.f32 %v7481_v37, %v9401_v11 }
 0x27b   : > { %1582 = vst [vmem:[%s7537_s5 + $0x180] sm:$0xff] %v1554_v5  ;;  %1583 = vst [vmem:[%s7537_s5 + $0x198] sm:$0x3f] %v1555_v18  ;;  %v1528_v35 = vmul.f32 %v7481_v37, %v6797_v16  ;;  %v1529_v13 = vmul.f32 %v7481_v37, %v9402_v26  ;;  %v1530_v2 = vmul.f32 %v7481_v37, %v6889_v38  ;;  %v2486_v16 = vrot.slane %v7488_v29, 4 }
 0x27c   : > { %1584 = vst [vmem:[%s7537_s5 + $0x1b0] sm:$0xff] %v1556_v56  ;;  %1585 = vst [vmem:[%s7537_s5 + $0x1c8] sm:$0x3f] %v1557_v42  ;;  %v1531_v36 = vmul.f32 %v7481_v37, %v6968_v49  ;;  %v1560_v6 = vadd.f32 %v7512_v17, %v1526_v32  ;;  %v1561_v7 = vadd.f32 %v7512_v17, %v1527_v52  ;;  %v3022_v56 = vld [vmem:[#allocation2 + $0xd8] sm:$0x3f]  ;;  %v9406_v52 = vld [vmem:[#allocation201_spill] sm:$0xff] }
 0x27d   : > { %1586 = vst [vmem:[%s7537_s5 + $0x1e0] sm:$0xff] %v1558_v3  ;;  %1587 = vst [vmem:[%s7537_s5 + $0x1f8] sm:$0x3f] %v1559_v54  ;;  %v2556_v53 = vadd.f32 %v7491_v1, %v9403_v15  ;;  %v1562_v38 = vadd.f32 %v7512_v17, %v1528_v35  ;;  %v1563_v43 = vadd.f32 %v7512_v17, %v1529_v13  ;;  %v9404_v1 = vld [vmem:[#allocation212_spill] sm:$0xff]  ;;  %v9407_v35 = vld [vmem:[#allocation195_spill] sm:$0xff] }
 0x27e   : > { %v1564_v49 = vadd.f32 %v7512_v17, %v1530_v2  ;;  %v1565_v37 = vadd.f32 %v7512_v17, %v1531_v36  ;;  %v2519_v44 = vmul.f32 %v7435_v8, %v7435_v8  ;;  %1588 = vst [vmem:[%s7537_s5 + $0x210] sm:$0xff] %v1560_v6  ;;  %1589 = vst [vmem:[%s7537_s5 + $0x228] sm:$0x3f] %v1561_v7  ;;  %v3110_v2 = vld [vmem:[#allocation2 + $0xd9] sm:$0x3f]  ;;  %v9408_v15 = vld [vmem:[#allocation186_spill] sm:$0xff] }
 0x27f   : > { %v2487_v25 = vadd.f32 %v2486_v16, %v7488_v29  ;;  %v2558_v22 = vadd.f32 %v9404_v1, %v2556_v53  ;;  %v3530_v0 = vadd.f32 %v7495_v40, %v7486_v45  ;;  %1590 = vst [vmem:[%s7537_s5 + $0x240] sm:$0xff] %v1562_v38  ;;  %1591 = vst [vmem:[%s7537_s5 + $0x258] sm:$0x3f] %v1563_v43  ;;  %v3531_v29 = vsel %vm1363_vm0, %v7493_v48, 0.0  ;;  %v9410_v1 = vld [vmem:[#allocation12_spill] sm:$0xff] }
 0x280   : > { %1592 = vst [vmem:[%s7537_s5 + $0x270] sm:$0xff] %v1564_v49  ;;  %1593 = vst [vmem:[%s7537_s5 + $0x288] sm:$0x3f] %v1565_v37  ;;  %v7628_v17 = vadd.f32 %v7476_v31, %v7458_v39  ;;  %v7632_v24 = vadd.f32 %v7484_v59, %v7465_v23  ;;  %v3574_v9 = vmul.f32 %v7439_v34, %v7439_v34  ;;  %v2560_v23 = vsel %vm1363_vm0, %v7445_v57, 0.0  ;;  %v2936_v59 = vld [vmem:[#allocation2 + $0xda] sm:$0x3f] }
 0x281   : > { %v2488_v14 = vrot.slane %v2487_v25, 2  ;;  %v2559_v40 = vadd.f32 %v2558_v22, %v2519_v44  ;;  %v3532_v27 = vadd.f32 %v3531_v29, %v3530_v0  ;;  %v3573_v5 = vmul.f32 %v7431_v41, %v7431_v41 }
 0x282   : > { %v2880_v18 = vmul.f32 %v8709_v62, %v2848_v28  ;;  %v2967_v39 = vmul.f32 %v9335_v10, %v7612_v60  ;;  %v3576_v31 = vmul.f32 %v7441_v30, %v7441_v30  ;;  %v3575_v32 = vmul.f32 %v7450_v19, %v7450_v19  ;;  %v9405_v62 = vld [vmem:[#allocation199_spill] sm:$0xff] }
 0x283   : > { %v2489_v42 = vadd.f32 %v2488_v14, %v2487_v25  ;;  %v2561_v3 = vadd.f32 %v2560_v23, %v2559_v40  ;;  %v3533_v54 = vadd.f32 %v3532_v27, %v7628_v17  ;;  %v7652_v11 = vadd.f32 %v9405_v62, %v7412_v4  ;;  %v9409_v25 = vld [vmem:[#allocation129_spill] sm:$0xff] }
 0x284   : > { %v7656_v26 = vadd.f32 %v9407_v35, %v9406_v52  ;;  %v3534_v57 = vsel %vm1363_vm0, %v7632_v24, 0.0  ;;  %v3601_v13 = vsel %vm1363_vm0, %v3574_v9, 0.0  ;;  %v2908_v53 = vadd.f32 %v2880_v18, %v9408_v15  ;;  %v3024_v9 = vld [vmem:[#allocation2 + $0xe8] sm:$0x3f]  ;;  %v9413_v35 = vld [vmem:[#allocation164_spill] sm:$0xff] }
 0x285   : > { %v2490_v36 = vrot.slane %v2489_v42, 1  ;;  %v2562_v6 = vrot.slane %v2561_v3, 4  ;;  %v3535_v7 = vadd.f32 %v3534_v57, %v3533_v54  ;;  %v3602_v16 = vadd.f32 %v3601_v13, %v3573_v5  ;;  %v9411_v18 = vld [vmem:[#allocation14_spill] sm:$0xff]  ;;  %v3023_v54 = vld [vmem:[#allocation2 + $0xe0] sm:$0xff] }
 0x286   : > { %v2968_v38 = vmul.f32 %v9335_v10, %v2936_v59  ;;  %v3054_v4 = vmul.f32 %v5759_v33, %v3022_v56  ;;  %v3604_v43 = vsel %vm1363_vm0, %v3576_v31, 0.0  ;;  %v7668_v22 = vadd.f32 %v9410_v1, %v9409_v25  ;;  %v9412_v59 = vld [vmem:[#allocation132_spill] sm:$0xff]  ;;  %v9415_v1 = vld [vmem:[#allocation285_spill] sm:$0xff] }
 0x287   : > { %v2491_v49 = vadd.f32 %v2490_v36, %v2489_v42  ;;  %v2563_v37 = vadd.f32 %v2562_v6, %v2561_v3  ;;  %v3536_v28 = vadd.f32 %v3535_v7, %v7652_v11  ;;  %v3603_v44 = vadd.f32 %v3602_v16, %v3575_v32  ;;  %v3198_v42 = vld [vmem:[#allocation2 + $0xda] sm:$0x3f]  ;;  %v3112_v32 = vld [vmem:[#allocation2 + $0xe9] sm:$0x3f]  ;;  %v9414_v36 = vld [vmem:[#allocation11_spill] sm:$0xff] }
 0x288   : > { %v3142_v0 = vmul.f32 %v5778_v61, %v3110_v2  ;;  %v3537_v29 = vsel %vm1363_vm0, %v7656_v26, 0.0  ;;  %v3578_v10 = vmul.f32 %v7493_v48, %v7493_v48  ;;  %v3577_v27 = vmul.f32 %v7486_v45, %v7486_v45 }
 0x289   : > { %v2564_v14 = vrot.slane %v2563_v37, 2  ;;  %v3538_v40 = vadd.f32 %v3537_v29, %v3536_v28  ;;  %v3605_v5 = vadd.f32 %v3604_v43, %v3603_v44  ;;  %v2995_v23 = vadd.f32 %v2967_v39, %v9411_v18  ;;  %v3284_v28 = vld [vmem:[#allocation2 + $0xd8] sm:$0x3f] }
 0x28a   : > { %v2996_v31 = vadd.f32 %v2968_v38, %v2908_v53  ;;  %v3082_v56 = vadd.f32 %v3054_v4, %v9412_v59  ;;  %v3229_v3 = vmul.f32 %v9350_v58, %v7612_v60  ;;  %v7681_v62 = vmul.f32 0.0051020407, %v2491_v49 }
 0x28b   : > { %v2565_v52 = vadd.f32 %v2564_v14, %v2563_v37  ;;  %v3539_v57 = vadd.f32 %v3538_v40, %v9413_v35  ;;  %v3606_v13 = vadd.f32 %v3605_v5, %v3577_v27  ;;  %v3056_v2 = vmul.f32 %v5759_v33, %v3024_v9  ;;  %v3200_v14 = vld [vmem:[#allocation2 + $0xea] sm:$0x3f]  ;;  %v9416_v40 = vld [vmem:[#allocation219_spill] sm:$0xff] }
 0x28c   : > { %v3540_v39 = vsel %vm1363_vm0, %v9414_v36, 0.0  ;;  %v3580_v6 = vmul.f32 %v7632_v24, %v7632_v24  ;;  %v3607_v7 = vsel %vm1363_vm0, %v3578_v10, 0.0  ;;  %v3579_v53 = vmul.f32 %v7628_v17, %v7628_v17  ;;  %v3286_v5 = vld [vmem:[#allocation2 + $0xe8] sm:$0x3f] }
 0x28d   : > { %v2566_v16 = vrot.slane %v2565_v52, 1  ;;  %v3541_v15 = vadd.f32 %v3540_v39, %v3539_v57  ;;  %v3608_v38 = vadd.f32 %v3607_v7, %v3606_v13  ;;  %v3170_v4 = vadd.f32 %v3142_v0, %v3082_v56  ;;  %v4115_v57 = vld [vmem:[#allocation2 + $0xe1] sm:$0xff] }
 0x28e   : > { %v3230_v43 = vmul.f32 %v9350_v58, %v3198_v42  ;;  %v3055_v49 = vmul.f32 %v5759_v33, %v3023_v54  ;;  %v3144_v37 = vmul.f32 %v5778_v61, %v3112_v32  ;;  %v2569_v25 = vmul.f32 %v7681_v62, %v7681_v62 }
 0x28f   : > { %v2567_v44 = vadd.f32 %v2566_v16, %v2565_v52  ;;  %v3542_v29 = vadd.f32 %v3541_v15, %v9415_v1  ;;  %v3609_v10 = vadd.f32 %v3608_v38, %v3579_v53  ;;  %v3084_v9 = vadd.f32 %v3056_v2, %v2996_v31  ;;  %v3372_v2 = vld [vmem:[#allocation2 + $0xd9] sm:$0x3f]  ;;  %v9417_v16 = vld [vmem:[#allocation227_spill] sm:$0xff] }
 0x290   : > { %v3543_v27 = vsel %vm1363_vm0, %v9416_v40, 0.0  ;;  %v3582_v0 = vmul.f32 %v7656_v26, %v7656_v26  ;;  %v3610_v33 = vsel %vm1363_vm0, %v3580_v6, 0.0  ;;  %v3581_v56 = vmul.f32 %v7652_v11, %v7652_v11 }
 0x291   : > { %v2568_v18 = vmul.f32 0.0051020407, %v2567_v44  ;;  %v3544_v59 = vadd.f32 %v3543_v27, %v3542_v29  ;;  %v3611_v42 = vadd.f32 %v3610_v33, %v3609_v10  ;;  %v3258_v32 = vadd.f32 %v3230_v43, %v3170_v4  ;;  %v3199_v43 = vld [vmem:[#allocation2 + $0xe2] sm:$0xff] }
 0x292   : > { %v3316_v52 = vmul.f32 %v6005_v50, %v3284_v28  ;;  %v3083_v31 = vadd.f32 %v3055_v49, %v2995_v23  ;;  %v3143_v13 = vmul.f32 %v4115_v57, %v5778_v61  ;;  %v3232_v39 = vmul.f32 %v9350_v58, %v3200_v14  ;;  %v3374_v23 = vld [vmem:[#allocation2 + $0xe9] sm:$0x3f]  ;;  %v9418_v28 = vld [vmem:[#allocation231_spill] sm:$0xff]  ;;  %v9420_v27 = vld [vmem:[#allocation137_spill] sm:$0xff] }
 0x293   : > { %v2570_v7 = vsub.f32 %v2568_v18, %v2569_v25  ;;  %v3545_v6 = vadd.f32 %v3544_v59, %v9417_v16  ;;  %v3612_v15 = vadd.f32 %v3611_v42, %v3581_v56  ;;  %v3172_v53 = vadd.f32 %v3144_v37, %v3084_v9  ;;  %v9419_v10 = vld [vmem:[#allocation90_spill] sm:$0xff] }
 0x294   : > { %v3318_v38 = vmul.f32 %v6005_v50, %v3286_v5  ;;  %v3584_v44 = vmul.f32 %v9414_v36, %v9414_v36  ;;  %v3613_v4 = vsel %vm1363_vm0, %v3582_v0, 0.0  ;;  %v3583_v29 = vmul.f32 %v9413_v35, %v9413_v35  ;;  %v3460_v5 = vld [vmem:[#allocation2 + $0xda] sm:$0x3f] }
 0x295   : > { %v2571_v49 = vadd.f32 1e-05, %v2570_v7  ;;  %v3547_v61 = vadd.f32 %v9418_v28, %v3545_v6  ;;  %v3614_v25 = vadd.f32 %v3613_v4, %v3612_v15  ;;  %v3257_v14 = vadd.f32 %v3229_v3, %v9419_v10  ;;  %v9421_v0 = vld [vmem:[#allocation264_spill] sm:$0xff]  ;;  %v3462_v4 = vld [vmem:[#allocation2 + $0xea] sm:$0x3f] }
 0x296   : > { %v3344_v37 = vadd.f32 %v3316_v52, %v9420_v27  ;;  %v3404_v9 = vmul.f32 %v9363_v55, %v3372_v2  ;;  %v3317_v33 = vmul.f32 %v6005_v50, %v3023_v54  ;;  %v3171_v18 = vadd.f32 %v3143_v13, %v3083_v31  ;;  %v9422_v52 = vld [vmem:[#allocation258_spill] sm:$0xff]  ;;  %v9423_v31 = vld [vmem:[#allocation139_spill] sm:$0xff] }
 0x297   : > { %4093 = vrsqrt.f32 %v2571_v49  ;;  %v3548_v59 = vadd.f32 %v3547_v61, %v9421_v0  ;;  %v3615_v56 = vadd.f32 %v3614_v25, %v3583_v29  ;;  %v3231_v42 = vmul.f32 %v9350_v58, %v3199_v43  ;;  %v9424_v13 = vld [vmem:[#allocation142_spill] sm:$0xff]  ;;  %v9425_v49 = vld [vmem:[#allocation183_spill] sm:$0xff] }
 0x298   : > { %v3346_v7 = vadd.f32 %v3318_v38, %v3258_v32  ;;  %v3406_v6 = vmul.f32 %v9363_v55, %v3374_v23  ;;  %v3616_v15 = vsel %vm1363_vm0, %v3584_v44, 0.0  ;;  %v3260_v3 = vadd.f32 %v3232_v39, %v3172_v53  ;;  %v9426_v44 = vld [vmem:[#allocation240_spill] sm:$0xff]  ;;  %v9427_v27 = vld [vmem:[#allocation226_spill] sm:$0xff] }
 0x299   : > { %v3550_v28 = vadd.f32 %v9422_v52, %v3548_v59  ;;  %v3585_v50 = vmul.f32 %v9415_v1, %v9415_v1  ;;  %v3617_v54 = vadd.f32 %v3616_v15, %v3615_v56  ;;  %v7729_v2 = vadd.f32 %v9424_v13, %v9423_v31  ;;  %v9428_v56 = vld [vmem:[#allocation276_spill] sm:$0xff] }
 0x29a   : > { %v3431_v58 = vadd.f32 %v9425_v49, %v7668_v22  ;;  %v3491_v32 = vmul.f32 %v9373_v12, %v7612_v60  ;;  %v3492_v38 = vmul.f32 %v9373_v12, %v3460_v5  ;;  %v3432_v39 = vadd.f32 %v3404_v9, %v3344_v37  ;;  %v9429_v60 = vld [vmem:[#allocation156_spill] sm:$0xff]  ;;  %v9430_v37 = vld [vmem:[#allocation229_spill] sm:$0xff]  ;;  %v9435_v49 = vld [vmem:[#allocation166_spill] sm:$0xff] }
 0x29b   : > { %v3405_v53 = vmul.f32 %v4115_v57, %v9363_v55  ;;  %v3551_v23 = vadd.f32 %v3550_v28, %v9426_v44  ;;  %v3618_v61 = vadd.f32 %v3617_v54, %v3585_v50  ;;  %v3345_v29 = vadd.f32 %v3317_v33, %v3257_v14  ;;  %v9431_v9 = vld [vmem:[#allocation257_spill] sm:$0xff]  ;;  %v9432_v33 = vld [vmem:[#allocation146_spill] sm:$0xff]  ;;  %v9434_v28 = vld [vmem:[#allocation107_spill] sm:$0xff] }
 0x29c   : > { %v3259_v25 = vadd.f32 %v3231_v42, %v3171_v18  ;;  %v3494_v10 = vmul.f32 %v9373_v12, %v3462_v4  ;;  %v3619_v59 = vsel %vm1363_vm0, %v9427_v27, 0.0  ;;  %v3434_v22 = vadd.f32 %v3406_v6, %v3346_v7  ;;  %v2573_v6 = vld [vmem:[%s7422_s27 + $0x1] sm:$0x1] }
 0x29d   : > { %v3348_v15 = vadd.f32 %v9428_v56, %v3260_v3  ;;  %v3553_v52 = vadd.f32 %v9429_v60, %v3551_v23  ;;  %v3620_v5 = vadd.f32 %v3619_v59, %v3618_v61  ;;  %v3622_v55 = vsel %vm1363_vm0, %v9430_v37, 0.0  ;;  %v9433_v3 = vld [vmem:[#allocation138_spill] sm:$0xff]  ;;  %v9436_v59 = vld [vmem:[#allocation192_spill] sm:$0xff] }
 0x29e   : > { %v3589_v57 = vmul.f32 %v9421_v0, %v9421_v0  ;;  %v3590_v14 = vmul.f32 %v9431_v9, %v9431_v9  ;;  %v3592_v18 = vmul.f32 %v9432_v33, %v9432_v33  ;;  %v3555_v42 = vsel %vm1363_vm0, %v7729_v2, 0.0 }
 0x29f   : > { %v7753_v7 = vadd.f32 %v3492_v38, %v3432_v39  ;;  %v3554_v4 = vadd.f32 %v3553_v52, %v9433_v3  ;;  %v3621_v50 = vadd.f32 %v3620_v5, %v9434_v28  ;;  %v7758_v54 = vadd.f32 %v3491_v32, %v3431_v58  ;;  %v9439_v28 = vld [vmem:[#allocation161_spill] sm:$0xff] }
 0x2a0   : > { %v3433_v31 = vadd.f32 %v3405_v53, %v3345_v29  ;;  %v3493_v13 = vmul.f32 %v9373_v12, %v3199_v43  ;;  %v3347_v23 = vadd.f32 %v9435_v49, %v3259_v25  ;;  %v7762_v27 = vadd.f32 %v3494_v10, %v3434_v22  ;;  %v2575_v53 = vld [vmem:[%s7456_s30 + $0x1] sm:$0x1]  ;;  %v9441_v49 = vld [vmem:[#allocation155_spill] sm:$0xff] }
 0x2a1   : > { %v4094_v61 = vpop.eup %4093  ;;  %v3436_v56 = vadd.f32 %v9436_v59, %v3348_v15  ;;  %v3556_v38 = vadd.f32 %v3555_v42, %v3554_v4  ;;  %v3623_v39 = vadd.f32 %v3622_v55, %v3621_v50  ;;  %v3625_v60 = vsel %vm1363_vm0, %v3590_v14, 0.0  ;;  %v9437_v22 = vld [vmem:[#allocation185_spill] sm:$0xff]  ;;  %v9438_v14 = vld [vmem:[#allocation196_spill] sm:$0xff] }
 0x2a2   : > { %v7768_v52 = vmul.f32 %v9426_v44, %v9426_v44  ;;  %v7771_v58 = vsel %vm1363_vm0, %v3592_v18, 0.0  ;;  %v2574_v32 = vmul.f32 %v4094_v61, %v2573_v6  ;;  %v7775_v12 = vmul.f32 %v7729_v2, %v7729_v2  ;;  %v9442_v61 = vld [vmem:[#allocation141_spill] sm:$0xff] }
 0x2a3   : > { %v3558_v43 = vsel %vm1363_vm0, %v7753_v7, 0.0  ;;  %v3557_v29 = vadd.f32 %v3556_v38, %v7758_v54  ;;  %v3624_v25 = vadd.f32 %v3623_v39, %v3589_v57  ;;  %v7781_v10 = vadd.f32 %v3493_v13, %v3433_v31  ;;  %v9440_v31 = vld [vmem:[#allocation218_spill] sm:$0xff] }
 0x2a4   : > { %v7784_v15 = vadd.f32 %v9437_v22, %v3347_v23  ;;  %v2576_v5 = vmul.f32 %v2574_v32, %v7681_v62  ;;  %v7788_v37 = vrot.slane %v2574_v32, %v9385_v20  ;;  %v7792_v55 = vsel %vm1363_vm0, %v7762_v27, 0.0  ;;  %v9444_v39 = vld [vmem:[#allocation38_spill] sm:$0xff] }
 0x2a5   : > { %v7795_v18 = vadd.f32 %v9438_v14, %v3436_v56  ;;  %v7797_v42 = vadd.f32 %v3558_v43, %v3557_v29  ;;  %v7799_v57 = vadd.f32 %v3625_v60, %v3624_v25  ;;  %v9443_v56 = vld [vmem:[#allocation281_spill] sm:$0xff]  ;;  %v9445_v32 = vld [vmem:[#allocation182_spill] sm:$0xff] }
 0x2a6   : > { %v2577_v6 = vsub.f32 %v2575_v53, %v2576_v5  ;;  %v2584_v4 = vmul.f32 %v7788_v37, %v7203_v47  ;;  %v2585_v62 = vmul.f32 %v7788_v37, %v7197_v21  ;;  %v2586_v50 = vmul.f32 %v7788_v37, %v9439_v28  ;;  %v9446_v29 = vld [vmem:[#allocation154_spill] sm:$0xff]  ;;  %v9447_v5 = vld [vmem:[#allocation163_spill] sm:$0xff] }
 0x2a7   : > { %v2587_v13 = vmul.f32 %v7788_v37, %v9440_v31  ;;  %v2588_v23 = vmul.f32 %v7788_v37, %v9441_v49  ;;  %v2589_v59 = vmul.f32 %v7788_v37, %v9442_v61  ;;  %v2590_v38 = vmul.f32 %v7788_v37, %v9443_v56  ;;  %v9448_v56 = vld [vmem:[#allocation140_spill] sm:$0xff] }
 0x2a8   : > { %v7816_v47 = vrot.slane %v2577_v6, %v9385_v20  ;;  %v2591_v21 = vmul.f32 %v7788_v37, %v9444_v39  ;;  %v2592_v60 = vmul.f32 %v7788_v37, %v7248_v63  ;;  %v2593_v43 = vmul.f32 %v7788_v37, %v9445_v32  ;;  %v9449_v39 = vld [vmem:[#allocation269_spill] sm:$0xff] }
 0x2a9   : > { %v2594_v53 = vmul.f32 %v7788_v37, %v7221_v46  ;;  %v2595_v25 = vmul.f32 %v7788_v37, %v9446_v29  ;;  %v2596_v22 = vmul.f32 %v7788_v37, %v9332_v51  ;;  %v2597_v14 = vmul.f32 %v7788_v37, %v9447_v5  ;;  %v9452_v29 = vld [vmem:[#allocation214_spill] sm:$0xff] }
 0x2aa   : > { %v2618_v6 = vadd.f32 %v7816_v47, %v2584_v4  ;;  %v2619_v63 = vadd.f32 %v7816_v47, %v2585_v62  ;;  %v2620_v28 = vadd.f32 %v7816_v47, %v2586_v50  ;;  %v2621_v46 = vadd.f32 %v7816_v47, %v2587_v13 }
 0x2ab   : > { %v2622_v31 = vadd.f32 %v7816_v47, %v2588_v23  ;;  %v2623_v49 = vadd.f32 %v7816_v47, %v2589_v59  ;;  %v2624_v51 = vadd.f32 %v7816_v47, %v2590_v38  ;;  %v2625_v61 = vadd.f32 %v7816_v47, %v2591_v21 }
 0x2ac   : > { %2646 = vst [vmem:[%s7537_s5 + $0x8] sm:$0xff] %v2618_v6  ;;  %2647 = vst [vmem:[%s7537_s5 + $0x20] sm:$0x3f] %v2619_v63  ;;  %v2626_v4 = vadd.f32 %v7816_v47, %v2592_v60  ;;  %v2627_v62 = vadd.f32 %v7816_v47, %v2593_v43  ;;  %v2628_v50 = vadd.f32 %v7816_v47, %v2594_v53  ;;  %v9450_v60 = vld [vmem:[#allocation188_spill] sm:$0xff]  ;;  %v9451_v43 = vld [vmem:[#allocation190_spill] sm:$0xff] }
 0x2ad   : > { %2648 = vst [vmem:[%s7537_s5 + $0x38] sm:$0xff] %v2620_v28  ;;  %2649 = vst [vmem:[%s7537_s5 + $0x50] sm:$0x3f] %v2621_v46  ;;  %v2629_v13 = vadd.f32 %v7816_v47, %v2595_v25  ;;  %v2630_v23 = vadd.f32 %v7816_v47, %v2596_v22  ;;  %v2631_v59 = vadd.f32 %v7816_v47, %v2597_v14  ;;  %v9453_v22 = vld [vmem:[#allocation104_spill] sm:$0xff]  ;;  %v9454_v63 = vld [vmem:[#allocation253_spill] sm:$0xff] }
 0x2ae   : > { %2650 = vst [vmem:[%s7537_s5 + $0x68] sm:$0xff] %v2622_v31  ;;  %2651 = vst [vmem:[%s7537_s5 + $0x80] sm:$0x3f] %v2623_v49  ;;  %v2598_v38 = vmul.f32 %v7788_v37, %v9448_v56  ;;  %v2599_v21 = vmul.f32 %v7788_v37, %v9449_v39  ;;  %v2600_v32 = vmul.f32 %v7788_v37, %v9450_v60  ;;  %v9455_v46 = vld [vmem:[#allocation234_spill] sm:$0xff] }
 0x2af   : > { %2652 = vst [vmem:[%s7537_s5 + $0x98] sm:$0xff] %v2624_v51  ;;  %2653 = vst [vmem:[%s7537_s5 + $0xb0] sm:$0x3f] %v2625_v61  ;;  %v2601_v53 = vmul.f32 %v7788_v37, %v9451_v43  ;;  %v2602_v25 = vmul.f32 %v7788_v37, %v9452_v29  ;;  %v2603_v5 = vmul.f32 %v7788_v37, %v9453_v22  ;;  %v9460_v43 = vld [vmem:[#allocation159_spill] sm:$0xff] }
 0x2b0   : > { %2654 = vst [vmem:[%s7537_s5 + $0xc8] sm:$0xff] %v2626_v4  ;;  %2655 = vst [vmem:[%s7537_s5 + $0xe0] sm:$0x3f] %v2627_v62  ;;  %v2632_v14 = vadd.f32 %v7816_v47, %v2598_v38  ;;  %v2633_v6 = vadd.f32 %v7816_v47, %v2599_v21  ;;  %v2604_v28 = vmul.f32 %v7788_v37, %v9454_v63  ;;  %v9458_v38 = vld [vmem:[#allocation157_spill] sm:$0xff]  ;;  %v9459_v21 = vld [vmem:[#allocation286_spill] sm:$0xff] }
 0x2b1   : > { %2656 = vst [vmem:[%s7537_s5 + $0xf8] sm:$0xff] %v2628_v50  ;;  %2657 = vst [vmem:[%s7537_s5 + $0x110] sm:$0x3f] %v2629_v13  ;;  %v2605_v31 = vmul.f32 %v7788_v37, %v9455_v46  ;;  %v2634_v49 = vadd.f32 %v7816_v47, %v2600_v32  ;;  %v2635_v51 = vadd.f32 %v7816_v47, %v2601_v53  ;;  %v9456_v13 = vld [vmem:[#allocation259_spill] sm:$0xff] }
 0x2b2   : > { %2658 = vst [vmem:[%s7537_s5 + $0x128] sm:$0xff] %v2630_v23  ;;  %2659 = vst [vmem:[%s7537_s5 + $0x140] sm:$0x3f] %v2631_v59  ;;  %v2636_v61 = vadd.f32 %v7816_v47, %v2602_v25  ;;  %v2637_v4 = vadd.f32 %v7816_v47, %v2603_v5  ;;  %v2638_v62 = vadd.f32 %v7816_v47, %v2604_v28  ;;  %v9457_v59 = vld [vmem:[#allocation261_spill] sm:$0xff]  ;;  %v9461_v28 = vld [vmem:[#allocation200_spill] sm:$0xff] }
 0x2b3   : > { %2660 = vst [vmem:[%s7537_s5 + $0x158] sm:$0xff] %v2632_v14  ;;  %2661 = vst [vmem:[%s7537_s5 + $0x170] sm:$0x3f] %v2633_v6  ;;  %v2639_v50 = vadd.f32 %v7816_v47, %v2605_v31  ;;  %v2606_v23 = vmul.f32 %v7788_v37, %v9456_v13  ;;  %v2607_v56 = vmul.f32 %v7788_v37, %v9457_v59  ;;  %v3631_v31 = vsel %vm1363_vm0, %v7775_v12, 0.0 }
 0x2b4   : > { %2662 = vst [vmem:[%s7537_s5 + $0x188] sm:$0xff] %v2634_v49  ;;  %2663 = vst [vmem:[%s7537_s5 + $0x1a0] sm:$0x3f] %v2635_v51  ;;  %v2608_v39 = vmul.f32 %v7788_v37, %v9458_v38  ;;  %v2609_v60 = vmul.f32 %v7788_v37, %v9459_v21  ;;  %v2610_v32 = vmul.f32 %v7788_v37, %v7435_v8  ;;  %v3564_v49 = vsel %vm1363_vm0, %v7795_v18, 0.0 }
 0x2b5   : > { %2664 = vst [vmem:[%s7537_s5 + $0x1b8] sm:$0xff] %v2636_v61  ;;  %2665 = vst [vmem:[%s7537_s5 + $0x1d0] sm:$0x3f] %v2637_v4  ;;  %v2611_v53 = vmul.f32 %v7788_v37, %v9460_v43  ;;  %v2640_v29 = vadd.f32 %v7816_v47, %v2606_v23  ;;  %v2641_v25 = vadd.f32 %v7816_v47, %v2607_v56 }
 0x2b6   : > { %2666 = vst [vmem:[%s7537_s5 + $0x1e8] sm:$0xff] %v2638_v62  ;;  %2667 = vst [vmem:[%s7537_s5 + $0x200] sm:$0x3f] %v2639_v50  ;;  %v3560_v22 = vadd.f32 %v7797_v42, %v7781_v10  ;;  %v3627_v5 = vadd.f32 %v7799_v57, %v7768_v52  ;;  %v2642_v8 = vadd.f32 %v7816_v47, %v2608_v39 }
 0x2b7   : > { %v2643_v37 = vadd.f32 %v7816_v47, %v2609_v60  ;;  %v2644_v14 = vadd.f32 %v7816_v47, %v2610_v32  ;;  %v2645_v6 = vadd.f32 %v7816_v47, %v2611_v53  ;;  %v3593_v63 = vmul.f32 %v9433_v3, %v9433_v3  ;;  %2668 = vst [vmem:[%s7537_s5 + $0x218] sm:$0xff] %v2640_v29 }
 0x2b8   : > { %v7918_v46 = vadd.f32 %v9461_v28, %v7784_v15  ;;  %2669 = vst [vmem:[%s7537_s5 + $0x230] sm:$0x3f] %v2641_v25  ;;  %v3562_v42 = vadd.f32 %v7792_v55, %v3560_v22  ;;  %v3629_v52 = vadd.f32 %v7771_v58, %v3627_v5  ;;  %2670 = vst [vmem:[%s7537_s5 + $0x248] sm:$0xff] %v2642_v8 }
 0x2b9   : > { %2671 = vst [vmem:[%s7537_s5 + $0x260] sm:$0x3f] %v2643_v37  ;;  %2672 = vst [vmem:[%s7537_s5 + $0x278] sm:$0xff] %v2644_v14  ;;  %v3596_v15 = vmul.f32 %v7753_v7, %v7753_v7  ;;  %v3595_v55 = vmul.f32 %v7758_v54, %v7758_v54  ;;  %v3598_v50 = vmul.f32 %v7762_v27, %v7762_v27 }
 0x2ba   : > { %2673 = vst [vmem:[%s7537_s5 + $0x290] sm:$0x3f] %v2645_v6  ;;  %v3563_v57 = vadd.f32 %v3562_v42, %v7918_v46  ;;  %v3630_v47 = vadd.f32 %v3629_v52, %v3593_v63  ;;  %v3597_v12 = vmul.f32 %v7781_v10, %v7781_v10  ;;  %v3600_v39 = vmul.f32 %v7795_v18, %v7795_v18 }
 0x2bb   : > { %v3634_v62 = vsel %vm1363_vm0, %v3596_v15, 0.0  ;;  %v3637_v38 = vsel %vm1363_vm0, %v3598_v50, 0.0  ;;  %v3599_v21 = vmul.f32 %v7918_v46, %v7918_v46 }
 0x2bc   : > { %v3565_v58 = vadd.f32 %v3564_v49, %v3563_v57  ;;  %v3632_v51 = vadd.f32 %v3631_v31, %v3630_v47  ;;  %v3640_v53 = vsel %vm1363_vm0, %v3600_v39, 0.0  ;;  %v3653_v31 = vld [vmem:[%s7422_s27 + $0x2] sm:$0x1] }
 0x2be   : > { %v3566_v61 = vrot.slane %v3565_v58, 4  ;;  %v3633_v4 = vadd.f32 %v3632_v51, %v3595_v55  ;;  %v3655_v55 = vld [vmem:[%s7456_s30 + $0x2] sm:$0x1] }
 0x2c0   : > { %v3567_v13 = vadd.f32 %v3566_v61, %v3565_v58  ;;  %v3635_v23 = vadd.f32 %v3634_v62, %v3633_v4 }
 0x2c2   : > { %v3568_v59 = vrot.slane %v3567_v13, 2  ;;  %v3636_v56 = vadd.f32 %v3635_v23, %v3597_v12 }
 0x2c4   : > { %v3569_v60 = vadd.f32 %v3568_v59, %v3567_v13  ;;  %v3638_v32 = vadd.f32 %v3637_v38, %v3636_v56 }
 0x2c6   : > { %v3639_v43 = vadd.f32 %v3638_v32, %v3599_v21  ;;  %v3570_v29 = vrot.slane %v3569_v60, 1 }
 0x2c8   : > { %v3641_v25 = vadd.f32 %v3640_v53, %v3639_v43  ;;  %v3571_v5 = vadd.f32 %v3570_v29, %v3569_v60  ;;  %v9462_v29 = vld [vmem:[#allocation228_spill] sm:$0xff] }
 0x2ca   : > { %v3642_v22 = vrot.slane %v3641_v25, 4  ;;  %v3572_v14 = vmul.f32 0.0051020407, %v3571_v5 }
 0x2cc   : > { %v3643_v8 = vadd.f32 %v3642_v22, %v3641_v25  ;;  %v3649_v42 = vmul.f32 %v3572_v14, %v3572_v14 }
 0x2ce   : > { %v3644_v37 = vrot.slane %v3643_v8, 2 }
 0x2d0   : > { %v3645_v6 = vadd.f32 %v3644_v37, %v3643_v8 }
 0x2d2   : > { %v3646_v63 = vrot.slane %v3645_v6, 1 }
 0x2d4   : > { %v3647_v28 = vadd.f32 %v3646_v63, %v3645_v6 }
 0x2d6   : > { %v3648_v52 = vmul.f32 0.0051020407, %v3647_v28 }
 0x2d8   : > { %v3650_v57 = vsub.f32 %v3648_v52, %v3649_v42 }
 0x2da   : > { %v3651_v47 = vadd.f32 1e-05, %v3650_v57 }
 0x2dc   : > { %4095 = vrsqrt.f32 %v3651_v47 }
 0x2e6   : > { %v4096_v15 = vpop.eup %4095 }
 0x2e7   : > { %v3654_v49 = vmul.f32 %v4096_v15, %v3653_v31 }
 0x2e9   : > { %v3656_v58 = vmul.f32 %v3654_v49, %v3572_v14  ;;  %v7951_v51 = vrot.slane %v3654_v49, %v9385_v20 }
 0x2eb   : > { %v3657_v61 = vsub.f32 %v3655_v55, %v3656_v58  ;;  %v3664_v4 = vmul.f32 %v7951_v51, %v7431_v41  ;;  %v3665_v62 = vmul.f32 %v7951_v51, %v7439_v34  ;;  %v3666_v50 = vmul.f32 %v7951_v51, %v7450_v19  ;;  %v3782_v58 = vld [vmem:[%s7537_s5 + $0x18] sm:$0xff] (%p4201_p5) }
 0x2ec   : > { %v3667_v12 = vmul.f32 %v7951_v51, %v7441_v30  ;;  %v3668_v13 = vmul.f32 %v7951_v51, %v7486_v45  ;;  %v3669_v23 = vmul.f32 %v7951_v51, %v7493_v48  ;;  %v3670_v59 = vmul.f32 %v7951_v51, %v7628_v17  ;;  %3783 = vst [vmem:[%s8080_s8 + $0x30] sm:$0xff] (%p4201_p5), %v3782_v58  ;;  %v3910_v58 = vld [vmem:[%s7537_s5 + $0x218] sm:$0xff] (%p4201_p5) }
 0x2ed   : > { %v7968_v41 = vrot.slane %v3657_v61, %v9385_v20  ;;  %v3671_v34 = vmul.f32 %v7951_v51, %v7632_v24  ;;  %v3672_v30 = vmul.f32 %v7951_v51, %v7652_v11  ;;  %v3673_v19 = vmul.f32 %v7951_v51, %v7656_v26  ;;  %3911 = vst [vmem:[%s8080_s8 + $0x428] sm:$0xff] (%p4201_p5), %v3910_v58 }
 0x2ee   : > { %v3674_v45 = vmul.f32 %v7951_v51, %v9413_v35  ;;  %v3675_v20 = vmul.f32 %v7951_v51, %v9414_v36  ;;  %v3676_v48 = vmul.f32 %v7951_v51, %v9415_v1  ;;  %v3677_v17 = vmul.f32 %v7951_v51, %v9416_v40 }
 0x2ef   : > { %v3698_v24 = vadd.f32 %v7968_v41, %v3664_v4  ;;  %v3699_v11 = vadd.f32 %v7968_v41, %v3665_v62  ;;  %v3700_v26 = vadd.f32 %v7968_v41, %v3666_v50  ;;  %v3701_v35 = vadd.f32 %v7968_v41, %v3667_v12  ;;  %v3788_v4 = vld [vmem:[%s7537_s5 + $0x30] sm:$0xff] (%p4201_p5)  ;;  %v3790_v62 = vld [vmem:[%s7537_s5 + $0x38] sm:$0xff] (%p4201_p5)  ;;  %v3794_v12 = vld [vmem:[%s7537_s5 + $0x48] sm:$0xff] (%p4201_p5) }
 0x2f0   : > { %v3702_v36 = vadd.f32 %v7968_v41, %v3668_v13  ;;  %v3703_v56 = vadd.f32 %v7968_v41, %v3669_v23  ;;  %v3704_v1 = vadd.f32 %v7968_v41, %v3670_v59  ;;  %v3705_v40 = vadd.f32 %v7968_v41, %v3671_v34  ;;  %3789 = vst [vmem:[%s8080_s8 + $0x60] sm:$0xff] (%p4201_p5), %v3788_v4  ;;  %v3796_v13 = vld [vmem:[%s7537_s5 + $0x50] sm:$0xff] (%p4201_p5)  ;;  %v3800_v59 = vld [vmem:[%s7537_s5 + $0x60] sm:$0xff] (%p4201_p5) }
 0x2f1   : > { %3726 = vst [vmem:[%s7537_s5 + $0x10] sm:$0xff] %v3698_v24  ;;  %3727 = vst [vmem:[%s7537_s5 + $0x28] sm:$0x3f] %v3699_v11  ;;  %v3706_v38 = vadd.f32 %v7968_v41, %v3672_v30  ;;  %v3707_v39 = vadd.f32 %v7968_v41, %v3673_v19  ;;  %v3708_v21 = vadd.f32 %v7968_v41, %v3674_v45  ;;  %v3806_v30 = vld [vmem:[%s7537_s5 + $0x78] sm:$0xff] (%p4201_p5)  ;;  %v3808_v19 = vld [vmem:[%s7537_s5 + $0x80] sm:$0xff] (%p4201_p5) }
 0x2f2   : > { %3728 = vst [vmem:[%s7537_s5 + $0x40] sm:$0xff] %v3700_v26  ;;  %3729 = vst [vmem:[%s7537_s5 + $0x58] sm:$0x3f] %v3701_v35  ;;  %v3709_v60 = vadd.f32 %v7968_v41, %v3675_v20  ;;  %v3710_v32 = vadd.f32 %v7968_v41, %v3676_v48  ;;  %v3711_v43 = vadd.f32 %v7968_v41, %v3677_v17  ;;  %v3812_v20 = vld [vmem:[%s7537_s5 + $0x90] sm:$0xff] (%p4201_p5)  ;;  %v3814_v48 = vld [vmem:[%s7537_s5 + $0x98] sm:$0xff] (%p4201_p5) }
 0x2f3   : > { %3730 = vst [vmem:[%s7537_s5 + $0x70] sm:$0xff] %v3702_v36  ;;  %3731 = vst [vmem:[%s7537_s5 + $0x88] sm:$0x3f] %v3703_v56  ;;  %v3678_v53 = vmul.f32 %v7951_v51, %v9417_v16  ;;  %v3679_v25 = vmul.f32 %v7951_v51, %v9462_v29  ;;  %v3680_v22 = vmul.f32 %v7951_v51, %v9421_v0  ;;  %v3818_v24 = vld [vmem:[%s7537_s5 + $0xa8] sm:$0xff] (%p4201_p5)  ;;  %v3820_v11 = vld [vmem:[%s7537_s5 + $0xb0] sm:$0xff] (%p4201_p5) }
 0x2f4   : > { %3732 = vst [vmem:[%s7537_s5 + $0xa0] sm:$0xff] %v3704_v1  ;;  %3733 = vst [vmem:[%s7537_s5 + $0xb8] sm:$0x3f] %v3705_v40  ;;  %v3681_v5 = vmul.f32 %v7951_v51, %v9431_v9  ;;  %v3682_v8 = vmul.f32 %v7951_v51, %v9426_v44  ;;  %v3683_v16 = vmul.f32 %v7951_v51, %v9432_v33  ;;  %v3824_v35 = vld [vmem:[%s7537_s5 + $0xc0] sm:$0xff] (%p4201_p5)  ;;  %v3826_v36 = vld [vmem:[%s7537_s5 + $0xc8] sm:$0xff] (%p4201_p5) }
 0x2f5   : > { %3734 = vst [vmem:[%s7537_s5 + $0xd0] sm:$0xff] %v3706_v38  ;;  %3735 = vst [vmem:[%s7537_s5 + $0xe8] sm:$0x3f] %v3707_v39  ;;  %v3712_v37 = vadd.f32 %v7968_v41, %v3678_v53  ;;  %v3713_v14 = vadd.f32 %v7968_v41, %v3679_v25  ;;  %v3684_v0 = vmul.f32 %v7951_v51, %v9433_v3  ;;  %v3830_v1 = vld [vmem:[%s7537_s5 + $0xd8] sm:$0xff] (%p4201_p5)  ;;  %v3832_v40 = vld [vmem:[%s7537_s5 + $0xe0] sm:$0xff] (%p4201_p5) }
 0x2f6   : > { %3736 = vst [vmem:[%s7537_s5 + $0x100] sm:$0xff] %v3708_v21  ;;  %3737 = vst [vmem:[%s7537_s5 + $0x118] sm:$0x3f] %v3709_v60  ;;  %v3685_v9 = vmul.f32 %v7951_v51, %v7729_v2  ;;  %v3714_v44 = vadd.f32 %v7968_v41, %v3680_v22  ;;  %v3715_v33 = vadd.f32 %v7968_v41, %v3681_v5  ;;  %v3836_v39 = vld [vmem:[%s7537_s5 + $0xf0] sm:$0xff] (%p4201_p5)  ;;  %v3838_v21 = vld [vmem:[%s7537_s5 + $0xf8] sm:$0xff] (%p4201_p5) }
 0x2f7   : > { %3738 = vst [vmem:[%s7537_s5 + $0x130] sm:$0xff] %v3710_v32  ;;  %3739 = vst [vmem:[%s7537_s5 + $0x148] sm:$0x3f] %v3711_v43  ;;  %v3716_v6 = vadd.f32 %v7968_v41, %v3682_v8  ;;  %v3717_v63 = vadd.f32 %v7968_v41, %v3683_v16  ;;  %v3718_v28 = vadd.f32 %v7968_v41, %v3684_v0  ;;  %v3842_v32 = vld [vmem:[%s7537_s5 + $0x108] sm:$0xff] (%p4201_p5)  ;;  %v3844_v43 = vld [vmem:[%s7537_s5 + $0x110] sm:$0xff] (%p4201_p5) }
 0x2f8   : > { %3740 = vst [vmem:[%s7537_s5 + $0x160] sm:$0xff] %v3712_v37  ;;  %3741 = vst [vmem:[%s7537_s5 + $0x178] sm:$0x3f] %v3713_v14  ;;  %v3719_v42 = vadd.f32 %v7968_v41, %v3685_v9  ;;  %v3686_v3 = vmul.f32 %v7951_v51, %v7758_v54  ;;  %v3687_v2 = vmul.f32 %v7951_v51, %v7753_v7  ;;  %3760 = sbr.rel (!%p4201_p5) target bundleno = 808 (0x328), region = 89  ;;  %v3780_v55 = vld [vmem:[%s7537_s5 + $0x10] sm:$0xff] (%p4201_p5)  ;;  %v3786_v61 = vld [vmem:[%s7537_s5 + $0x28] sm:$0xff] (%p4201_p5) }
 0x2f9   : > { %3742 = vst [vmem:[%s7537_s5 + $0x190] sm:$0xff] %v3714_v44  ;;  %3743 = vst [vmem:[%s7537_s5 + $0x1a8] sm:$0x3f] %v3715_v33  ;;  %v3688_v52 = vmul.f32 %v7951_v51, %v7781_v10  ;;  %v3689_v57 = vmul.f32 %v7951_v51, %v7762_v27  ;;  %v3690_v54 = vmul.f32 %v7951_v51, %v7918_v46  ;;  %v3778_v46 = vld [vmem:[%s7537_s5 + $0x8] sm:$0xff] (%p4201_p5)  ;;  %v3792_v50 = vld [vmem:[%s7537_s5 + $0x40] sm:$0xff] (%p4201_p5) }
 0x2fa   : > { %3744 = vst [vmem:[%s7537_s5 + $0x1c0] sm:$0xff] %v3716_v6  ;;  %3745 = vst [vmem:[%s7537_s5 + $0x1d8] sm:$0x3f] %v3717_v63  ;;  %v3691_v7 = vmul.f32 %v7951_v51, %v7795_v18  ;;  %v3720_v47 = vadd.f32 %v7968_v41, %v3686_v3  ;;  %v3721_v31 = vadd.f32 %v7968_v41, %v3687_v2  ;;  %v3776_v18 = vld [vmem:[%s7537_s5] sm:$0xff] (%p4201_p5)  ;;  %v3798_v23 = vld [vmem:[%s7537_s5 + $0x58] sm:$0xff] (%p4201_p5) }
 0x2fb   : > { %3746 = vst [vmem:[%s7537_s5 + $0x1f0] sm:$0xff] %v3718_v28  ;;  %3747 = vst [vmem:[%s7537_s5 + $0x208] sm:$0x3f] %v3719_v42  ;;  %v3722_v15 = vadd.f32 %v7968_v41, %v3688_v52  ;;  %v3723_v10 = vadd.f32 %v7968_v41, %v3689_v57  ;;  %v3724_v49 = vadd.f32 %v7968_v41, %v3690_v54  ;;  %v3784_v51 = vld [vmem:[%s7537_s5 + $0x20] sm:$0xff] (%p4201_p5)  ;;  %v3804_v34 = vld [vmem:[%s7537_s5 + $0x70] sm:$0xff] (%p4201_p5) }
 0x2fc   : > { %v3725_v27 = vadd.f32 %v7968_v41, %v3691_v7  ;;  %3748 = vst [vmem:[%s7537_s5 + $0x220] sm:$0xff] %v3720_v47  ;;  %3749 = vst [vmem:[%s7537_s5 + $0x238] sm:$0x3f] %v3721_v31  ;;  %v3802_v41 = vld [vmem:[%s7537_s5 + $0x68] sm:$0xff] (%p4201_p5)  ;;  %v3816_v17 = vld [vmem:[%s7537_s5 + $0xa0] sm:$0xff] (%p4201_p5) }
 0x2fd   : > { %3750 = vst [vmem:[%s7537_s5 + $0x250] sm:$0xff] %v3722_v15  ;;  %3751 = vst [vmem:[%s7537_s5 + $0x268] sm:$0x3f] %v3723_v10  ;;  %v3810_v45 = vld [vmem:[%s7537_s5 + $0x88] sm:$0xff] (%p4201_p5)  ;;  %v3822_v26 = vld [vmem:[%s7537_s5 + $0xb8] sm:$0xff] (%p4201_p5) }
 0x2fe   : > { %3752 = vst [vmem:[%s7537_s5 + $0x280] sm:$0xff] %v3724_v49  ;;  %3753 = vst [vmem:[%s7537_s5 + $0x298] sm:$0x3f] %v3725_v27  ;;  %v3828_v56 = vld [vmem:[%s7537_s5 + $0xd0] sm:$0xff] (%p4201_p5)  ;;  %v3834_v38 = vld [vmem:[%s7537_s5 + $0xe8] sm:$0xff] (%p4201_p5) }
 0x2ff   : > { %3777 = vst [vmem:[%s8080_s8] sm:$0xff] %v3776_v18  ;;  %3779 = vst [vmem:[%s8080_s8 + $0x8] sm:$0xff] %v3778_v46  ;;  %v3840_v60 = vld [vmem:[%s7537_s5 + $0x100] sm:$0xff]  ;;  %v3846_v53 = vld [vmem:[%s7537_s5 + $0x118] sm:$0xff] }
 0x300   : > { %3781 = vst [vmem:[%s8080_s8 + $0x10] sm:$0xff] %v3780_v55  ;;  %3785 = vst [vmem:[%s8080_s8 + $0x38] sm:$0xff] %v3784_v51  ;;  %v3848_v29 = vld [vmem:[%s7537_s5 + $0x120] sm:$0xff]  ;;  %v3850_v25 = vld [vmem:[%s7537_s5 + $0x128] sm:$0xff] }
 0x301   : > { %3787 = vst [vmem:[%s8080_s8 + $0x40] sm:$0xff] %v3786_v61  ;;  %3791 = vst [vmem:[%s8080_s8 + $0x68] sm:$0xff] %v3790_v62  ;;  %v3852_v22 = vld [vmem:[%s7537_s5 + $0x130] sm:$0xff]  ;;  %v3854_v5 = vld [vmem:[%s7537_s5 + $0x138] sm:$0xff] }
 0x302   : > { %3793 = vst [vmem:[%s8080_s8 + $0x70] sm:$0xff] %v3792_v50  ;;  %3795 = vst [vmem:[%s8080_s8 + $0x90] sm:$0xff] %v3794_v12  ;;  %v3856_v8 = vld [vmem:[%s7537_s5 + $0x140] sm:$0xff]  ;;  %v3858_v16 = vld [vmem:[%s7537_s5 + $0x148] sm:$0xff] }
 0x303   : > { %3797 = vst [vmem:[%s8080_s8 + $0x98] sm:$0xff] %v3796_v13  ;;  %3799 = vst [vmem:[%s8080_s8 + $0xa0] sm:$0xff] %v3798_v23  ;;  %v3860_v37 = vld [vmem:[%s7537_s5 + $0x150] sm:$0xff]  ;;  %v3862_v14 = vld [vmem:[%s7537_s5 + $0x158] sm:$0xff] }
 0x304   : > { %3801 = vst [vmem:[%s8080_s8 + $0xc0] sm:$0xff] %v3800_v59  ;;  %3803 = vst [vmem:[%s8080_s8 + $0xc8] sm:$0xff] %v3802_v41  ;;  %v3864_v0 = vld [vmem:[%s7537_s5 + $0x160] sm:$0xff]  ;;  %v3866_v9 = vld [vmem:[%s7537_s5 + $0x168] sm:$0xff] }
 0x305   : > { %3805 = vst [vmem:[%s8080_s8 + $0xd0] sm:$0xff] %v3804_v34  ;;  %3807 = vst [vmem:[%s8080_s8 + $0xf0] sm:$0xff] %v3806_v30  ;;  %v3868_v44 = vld [vmem:[%s7537_s5 + $0x170] sm:$0xff]  ;;  %v3870_v33 = vld [vmem:[%s7537_s5 + $0x178] sm:$0xff] }
 0x306   : > { %3809 = vst [vmem:[%s8080_s8 + $0xf8] sm:$0xff] %v3808_v19  ;;  %3811 = vst [vmem:[%s8080_s8 + $0x100] sm:$0xff] %v3810_v45  ;;  %v3872_v6 = vld [vmem:[%s7537_s5 + $0x180] sm:$0xff]  ;;  %v3874_v63 = vld [vmem:[%s7537_s5 + $0x188] sm:$0xff] }
 0x307   : > { %3813 = vst [vmem:[%s8080_s8 + $0x120] sm:$0xff] %v3812_v20  ;;  %3815 = vst [vmem:[%s8080_s8 + $0x128] sm:$0xff] %v3814_v48  ;;  %v3876_v28 = vld [vmem:[%s7537_s5 + $0x190] sm:$0xff]  ;;  %v3878_v42 = vld [vmem:[%s7537_s5 + $0x198] sm:$0xff] }
 0x308   : > { %3817 = vst [vmem:[%s8080_s8 + $0x130] sm:$0xff] %v3816_v17  ;;  %3819 = vst [vmem:[%s8080_s8 + $0x150] sm:$0xff] %v3818_v24  ;;  %v3880_v3 = vld [vmem:[%s7537_s5 + $0x1a0] sm:$0xff]  ;;  %v3882_v2 = vld [vmem:[%s7537_s5 + $0x1a8] sm:$0xff] }
 0x309   : > { %3821 = vst [vmem:[%s8080_s8 + $0x158] sm:$0xff] %v3820_v11  ;;  %3823 = vst [vmem:[%s8080_s8 + $0x160] sm:$0xff] %v3822_v26  ;;  %v3884_v52 = vld [vmem:[%s7537_s5 + $0x1b0] sm:$0xff]  ;;  %v3886_v57 = vld [vmem:[%s7537_s5 + $0x1b8] sm:$0xff] }
 0x30a   : > { %3825 = vst [vmem:[%s8080_s8 + $0x180] sm:$0xff] %v3824_v35  ;;  %3827 = vst [vmem:[%s8080_s8 + $0x188] sm:$0xff] %v3826_v36  ;;  %v3888_v54 = vld [vmem:[%s7537_s5 + $0x1c0] sm:$0xff]  ;;  %v3890_v7 = vld [vmem:[%s7537_s5 + $0x1c8] sm:$0xff] }
 0x30b   : > { %3829 = vst [vmem:[%s8080_s8 + $0x190] sm:$0xff] %v3828_v56  ;;  %3831 = vst [vmem:[%s8080_s8 + $0x1b0] sm:$0xff] %v3830_v1  ;;  %v3892_v47 = vld [vmem:[%s7537_s5 + $0x1d0] sm:$0xff]  ;;  %v3894_v31 = vld [vmem:[%s7537_s5 + $0x1d8] sm:$0xff] }
 0x30c   : > { %3833 = vst [vmem:[%s8080_s8 + $0x1b8] sm:$0xff] %v3832_v40  ;;  %3835 = vst [vmem:[%s8080_s8 + $0x1c0] sm:$0xff] %v3834_v38  ;;  %v3896_v15 = vld [vmem:[%s7537_s5 + $0x1e0] sm:$0xff]  ;;  %v3898_v10 = vld [vmem:[%s7537_s5 + $0x1e8] sm:$0xff] }
 0x30d   : > { %3837 = vst [vmem:[%s8080_s8 + $0x1e0] sm:$0xff] %v3836_v39  ;;  %3839 = vst [vmem:[%s8080_s8 + $0x1e8] sm:$0xff] %v3838_v21  ;;  %v3900_v49 = vld [vmem:[%s7537_s5 + $0x1f0] sm:$0xff]  ;;  %v3902_v27 = vld [vmem:[%s7537_s5 + $0x1f8] sm:$0xff] }
 0x30e   : > { %3841 = vst [vmem:[%s8080_s8 + $0x1f0] sm:$0xff] %v3840_v60  ;;  %3843 = vst [vmem:[%s8080_s8 + $0x210] sm:$0xff] %v3842_v32  ;;  %v3904_v18 = vld [vmem:[%s7537_s5 + $0x200] sm:$0xff]  ;;  %v3906_v46 = vld [vmem:[%s7537_s5 + $0x208] sm:$0xff] }
 0x30f   : > { %3845 = vst [vmem:[%s8080_s8 + $0x218] sm:$0xff] %v3844_v43  ;;  %3847 = vst [vmem:[%s8080_s8 + $0x220] sm:$0xff] %v3846_v53  ;;  %v3908_v55 = vld [vmem:[%s7537_s5 + $0x210] sm:$0xff]  ;;  %v3912_v51 = vld [vmem:[%s7537_s5 + $0x220] sm:$0xff] }
 0x310   : > { %3849 = vst [vmem:[%s8080_s8 + $0x240] sm:$0xff] %v3848_v29  ;;  %3851 = vst [vmem:[%s8080_s8 + $0x248] sm:$0xff] %v3850_v25  ;;  %v3914_v61 = vld [vmem:[%s7537_s5 + $0x228] sm:$0xff]  ;;  %v3916_v4 = vld [vmem:[%s7537_s5 + $0x230] sm:$0xff] }
 0x311   : > { %3853 = vst [vmem:[%s8080_s8 + $0x250] sm:$0xff] %v3852_v22  ;;  %3855 = vst [vmem:[%s8080_s8 + $0x270] sm:$0xff] %v3854_v5  ;;  %v3918_v62 = vld [vmem:[%s7537_s5 + $0x238] sm:$0xff]  ;;  %v3920_v50 = vld [vmem:[%s7537_s5 + $0x240] sm:$0xff] }
 0x312   : > { %3857 = vst [vmem:[%s8080_s8 + $0x278] sm:$0xff] %v3856_v8  ;;  %3859 = vst [vmem:[%s8080_s8 + $0x280] sm:$0xff] %v3858_v16  ;;  %v3922_v12 = vld [vmem:[%s7537_s5 + $0x248] sm:$0xff]  ;;  %v3924_v13 = vld [vmem:[%s7537_s5 + $0x250] sm:$0xff] }
 0x313   : > { %3861 = vst [vmem:[%s8080_s8 + $0x2a0] sm:$0xff] %v3860_v37  ;;  %3863 = vst [vmem:[%s8080_s8 + $0x2a8] sm:$0xff] %v3862_v14  ;;  %v3926_v23 = vld [vmem:[%s7537_s5 + $0x258] sm:$0xff]  ;;  %v3928_v59 = vld [vmem:[%s7537_s5 + $0x260] sm:$0xff] }
 0x314   : > { %3865 = vst [vmem:[%s8080_s8 + $0x2b0] sm:$0xff] %v3864_v0  ;;  %3867 = vst [vmem:[%s8080_s8 + $0x2d0] sm:$0xff] %v3866_v9  ;;  %v3930_v41 = vld [vmem:[%s7537_s5 + $0x268] sm:$0xff]  ;;  %v3932_v34 = vld [vmem:[%s7537_s5 + $0x270] sm:$0xff] }
 0x315   : > { %3869 = vst [vmem:[%s8080_s8 + $0x2d8] sm:$0xff] %v3868_v44  ;;  %3871 = vst [vmem:[%s8080_s8 + $0x2e0] sm:$0xff] %v3870_v33  ;;  %v3934_v30 = vld [vmem:[%s7537_s5 + $0x278] sm:$0xff]  ;;  %v3936_v19 = vld [vmem:[%s7537_s5 + $0x280] sm:$0xff] }
 0x316   : > { %3873 = vst [vmem:[%s8080_s8 + $0x300] sm:$0xff] %v3872_v6  ;;  %3875 = vst [vmem:[%s8080_s8 + $0x308] sm:$0xff] %v3874_v63  ;;  %v3938_v45 = vld [vmem:[%s7537_s5 + $0x288] sm:$0xff]  ;;  %v3940_v20 = vld [vmem:[%s7537_s5 + $0x290] sm:$0xff] }
 0x317   : > { %3877 = vst [vmem:[%s8080_s8 + $0x310] sm:$0xff] %v3876_v28  ;;  %3879 = vst [vmem:[%s8080_s8 + $0x330] sm:$0xff] %v3878_v42  ;;  %v3942_v48 = vld [vmem:[%s7537_s5 + $0x298] sm:$0xff] }
 0x318   : > { %3881 = vst [vmem:[%s8080_s8 + $0x338] sm:$0xff] %v3880_v3  ;;  %3883 = vst [vmem:[%s8080_s8 + $0x340] sm:$0xff] %v3882_v2 }
 0x319   : > { %3885 = vst [vmem:[%s8080_s8 + $0x360] sm:$0xff] %v3884_v52  ;;  %3887 = vst [vmem:[%s8080_s8 + $0x368] sm:$0xff] %v3886_v57 }
 0x31a   : > { %3889 = vst [vmem:[%s8080_s8 + $0x370] sm:$0xff] %v3888_v54  ;;  %3891 = vst [vmem:[%s8080_s8 + $0x390] sm:$0xff] %v3890_v7 }
 0x31b   : > { %3893 = vst [vmem:[%s8080_s8 + $0x398] sm:$0xff] %v3892_v47  ;;  %3895 = vst [vmem:[%s8080_s8 + $0x3a0] sm:$0xff] %v3894_v31 }
 0x31c   : > { %3897 = vst [vmem:[%s8080_s8 + $0x3c0] sm:$0xff] %v3896_v15  ;;  %3899 = vst [vmem:[%s8080_s8 + $0x3c8] sm:$0xff] %v3898_v10 }
 0x31d   : > { %3901 = vst [vmem:[%s8080_s8 + $0x3d0] sm:$0xff] %v3900_v49  ;;  %3903 = vst [vmem:[%s8080_s8 + $0x3f0] sm:$0xff] %v3902_v27 }
 0x31e   : > { %3905 = vst [vmem:[%s8080_s8 + $0x3f8] sm:$0xff] %v3904_v18  ;;  %3907 = vst [vmem:[%s8080_s8 + $0x400] sm:$0xff] %v3906_v46 }
 0x31f   : > { %3909 = vst [vmem:[%s8080_s8 + $0x420] sm:$0xff] %v3908_v55  ;;  %3913 = vst [vmem:[%s8080_s8 + $0x430] sm:$0xff] %v3912_v51 }
 0x320   : > { %3915 = vst [vmem:[%s8080_s8 + $0x450] sm:$0xff] %v3914_v61  ;;  %3917 = vst [vmem:[%s8080_s8 + $0x458] sm:$0xff] %v3916_v4 }
 0x321   : > { %3919 = vst [vmem:[%s8080_s8 + $0x460] sm:$0xff] %v3918_v62  ;;  %3921 = vst [vmem:[%s8080_s8 + $0x480] sm:$0xff] %v3920_v50 }
 0x322   : > { %3923 = vst [vmem:[%s8080_s8 + $0x488] sm:$0xff] %v3922_v12  ;;  %3925 = vst [vmem:[%s8080_s8 + $0x490] sm:$0xff] %v3924_v13 }
 0x323   : > { %3927 = vst [vmem:[%s8080_s8 + $0x4b0] sm:$0xff] %v3926_v23  ;;  %3929 = vst [vmem:[%s8080_s8 + $0x4b8] sm:$0xff] %v3928_v59 }
 0x324   : > { %3931 = vst [vmem:[%s8080_s8 + $0x4c0] sm:$0xff] %v3930_v41  ;;  %3933 = vst [vmem:[%s8080_s8 + $0x4e0] sm:$0xff] %v3932_v34 }
 0x325   : > { %3935 = vst [vmem:[%s8080_s8 + $0x4e8] sm:$0xff] %v3934_v30  ;;  %3937 = vst [vmem:[%s8080_s8 + $0x4f0] sm:$0xff] %v3936_v19 }
 0x326   : > { %3939 = vst [vmem:[%s8080_s8 + $0x510] sm:$0xff] %v3938_v45  ;;  %3941 = vst [vmem:[%s8080_s8 + $0x518] sm:$0xff] %v3940_v20 }
 0x327   : > { %3943 = vst [vmem:[%s8080_s8 + $0x520] sm:$0xff] %v3942_v48 }
 0x328 PF: > { %p11_p11 = scmp.ge.s32.totalorder %s4185_s19, 4   ;;  %s9463_s15 = smov %s4134_s16 }
 0x329   : > { %s9464_s16 = smov %s4195_s22  ;;  %s9465_s17 = smov %s4185_s19 }
 0x32a   :  { %13 = sbr.rel (!%p11_p11) target bundleno = 2 (0x2), region = 165 }

</bundles_post_ra>
